<compile_context>
chip_gen: v7x
topology: tpu7x:2x2x1
jax: 0.10.0
libtpu: 0.0.40
codegen_flags: <defaults>
</compile_context>

<pallas_src>
import jax
import jax.numpy as jnp
import numpy as np
from jax.experimental import pallas as pl
from jax.experimental.pallas import tpu as pltpu


def _const_spec(shape):
    """BlockSpec for a grid-invariant (weight) input; single-buffered when supported."""
    idx = lambda i, _n=len(shape): (0,) * _n
    buffered = getattr(pl, "Buffered", None)
    if buffered is not None:
        try:
            return pl.BlockSpec(shape, idx, pipeline_mode=buffered(1))
        except TypeError:          # older jax without pipeline_mode kwarg
            pass
    return pl.BlockSpec(shape, idx)


def variable_block_forward(x, params, *, batch_block=None, mm_dtype=jnp.bfloat16,
                           out_dtype=jnp.float32):
    """Fused forward pass. Returns (x_out, y_out), each (B, T, N, C) in out_dtype."""
    B, T, N, C = x.shape
    NC = N * C
    f32 = jnp.float32
    HI = jax.lax.Precision.HIGHEST

    if batch_block is None:
        # Single grid step: on v5e/v6e the grid is a serial loop on one TensorCore, so
        # splitting only adds per-step overhead and halves matmul M.  On v7x, shard the
        # batch across the 2 TCs (batch_block=B//2) only when per-step work is >= a few us.
        batch_block = B
    assert B % batch_block == 0
    Bt = batch_block
    num_blocks = B // Bt
    rows = Bt * T                     # row count of the lane-dense slab per step

    # ------------- wrapper-side constant folding (hoisted out of the kernel) ----------
    # spatial adjacency (batch independent): adj = sum_k relu(U_k V_k), lifted onto the
    # N*C-wide slab as kron(adj.T, I_C) so the spatial mix is one lane-dense matmul.
    adj = jnp.sum(jax.nn.relu(
        jnp.einsum("knl,klm->knm", params["U"].astype(f32), params["V"].astype(f32),
                   precision=HI)), axis=0)                                  # (N, N) f32
    eye_c = jnp.eye(C, dtype=f32)
    eye_n = jnp.eye(N, dtype=f32)
    a_sp = jnp.kron(adj.T, eye_c).astype(mm_dtype)                          # (NC, NC)

    # fused GLU: [blockdiag_N(w1) | blockdiag_N(w2)] -> split lands at column NC (aligned)
    wg = jnp.concatenate([jnp.kron(eye_n, params["glu_w1"].astype(f32)),
                          jnp.kron(eye_n, params["glu_w2"].astype(f32))],
                         axis=1).astype(mm_dtype)                           # (NC, 2NC)
    bg = jnp.concatenate([jnp.tile(params["glu_b1"], N),
                          jnp.tile(params["glu_b2"], N)])[None, :].astype(f32)  # (1, 2NC)

    # both temporal adjacencies stacked into one (6T, T) operand
    at = jnp.concatenate([params["adj_t1"], params["adj_t2"]],
                         axis=0).astype(mm_dtype)                           # (6T, T)

    # branch fc (3C -> C) decomposed into three (C, C) slices, each lifted to blockdiag_N
    def fc_blockdiag(w):              # (3C, C) -> (3NC, NC)
        return jnp.concatenate(
            [jnp.kron(eye_n, w[k * C:(k + 1) * C, :].astype(f32)) for k in range(3)],
            axis=0)
    wf = jnp.stack([fc_blockdiag(params["fc1_w"]),
                    fc_blockdiag(params["fc2_w"])]).astype(mm_dtype)        # (2, 3NC, NC)
    bf = jnp.stack([jnp.tile(params["fc1_b"], N),
                    jnp.tile(params["fc2_b"], N)])[:, None, :].astype(f32)  # (2, 1, NC)

    x_lane = x.reshape(B, T, NC).astype(f32)                                # lane-dense

    # --------------------------------- kernel -----------------------------------------
    def kernel(x_ref, asp_ref, wg_ref, bg_ref, at_ref, wf_ref, bf_ref, xo_ref, yo_ref):
        x_slab = x_ref[...]                              # (Bt, T, NC) f32
        x_rows = x_slab.reshape(rows, NC)                # leading-dim merge: no relayout

        # dsgnn spatial mix directly on the 512-lane slab
        h = jnp.dot(x_rows.astype(mm_dtype), asp_ref[...],
                    preferred_element_type=jnp.float32)                    # (rows, NC)

        # fused GLU; split at column NC (128-aligned, no sub-tile lane split)
        gl = jnp.dot(h.astype(mm_dtype), wg_ref[...],
                     preferred_element_type=jnp.float32) + bg_ref[...]     # (rows, 2NC)
        s = gl[:, :NC] * jax.nn.sigmoid(gl[:, NC:]) + x_rows               # (rows, NC)

        # both dtgnn temporal mixes in one stacked (6T, T) matmul along the time axis
        s3 = s.reshape(Bt, T, NC)
        ht = jnp.einsum("qp,bpd->bqd", at_ref[...], s3.astype(mm_dtype),
                        preferred_element_type=jnp.float32)                # (Bt, 6T, NC)

        def branch(j, out_ref):
            pre = bf_ref[j]                                                # (1, NC) bias
            for k in range(3):
                q0 = (3 * j + k) * T                    # T-aligned (sublane-tile) slice
                chunk = ht[:, q0:q0 + T, :].reshape(rows, NC).astype(mm_dtype)
                pre = pre + jnp.dot(chunk, wf_ref[j, k * NC:(k + 1) * NC, :],
                                    preferred_element_type=jnp.float32)
            # dtgnn adds s internally; variable_block adds s again -> +2s
            o = jax.nn.relu(pre) + 2.0 * s
            out_ref[...] = o.reshape(Bt, T, NC).astype(out_ref.dtype)      # lane-dense store

        branch(0, xo_ref)
        branch(1, yo_ref)

    # --------------------------------- specs / call ------------------------------------
    blk = pl.BlockSpec((Bt, T, NC), lambda i: (i, 0, 0))

    flops = (2 * B * T * NC * NC                 # spatial mix (block-diagonal)
             + 2 * B * T * NC * 2 * NC           # fused GLU
             + 2 * B * 6 * T * T * NC            # stacked temporal mix
             + 2 * 6 * B * T * NC * NC)          # branch fc (6 block-diag matmuls)
    elt_out = jnp.dtype(out_dtype).itemsize
    bytes_accessed = (B * T * NC * 4 + 2 * B * T * NC * elt_out
                      + (a_sp.size + wg.size + at.size + wf.size) * 2
                      + (bg.size + bf.size) * 4)
    cost = pl.CostEstimate(flops=int(flops), transcendentals=int(B * T * NC),
                           bytes_accessed=int(bytes_accessed))

    # VMEM budget: f32 intermediates (~14 slabs) + (double-)buffered x/outs + weights.
    vmem_est = (14 * rows * NC * 4
                + 2 * (rows * NC * 4 + 2 * rows * NC * elt_out)
                + 2 * 2 * (a_sp.size + wg.size + wf.size + at.size))
    compiler_kwargs = {}
    if vmem_est > 32 * 1024 * 1024:
        # Cap at v7x's 64 MiB/TC; shrink batch_block instead of exceeding it.
        compiler_kwargs["vmem_limit_bytes"] = int(min(vmem_est, 64 * 1024 * 1024))

    compiler_params = pltpu.CompilerParams(
        dimension_semantics=(("arbitrary",) if num_blocks == 1 else ("parallel",)),
        **compiler_kwargs)

    xo, yo = pl.pallas_call(
        kernel,
        out_shape=(jax.ShapeDtypeStruct((B, T, NC), out_dtype),
                   jax.ShapeDtypeStruct((B, T, NC), out_dtype)),
        grid=(num_blocks,),
        in_specs=[
            blk,                           # x (lane dense, batch-blocked)
            _const_spec((NC, NC)),         # kron(adj.T, I_C)
            _const_spec((NC, 2 * NC)),     # fused GLU weight (block-diagonal)
            _const_spec((1, 2 * NC)),      # fused GLU bias
            _const_spec((6 * T, T)),       # stacked temporal adjacencies
            _const_spec((2, 3 * NC, NC)),  # branch fc weights (block-diagonal slices)
            _const_spec((2, 1, NC)),       # branch fc biases
        ],
        out_specs=(blk, blk),
        compiler_params=compiler_params,
        cost_estimate=cost,
    )(x_lane, a_sp, wg, bg, at, wf, bf)

    return xo.reshape(B, T, N, C), yo.reshape(B, T, N, C)


# ---------------------------------------------------------------------------
# Pure-JAX reference (same math, f32 HIGHEST precision) for correctness checking
# ---------------------------------------------------------------------------
def reference_forward(x, params):
    HI = jax.lax.Precision.HIGHEST
    B, T, N, C = x.shape
    adj = jnp.sum(
        jax.nn.relu(jnp.einsum("knl,klm->knm", params["U"], params["V"],
                               precision=HI)), axis=0)
    h = jnp.einsum("nm,btmc->btnc", adj, x, precision=HI)
    a = jnp.einsum("btnc,cd->btnd", h, params["glu_w1"], precision=HI) + params["glu_b1"]
    b = jnp.einsum("btnc,cd->btnd", h, params["glu_w2"], precision=HI) + params["glu_b2"]
    s = a * jax.nn.sigmoid(b) + x

    def dtgnn(adj_t, wfm, bfv):
        ht = jnp.einsum("qp,bpnc->bqnc", adj_t, s, precision=HI)
        ht = ht.reshape(B, 3, T, N, C).transpose(0, 2, 3, 1, 4).reshape(B, T, N, 3 * C)
        return jax.nn.relu(jnp.einsum("btnk,kc->btnc", ht, wfm, precision=HI) + bfv) + s

    x_out = dtgnn(params["adj_t1"], params["fc1_w"], params["fc1_b"]) + s
    y_out = dtgnn(params["adj_t2"], params["fc2_w"], params["fc2_b"]) + s
    return x_out, y_out


# ---------------------------------------------------------------------------
def make_params(key, N, T, C, L):
    ks = jax.random.split(key, 12)
    scale = 0.1
    return {
        "U": scale * jax.random.normal(ks[0], (3, N, L), jnp.float32),
        "V": scale * jax.random.normal(ks[1], (3, L, N), jnp.float32),
        # Linear weights stored as (in, out) == PyTorch W.T
        "glu_w1": scale * jax.random.normal(ks[2], (C, C), jnp.float32),
        "glu_b1": scale * jax.random.normal(ks[3], (C,), jnp.float32),
        "glu_w2": scale * jax.random.normal(ks[4], (C, C), jnp.float32),
        "glu_b2": scale * jax.random.normal(ks[5], (C,), jnp.float32),
        "adj_t1": scale * jax.random.normal(ks[6], (3 * T, T), jnp.float32),
        "fc1_w": scale * jax.random.normal(ks[7], (3 * C, C), jnp.float32),
        "fc1_b": scale * jax.random.normal(ks[8], (C,), jnp.float32),
        "adj_t2": scale * jax.random.normal(ks[9], (3 * T, T), jnp.float32),
        "fc2_w": scale * jax.random.normal(ks[10], (3 * C, C), jnp.float32),
        "fc2_b": scale * jax.random.normal(ks[11], (C,), jnp.float32),
    }


if __name__ == "__main__":
    B, T, N, C, L = 2, 8, 16, 32, 32   # batch, his_num, node_num, d_model, num_of_latent
    key = jax.random.PRNGKey(0)
    kx, kp = jax.random.split(key)
    x = jax.random.normal(kx, (B, T, N, C), jnp.float32)
    params = make_params(kp, N, T, C, L)

    x_out, y_out = variable_block_forward(x, params)
    jax.block_until_ready((x_out, y_out))

    x_ref, y_ref = reference_forward(x, params)
    # bf16 matmul operands (f32 accumulation) vs f32/HIGHEST reference -> 2e-2 tol.
    np.testing.assert_allclose(np.asarray(x_out), np.asarray(x_ref), rtol=2e-2, atol=2e-2)
    np.testing.assert_allclose(np.asarray(y_out), np.asarray(y_ref), rtol=2e-2, atol=2e-2)

    print("KERNEL_OK")
</pallas_src>

<mosaic_0001>
module attributes {stable_mosaic.version = 11 : i64} {
  func.func @kernel(%arg0: i32, %arg1: memref<2x8x512xf32, #tpu.memory_space<vmem>>, %arg2: memref<512x512xbf16, #tpu.memory_space<vmem>>, %arg3: memref<512x1024xbf16, #tpu.memory_space<vmem>>, %arg4: memref<1x1024xf32, #tpu.memory_space<vmem>>, %arg5: memref<48x8xbf16, #tpu.memory_space<vmem>>, %arg6: memref<2x1536x512xbf16, #tpu.memory_space<vmem>>, %arg7: memref<2x1x512xf32, #tpu.memory_space<vmem>>, %arg8: memref<2x8x512xf32, #tpu.memory_space<vmem>>, %arg9: memref<2x8x512xf32, #tpu.memory_space<vmem>>) attributes {dimension_semantics = [#tpu.dimension_semantics<arbitrary>], iteration_bounds = array<i64: 1>, scalar_prefetch = 0 : i64, scratch_operands = 0 : i64, tpu.core_type = #tpu.core_type<tc>, window_params = [{transform_indices = @transform_0, window_bounds = array<i64: 2, 8, 512>}, {pipeline_mode = #tpu.pipeline_mode<synchronous>, transform_indices = @transform_1, window_bounds = array<i64: 512, 512>}, {pipeline_mode = #tpu.pipeline_mode<synchronous>, transform_indices = @transform_2, window_bounds = array<i64: 512, 1024>}, {pipeline_mode = #tpu.pipeline_mode<synchronous>, transform_indices = @transform_3, window_bounds = array<i64: 1, 1024>}, {pipeline_mode = #tpu.pipeline_mode<synchronous>, transform_indices = @transform_4, window_bounds = array<i64: 48, 8>}, {pipeline_mode = #tpu.pipeline_mode<synchronous>, transform_indices = @transform_5, window_bounds = array<i64: 2, 1536, 512>}, {pipeline_mode = #tpu.pipeline_mode<synchronous>, transform_indices = @transform_6, window_bounds = array<i64: 2, 1, 512>}, {transform_indices = @transform_7, window_bounds = array<i64: 2, 8, 512>}, {transform_indices = @transform_8, window_bounds = array<i64: 2, 8, 512>}]} {
    %c0 = arith.constant 0 : index
    %c0_0 = arith.constant 0 : index
    %c0_1 = arith.constant 0 : index
    %0 = vector.load %arg1[%c0, %c0_0, %c0_1] : memref<2x8x512xf32, #tpu.memory_space<vmem>>, vector<2x8x512xf32>
    %1 = vector.shape_cast %0 : vector<2x8x512xf32> to vector<16x512xf32>
    %2 = arith.truncf %1 : vector<16x512xf32> to vector<16x512xbf16>
    %c0_2 = arith.constant 0 : index
    %c0_3 = arith.constant 0 : index
    %3 = vector.load %arg2[%c0_2, %c0_3] : memref<512x512xbf16, #tpu.memory_space<vmem>>, vector<512x512xbf16>
    %cst = arith.constant dense<0.000000e+00> : vector<16x512xf32>
    %4 = tpu.matmul %2, %3, %cst {dimension_numbers = #tpu.dot_dimension_numbers<[1], [0], [0], [1], [0, 0, 1, 1], [], []>} : vector<16x512xbf16>, vector<512x512xbf16>, vector<16x512xf32> -> vector<16x512xf32>
    %5 = arith.truncf %4 : vector<16x512xf32> to vector<16x512xbf16>
    %c0_4 = arith.constant 0 : index
    %c0_5 = arith.constant 0 : index
    %6 = vector.load %arg3[%c0_4, %c0_5] : memref<512x1024xbf16, #tpu.memory_space<vmem>>, vector<512x1024xbf16>
    %cst_6 = arith.constant dense<0.000000e+00> : vector<16x1024xf32>
    %7 = tpu.matmul %5, %6, %cst_6 {dimension_numbers = #tpu.dot_dimension_numbers<[1], [0], [0], [1], [0, 0, 1, 1], [], []>} : vector<16x512xbf16>, vector<512x1024xbf16>, vector<16x1024xf32> -> vector<16x1024xf32>
    %c0_7 = arith.constant 0 : index
    %c0_8 = arith.constant 0 : index
    %8 = vector.load %arg4[%c0_7, %c0_8] : memref<1x1024xf32, #tpu.memory_space<vmem>>, vector<1x1024xf32>
    %9 = vector.broadcast %8 : vector<1x1024xf32> to vector<16x1024xf32>
    %10 = arith.addf %7, %9 : vector<16x1024xf32>
    %11 = vector.extract_strided_slice %10 {offsets = [0, 0], sizes = [16, 512], strides = [1, 1]} : vector<16x1024xf32> to vector<16x512xf32>
    %12 = vector.extract_strided_slice %10 {offsets = [0, 512], sizes = [16, 512], strides = [1, 1]} : vector<16x1024xf32> to vector<16x512xf32>
    %13 = arith.negf %12 : vector<16x512xf32>
    %14 = math.exp %13 : vector<16x512xf32>
    %cst_9 = arith.constant 1.000000e+00 : f32
    %15 = vector.broadcast %cst_9 : f32 to vector<16x512xf32>
    %16 = arith.addf %15, %14 : vector<16x512xf32>
    %17 = arith.divf %15, %16 : vector<16x512xf32>
    %18 = arith.mulf %11, %17 : vector<16x512xf32>
    %19 = arith.addf %18, %1 : vector<16x512xf32>
    %20 = vector.shape_cast %19 : vector<16x512xf32> to vector<2x8x512xf32>
    %c0_10 = arith.constant 0 : index
    %c0_11 = arith.constant 0 : index
    %21 = vector.load %arg5[%c0_10, %c0_11] : memref<48x8xbf16, #tpu.memory_space<vmem>>, vector<48x8xbf16>
    %22 = arith.truncf %20 : vector<2x8x512xf32> to vector<2x8x512xbf16>
    "tpu.trace_start"() <{level = 10 : i32, message = "qp,bpd->bqd"}> : () -> ()
    %cst_12 = arith.constant dense<0.000000e+00> : vector<2x512x48xf32>
    %23 = tpu.matmul %22, %21, %cst_12 {dimension_numbers = #tpu.dot_dimension_numbers<[1], [1], [0, 2], [0], [0, 0, 0, 2, 1, 0], [], []>} : vector<2x8x512xbf16>, vector<48x8xbf16>, vector<2x512x48xf32> -> vector<2x512x48xf32>
    %24 = tpu.transpose %23, [0, 2, 1] : vector<2x512x48xf32> -> vector<2x48x512xf32>
    "tpu.trace_stop"() : () -> ()
    %c0_13 = arith.constant 0 : index
    %c0_14 = arith.constant 0 : index
    %c0_15 = arith.constant 0 : index
    %25 = vector.load %arg7[%c0_13, %c0_14, %c0_15] : memref<2x1x512xf32, #tpu.memory_space<vmem>>, vector<1x1x512xf32>
    %26 = vector.shape_cast %25 : vector<1x1x512xf32> to vector<1x512xf32>
    %27 = vector.extract_strided_slice %24 {offsets = [0, 0, 0], sizes = [2, 8, 512], strides = [1, 1, 1]} : vector<2x48x512xf32> to vector<2x8x512xf32>
    %28 = vector.shape_cast %27 : vector<2x8x512xf32> to vector<16x512xf32>
    %29 = arith.truncf %28 : vector<16x512xf32> to vector<16x512xbf16>
    %c0_16 = arith.constant 0 : index
    %c0_17 = arith.constant 0 : index
    %c0_18 = arith.constant 0 : index
    %30 = vector.load %arg6[%c0_16, %c0_17, %c0_18] : memref<2x1536x512xbf16, #tpu.memory_space<vmem>>, vector<1x512x512xbf16>
    %31 = vector.shape_cast %30 : vector<1x512x512xbf16> to vector<512x512xbf16>
    %cst_19 = arith.constant dense<0.000000e+00> : vector<16x512xf32>
    %32 = tpu.matmul %29, %31, %cst_19 {dimension_numbers = #tpu.dot_dimension_numbers<[1], [0], [0], [1], [0, 0, 1, 1], [], []>} : vector<16x512xbf16>, vector<512x512xbf16>, vector<16x512xf32> -> vector<16x512xf32>
    %33 = vector.broadcast %26 : vector<1x512xf32> to vector<16x512xf32>
    %34 = arith.addf %33, %32 : vector<16x512xf32>
    %35 = vector.extract_strided_slice %24 {offsets = [0, 8, 0], sizes = [2, 8, 512], strides = [1, 1, 1]} : vector<2x48x512xf32> to vector<2x8x512xf32>
    %36 = vector.shape_cast %35 : vector<2x8x512xf32> to vector<16x512xf32>
    %37 = arith.truncf %36 : vector<16x512xf32> to vector<16x512xbf16>
    %c0_20 = arith.constant 0 : index
    %c512 = arith.constant 512 : index
    %c0_21 = arith.constant 0 : index
    %38 = vector.load %arg6[%c0_20, %c512, %c0_21] : memref<2x1536x512xbf16, #tpu.memory_space<vmem>>, vector<1x512x512xbf16>
    %39 = vector.shape_cast %38 : vector<1x512x512xbf16> to vector<512x512xbf16>
    %cst_22 = arith.constant dense<0.000000e+00> : vector<16x512xf32>
    %40 = tpu.matmul %37, %39, %cst_22 {dimension_numbers = #tpu.dot_dimension_numbers<[1], [0], [0], [1], [0, 0, 1, 1], [], []>} : vector<16x512xbf16>, vector<512x512xbf16>, vector<16x512xf32> -> vector<16x512xf32>
    %41 = arith.addf %34, %40 : vector<16x512xf32>
    %42 = vector.extract_strided_slice %24 {offsets = [0, 16, 0], sizes = [2, 8, 512], strides = [1, 1, 1]} : vector<2x48x512xf32> to vector<2x8x512xf32>
    %43 = vector.shape_cast %42 : vector<2x8x512xf32> to vector<16x512xf32>
    %44 = arith.truncf %43 : vector<16x512xf32> to vector<16x512xbf16>
    %c0_23 = arith.constant 0 : index
    %c1024 = arith.constant 1024 : index
    %c0_24 = arith.constant 0 : index
    %45 = vector.load %arg6[%c0_23, %c1024, %c0_24] : memref<2x1536x512xbf16, #tpu.memory_space<vmem>>, vector<1x512x512xbf16>
    %46 = vector.shape_cast %45 : vector<1x512x512xbf16> to vector<512x512xbf16>
    %cst_25 = arith.constant dense<0.000000e+00> : vector<16x512xf32>
    %47 = tpu.matmul %44, %46, %cst_25 {dimension_numbers = #tpu.dot_dimension_numbers<[1], [0], [0], [1], [0, 0, 1, 1], [], []>} : vector<16x512xbf16>, vector<512x512xbf16>, vector<16x512xf32> -> vector<16x512xf32>
    %48 = arith.addf %41, %47 : vector<16x512xf32>
    %cst_26 = arith.constant 0.000000e+00 : f32
    %49 = vector.broadcast %cst_26 : f32 to vector<16x512xf32>
    %50 = arith.maximumf %48, %49 : vector<16x512xf32>
    %cst_27 = arith.constant 2.000000e+00 : f32
    %51 = vector.broadcast %cst_27 : f32 to vector<16x512xf32>
    %52 = arith.mulf %51, %19 : vector<16x512xf32>
    %53 = arith.addf %50, %52 : vector<16x512xf32>
    %54 = vector.shape_cast %53 : vector<16x512xf32> to vector<2x8x512xf32>
    %c0_28 = arith.constant 0 : index
    %c0_29 = arith.constant 0 : index
    %c0_30 = arith.constant 0 : index
    %55 = vector.load %arg8[%c0_28, %c0_29, %c0_30] : memref<2x8x512xf32, #tpu.memory_space<vmem>>, vector<2x8x512xf32>
    tpu.vector_store %arg8[%c0_28, %c0_29, %c0_30], %54 {strides = array<i32>} : memref<2x8x512xf32, #tpu.memory_space<vmem>>, vector<2x8x512xf32>,
    %c1 = arith.constant 1 : index
    %c0_31 = arith.constant 0 : index
    %c0_32 = arith.constant 0 : index
    %56 = vector.load %arg7[%c1, %c0_31, %c0_32] : memref<2x1x512xf32, #tpu.memory_space<vmem>>, vector<1x1x512xf32>
    %57 = vector.shape_cast %56 : vector<1x1x512xf32> to vector<1x512xf32>
    %58 = vector.extract_strided_slice %24 {offsets = [0, 24, 0], sizes = [2, 8, 512], strides = [1, 1, 1]} : vector<2x48x512xf32> to vector<2x8x512xf32>
    %59 = vector.shape_cast %58 : vector<2x8x512xf32> to vector<16x512xf32>
    %60 = arith.truncf %59 : vector<16x512xf32> to vector<16x512xbf16>
    %c1_33 = arith.constant 1 : index
    %c0_34 = arith.constant 0 : index
    %c0_35 = arith.constant 0 : index
    %61 = vector.load %arg6[%c1_33, %c0_34, %c0_35] : memref<2x1536x512xbf16, #tpu.memory_space<vmem>>, vector<1x512x512xbf16>
    %62 = vector.shape_cast %61 : vector<1x512x512xbf16> to vector<512x512xbf16>
    %cst_36 = arith.constant dense<0.000000e+00> : vector<16x512xf32>
    %63 = tpu.matmul %60, %62, %cst_36 {dimension_numbers = #tpu.dot_dimension_numbers<[1], [0], [0], [1], [0, 0, 1, 1], [], []>} : vector<16x512xbf16>, vector<512x512xbf16>, vector<16x512xf32> -> vector<16x512xf32>
    %64 = vector.broadcast %57 : vector<1x512xf32> to vector<16x512xf32>
    %65 = arith.addf %64, %63 : vector<16x512xf32>
    %66 = vector.extract_strided_slice %24 {offsets = [0, 32, 0], sizes = [2, 8, 512], strides = [1, 1, 1]} : vector<2x48x512xf32> to vector<2x8x512xf32>
    %67 = vector.shape_cast %66 : vector<2x8x512xf32> to vector<16x512xf32>
    %68 = arith.truncf %67 : vector<16x512xf32> to vector<16x512xbf16>
    %c1_37 = arith.constant 1 : index
    %c512_38 = arith.constant 512 : index
    %c0_39 = arith.constant 0 : index
    %69 = vector.load %arg6[%c1_37, %c512_38, %c0_39] : memref<2x1536x512xbf16, #tpu.memory_space<vmem>>, vector<1x512x512xbf16>
    %70 = vector.shape_cast %69 : vector<1x512x512xbf16> to vector<512x512xbf16>
    %cst_40 = arith.constant dense<0.000000e+00> : vector<16x512xf32>
    %71 = tpu.matmul %68, %70, %cst_40 {dimension_numbers = #tpu.dot_dimension_numbers<[1], [0], [0], [1], [0, 0, 1, 1], [], []>} : vector<16x512xbf16>, vector<512x512xbf16>, vector<16x512xf32> -> vector<16x512xf32>
    %72 = arith.addf %65, %71 : vector<16x512xf32>
    %73 = vector.extract_strided_slice %24 {offsets = [0, 40, 0], sizes = [2, 8, 512], strides = [1, 1, 1]} : vector<2x48x512xf32> to vector<2x8x512xf32>
    %74 = vector.shape_cast %73 : vector<2x8x512xf32> to vector<16x512xf32>
    %75 = arith.truncf %74 : vector<16x512xf32> to vector<16x512xbf16>
    %c1_41 = arith.constant 1 : index
    %c1024_42 = arith.constant 1024 : index
    %c0_43 = arith.constant 0 : index
    %76 = vector.load %arg6[%c1_41, %c1024_42, %c0_43] : memref<2x1536x512xbf16, #tpu.memory_space<vmem>>, vector<1x512x512xbf16>
    %77 = vector.shape_cast %76 : vector<1x512x512xbf16> to vector<512x512xbf16>
    %cst_44 = arith.constant dense<0.000000e+00> : vector<16x512xf32>
    %78 = tpu.matmul %75, %77, %cst_44 {dimension_numbers = #tpu.dot_dimension_numbers<[1], [0], [0], [1], [0, 0, 1, 1], [], []>} : vector<16x512xbf16>, vector<512x512xbf16>, vector<16x512xf32> -> vector<16x512xf32>
    %79 = arith.addf %72, %78 : vector<16x512xf32>
    %cst_45 = arith.constant 0.000000e+00 : f32
    %80 = vector.broadcast %cst_45 : f32 to vector<16x512xf32>
    %81 = arith.maximumf %79, %80 : vector<16x512xf32>
    %cst_46 = arith.constant 2.000000e+00 : f32
    %82 = vector.broadcast %cst_46 : f32 to vector<16x512xf32>
    %83 = arith.mulf %82, %19 : vector<16x512xf32>
    %84 = arith.addf %81, %83 : vector<16x512xf32>
    %85 = vector.shape_cast %84 : vector<16x512xf32> to vector<2x8x512xf32>
    %c0_47 = arith.constant 0 : index
    %c0_48 = arith.constant 0 : index
    %c0_49 = arith.constant 0 : index
    %86 = vector.load %arg9[%c0_47, %c0_48, %c0_49] : memref<2x8x512xf32, #tpu.memory_space<vmem>>, vector<2x8x512xf32>
    tpu.vector_store %arg9[%c0_47, %c0_48, %c0_49], %85 {strides = array<i32>} : memref<2x8x512xf32, #tpu.memory_space<vmem>>, vector<2x8x512xf32>,
    return
  }
  func.func @transform_0(%arg0: i32) -> (i32, i32, i32) {
    %c0_i32 = arith.constant 0 : i32
    %c0_i32_0 = arith.constant 0 : i32
    %c0_i32_1 = arith.constant 0 : i32
    return %arg0, %c0_i32, %c0_i32_0 : i32, i32, i32
  }
  func.func @transform_1(%arg0: i32) -> (i32, i32) {
    %c0_i32 = arith.constant 0 : i32
    %c0_i32_0 = arith.constant 0 : i32
    %c0_i32_1 = arith.constant 0 : i32
    return %c0_i32, %c0_i32_0 : i32, i32
  }
  func.func @transform_2(%arg0: i32) -> (i32, i32) {
    %c0_i32 = arith.constant 0 : i32
    %c0_i32_0 = arith.constant 0 : i32
    %c0_i32_1 = arith.constant 0 : i32
    return %c0_i32, %c0_i32_0 : i32, i32
  }
  func.func @transform_3(%arg0: i32) -> (i32, i32) {
    %c0_i32 = arith.constant 0 : i32
    %c0_i32_0 = arith.constant 0 : i32
    %c0_i32_1 = arith.constant 0 : i32
    return %c0_i32, %c0_i32_0 : i32, i32
  }
  func.func @transform_4(%arg0: i32) -> (i32, i32) {
    %c0_i32 = arith.constant 0 : i32
    %c0_i32_0 = arith.constant 0 : i32
    %c0_i32_1 = arith.constant 0 : i32
    return %c0_i32, %c0_i32_0 : i32, i32
  }
  func.func @transform_5(%arg0: i32) -> (i32, i32, i32) {
    %c0_i32 = arith.constant 0 : i32
    %c0_i32_0 = arith.constant 0 : i32
    %c0_i32_1 = arith.constant 0 : i32
    %c0_i32_2 = arith.constant 0 : i32
    return %c0_i32, %c0_i32_0, %c0_i32_1 : i32, i32, i32
  }
  func.func @transform_6(%arg0: i32) -> (i32, i32, i32) {
    %c0_i32 = arith.constant 0 : i32
    %c0_i32_0 = arith.constant 0 : i32
    %c0_i32_1 = arith.constant 0 : i32
    %c0_i32_2 = arith.constant 0 : i32
    return %c0_i32, %c0_i32_0, %c0_i32_1 : i32, i32, i32
  }
  func.func @transform_7(%arg0: i32) -> (i32, i32, i32) {
    %c0_i32 = arith.constant 0 : i32
    %c0_i32_0 = arith.constant 0 : i32
    %c0_i32_1 = arith.constant 0 : i32
    return %arg0, %c0_i32, %c0_i32_0 : i32, i32, i32
  }
  func.func @transform_8(%arg0: i32) -> (i32, i32, i32) {
    %c0_i32 = arith.constant 0 : i32
    %c0_i32_0 = arith.constant 0 : i32
    %c0_i32_1 = arith.constant 0 : i32
    return %arg0, %c0_i32, %c0_i32_0 : i32, i32, i32
  }
}

</mosaic_0001>

<bundles_post_ra>
// kernel: tpu_custom_call.1
= control target key start
LH: loop header
LB: loop body
LE: loop exit
PB: predicated region body
PF: predicated region fallthrough
CT: control target
= control target key end

     0   :  { %14 = vsyncpa [#allocation3], 0  ;;  %s14268_s0 = inlined_call_operand.hbm [shape: f32[2,8,512], index: 0, kind: input, shape index: {}]   ;;  %s14269_s1 = inlined_call_operand.hbm [shape: bf16[512,512], index: 1, kind: input, shape index: {}]   ;;  %s14270_s2 = inlined_call_operand.hbm [shape: bf16[512,1024], index: 2, kind: input, shape index: {}]   ;;  %s14271_s3 = inlined_call_operand.hbm [shape: f32[1,1024], index: 3, kind: input, shape index: {}]   ;;  %s14272_s4 = inlined_call_operand.vmem [shape: bf16[48,8], index: 4, kind: input, shape index: {}]   ;;  %s14273_s5 = inlined_call_operand.hbm [shape: bf16[2,1536,512], index: 5, kind: input, shape index: {}]   ;;  %s14274_s6 = inlined_call_operand.hbm [shape: f32[2,1,512], index: 6, kind: input, shape index: {}]   ;;  %s14275_s7 = inlined_call_operand.hbm [shape: f32[2,8,512], index: 7, kind: output, shape index: {0}]   ;;  %s14276_s8 = inlined_call_operand.hbm [shape: f32[2,8,512], index: 8, kind: output, shape index: {1}]  }
   0x1   :  { %15 = vsyncpa [#allocation6], 0 }
   0x2   :  { %16 = vsyncpa [#allocation9], 0 }
   0x3   :  { %17 = vsyncpa [#allocation12], 0 }
   0x4   :  { %18 = vsyncpa [#allocation4], 0 }
   0x5   :  { %19 = vsyncpa [#allocation15], 0  ;;  %s13477_s27 = smov [#allocation5]   ;;  %s13289_s9 = scalar_lea.hbm %s14269_s1, 16384 }
   0x6   :  { %s37_s28 = sshll.u32 %s13477_s27, 4  ;;  %p13290_p0 = scmp.ne.s32.totalorder %s14269_s1, %s13289_s9  ;;  %s38_s28 = int_to_ptr.vmem [resolvable:$true] %s37_s28 }
   0x7   :  { %p13293_p1 = scmp.lt.u32.totalorder %s13289_s9, %s14269_s1 }
   0x9   :  { %p13295_p2 = pnand %p13293_p1, %p13290_p0 }
   0xb   :  { %13298 = shalt.err (!%p13295_p2)
}
   0xc   :  { %s13299_s14 = scalar_lea.vmem %s38_s28, 16384  ;;  %p13304_p4 = scmp.lt.s32.totalorder %s38_s28, %s38_s28 }
   0xd   :  { %p13300_p3 = scmp.ne.s32.totalorder %s38_s28, %s13299_s14  ;;  %p13305_p5 = scmp.lt.s32.totalorder %s13299_s14, %s13299_s14 }
   0xf   :  { %p13306_p6 = por %p13305_p5, %p13304_p4 }
  0x11   :  { %p13307_p7 = pnand %p13306_p6, %p13300_p3 }
  0x13   :  { %13310 = shalt.err (!%p13307_p7)
}
  0x14   :  { %s13478_s15 = smov 256   ;;  %s13479_s16 = smov 16  }
  0x15   :  { %43 = dma.hbm_to_vmem [thread:$0]  %s14269_s1, 16384, %s38_s28, [#allocation6], %s13478_s15, %s13478_s15, %s13479_s16  }
  0x16   :  { %s13480_s19 = smov [#allocation8]   ;;  %s13481_s21 = smov [#allocation2]  }
  0x17   :  { %s62_s20 = sshll.u32 %s13480_s19, 4  ;;  %s25_s22 = sshll.u32 %s13481_s21, 4  ;;  %s63_s20 = int_to_ptr.vmem [resolvable:$true] %s62_s20  ;;  %s26_s22 = int_to_ptr.vmem [resolvable:$true] %s25_s22 }
  0x18   :  { %s13311_s25 = scalar_lea.hbm %s14271_s3, 128 }
  0x19   :  { %p13312_p8 = scmp.ne.s32.totalorder %s14271_s3, %s13311_s25  ;;  %p13315_p9 = scmp.lt.u32.totalorder %s13311_s25, %s14271_s3 }
  0x1b   :  { %p13317_p10 = pnand %p13315_p9, %p13312_p8 }
  0x1d   :  { %13320 = shalt.err (!%p13317_p10)
}
  0x1e   :  { %s13321_s1 = scalar_lea.vmem %s63_s20, 128  ;;  %p13326_p12 = scmp.lt.s32.totalorder %s63_s20, %s63_s20 }
  0x1f   :  { %p13322_p11 = scmp.ne.s32.totalorder %s63_s20, %s13321_s1  ;;  %p13327_p13 = scmp.lt.s32.totalorder %s13321_s1, %s13321_s1 }
  0x21   :  { %p13328_p0 = por %p13327_p13, %p13326_p12 }
  0x23   :  { %p13329_p1 = pnand %p13328_p0, %p13322_p11 }
  0x25   :  { %13332 = shalt.err (!%p13329_p1)
}
  0x26   :  { %65 = dma.hbm_to_vmem [thread:$0]  %s14271_s3, 128, %s63_s20, [#allocation9]  }
  0x27   :  { %s13333_s12 = scalar_lea.hbm %s14268_s0, 1024 }
  0x28   :  { %p13334_p2 = scmp.ne.s32.totalorder %s14268_s0, %s13333_s12  ;;  %p13337_p3 = scmp.lt.u32.totalorder %s13333_s12, %s14268_s0 }
  0x2a   :  { %p13339_p4 = pnand %p13337_p3, %p13334_p2 }
  0x2c   :  { %13342 = shalt.err (!%p13339_p4)
}
  0x2d   :  { %s13343_s19 = scalar_lea.vmem %s26_s22, 1024  ;;  %p13348_p6 = scmp.lt.s32.totalorder %s26_s22, %s26_s22 }
  0x2e   :  { %p13344_p5 = scmp.ne.s32.totalorder %s26_s22, %s13343_s19  ;;  %p13349_p7 = scmp.lt.s32.totalorder %s13343_s19, %s13343_s19 }
  0x30   :  { %p13350_p8 = por %p13349_p7, %p13348_p6 }
  0x32   :  { %p13351_p9 = pnand %p13350_p8, %p13344_p5 }
  0x34   :  { %13354 = shalt.err (!%p13351_p9)
}
  0x35   :  { %s13482_s3 = smov 512   ;;  %s13483_s20 = smov 32  }
  0x36   :  { %31 = dma.hbm_to_vmem [thread:$0]  %s14268_s0, 1024, %s26_s22, [#allocation3], %s13482_s3, %s13482_s3, %s13483_s20  }
  0x37   :  { %s13484_s24 = smov [#allocation7]   ;;  %s13485_s26 = smov [#allocation10]  }
  0x38   :  { %s49_s25 = sshll.u32 %s13484_s24, 4  ;;  %s73_s27 = sshll.u32 %s13485_s26, 4  ;;  %s50_s25 = int_to_ptr.vmem [resolvable:$true] %s49_s25  ;;  %s74_s27 = int_to_ptr.vmem [resolvable:$true] %s73_s27 }
  0x39   :  { %s13355_s1 = scalar_lea.hbm %s14270_s2, 32768 }
  0x3a   :  { %p13356_p10 = scmp.ne.s32.totalorder %s14270_s2, %s13355_s1  ;;  %p13359_p11 = scmp.lt.u32.totalorder %s13355_s1, %s14270_s2 }
  0x3c   :  { %p13361_p12 = pnand %p13359_p11, %p13356_p10 }
  0x3e   :  { %13364 = shalt.err (!%p13361_p12)
}
  0x3f   :  { %s13365_s0 = scalar_lea.vmem %s50_s25, 32768  ;;  %p13370_p0 = scmp.lt.s32.totalorder %s50_s25, %s50_s25 }
  0x40   :  { %p13366_p13 = scmp.ne.s32.totalorder %s50_s25, %s13365_s0  ;;  %p13371_p1 = scmp.lt.s32.totalorder %s13365_s0, %s13365_s0 }
  0x42   :  { %p13372_p2 = por %p13371_p1, %p13370_p0 }
  0x44   :  { %p13373_p3 = pnand %p13372_p2, %p13366_p13 }
  0x46   :  { %13376 = shalt.err (!%p13373_p3)
}
  0x47   :  { %55 = dma.hbm_to_vmem [thread:$0]  %s14270_s2, 32768, %s50_s25, [#allocation6], %s13482_s3, %s13482_s3, %s13483_s20  }
  0x48   :  { %s13377_s17 = scalar_lea.hbm %s14273_s5, 98304 }
  0x49   :  { %p13378_p4 = scmp.ne.s32.totalorder %s14273_s5, %s13377_s17  ;;  %p13381_p5 = scmp.lt.u32.totalorder %s13377_s17, %s14273_s5 }
  0x4b   :  { %p13383_p6 = pnand %p13381_p5, %p13378_p4 }
  0x4d   :  { %13386 = shalt.err (!%p13383_p6)
}
  0x4e   :  { %s13387_s24 = scalar_lea.vmem %s74_s27, 98304  ;;  %p13392_p8 = scmp.lt.s32.totalorder %s74_s27, %s74_s27 }
  0x4f   :  { %p13388_p7 = scmp.ne.s32.totalorder %s74_s27, %s13387_s24  ;;  %p13393_p9 = scmp.lt.s32.totalorder %s13387_s24, %s13387_s24 }
  0x51   :  { %p13394_p10 = por %p13393_p9, %p13392_p8 }
  0x53   :  { %p13395_p11 = pnand %p13394_p10, %p13388_p7 }
  0x55   :  { %13398 = shalt.err (!%p13395_p11)
}
  0x56   :  { %79 = dma.hbm_to_vmem [thread:$0]  %s14273_s5, 98304, %s74_s27, [#allocation9], %s13478_s15, %s13478_s15, %s13479_s16  }
  0x57   :  { %s13486_s26 = smov [#allocation11]   ;;  %s13399_s28 = scalar_lea.hbm %s14274_s6, 128 }
  0x58   :  { %s85_s29 = sshll.u32 %s13486_s26, 4  ;;  %p13400_p12 = scmp.ne.s32.totalorder %s14274_s6, %s13399_s28  ;;  %s86_s29 = int_to_ptr.vmem [resolvable:$true] %s85_s29 }
  0x59   :  { %p13403_p13 = scmp.lt.u32.totalorder %s13399_s28, %s14274_s6 }
  0x5b   :  { %p13405_p0 = pnand %p13403_p13, %p13400_p12 }
  0x5d   :  { %13408 = shalt.err (!%p13405_p0)
}
  0x5e   :  { %s13409_s22 = scalar_lea.vmem %s86_s29, 128  ;;  %p13414_p2 = scmp.lt.s32.totalorder %s86_s29, %s86_s29 }
  0x5f   :  { %p13410_p1 = scmp.ne.s32.totalorder %s86_s29, %s13409_s22  ;;  %p13415_p3 = scmp.lt.s32.totalorder %s13409_s22, %s13409_s22 }
  0x61   :  { %p13416_p4 = por %p13415_p3, %p13414_p2 }
  0x63   :  { %p13417_p5 = pnand %p13416_p4, %p13410_p1 }
  0x65   :  { %13420 = shalt.err (!%p13417_p5)
}
  0x66   :  { %s13487_s5 = smov 64   ;;  %s13488_s15 = smov 4  }
  0x67   :  { %91 = dma.hbm_to_vmem [thread:$0]  %s14274_s6, 128, %s86_s29, [#allocation12], %s13487_s5, %s13487_s5, %s13488_s15  }
  0x68   :  { %13465 = dma.done.wait [#allocation3], 1024  }
  0x69   :  { %13466 = vsyncadd [#allocation3], 4294966272 }
  0x6a   :  { %13467 = dma.done.wait [#allocation6], 49152  }
  0x6b   :  { %13468 = vsyncadd [#allocation6], 4294918144 }
  0x6c   :  { %13469 = dma.done.wait [#allocation9], 98432  }
  0x6d   :  { %13470 = vsyncadd [#allocation9], 4294868864 }
  0x6e   :  { %13471 = dma.done.wait [#allocation12], 128  }
  0x6f   :  { %13472 = vsyncadd [#allocation12], 4294967168  ;;  %v11902_v0 = vld [vmem:[#allocation5 + $0x4] ss:$16 sps:$4 sm:$0xff]   ;;  %v11904_v1 = vld [vmem:[#allocation5 + $0xc] ss:$16 sps:$4 sm:$0xff]  }
  0x70   :  { %891 = vmatprep.subr.bf16.mxu0 %v11902_v0  ;;  %v11906_v2 = vld [vmem:[#allocation5] ss:$16 sps:$4 sm:$0xff]   ;;  %v11907_v3 = vld [vmem:[#allocation5 + $0x8] ss:$16 sps:$4 sm:$0xff]   ;;  %977 = vmatprep.subr.bf16.mxu1 %v11904_v1  ;;  %v11908_v4 = vld [vmem:[#allocation5 + $0x24] ss:$16 sps:$4 sm:$0xff]  }
  0x71   :  { %892 = vmatpush1.bf16.msra.mxu0 %v11906_v2  ;;  %978 = vmatpush1.bf16.msra.mxu1 %v11907_v3  ;;  %v11910_v5 = vld [vmem:[#allocation5 + $0x2c] ss:$16 sps:$4 sm:$0xff]   ;;  %v11912_v6 = vld [vmem:[#allocation5 + $0x20] ss:$16 sps:$4 sm:$0xff]   ;;  %v11913_v7 = vld [vmem:[#allocation5 + $0x28] ss:$16 sps:$4 sm:$0xff]  }
  0x72   :  { %893 = vmatprep.subr.bf16.mxu0 %v11908_v4  ;;  %979 = vmatprep.subr.bf16.mxu1 %v11910_v5  ;;  %v11914_v8 = vld [vmem:[#allocation5 + $0x44] ss:$16 sps:$4 sm:$0xff]   ;;  %v11916_v9 = vld [vmem:[#allocation5 + $0x4c] ss:$16 sps:$4 sm:$0xff]   ;;  %v11918_v10 = vld [vmem:[#allocation5 + $0x40] ss:$16 sps:$4 sm:$0xff]  }
  0x73   :  { %v11919_v11 = vld [vmem:[#allocation5 + $0x48] ss:$16 sps:$4 sm:$0xff]   ;;  %v11920_v12 = vld [vmem:[#allocation5 + $0x64] ss:$16 sps:$4 sm:$0xff]   ;;  %v11922_v13 = vld [vmem:[#allocation5 + $0x6c] ss:$16 sps:$4 sm:$0xff]  }
  0x74   :  { %v11924_v14 = vld [vmem:[#allocation5 + $0x60] ss:$16 sps:$4 sm:$0xff]   ;;  %v11925_v15 = vld [vmem:[#allocation5 + $0x68] ss:$16 sps:$4 sm:$0xff]   ;;  %v11926_v16 = vld [vmem:[#allocation5 + $0x84] ss:$16 sps:$4 sm:$0xff]  }
  0x75   :  { %894 = vmatpush1.bf16.msra.mxu0 %v11912_v6  ;;  %980 = vmatpush1.bf16.msra.mxu1 %v11913_v7  ;;  %v11928_v17 = vld [vmem:[#allocation5 + $0x8c] ss:$16 sps:$4 sm:$0xff]   ;;  %v11930_v18 = vld [vmem:[#allocation5 + $0x80] ss:$16 sps:$4 sm:$0xff]   ;;  %v11931_v19 = vld [vmem:[#allocation5 + $0x88] ss:$16 sps:$4 sm:$0xff]  }
  0x76   :  { %895 = vmatprep.subr.bf16.mxu0 %v11914_v8  ;;  %981 = vmatprep.subr.bf16.mxu1 %v11916_v9  ;;  %v11932_v20 = vld [vmem:[#allocation5 + $0xa4] ss:$16 sps:$4 sm:$0xff]   ;;  %v11934_v21 = vld [vmem:[#allocation5 + $0xac] ss:$16 sps:$4 sm:$0xff]   ;;  %v11936_v22 = vld [vmem:[#allocation5 + $0xa0] ss:$16 sps:$4 sm:$0xff]  }
  0x77   :  { %v11937_v23 = vld [vmem:[#allocation5 + $0xa8] ss:$16 sps:$4 sm:$0xff]   ;;  %v11938_v24 = vld [vmem:[#allocation5 + $0xc4] ss:$16 sps:$4 sm:$0xff]   ;;  %v11940_v25 = vld [vmem:[#allocation5 + $0xcc] ss:$16 sps:$4 sm:$0xff]  }
  0x78   :  { %v11942_v26 = vld [vmem:[#allocation5 + $0xc0] ss:$16 sps:$4 sm:$0xff]   ;;  %v11943_v27 = vld [vmem:[#allocation5 + $0xc8] ss:$16 sps:$4 sm:$0xff]   ;;  %v11944_v28 = vld [vmem:[#allocation5 + $0xe4] ss:$16 sps:$4 sm:$0xff]  }
  0x79   :  { %896 = vmatpush1.bf16.msra.mxu0 %v11918_v10  ;;  %982 = vmatpush1.bf16.msra.mxu1 %v11919_v11  ;;  %v11946_v29 = vld [vmem:[#allocation5 + $0xec] ss:$16 sps:$4 sm:$0xff]   ;;  %v11948_v30 = vld [vmem:[#allocation5 + $0xe0] ss:$16 sps:$4 sm:$0xff]   ;;  %v11949_v31 = vld [vmem:[#allocation5 + $0xe8] ss:$16 sps:$4 sm:$0xff]  }
  0x7a   :  { %897 = vmatprep.subr.bf16.mxu0 %v11920_v12  ;;  %983 = vmatprep.subr.bf16.mxu1 %v11922_v13  ;;  %v11950_v32 = vld [vmem:[#allocation5 + $0x104] ss:$16 sps:$4 sm:$0xff]   ;;  %v11952_v33 = vld [vmem:[#allocation5 + $0x10c] ss:$16 sps:$4 sm:$0xff]   ;;  %v11954_v34 = vld [vmem:[#allocation5 + $0x100] ss:$16 sps:$4 sm:$0xff]  }
  0x7b   :  { %v11955_v35 = vld [vmem:[#allocation5 + $0x108] ss:$16 sps:$4 sm:$0xff]   ;;  %v11956_v36 = vld [vmem:[#allocation5 + $0x124] ss:$16 sps:$4 sm:$0xff]   ;;  %v11958_v37 = vld [vmem:[#allocation5 + $0x12c] ss:$16 sps:$4 sm:$0xff]  }
  0x7c   :  { %v11960_v38 = vld [vmem:[#allocation5 + $0x120] ss:$16 sps:$4 sm:$0xff]   ;;  %v11961_v39 = vld [vmem:[#allocation5 + $0x128] ss:$16 sps:$4 sm:$0xff]   ;;  %v11962_v40 = vld [vmem:[#allocation5 + $0x144] ss:$16 sps:$4 sm:$0xff]  }
  0x7d   :  { %898 = vmatpush1.bf16.msra.mxu0 %v11924_v14  ;;  %984 = vmatpush1.bf16.msra.mxu1 %v11925_v15  ;;  %v11964_v41 = vld [vmem:[#allocation5 + $0x14c] ss:$16 sps:$4 sm:$0xff]   ;;  %v11966_v42 = vld [vmem:[#allocation5 + $0x140] ss:$16 sps:$4 sm:$0xff]   ;;  %v11967_v43 = vld [vmem:[#allocation5 + $0x148] ss:$16 sps:$4 sm:$0xff]  }
  0x7e   :  { %899 = vmatprep.subr.bf16.mxu0 %v11926_v16  ;;  %985 = vmatprep.subr.bf16.mxu1 %v11928_v17  ;;  %v11968_v44 = vld [vmem:[#allocation5 + $0x164] ss:$16 sps:$4 sm:$0xff]   ;;  %v11970_v45 = vld [vmem:[#allocation5 + $0x16c] ss:$16 sps:$4 sm:$0xff]   ;;  %v11972_v48 = vld [vmem:[#allocation5 + $0x160] ss:$16 sps:$4 sm:$0xff]  }
  0x7f   :  { %v112_v46 = vld [vmem:[#allocation2 + $0x8] sm:$0xff]  ;;  %v11974_v51 = vld [vmem:[#allocation5 + $0x184] ss:$16 sps:$4 sm:$0xff]   ;;  %v11978_v53 = vld [vmem:[#allocation5 + $0x180] ss:$16 sps:$4 sm:$0xff]   ;;  %vm3210_vm0 = vcmask 64512  }
  0x80   :  { %v116_v47 = vld [vmem:[#allocation2 + $0x28] sm:$0xff]  ;;  %v11980_v55 = vld [vmem:[#allocation5 + $0x1a4] ss:$16 sps:$4 sm:$0xff]   ;;  %v11984_v57 = vld [vmem:[#allocation5 + $0x1a0] ss:$16 sps:$4 sm:$0xff]  }
  0x81   :  { %900 = vmatpush1.bf16.msra.mxu0 %v11930_v18  ;;  %986 = vmatpush1.bf16.msra.mxu1 %v11931_v19  ;;  %v11973_v49 = vld [vmem:[#allocation5 + $0x168] ss:$16 sps:$4 sm:$0xff]   ;;  %v120_v50 = vpack.c.bf16 %v116_v47, %v112_v46  ;;  %v11976_v52 = vld [vmem:[#allocation5 + $0x18c] ss:$16 sps:$4 sm:$0xff]   ;;  %v11986_v59 = vld [vmem:[#allocation5 + $0x1c4] ss:$16 sps:$4 sm:$0xff]  }
  0x82   :  { %901 = vmatprep.subr.bf16.mxu0 %v11932_v20  ;;  %987 = vmatprep.subr.bf16.mxu1 %v11934_v21  ;;  %v11979_v54 = vld [vmem:[#allocation5 + $0x188] ss:$16 sps:$4 sm:$0xff]   ;;  %v11982_v56 = vld [vmem:[#allocation5 + $0x1ac] ss:$16 sps:$4 sm:$0xff]   ;;  %v11990_v61 = vld [vmem:[#allocation5 + $0x1c0] ss:$16 sps:$4 sm:$0xff]  }
  0x83   :  { %923 = vmatprep.mubr.bf16.mxu0 %v120_v50  ;;  %1009 = vmatprep.mubr.bf16.mxu1 %v120_v50  ;;  %v11985_v58 = vld [vmem:[#allocation5 + $0x1a8] ss:$16 sps:$4 sm:$0xff]   ;;  %v11988_v60 = vld [vmem:[#allocation5 + $0x1cc] ss:$16 sps:$4 sm:$0xff]   ;;  %v11992_v63 = vld [vmem:[#allocation5 + $0x1e4] ss:$16 sps:$4 sm:$0xff]  }
  0x84   :  { %v11991_v62 = vld [vmem:[#allocation5 + $0x1c8] ss:$16 sps:$4 sm:$0xff]   ;;  %v11994_v0 = vld [vmem:[#allocation5 + $0x1ec] ss:$16 sps:$4 sm:$0xff]   ;;  %v11996_v1 = vld [vmem:[#allocation5 + $0x1e0] ss:$16 sps:$4 sm:$0xff]  }
  0x85   :  { %902 = vmatpush1.bf16.msra.mxu0 %v11936_v22  ;;  %988 = vmatpush1.bf16.msra.mxu1 %v11937_v23  ;;  %v11997_v2 = vld [vmem:[#allocation5 + $0x1e8] ss:$16 sps:$4 sm:$0xff]   ;;  %v12000_v3 = vld [vmem:[#allocation5 + $0x204] ss:$16 sps:$4 sm:$0xff]   ;;  %v12003_v6 = vld [vmem:[#allocation5 + $0x20c] ss:$16 sps:$4 sm:$0xff]  }
  0x86   :  { %903 = vmatprep.subr.bf16.mxu0 %v11938_v24  ;;  %989 = vmatprep.subr.bf16.mxu1 %v11940_v25  ;;  %v111_v4 = vld [vmem:[#allocation2] sm:$0xff]  ;;  %v12001_v8 = vld [vmem:[#allocation5 + $0x208] ss:$16 sps:$4 sm:$0xff]   ;;  %v12009_v11 = vld [vmem:[#allocation5 + $0x22c] ss:$16 sps:$4 sm:$0xff]  }
  0x87   :  { %v115_v5 = vld [vmem:[#allocation2 + $0x20] sm:$0xff]  ;;  %v12007_v13 = vld [vmem:[#allocation5 + $0x228] ss:$16 sps:$4 sm:$0xff]   ;;  %v12015_v15 = vld [vmem:[#allocation5 + $0x24c] ss:$16 sps:$4 sm:$0xff]  }
  0x88   :  { %v11998_v7 = vld [vmem:[#allocation5 + $0x200] ss:$16 sps:$4 sm:$0xff]   ;;  %v119_v9 = vpack.c.bf16 %v115_v5, %v111_v4  ;;  %v12006_v10 = vld [vmem:[#allocation5 + $0x224] ss:$16 sps:$4 sm:$0xff]   ;;  %v12013_v17 = vld [vmem:[#allocation5 + $0x248] ss:$16 sps:$4 sm:$0xff]  }
  0x89   :  { %904 = vmatpush1.bf16.msra.mxu0 %v11942_v26  ;;  %990 = vmatpush1.bf16.msra.mxu1 %v11943_v27  ;;  %v12004_v12 = vld [vmem:[#allocation5 + $0x220] ss:$16 sps:$4 sm:$0xff]   ;;  %v12012_v14 = vld [vmem:[#allocation5 + $0x244] ss:$16 sps:$4 sm:$0xff]   ;;  %v12021_v19 = vld [vmem:[#allocation5 + $0x26c] ss:$16 sps:$4 sm:$0xff]  }
  0x8a   :  { %905 = vmatprep.subr.bf16.mxu0 %v11944_v28  ;;  %991 = vmatprep.subr.bf16.mxu1 %v11946_v29  ;;  %v12010_v16 = vld [vmem:[#allocation5 + $0x240] ss:$16 sps:$4 sm:$0xff]   ;;  %v12018_v18 = vld [vmem:[#allocation5 + $0x264] ss:$16 sps:$4 sm:$0xff]   ;;  %v12019_v21 = vld [vmem:[#allocation5 + $0x268] ss:$16 sps:$4 sm:$0xff]  }
  0x8b   :  { %v12016_v20 = vld [vmem:[#allocation5 + $0x260] ss:$16 sps:$4 sm:$0xff]   ;;  %v12024_v22 = vld [vmem:[#allocation5 + $0x284] ss:$16 sps:$4 sm:$0xff]   ;;  %v12027_v23 = vld [vmem:[#allocation5 + $0x28c] ss:$16 sps:$4 sm:$0xff]  }
  0x8c   :  { %v12022_v24 = vld [vmem:[#allocation5 + $0x280] ss:$16 sps:$4 sm:$0xff]   ;;  %v12025_v25 = vld [vmem:[#allocation5 + $0x288] ss:$16 sps:$4 sm:$0xff]   ;;  %v12030_v26 = vld [vmem:[#allocation5 + $0x2a4] ss:$16 sps:$4 sm:$0xff]  }
  0x8d   :  { %906 = vmatpush1.bf16.msra.mxu0 %v11948_v30  ;;  %992 = vmatpush1.bf16.msra.mxu1 %v11949_v31  ;;  %v12033_v27 = vld [vmem:[#allocation5 + $0x2ac] ss:$16 sps:$4 sm:$0xff]   ;;  %v12028_v28 = vld [vmem:[#allocation5 + $0x2a0] ss:$16 sps:$4 sm:$0xff]   ;;  %v12031_v29 = vld [vmem:[#allocation5 + $0x2a8] ss:$16 sps:$4 sm:$0xff]  }
  0x8e   :  { %907 = vmatprep.subr.bf16.mxu0 %v11950_v32  ;;  %993 = vmatprep.subr.bf16.mxu1 %v11952_v33  ;;  %v12036_v30 = vld [vmem:[#allocation5 + $0x2c4] ss:$16 sps:$4 sm:$0xff]   ;;  %v12039_v31 = vld [vmem:[#allocation5 + $0x2cc] ss:$16 sps:$4 sm:$0xff]   ;;  %v12052_v47 = vld [vmem:[#allocation5 + $0x320] ss:$16 sps:$4 sm:$0xff]  }
  0x8f   :  { %v114_v32 = vld [vmem:[#allocation2 + $0x18] sm:$0xff]  ;;  %v12090_v5 = vld [vmem:[#allocation5 + $0x3e4] ss:$16 sps:$4 sm:$0xff]  }
  0x90   :  { %v118_v33 = vld [vmem:[#allocation2 + $0x38] sm:$0xff] }
  0x91   :  { %908 = vmatpush1.bf16.msra.mxu0 %v11954_v34  ;;  %994 = vmatpush1.bf16.msra.mxu1 %v11955_v35  ;;  %v12034_v34 = vld [vmem:[#allocation5 + $0x2c0] ss:$16 sps:$4 sm:$0xff]   ;;  %v12037_v35 = vld [vmem:[#allocation5 + $0x2c8] ss:$16 sps:$4 sm:$0xff]   ;;  %v12057_v46 = vld [vmem:[#allocation5 + $0x32c] ss:$16 sps:$4 sm:$0xff]  }
  0x92   :  { %909 = vmatprep.subr.bf16.mxu0 %v11956_v36  ;;  %995 = vmatprep.subr.bf16.mxu1 %v11958_v37  ;;  %v122_v36 = vpack.c.bf16 %v118_v33, %v114_v32  ;;  %v12042_v37 = vld [vmem:[#allocation5 + $0x2e4] ss:$16 sps:$4 sm:$0xff]   ;;  %v12063_v50 = vld [vmem:[#allocation5 + $0x34c] ss:$16 sps:$4 sm:$0xff]   ;;  %v12085_v4 = vld [vmem:[#allocation5 + $0x3c8] ss:$16 sps:$4 sm:$0xff]  }
  0x93   :  { %v1091_v32 = vld [vmem:[#allocation7 + $0xc0] sm:$0xff] }
  0x94   :  { %v1095_v33 = vld [vmem:[#allocation7 + $0xe0] sm:$0xff] }
  0x95   :  { %910 = vmatpush1.bf16.msra.mxu0 %v11960_v38  ;;  %996 = vmatpush1.bf16.msra.mxu1 %v11961_v39  ;;  %v12045_v38 = vld [vmem:[#allocation5 + $0x2ec] ss:$16 sps:$4 sm:$0xff]   ;;  %v12040_v39 = vld [vmem:[#allocation5 + $0x2e0] ss:$16 sps:$4 sm:$0xff]  }
  0x96   :  { %911 = vmatprep.subr.bf16.mxu0 %v11962_v40  ;;  %997 = vmatprep.subr.bf16.mxu1 %v11964_v41  ;;  %v12043_v40 = vld [vmem:[#allocation5 + $0x2e8] ss:$16 sps:$4 sm:$0xff]   ;;  %v12048_v41 = vld [vmem:[#allocation5 + $0x304] ss:$16 sps:$4 sm:$0xff]  }
  0x99   :  { %912 = vmatpush1.bf16.msra.mxu0 %v11966_v42  ;;  %998 = vmatpush1.bf16.msra.mxu1 %v11967_v43  ;;  %v12051_v42 = vld [vmem:[#allocation5 + $0x30c] ss:$16 sps:$4 sm:$0xff]   ;;  %v12046_v43 = vld [vmem:[#allocation5 + $0x300] ss:$16 sps:$4 sm:$0xff]  }
  0x9a   :  { %913 = vmatprep.subr.bf16.mxu0 %v11968_v44  ;;  %999 = vmatprep.subr.bf16.mxu1 %v11970_v45  ;;  %v12049_v44 = vld [vmem:[#allocation5 + $0x308] ss:$16 sps:$4 sm:$0xff]   ;;  %v12054_v45 = vld [vmem:[#allocation5 + $0x324] ss:$16 sps:$4 sm:$0xff]  }
  0x9d   :  { %914 = vmatpush1.bf16.msra.mxu0 %v11972_v48  ;;  %1000 = vmatpush1.bf16.msra.mxu1 %v11973_v49  ;;  %v12055_v48 = vld [vmem:[#allocation5 + $0x328] ss:$16 sps:$4 sm:$0xff]   ;;  %v12060_v49 = vld [vmem:[#allocation5 + $0x344] ss:$16 sps:$4 sm:$0xff]  }
  0x9e   :  { %915 = vmatprep.subr.bf16.mxu0 %v11974_v51  ;;  %1001 = vmatprep.subr.bf16.mxu1 %v11976_v52  ;;  %v12058_v51 = vld [vmem:[#allocation5 + $0x340] ss:$16 sps:$4 sm:$0xff]   ;;  %v12061_v52 = vld [vmem:[#allocation5 + $0x348] ss:$16 sps:$4 sm:$0xff]  }
  0xa1   :  { %916 = vmatpush1.bf16.msra.mxu0 %v11978_v53  ;;  %1002 = vmatpush1.bf16.msra.mxu1 %v11979_v54  ;;  %v12066_v53 = vld [vmem:[#allocation5 + $0x364] ss:$16 sps:$4 sm:$0xff]   ;;  %v12069_v54 = vld [vmem:[#allocation5 + $0x36c] ss:$16 sps:$4 sm:$0xff]  }
  0xa2   :  { %917 = vmatprep.subr.bf16.mxu0 %v11980_v55  ;;  %1003 = vmatprep.subr.bf16.mxu1 %v11982_v56  ;;  %v12064_v55 = vld [vmem:[#allocation5 + $0x360] ss:$16 sps:$4 sm:$0xff]   ;;  %v12067_v56 = vld [vmem:[#allocation5 + $0x368] ss:$16 sps:$4 sm:$0xff]  }
  0xa5   :  { %918 = vmatpush1.bf16.msra.mxu0 %v11984_v57  ;;  %1004 = vmatpush1.bf16.msra.mxu1 %v11985_v58  ;;  %v12072_v57 = vld [vmem:[#allocation5 + $0x384] ss:$16 sps:$4 sm:$0xff]   ;;  %v12075_v58 = vld [vmem:[#allocation5 + $0x38c] ss:$16 sps:$4 sm:$0xff]  }
  0xa6   :  { %919 = vmatprep.subr.bf16.mxu0 %v11986_v59  ;;  %1005 = vmatprep.subr.bf16.mxu1 %v11988_v60  ;;  %v12070_v59 = vld [vmem:[#allocation5 + $0x380] ss:$16 sps:$4 sm:$0xff]   ;;  %v12073_v60 = vld [vmem:[#allocation5 + $0x388] ss:$16 sps:$4 sm:$0xff]  }
  0xa9   :  { %920 = vmatpush1.bf16.msra.mxu0 %v11990_v61  ;;  %1006 = vmatpush1.bf16.msra.mxu1 %v11991_v62  ;;  %v12078_v61 = vld [vmem:[#allocation5 + $0x3a4] ss:$16 sps:$4 sm:$0xff]   ;;  %v12081_v62 = vld [vmem:[#allocation5 + $0x3ac] ss:$16 sps:$4 sm:$0xff]  }
  0xaa   :  { %921 = vmatprep.subr.bf16.mxu0 %v11992_v63  ;;  %1007 = vmatprep.subr.bf16.mxu1 %v11994_v0  ;;  %v12076_v63 = vld [vmem:[#allocation5 + $0x3a0] ss:$16 sps:$4 sm:$0xff]   ;;  %v12079_v0 = vld [vmem:[#allocation5 + $0x3a8] ss:$16 sps:$4 sm:$0xff]  }
  0xad   :  { %922 = vmatpush1.bf16.msra.mxu0 %v11996_v1  ;;  %1008 = vmatpush1.bf16.msra.mxu1 %v11997_v2  ;;  %v12084_v1 = vld [vmem:[#allocation5 + $0x3c4] ss:$16 sps:$4 sm:$0xff]   ;;  %v12087_v2 = vld [vmem:[#allocation5 + $0x3cc] ss:$16 sps:$4 sm:$0xff]  }
  0xae   :  { %934 = vmatprep.subr.bf16.mxu0 %v12000_v3  ;;  %1020 = vmatprep.subr.bf16.mxu1 %v12003_v6  ;;  %v12082_v3 = vld [vmem:[#allocation5 + $0x3c0] ss:$16 sps:$4 sm:$0xff]   ;;  %v12093_v6 = vld [vmem:[#allocation5 + $0x3ec] ss:$16 sps:$4 sm:$0xff]  }
  0xb0   :  { %924 = vmatmul.mubr.bf16.vlgmr.msra.gmra.mrb[0].mxu0 %v119_v9  ;;  %1010 = vmatmul.mubr.bf16.vlgmr.msra.gmra.mrb[0].mxu1 %v119_v9  ;;  %v1068_v9 = vld [vmem:[#allocation7 + $0x8] sm:$0xff] }
  0xb1   :  { %935 = vmatpush1.bf16.msra.mxu0 %v11998_v7  ;;  %1021 = vmatpush1.bf16.msra.mxu1 %v12001_v8  ;;  %v1067_v7 = vld [vmem:[#allocation7] sm:$0xff] }
  0xb2   :  { %936 = vmatprep.subr.bf16.mxu0 %v12006_v10  ;;  %1022 = vmatprep.subr.bf16.mxu1 %v12009_v11  ;;  %v1071_v8 = vld [vmem:[#allocation7 + $0x20] sm:$0xff]  ;;  %v1072_v10 = vld [vmem:[#allocation7 + $0x28] sm:$0xff] }
  0xb3   :  { %966 = vmatprep.mubr.bf16.mxu0 %v122_v36  ;;  %1052 = vmatprep.mubr.bf16.mxu1 %v122_v36  ;;  %v12088_v11 = vld [vmem:[#allocation5 + $0x3e0] ss:$16 sps:$4 sm:$0xff]  }
  0xb5   :  { %937 = vmatpush1.bf16.msra.mxu0 %v12004_v12  ;;  %1023 = vmatpush1.bf16.msra.mxu1 %v12007_v13  ;;  %v12091_v12 = vld [vmem:[#allocation5 + $0x3e8] ss:$16 sps:$4 sm:$0xff]   ;;  %v113_v13 = vld [vmem:[#allocation2 + $0x10] sm:$0xff] }
  0xb6   :  { %938 = vmatprep.subr.bf16.mxu0 %v12012_v14  ;;  %1024 = vmatprep.subr.bf16.mxu1 %v12015_v15  ;;  %v117_v14 = vld [vmem:[#allocation2 + $0x30] sm:$0xff]  ;;  %v1075_v15 = vld [vmem:[#allocation7 + $0x40] sm:$0xff] }
  0xb9   :  { %939 = vmatpush1.bf16.msra.mxu0 %v12010_v16  ;;  %1025 = vmatpush1.bf16.msra.mxu1 %v12013_v17  ;;  %v1079_v16 = vld [vmem:[#allocation7 + $0x60] sm:$0xff]  ;;  %v1076_v17 = vld [vmem:[#allocation7 + $0x48] sm:$0xff] }
  0xba   :  { %940 = vmatprep.subr.bf16.mxu0 %v12018_v18  ;;  %1026 = vmatprep.subr.bf16.mxu1 %v12021_v19  ;;  %v1080_v18 = vld [vmem:[#allocation7 + $0x68] sm:$0xff]  ;;  %v10192_v19 = vcombine.high %v1067_v7, %v1071_v8 }
  0xbd   :  { %941 = vmatpush1.bf16.msra.mxu0 %v12016_v20  ;;  %1027 = vmatpush1.bf16.msra.mxu1 %v12019_v21  ;;  %v10194_v20 = vcombine.high %v1068_v9, %v1072_v10  ;;  %v121_v21 = vpack.c.bf16 %v117_v14, %v113_v13 }
  0xbe   :  { %942 = vmatprep.subr.bf16.mxu0 %v12024_v22  ;;  %1028 = vmatprep.subr.bf16.mxu1 %v12027_v23  ;;  %v10191_v22 = vcombine.low %v1067_v7, %v1071_v8  ;;  %v10193_v23 = vcombine.low %v1068_v9, %v1072_v10  ;;  %v1131_v8 = vld [vmem:[#allocation7 + $0x200] sm:$0xff]  ;;  %v1132_v10 = vld [vmem:[#allocation7 + $0x208] sm:$0xff] }
  0xbf   :  { %v1135_v9 = vld [vmem:[#allocation7 + $0x220] sm:$0xff] }
  0xc1   :  { %943 = vmatpush1.bf16.msra.mxu0 %v12022_v24  ;;  %1029 = vmatpush1.bf16.msra.mxu1 %v12025_v25  ;;  %v1083_v24 = vld [vmem:[#allocation7 + $0x80] sm:$0xff] }
  0xc2   :  { %944 = vmatprep.subr.bf16.mxu0 %v12030_v26  ;;  %1030 = vmatprep.subr.bf16.mxu1 %v12033_v27  ;;  %v1087_v25 = vld [vmem:[#allocation7 + $0xa0] sm:$0xff]  ;;  %v1084_v26 = vld [vmem:[#allocation7 + $0x88] sm:$0xff] }
  0xc3   :  { %v1088_v27 = vld [vmem:[#allocation7 + $0xa8] sm:$0xff]  ;;  %v10208_v36 = vcombine.high %v1083_v24, %v1087_v25 }
  0xc5   :  { %945 = vmatpush1.bf16.msra.mxu0 %v12028_v28  ;;  %1031 = vmatpush1.bf16.msra.mxu1 %v12031_v29  ;;  %v10200_v28 = vcombine.high %v1075_v15, %v1079_v16  ;;  %v10202_v29 = vcombine.high %v1076_v17, %v1080_v18 }
  0xc6   :  { %946 = vmatprep.subr.bf16.mxu0 %v12036_v30  ;;  %1032 = vmatprep.subr.bf16.mxu1 %v12039_v31  ;;  %v10199_v30 = vcombine.low %v1075_v15, %v1079_v16  ;;  %v10201_v31 = vcombine.low %v1076_v17, %v1080_v18  ;;  %v1139_v16 = vld [vmem:[#allocation7 + $0x240] sm:$0xff]  ;;  %v1140_v18 = vld [vmem:[#allocation7 + $0x248] sm:$0xff] }
  0xc7   :  { %v1143_v17 = vld [vmem:[#allocation7 + $0x260] sm:$0xff] }
  0xc9   :  { %947 = vmatpush1.bf16.msra.mxu0 %v12034_v34  ;;  %1033 = vmatpush1.bf16.msra.mxu1 %v12037_v35  ;;  %v1092_v34 = vld [vmem:[#allocation7 + $0xc8] sm:$0xff] }
  0xca   :  { %948 = vmatprep.subr.bf16.mxu0 %v12042_v37  ;;  %1034 = vmatprep.subr.bf16.mxu1 %v12045_v38  ;;  %v1096_v35 = vld [vmem:[#allocation7 + $0xe8] sm:$0xff]  ;;  %v10210_v37 = vcombine.high %v1084_v26, %v1088_v27  ;;  %v10207_v38 = vcombine.low %v1083_v24, %v1087_v25  ;;  %v1147_v24 = vld [vmem:[#allocation7 + $0x280] sm:$0xff] }
  0xcb   :  { %v1151_v25 = vld [vmem:[#allocation7 + $0x2a0] sm:$0xff] }
  0xcd   :  { %949 = vmatpush1.bf16.msra.mxu0 %v12040_v39  ;;  %1035 = vmatpush1.bf16.msra.mxu1 %v12043_v40  ;;  %v10209_v39 = vcombine.low %v1084_v26, %v1088_v27  ;;  %v1099_v40 = vld [vmem:[#allocation7 + $0x100] sm:$0xff]  ;;  %v1148_v26 = vld [vmem:[#allocation7 + $0x288] sm:$0xff] }
  0xce   :  { %950 = vmatprep.subr.bf16.mxu0 %v12048_v41  ;;  %1036 = vmatprep.subr.bf16.mxu1 %v12051_v42  ;;  %v1103_v41 = vld [vmem:[#allocation7 + $0x120] sm:$0xff]  ;;  %v1100_v42 = vld [vmem:[#allocation7 + $0x108] sm:$0xff] }
  0xcf   :  { %v1152_v27 = vld [vmem:[#allocation7 + $0x2a8] sm:$0xff] }
  0xd1   :  { %951 = vmatpush1.bf16.msra.mxu0 %v12046_v43  ;;  %1037 = vmatpush1.bf16.msra.mxu1 %v12049_v44  ;;  %v1104_v43 = vld [vmem:[#allocation7 + $0x128] sm:$0xff]  ;;  %v10216_v44 = vcombine.high %v1091_v32, %v1095_v33 }
  0xd2   :  { %952 = vmatprep.subr.bf16.mxu0 %v12054_v45  ;;  %1038 = vmatprep.subr.bf16.mxu1 %v12057_v46  ;;  %v10218_v45 = vcombine.high %v1092_v34, %v1096_v35  ;;  %v10215_v46 = vcombine.low %v1091_v32, %v1095_v33  ;;  %v1155_v32 = vld [vmem:[#allocation7 + $0x2c0] sm:$0xff] }
  0xd3   :  { %v1159_v33 = vld [vmem:[#allocation7 + $0x2e0] sm:$0xff] }
  0xd5   :  { %953 = vmatpush1.bf16.msra.mxu0 %v12052_v47  ;;  %1039 = vmatpush1.bf16.msra.mxu1 %v12055_v48  ;;  %v10217_v47 = vcombine.low %v1092_v34, %v1096_v35  ;;  %v1107_v48 = vld [vmem:[#allocation7 + $0x140] sm:$0xff]  ;;  %v1156_v34 = vld [vmem:[#allocation7 + $0x2c8] sm:$0xff] }
  0xd6   :  { %954 = vmatprep.subr.bf16.mxu0 %v12060_v49  ;;  %1040 = vmatprep.subr.bf16.mxu1 %v12063_v50  ;;  %v1111_v49 = vld [vmem:[#allocation7 + $0x160] sm:$0xff]  ;;  %v1108_v50 = vld [vmem:[#allocation7 + $0x148] sm:$0xff] }
  0xd7   :  { %v1160_v35 = vld [vmem:[#allocation7 + $0x2e8] sm:$0xff] }
  0xd9   :  { %955 = vmatpush1.bf16.msra.mxu0 %v12058_v51  ;;  %1041 = vmatpush1.bf16.msra.mxu1 %v12061_v52  ;;  %v1112_v51 = vld [vmem:[#allocation7 + $0x168] sm:$0xff]  ;;  %v10224_v52 = vcombine.high %v1099_v40, %v1103_v41 }
  0xda   :  { %956 = vmatprep.subr.bf16.mxu0 %v12066_v53  ;;  %1042 = vmatprep.subr.bf16.mxu1 %v12069_v54  ;;  %v10226_v53 = vcombine.high %v1100_v42, %v1104_v43  ;;  %v10223_v54 = vcombine.low %v1099_v40, %v1103_v41  ;;  %v1163_v40 = vld [vmem:[#allocation7 + $0x300] sm:$0xff] }
  0xdb   :  { %v1167_v41 = vld [vmem:[#allocation7 + $0x320] sm:$0xff] }
  0xdd   :  { %957 = vmatpush1.bf16.msra.mxu0 %v12064_v55  ;;  %1043 = vmatpush1.bf16.msra.mxu1 %v12067_v56  ;;  %v10225_v55 = vcombine.low %v1100_v42, %v1104_v43  ;;  %v1115_v56 = vld [vmem:[#allocation7 + $0x180] sm:$0xff]  ;;  %v1164_v42 = vld [vmem:[#allocation7 + $0x308] sm:$0xff] }
  0xde   :  { %958 = vmatprep.subr.bf16.mxu0 %v12072_v57  ;;  %1044 = vmatprep.subr.bf16.mxu1 %v12075_v58  ;;  %v1119_v57 = vld [vmem:[#allocation7 + $0x1a0] sm:$0xff]  ;;  %v1116_v58 = vld [vmem:[#allocation7 + $0x188] sm:$0xff] }
  0xdf   :  { %v1168_v43 = vld [vmem:[#allocation7 + $0x328] sm:$0xff] }
  0xe1   :  { %959 = vmatpush1.bf16.msra.mxu0 %v12070_v59  ;;  %1045 = vmatpush1.bf16.msra.mxu1 %v12073_v60  ;;  %v1120_v59 = vld [vmem:[#allocation7 + $0x1a8] sm:$0xff]  ;;  %v10232_v60 = vcombine.high %v1107_v48, %v1111_v49 }
  0xe2   :  { %960 = vmatprep.subr.bf16.mxu0 %v12078_v61  ;;  %1046 = vmatprep.subr.bf16.mxu1 %v12081_v62  ;;  %v10234_v61 = vcombine.high %v1108_v50, %v1112_v51  ;;  %v10231_v62 = vcombine.low %v1107_v48, %v1111_v49  ;;  %v10241_v7 = vcombine.low %v1116_v58, %v1120_v59  ;;  %v1171_v48 = vld [vmem:[#allocation7 + $0x340] sm:$0xff] }
  0xe3   :  { %v1175_v49 = vld [vmem:[#allocation7 + $0x360] sm:$0xff] }
  0xe5   :  { %961 = vmatpush1.bf16.msra.mxu0 %v12076_v63  ;;  %1047 = vmatpush1.bf16.msra.mxu1 %v12079_v0  ;;  %v10233_v63 = vcombine.low %v1108_v50, %v1112_v51  ;;  %v1123_v0 = vld [vmem:[#allocation7 + $0x1c0] sm:$0xff]  ;;  %v1172_v50 = vld [vmem:[#allocation7 + $0x348] sm:$0xff] }
  0xe6   :  { %962 = vmatprep.subr.bf16.mxu0 %v12084_v1  ;;  %1048 = vmatprep.subr.bf16.mxu1 %v12087_v2  ;;  %v1127_v1 = vld [vmem:[#allocation7 + $0x1e0] sm:$0xff]  ;;  %v1124_v2 = vld [vmem:[#allocation7 + $0x1c8] sm:$0xff] }
  0xe7   :  { %v10247_v14 = vcombine.low %v1123_v0, %v1127_v1  ;;  %v1176_v51 = vld [vmem:[#allocation7 + $0x368] sm:$0xff] }
  0xe9   :  { %963 = vmatpush1.bf16.msra.mxu0 %v12082_v3  ;;  %1049 = vmatpush1.bf16.msra.mxu1 %v12085_v4  ;;  %v1128_v3 = vld [vmem:[#allocation7 + $0x1e8] sm:$0xff]  ;;  %v10240_v4 = vcombine.high %v1115_v56, %v1119_v57 }
  0xea   :  { %964 = vmatprep.subr.bf16.mxu0 %v12090_v5  ;;  %1050 = vmatprep.subr.bf16.mxu1 %v12093_v6  ;;  %v10242_v5 = vcombine.high %v1116_v58, %v1120_v59  ;;  %v10239_v6 = vcombine.low %v1115_v56, %v1119_v57  ;;  %v10250_v13 = vcombine.high %v1124_v2, %v1128_v3  ;;  %v1179_v56 = vld [vmem:[#allocation7 + $0x380] sm:$0xff]  ;;  %v1180_v58 = vld [vmem:[#allocation7 + $0x388] sm:$0xff] }
  0xeb   :  { %v10249_v15 = vcombine.low %v1124_v2, %v1128_v3  ;;  %v1183_v57 = vld [vmem:[#allocation7 + $0x3a0] sm:$0xff]  ;;  %v1184_v59 = vld [vmem:[#allocation7 + $0x3a8] sm:$0xff] }
  0xec   :  { %v10303_v2 = vcombine.low %v1179_v56, %v1183_v57  ;;  %v10305_v3 = vcombine.low %v1180_v58, %v1184_v59 }
  0xed   :  { %965 = vmatpush1.bf16.msra.mxu0 %v12088_v11  ;;  %1051 = vmatpush1.bf16.msra.mxu1 %v12091_v12  ;;  %v1136_v11 = vld [vmem:[#allocation7 + $0x228] sm:$0xff]  ;;  %v10248_v12 = vcombine.high %v1123_v0, %v1127_v1  ;;  %v10304_v0 = vcombine.high %v1179_v56, %v1183_v57  ;;  %v10306_v1 = vcombine.high %v1180_v58, %v1184_v59 }
  0xee   :  { %2645 = vmatprep.subr.bf16.mxu0 %v10192_v19  ;;  %2731 = vmatprep.subr.bf16.mxu1 %v10194_v20  ;;  %v1144_v19 = vld [vmem:[#allocation7 + $0x268] sm:$0xff]  ;;  %v10256_v20 = vcombine.high %v1131_v8, %v1135_v9 }
  0xef   :  { %v1228_v56 = vld [vmem:[#allocation7 + $0x508] sm:$0xff] }
  0xf0   :  { %967 = vmatmul.mubr.bf16.vlgmr.msra.gmra.mrb[0].mxu0 %v121_v21  ;;  %1053 = vmatmul.mubr.bf16.vlgmr.msra.gmra.mrb[0].mxu1 %v121_v21  ;;  %v10258_v21 = vcombine.high %v1132_v10, %v1136_v11  ;;  %v1232_v57 = vld [vmem:[#allocation7 + $0x528] sm:$0xff] }
  0xf1   :  { %2646 = vmatpush1.bf16.msra.mxu0 %v10191_v22  ;;  %2732 = vmatpush1.bf16.msra.mxu1 %v10193_v23  ;;  %v10255_v22 = vcombine.low %v1131_v8, %v1135_v9  ;;  %v10257_v23 = vcombine.low %v1132_v10, %v1136_v11  ;;  %v1192_v8 = vld [vmem:[#allocation7 + $0x3e8] sm:$0xff] }
  0xf2   :  { %2647 = vmatprep.subr.bf16.mxu0 %v10200_v28  ;;  %2733 = vmatprep.subr.bf16.mxu1 %v10202_v29  ;;  %v10264_v28 = vcombine.high %v1139_v16, %v1143_v17  ;;  %v10266_v29 = vcombine.high %v1140_v18, %v1144_v19 }
  0xf5   :  { %2648 = vmatpush1.bf16.msra.mxu0 %v10199_v30  ;;  %2734 = vmatpush1.bf16.msra.mxu1 %v10201_v31  ;;  %v10263_v30 = vcombine.low %v1139_v16, %v1143_v17  ;;  %v10265_v31 = vcombine.low %v1140_v18, %v1144_v19  ;;  %v1200_v16 = vld [vmem:[#allocation7 + $0x428] sm:$0xff] }
  0xf6   :  { %2649 = vmatprep.subr.bf16.mxu0 %v10208_v36  ;;  %2735 = vmatprep.subr.bf16.mxu1 %v10210_v37  ;;  %v10272_v36 = vcombine.high %v1147_v24, %v1151_v25  ;;  %v10274_v37 = vcombine.high %v1148_v26, %v1152_v27 }
  0xf9   :  { %2650 = vmatpush1.bf16.msra.mxu0 %v10207_v38  ;;  %2736 = vmatpush1.bf16.msra.mxu1 %v10209_v39  ;;  %v10271_v38 = vcombine.low %v1147_v24, %v1151_v25  ;;  %v10273_v39 = vcombine.low %v1148_v26, %v1152_v27  ;;  %v1203_v24 = vld [vmem:[#allocation7 + $0x440] sm:$0xff]  ;;  %v1204_v26 = vld [vmem:[#allocation7 + $0x448] sm:$0xff] }
  0xfa   :  { %2651 = vmatprep.subr.bf16.mxu0 %v10216_v44  ;;  %2737 = vmatprep.subr.bf16.mxu1 %v10218_v45  ;;  %v10280_v44 = vcombine.high %v1155_v32, %v1159_v33  ;;  %v10282_v45 = vcombine.high %v1156_v34, %v1160_v35  ;;  %v1207_v25 = vld [vmem:[#allocation7 + $0x460] sm:$0xff] }
  0xfd   :  { %2652 = vmatpush1.bf16.msra.mxu0 %v10215_v46  ;;  %2738 = vmatpush1.bf16.msra.mxu1 %v10217_v47  ;;  %v10279_v46 = vcombine.low %v1155_v32, %v1159_v33  ;;  %v10281_v47 = vcombine.low %v1156_v34, %v1160_v35 }
  0xfe   :  { %2653 = vmatprep.subr.bf16.mxu0 %v10224_v52  ;;  %2739 = vmatprep.subr.bf16.mxu1 %v10226_v53  ;;  %v10288_v52 = vcombine.high %v1163_v40, %v1167_v41  ;;  %v10290_v53 = vcombine.high %v1164_v42, %v1168_v43 }
 0x101   :  { %2654 = vmatpush1.bf16.msra.mxu0 %v10223_v54  ;;  %2740 = vmatpush1.bf16.msra.mxu1 %v10225_v55  ;;  %v10287_v54 = vcombine.low %v1163_v40, %v1167_v41  ;;  %v10289_v55 = vcombine.low %v1164_v42, %v1168_v43  ;;  %v1216_v41 = vld [vmem:[#allocation7 + $0x4a8] sm:$0xff]  ;;  %v10327_v42 = vcombine.low %v1203_v24, %v1207_v25 }
 0x102   :  { %2655 = vmatprep.subr.bf16.mxu0 %v10232_v60  ;;  %2741 = vmatprep.subr.bf16.mxu1 %v10234_v61  ;;  %v10296_v60 = vcombine.high %v1171_v48, %v1175_v49  ;;  %v10298_v61 = vcombine.high %v1172_v50, %v1176_v51 }
 0x105   :  { %2656 = vmatpush1.bf16.msra.mxu0 %v10231_v62  ;;  %2742 = vmatpush1.bf16.msra.mxu1 %v10233_v63  ;;  %v10295_v62 = vcombine.low %v1171_v48, %v1175_v49  ;;  %v10297_v63 = vcombine.low %v1172_v50, %v1176_v51  ;;  %v1220_v48 = vld [vmem:[#allocation7 + $0x4c8] sm:$0xff] }
 0x106   :  { %2657 = vmatprep.subr.bf16.mxu0 %v10240_v4  ;;  %2743 = vmatprep.subr.bf16.mxu1 %v10242_v5  ;;  %v1187_v4 = vld [vmem:[#allocation7 + $0x3c0] sm:$0xff]  ;;  %v1224_v49 = vld [vmem:[#allocation7 + $0x4e8] sm:$0xff] }
 0x107   :  { %v1191_v5 = vld [vmem:[#allocation7 + $0x3e0] sm:$0xff]  ;;  %v10345_v59 = vcombine.low %v1220_v48, %v1224_v49 }
 0x108   :  { %v10311_v9 = vcombine.low %v1187_v4, %v1191_v5 }
 0x109   :  { %2658 = vmatpush1.bf16.msra.mxu0 %v10239_v6  ;;  %2744 = vmatpush1.bf16.msra.mxu1 %v10241_v7  ;;  %v1188_v6 = vld [vmem:[#allocation7 + $0x3c8] sm:$0xff]  ;;  %v10312_v7 = vcombine.high %v1187_v4, %v1191_v5 }
 0x10a   :  { %2659 = vmatprep.subr.bf16.mxu0 %v10248_v12  ;;  %2745 = vmatprep.subr.bf16.mxu1 %v10250_v13  ;;  %v10313_v10 = vcombine.low %v1188_v6, %v1192_v8  ;;  %v10314_v11 = vcombine.high %v1188_v6, %v1192_v8  ;;  %v1195_v12 = vld [vmem:[#allocation7 + $0x400] sm:$0xff]  ;;  %v1244_v8 = vld [vmem:[#allocation7 + $0x588] sm:$0xff] }
 0x10b   :  { %v1199_v13 = vld [vmem:[#allocation7 + $0x420] sm:$0xff] }
 0x10c   :  { %v10319_v17 = vcombine.low %v1195_v12, %v1199_v13  ;;  %v1243_v6 = vld [vmem:[#allocation7 + $0x580] sm:$0xff] }
 0x10d   :  { %2660 = vmatpush1.bf16.msra.mxu0 %v10247_v14  ;;  %2746 = vmatpush1.bf16.msra.mxu1 %v10249_v15  ;;  %v1196_v14 = vld [vmem:[#allocation7 + $0x408] sm:$0xff]  ;;  %v10320_v15 = vcombine.high %v1195_v12, %v1199_v13 }
 0x10e   :  { %2661 = vmatprep.subr.bf16.mxu0 %v10256_v20  ;;  %2747 = vmatprep.subr.bf16.mxu1 %v10258_v21  ;;  %v10321_v18 = vcombine.low %v1196_v14, %v1200_v16  ;;  %v10322_v19 = vcombine.high %v1196_v14, %v1200_v16  ;;  %v1251_v14 = vld [vmem:[#allocation7 + $0x5c0] sm:$0xff]  ;;  %v1252_v16 = vld [vmem:[#allocation7 + $0x5c8] sm:$0xff] }
 0x111   :  { %2662 = vmatpush1.bf16.msra.mxu0 %v10255_v22  ;;  %2748 = vmatpush1.bf16.msra.mxu1 %v10257_v23 }
 0x112   :  { %2663 = vmatprep.subr.bf16.mxu0 %v10264_v28  ;;  %2749 = vmatprep.subr.bf16.mxu1 %v10266_v29  ;;  %v1208_v29 = vld [vmem:[#allocation7 + $0x468] sm:$0xff] }
 0x113   :  { %v10330_v40 = vcombine.high %v1204_v26, %v1208_v29  ;;  %v10329_v43 = vcombine.low %v1204_v26, %v1208_v29 }
 0x115   :  { %2664 = vmatpush1.bf16.msra.mxu0 %v10263_v30  ;;  %2750 = vmatpush1.bf16.msra.mxu1 %v10265_v31 }
 0x116   :  { %2665 = vmatprep.subr.bf16.mxu0 %v10272_v36  ;;  %2751 = vmatprep.subr.bf16.mxu1 %v10274_v37  ;;  %v1211_v36 = vld [vmem:[#allocation7 + $0x480] sm:$0xff] }
 0x117   :  { %v1215_v37 = vld [vmem:[#allocation7 + $0x4a0] sm:$0xff] }
 0x118   :  { %v10335_v50 = vcombine.low %v1211_v36, %v1215_v37 }
 0x119   :  { %2666 = vmatpush1.bf16.msra.mxu0 %v10271_v38  ;;  %2752 = vmatpush1.bf16.msra.mxu1 %v10273_v39  ;;  %v1212_v38 = vld [vmem:[#allocation7 + $0x488] sm:$0xff]  ;;  %v10328_v39 = vcombine.high %v1203_v24, %v1207_v25 }
 0x11a   :  { %2667 = vmatprep.subr.bf16.mxu0 %v10280_v44  ;;  %2753 = vmatprep.subr.bf16.mxu1 %v10282_v45  ;;  %v1219_v44 = vld [vmem:[#allocation7 + $0x4c0] sm:$0xff]  ;;  %v10336_v45 = vcombine.high %v1211_v36, %v1215_v37  ;;  %v10337_v51 = vcombine.low %v1212_v38, %v1216_v41  ;;  %v1260_v24 = vld [vmem:[#allocation7 + $0x608] sm:$0xff] }
 0x11b   :  { %v1264_v25 = vld [vmem:[#allocation7 + $0x628] sm:$0xff] }
 0x11c   :  { %v10386_v29 = vcombine.high %v1260_v24, %v1264_v25  ;;  %v1268_v36 = vld [vmem:[#allocation7 + $0x648] sm:$0xff] }
 0x11d   :  { %2668 = vmatpush1.bf16.msra.mxu0 %v10279_v46  ;;  %2754 = vmatpush1.bf16.msra.mxu1 %v10281_v47  ;;  %v10338_v46 = vcombine.high %v1212_v38, %v1216_v41  ;;  %v1223_v47 = vld [vmem:[#allocation7 + $0x4e0] sm:$0xff]  ;;  %v1272_v37 = vld [vmem:[#allocation7 + $0x668] sm:$0xff] }
 0x11e   :  { %2669 = vmatprep.subr.bf16.mxu0 %v10288_v52  ;;  %2755 = vmatprep.subr.bf16.mxu1 %v10290_v53  ;;  %v10344_v52 = vcombine.high %v1219_v44, %v1223_v47  ;;  %v10346_v53 = vcombine.high %v1220_v48, %v1224_v49  ;;  %v10343_v58 = vcombine.low %v1219_v44, %v1223_v47  ;;  %v1276_v44 = vld [vmem:[#allocation7 + $0x688] sm:$0xff] }
 0x11f   :  { %v10394_v41 = vcombine.high %v1268_v36, %v1272_v37  ;;  %v10393_v47 = vcombine.low %v1268_v36, %v1272_v37 }
 0x121   :  { %2670 = vmatpush1.bf16.msra.mxu0 %v10287_v54  ;;  %2756 = vmatpush1.bf16.msra.mxu1 %v10289_v55  ;;  %v1227_v54 = vld [vmem:[#allocation7 + $0x500] sm:$0xff] }
 0x122   :  { %2671 = vmatprep.subr.bf16.mxu0 %v10296_v60  ;;  %2757 = vmatprep.subr.bf16.mxu1 %v10298_v61  ;;  %v1231_v55 = vld [vmem:[#allocation7 + $0x520] sm:$0xff]  ;;  %v10354_v61 = vcombine.high %v1228_v56, %v1232_v57 }
 0x123   :  { %v10352_v60 = vcombine.high %v1227_v54, %v1231_v55 }
 0x125   :  { %2672 = vmatpush1.bf16.msra.mxu0 %v10295_v62  ;;  %2758 = vmatpush1.bf16.msra.mxu1 %v10297_v63  ;;  %v1235_v62 = vld [vmem:[#allocation7 + $0x540] sm:$0xff] }
 0x126   :  { %2673 = vmatprep.subr.bf16.mxu0 %v10304_v0  ;;  %2759 = vmatprep.subr.bf16.mxu1 %v10306_v1  ;;  %v1239_v63 = vld [vmem:[#allocation7 + $0x560] sm:$0xff]  ;;  %v1236_v0 = vld [vmem:[#allocation7 + $0x548] sm:$0xff] }
 0x127   :  { %v1240_v1 = vld [vmem:[#allocation7 + $0x568] sm:$0xff]  ;;  %v10360_v4 = vcombine.high %v1235_v62, %v1239_v63 }
 0x128   :  { %v10362_v5 = vcombine.high %v1236_v0, %v1240_v1 }
 0x129   :  { %2674 = vmatpush1.bf16.msra.mxu0 %v10303_v2  ;;  %2760 = vmatpush1.bf16.msra.mxu1 %v10305_v3  ;;  %v10351_v2 = vcombine.low %v1227_v54, %v1231_v55  ;;  %v10353_v3 = vcombine.low %v1228_v56, %v1232_v57 }
 0x12a   :  { %2675 = vmatprep.subr.bf16.mxu0 %v10312_v7  ;;  %2761 = vmatprep.subr.bf16.mxu1 %v10314_v11  ;;  %v1247_v7 = vld [vmem:[#allocation7 + $0x5a0] sm:$0xff]  ;;  %v10361_v11 = vcombine.low %v1236_v0, %v1240_v1 }
 0x12b   :  { %v10368_v12 = vcombine.high %v1243_v6, %v1247_v7 }
 0x12d   :  { %2676 = vmatpush1.bf16.msra.mxu0 %v10311_v9  ;;  %2762 = vmatpush1.bf16.msra.mxu1 %v10313_v10  ;;  %v1248_v9 = vld [vmem:[#allocation7 + $0x5a8] sm:$0xff]  ;;  %v10359_v10 = vcombine.low %v1235_v62, %v1239_v63 }
 0x12e   :  { %2688 = vmatprep.subr.bf16.mxu0 %v10320_v15  ;;  %2774 = vmatprep.subr.bf16.mxu1 %v10322_v19  ;;  %v10370_v13 = vcombine.high %v1244_v8, %v1248_v9  ;;  %v1255_v15 = vld [vmem:[#allocation7 + $0x5e0] sm:$0xff]  ;;  %v10369_v19 = vcombine.low %v1244_v8, %v1248_v9 }
 0x12f   :  { %v10375_v26 = vcombine.low %v1251_v14, %v1255_v15 }
 0x1c3   :  { %v968_v20 = vpop.f32.mrb[0].mxu0  ;;  %v1054_v21 = vpop.f32.mrb[0].mxu1 }
 0x1c4   :  { %v970_v22 = vpop.f32.mrb[1].mxu0  ;;  %v1056_v23 = vpop.f32.mrb[1].mxu1 }
 0x1c5   :  { %v972_v27 = vpop.f32.mrb[2].mxu0  ;;  %v1058_v28 = vpop.f32.mrb[2].mxu1 }
 0x1c6   :  { %v13620_v30 = vpack.c.bf16 %v972_v27, %v968_v20  ;;  %v13622_v31 = vpack.c.bf16 %v1058_v28, %v1054_v21  ;;  %v974_v32 = vpop.f32.mrb[3].mxu0  ;;  %v1060_v33 = vpop.f32.mrb[3].mxu1  ;;  %v10376_v20 = vcombine.high %v1251_v14, %v1255_v15 }
 0x1c7   :  { %v13624_v34 = vpack.c.bf16 %v974_v32, %v970_v22  ;;  %v13626_v35 = vpack.c.bf16 %v1060_v33, %v1056_v23  ;;  %v1259_v22 = vld [vmem:[#allocation7 + $0x600] sm:$0xff] }
 0x1c8   :  { %v1263_v23 = vld [vmem:[#allocation7 + $0x620] sm:$0xff] }
 0x1c9   :  { %2677 = vmatprep.mubr.bf16.mxu0 %v13624_v34  ;;  %2763 = vmatprep.mubr.bf16.mxu1 %v13624_v34  ;;  %v10384_v28 = vcombine.high %v1259_v22, %v1263_v23  ;;  %v1267_v32 = vld [vmem:[#allocation7 + $0x640] sm:$0xff]  ;;  %v10383_v38 = vcombine.low %v1259_v22, %v1263_v23 }
 0x1ca   :  { %2678 = vmatmul.mubr.bf16.vlgmr.msra.gmra.mrb[4].mxu0 %v13620_v30  ;;  %2764 = vmatmul.mubr.bf16.vlgmr.msra.gmra.mrb[4].mxu1 %v13620_v30  ;;  %v1271_v33 = vld [vmem:[#allocation7 + $0x660] sm:$0xff] }
 0x1cb   :  { %2689 = vmatpush1.bf16.msra.mxu0 %v10319_v17  ;;  %2775 = vmatpush1.bf16.msra.mxu1 %v10321_v18  ;;  %v1256_v17 = vld [vmem:[#allocation7 + $0x5e8] sm:$0xff]  ;;  %v10367_v18 = vcombine.low %v1243_v6, %v1247_v7 }
 0x1cc   :  { %2720 = vmatprep.mubr.bf16.mxu0 %v13626_v35  ;;  %2806 = vmatprep.mubr.bf16.mxu1 %v13626_v35  ;;  %v10378_v21 = vcombine.high %v1252_v16, %v1256_v17  ;;  %v10377_v27 = vcombine.low %v1252_v16, %v1256_v17 }
 0x1cd   :  { %2690 = vmatprep.subr.bf16.mxu0 %v10328_v39  ;;  %2776 = vmatprep.subr.bf16.mxu1 %v10330_v40  ;;  %v10385_v39 = vcombine.low %v1260_v24, %v1264_v25  ;;  %v10392_v40 = vcombine.high %v1267_v32, %v1271_v33 }
 0x1cf   :  { %2691 = vmatpush1.bf16.msra.mxu0 %v10327_v42  ;;  %2777 = vmatpush1.bf16.msra.mxu1 %v10329_v43  ;;  %v1275_v42 = vld [vmem:[#allocation7 + $0x680] sm:$0xff] }
 0x1d0   :  { %2692 = vmatprep.subr.bf16.mxu0 %v10336_v45  ;;  %2778 = vmatprep.subr.bf16.mxu1 %v10338_v46  ;;  %v1279_v43 = vld [vmem:[#allocation7 + $0x6a0] sm:$0xff]  ;;  %v1280_v45 = vld [vmem:[#allocation7 + $0x6a8] sm:$0xff]  ;;  %v10391_v46 = vcombine.low %v1267_v32, %v1271_v33 }
 0x1d1   :  { %v10400_v48 = vcombine.high %v1275_v42, %v1279_v43  ;;  %v10402_v49 = vcombine.high %v1276_v44, %v1280_v45  ;;  %v10399_v54 = vcombine.low %v1275_v42, %v1279_v43  ;;  %v10401_v55 = vcombine.low %v1276_v44, %v1280_v45  ;;  %v1085_v43 = vld [vmem:[#allocation7 + $0x90] sm:$0xff] }
 0x1d2   :  { %v1089_v44 = vld [vmem:[#allocation7 + $0xb0] sm:$0xff] }
 0x1d3   :  { %2693 = vmatpush1.bf16.msra.mxu0 %v10335_v50  ;;  %2779 = vmatpush1.bf16.msra.mxu1 %v10337_v51  ;;  %v1283_v50 = vld [vmem:[#allocation7 + $0x6c0] sm:$0xff] }
 0x1d4   :  { %2694 = vmatprep.subr.bf16.mxu0 %v10344_v52  ;;  %2780 = vmatprep.subr.bf16.mxu1 %v10346_v53  ;;  %v1287_v51 = vld [vmem:[#allocation7 + $0x6e0] sm:$0xff]  ;;  %v1284_v52 = vld [vmem:[#allocation7 + $0x6c8] sm:$0xff] }
 0x1d5   :  { %v1288_v53 = vld [vmem:[#allocation7 + $0x6e8] sm:$0xff]  ;;  %v10408_v56 = vcombine.high %v1283_v50, %v1287_v51  ;;  %v10407_v62 = vcombine.low %v1283_v50, %v1287_v51  ;;  %v1093_v51 = vld [vmem:[#allocation7 + $0xd0] sm:$0xff] }
 0x1d6   :  { %v10410_v57 = vcombine.high %v1284_v52, %v1288_v53  ;;  %v10409_v63 = vcombine.low %v1284_v52, %v1288_v53  ;;  %v1097_v52 = vld [vmem:[#allocation7 + $0xf0] sm:$0xff] }
 0x1d7   :  { %2695 = vmatpush1.bf16.msra.mxu0 %v10343_v58  ;;  %2781 = vmatpush1.bf16.msra.mxu1 %v10345_v59  ;;  %v1291_v58 = vld [vmem:[#allocation7 + $0x700] sm:$0xff] }
 0x1d8   :  { %2696 = vmatprep.subr.bf16.mxu0 %v10352_v60  ;;  %2782 = vmatprep.subr.bf16.mxu1 %v10354_v61  ;;  %v1295_v59 = vld [vmem:[#allocation7 + $0x720] sm:$0xff]  ;;  %v1292_v60 = vld [vmem:[#allocation7 + $0x708] sm:$0xff] }
 0x1d9   :  { %v1296_v61 = vld [vmem:[#allocation7 + $0x728] sm:$0xff]  ;;  %v10416_v0 = vcombine.high %v1291_v58, %v1295_v59  ;;  %v10415_v6 = vcombine.low %v1291_v58, %v1295_v59  ;;  %v10211_v58 = vcombine.low %v1085_v43, %v1089_v44  ;;  %v1101_v59 = vld [vmem:[#allocation7 + $0x110] sm:$0xff] }
 0x1da   :  { %v10418_v1 = vcombine.high %v1292_v60, %v1296_v61  ;;  %v10417_v7 = vcombine.low %v1292_v60, %v1296_v61  ;;  %v1105_v60 = vld [vmem:[#allocation7 + $0x130] sm:$0xff] }
 0x1db   :  { %2697 = vmatpush1.bf16.msra.mxu0 %v10351_v2  ;;  %2783 = vmatpush1.bf16.msra.mxu1 %v10353_v3  ;;  %v1299_v2 = vld [vmem:[#allocation7 + $0x740] sm:$0xff] }
 0x1dc   :  { %2698 = vmatprep.subr.bf16.mxu0 %v10360_v4  ;;  %2784 = vmatprep.subr.bf16.mxu1 %v10362_v5  ;;  %v1303_v3 = vld [vmem:[#allocation7 + $0x760] sm:$0xff]  ;;  %v1300_v4 = vld [vmem:[#allocation7 + $0x748] sm:$0xff] }
 0x1dd   :  { %v1304_v5 = vld [vmem:[#allocation7 + $0x768] sm:$0xff]  ;;  %v10424_v8 = vcombine.high %v1299_v2, %v1303_v3  ;;  %v10423_v14 = vcombine.low %v1299_v2, %v1303_v3  ;;  %v1109_v2 = vld [vmem:[#allocation7 + $0x150] sm:$0xff] }
 0x1de   :  { %v10426_v9 = vcombine.high %v1300_v4, %v1304_v5  ;;  %v10425_v15 = vcombine.low %v1300_v4, %v1304_v5  ;;  %v1113_v3 = vld [vmem:[#allocation7 + $0x170] sm:$0xff]  ;;  %v10228_v5 = vcombine.high %v1101_v59, %v1105_v60 }
 0x1df   :  { %2699 = vmatpush1.bf16.msra.mxu0 %v10359_v10  ;;  %2785 = vmatpush1.bf16.msra.mxu1 %v10361_v11  ;;  %v1307_v10 = vld [vmem:[#allocation7 + $0x780] sm:$0xff] }
 0x1e0   :  { %2700 = vmatprep.subr.bf16.mxu0 %v10368_v12  ;;  %2786 = vmatprep.subr.bf16.mxu1 %v10370_v13  ;;  %v1311_v11 = vld [vmem:[#allocation7 + $0x7a0] sm:$0xff]  ;;  %v1308_v12 = vld [vmem:[#allocation7 + $0x788] sm:$0xff] }
 0x1e1   :  { %v1312_v13 = vld [vmem:[#allocation7 + $0x7a8] sm:$0xff]  ;;  %v10432_v16 = vcombine.high %v1307_v10, %v1311_v11  ;;  %v10431_v22 = vcombine.low %v1307_v10, %v1311_v11  ;;  %v1117_v10 = vld [vmem:[#allocation7 + $0x190] sm:$0xff] }
 0x1e2   :  { %v10434_v17 = vcombine.high %v1308_v12, %v1312_v13  ;;  %v10433_v23 = vcombine.low %v1308_v12, %v1312_v13  ;;  %v1121_v11 = vld [vmem:[#allocation7 + $0x1b0] sm:$0xff]  ;;  %v10236_v13 = vcombine.high %v1109_v2, %v1113_v3 }
 0x1e3   :  { %2701 = vmatpush1.bf16.msra.mxu0 %v10367_v18  ;;  %2787 = vmatpush1.bf16.msra.mxu1 %v10369_v19  ;;  %v1315_v18 = vld [vmem:[#allocation7 + $0x7c0] sm:$0xff] }
 0x1e4   :  { %2702 = vmatprep.subr.bf16.mxu0 %v10376_v20  ;;  %2788 = vmatprep.subr.bf16.mxu1 %v10378_v21  ;;  %v1319_v19 = vld [vmem:[#allocation7 + $0x7e0] sm:$0xff]  ;;  %v1316_v20 = vld [vmem:[#allocation7 + $0x7c8] sm:$0xff] }
 0x1e5   :  { %v1320_v21 = vld [vmem:[#allocation7 + $0x7e8] sm:$0xff]  ;;  %v10440_v24 = vcombine.high %v1315_v18, %v1319_v19  ;;  %v10439_v32 = vcombine.low %v1315_v18, %v1319_v19  ;;  %v10244_v19 = vcombine.high %v1117_v10, %v1121_v11 }
 0x1e6   :  { %v10442_v25 = vcombine.high %v1316_v20, %v1320_v21  ;;  %v10441_v33 = vcombine.low %v1316_v20, %v1320_v21  ;;  %v1125_v21 = vld [vmem:[#allocation7 + $0x1d0] sm:$0xff] }
 0x1e7   :  { %2703 = vmatpush1.bf16.msra.mxu0 %v10375_v26  ;;  %2789 = vmatpush1.bf16.msra.mxu1 %v10377_v27  ;;  %v1069_v26 = vld [vmem:[#allocation7 + $0x10] sm:$0xff] }
 0x1e8   :  { %2704 = vmatprep.subr.bf16.mxu0 %v10384_v28  ;;  %2790 = vmatprep.subr.bf16.mxu1 %v10386_v29  ;;  %v1073_v27 = vld [vmem:[#allocation7 + $0x30] sm:$0xff]  ;;  %v1070_v28 = vld [vmem:[#allocation7 + $0x18] sm:$0xff] }
 0x1e9   :  { %v1074_v29 = vld [vmem:[#allocation7 + $0x38] sm:$0xff]  ;;  %v10196_v36 = vcombine.high %v1069_v26, %v1073_v27  ;;  %v10195_v42 = vcombine.low %v1069_v26, %v1073_v27 }
 0x1ea   :  { %v10198_v37 = vcombine.high %v1070_v28, %v1074_v29  ;;  %v10197_v45 = vcombine.low %v1070_v28, %v1074_v29  ;;  %v1133_v29 = vld [vmem:[#allocation7 + $0x210] sm:$0xff] }
 0x1eb   :  { %2705 = vmatpush1.bf16.msra.mxu0 %v10383_v38  ;;  %2791 = vmatpush1.bf16.msra.mxu1 %v10385_v39  ;;  %v1077_v38 = vld [vmem:[#allocation7 + $0x50] sm:$0xff] }
 0x1ec   :  { %2706 = vmatprep.subr.bf16.mxu0 %v10392_v40  ;;  %2792 = vmatprep.subr.bf16.mxu1 %v10394_v41  ;;  %v1081_v39 = vld [vmem:[#allocation7 + $0x70] sm:$0xff]  ;;  %v1078_v40 = vld [vmem:[#allocation7 + $0x58] sm:$0xff] }
 0x1ed   :  { %v1082_v41 = vld [vmem:[#allocation7 + $0x78] sm:$0xff]  ;;  %v10203_v50 = vcombine.low %v1077_v38, %v1081_v39 }
 0x1ee   :  { %v10205_v53 = vcombine.low %v1078_v40, %v1082_v41 }
 0x1ef   :  { %2707 = vmatpush1.bf16.msra.mxu0 %v10391_v46  ;;  %2793 = vmatpush1.bf16.msra.mxu1 %v10393_v47  ;;  %v1086_v46 = vld [vmem:[#allocation7 + $0x98] sm:$0xff] }
 0x1f0   :  { %2708 = vmatprep.subr.bf16.mxu0 %v10400_v48  ;;  %2794 = vmatprep.subr.bf16.mxu1 %v10402_v49  ;;  %v1090_v47 = vld [vmem:[#allocation7 + $0xb8] sm:$0xff]  ;;  %v10204_v48 = vcombine.high %v1077_v38, %v1081_v39  ;;  %v10206_v49 = vcombine.high %v1078_v40, %v1082_v41  ;;  %v1141_v41 = vld [vmem:[#allocation7 + $0x250] sm:$0xff] }
 0x1f1   :  { %v10213_v61 = vcombine.low %v1086_v46, %v1090_v47 }
 0x1f3   :  { %2709 = vmatpush1.bf16.msra.mxu0 %v10399_v54  ;;  %2795 = vmatpush1.bf16.msra.mxu1 %v10401_v55  ;;  %v10212_v54 = vcombine.high %v1085_v43, %v1089_v44  ;;  %v1094_v55 = vld [vmem:[#allocation7 + $0xd8] sm:$0xff] }
 0x1f4   :  { %2710 = vmatprep.subr.bf16.mxu0 %v10408_v56  ;;  %2796 = vmatprep.subr.bf16.mxu1 %v10410_v57  ;;  %v1098_v56 = vld [vmem:[#allocation7 + $0xf8] sm:$0xff]  ;;  %v10214_v57 = vcombine.high %v1086_v46, %v1090_v47 }
 0x1f5   :  { %v10221_v4 = vcombine.low %v1094_v55, %v1098_v56  ;;  %v1142_v43 = vld [vmem:[#allocation7 + $0x258] sm:$0xff] }
 0x1f6   :  { %v1146_v44 = vld [vmem:[#allocation7 + $0x278] sm:$0xff] }
 0x1f7   :  { %2711 = vmatpush1.bf16.msra.mxu0 %v10407_v62  ;;  %2797 = vmatpush1.bf16.msra.mxu1 %v10409_v63  ;;  %v10220_v62 = vcombine.high %v1093_v51, %v1097_v52  ;;  %v1102_v63 = vld [vmem:[#allocation7 + $0x118] sm:$0xff] }
 0x1f8   :  { %2712 = vmatprep.subr.bf16.mxu0 %v10416_v0  ;;  %2798 = vmatprep.subr.bf16.mxu1 %v10418_v1  ;;  %v1106_v0 = vld [vmem:[#allocation7 + $0x138] sm:$0xff]  ;;  %v10222_v1 = vcombine.high %v1094_v55, %v1098_v56 }
 0x1f9   :  { %v10229_v12 = vcombine.low %v1102_v63, %v1106_v0 }
 0x1fb   :  { %2713 = vmatpush1.bf16.msra.mxu0 %v10415_v6  ;;  %2799 = vmatpush1.bf16.msra.mxu1 %v10417_v7  ;;  %v1110_v6 = vld [vmem:[#allocation7 + $0x158] sm:$0xff] }
 0x1fc   :  { %2714 = vmatprep.subr.bf16.mxu0 %v10424_v8  ;;  %2800 = vmatprep.subr.bf16.mxu1 %v10426_v9  ;;  %v1114_v7 = vld [vmem:[#allocation7 + $0x178] sm:$0xff]  ;;  %v10230_v8 = vcombine.high %v1102_v63, %v1106_v0  ;;  %v10227_v9 = vcombine.low %v1101_v59, %v1105_v60 }
 0x1fd   :  { %v10237_v18 = vcombine.low %v1110_v6, %v1114_v7  ;;  %v1158_v59 = vld [vmem:[#allocation7 + $0x2d8] sm:$0xff] }
 0x1fe   :  { %v1162_v60 = vld [vmem:[#allocation7 + $0x2f8] sm:$0xff] }
 0x1ff   :  { %2715 = vmatpush1.bf16.msra.mxu0 %v10423_v14  ;;  %2801 = vmatpush1.bf16.msra.mxu1 %v10425_v15  ;;  %v1118_v14 = vld [vmem:[#allocation7 + $0x198] sm:$0xff]  ;;  %v10286_v0 = vcombine.high %v1158_v59, %v1162_v60 }
 0x200   :  { %2716 = vmatprep.subr.bf16.mxu0 %v10432_v16  ;;  %2802 = vmatprep.subr.bf16.mxu1 %v10434_v17  ;;  %v1122_v15 = vld [vmem:[#allocation7 + $0x1b8] sm:$0xff]  ;;  %v10238_v16 = vcombine.high %v1110_v6, %v1114_v7  ;;  %v10235_v17 = vcombine.low %v1109_v2, %v1113_v3 }
 0x201   :  { %v10246_v20 = vcombine.high %v1118_v14, %v1122_v15  ;;  %v10245_v26 = vcombine.low %v1118_v14, %v1122_v15  ;;  %v1166_v2 = vld [vmem:[#allocation7 + $0x318] sm:$0xff] }
 0x202   :  { %v1170_v3 = vld [vmem:[#allocation7 + $0x338] sm:$0xff] }
 0x203   :  { %2717 = vmatpush1.bf16.msra.mxu0 %v10431_v22  ;;  %2803 = vmatpush1.bf16.msra.mxu1 %v10433_v23  ;;  %v1129_v22 = vld [vmem:[#allocation7 + $0x1f0] sm:$0xff]  ;;  %v1126_v23 = vld [vmem:[#allocation7 + $0x1d8] sm:$0xff]  ;;  %v10294_v7 = vcombine.high %v1166_v2, %v1170_v3 }
 0x204   :  { %2718 = vmatprep.subr.bf16.mxu0 %v10440_v24  ;;  %2804 = vmatprep.subr.bf16.mxu1 %v10442_v25  ;;  %v1130_v24 = vld [vmem:[#allocation7 + $0x1f8] sm:$0xff]  ;;  %v10243_v25 = vcombine.low %v1117_v10, %v1121_v11  ;;  %v10252_v27 = vcombine.high %v1125_v21, %v1129_v22 }
 0x205   :  { %v10254_v28 = vcombine.high %v1126_v23, %v1130_v24  ;;  %v10253_v38 = vcombine.low %v1126_v23, %v1130_v24  ;;  %v1174_v10 = vld [vmem:[#allocation7 + $0x358] sm:$0xff]  ;;  %v1189_v24 = vld [vmem:[#allocation7 + $0x3d0] sm:$0xff] }
 0x206   :  { %v1178_v11 = vld [vmem:[#allocation7 + $0x378] sm:$0xff] }
 0x207   :  { %2719 = vmatpush1.bf16.msra.mxu0 %v10439_v32  ;;  %2805 = vmatpush1.bf16.msra.mxu1 %v10441_v33  ;;  %v1137_v32 = vld [vmem:[#allocation7 + $0x230] sm:$0xff]  ;;  %v1134_v33 = vld [vmem:[#allocation7 + $0x218] sm:$0xff]  ;;  %v10302_v15 = vcombine.high %v1174_v10, %v1178_v11 }
 0x208   :  { %2817 = vmatprep.subr.bf16.mxu0 %v10196_v36  ;;  %2903 = vmatprep.subr.bf16.mxu1 %v10198_v37  ;;  %v1138_v36 = vld [vmem:[#allocation7 + $0x238] sm:$0xff]  ;;  %v10251_v37 = vcombine.low %v1125_v21, %v1129_v22  ;;  %v10260_v39 = vcombine.high %v1133_v29, %v1137_v32  ;;  %v10301_v21 = vcombine.low %v1174_v10, %v1178_v11  ;;  %v1241_v10 = vld [vmem:[#allocation7 + $0x570] sm:$0xff] }
 0x209   :  { %v10262_v40 = vcombine.high %v1134_v33, %v1138_v36  ;;  %v10261_v46 = vcombine.low %v1134_v33, %v1138_v36  ;;  %v1197_v36 = vld [vmem:[#allocation7 + $0x410] sm:$0xff]  ;;  %v1238_v11 = vld [vmem:[#allocation7 + $0x558] sm:$0xff] }
 0x20a   :  { %2721 = vmatmul.mubr.bf16.vlgmr.msra.gmra.mrb[4].mxu0 %v13622_v31  ;;  %2807 = vmatmul.mubr.bf16.vlgmr.msra.gmra.mrb[4].mxu1 %v13622_v31 }
 0x20b   :  { %2818 = vmatpush1.bf16.msra.mxu0 %v10195_v42  ;;  %2849 = vmatprep.mubr.bf16.mxu0 %v13624_v34  ;;  %v1145_v42 = vld [vmem:[#allocation7 + $0x270] sm:$0xff] }
 0x20c   :  { %2904 = vmatpush1.bf16.msra.mxu1 %v10197_v45  ;;  %2935 = vmatprep.mubr.bf16.mxu1 %v13624_v34  ;;  %v10219_v34 = vcombine.low %v1093_v51, %v1097_v52  ;;  %v10259_v45 = vcombine.low %v1133_v29, %v1137_v32  ;;  %v10268_v47 = vcombine.high %v1141_v41, %v1145_v42  ;;  %v1150_v51 = vld [vmem:[#allocation7 + $0x298] sm:$0xff] }
 0x20d   :  { %2819 = vmatprep.subr.bf16.mxu0 %v10204_v48  ;;  %2905 = vmatprep.subr.bf16.mxu1 %v10206_v49  ;;  %v10270_v48 = vcombine.high %v1142_v43, %v1146_v44  ;;  %v1149_v49 = vld [vmem:[#allocation7 + $0x290] sm:$0xff]  ;;  %v1154_v52 = vld [vmem:[#allocation7 + $0x2b8] sm:$0xff] }
 0x20e   :  { %v10278_v56 = vcombine.high %v1150_v51, %v1154_v52 }
 0x20f   :  { %2820 = vmatpush1.bf16.msra.mxu0 %v10203_v50  ;;  %v1153_v50 = vld [vmem:[#allocation7 + $0x2b0] sm:$0xff] }
 0x210   :  { %2906 = vmatpush1.bf16.msra.mxu1 %v10205_v53  ;;  %2821 = vmatprep.subr.bf16.mxu0 %v10212_v54  ;;  %v10267_v53 = vcombine.low %v1141_v41, %v1145_v42  ;;  %v10269_v54 = vcombine.low %v1142_v43, %v1146_v44  ;;  %v10276_v55 = vcombine.high %v1149_v49, %v1153_v50  ;;  %v1205_v44 = vld [vmem:[#allocation7 + $0x450] sm:$0xff] }
 0x211   :  { %2907 = vmatprep.subr.bf16.mxu1 %v10214_v57  ;;  %v1157_v57 = vld [vmem:[#allocation7 + $0x2d0] sm:$0xff] }
 0x213   :  { %2822 = vmatpush1.bf16.msra.mxu0 %v10211_v58  ;;  %v1161_v58 = vld [vmem:[#allocation7 + $0x2f0] sm:$0xff] }
 0x214   :  { %2908 = vmatpush1.bf16.msra.mxu1 %v10213_v61  ;;  %2823 = vmatprep.subr.bf16.mxu0 %v10220_v62  ;;  %v10275_v61 = vcombine.low %v1149_v49, %v1153_v50  ;;  %v10277_v62 = vcombine.low %v1150_v51, %v1154_v52  ;;  %v10284_v63 = vcombine.high %v1157_v57, %v1161_v58  ;;  %v1213_v51 = vld [vmem:[#allocation7 + $0x490] sm:$0xff] }
 0x215   :  { %2909 = vmatprep.subr.bf16.mxu1 %v10222_v1  ;;  %v1165_v1 = vld [vmem:[#allocation7 + $0x310] sm:$0xff] }
 0x216   :  { %v1217_v52 = vld [vmem:[#allocation7 + $0x4b0] sm:$0xff] }
 0x217   :  { %2824 = vmatpush1.bf16.msra.mxu0 %v10219_v34  ;;  %v1169_v34 = vld [vmem:[#allocation7 + $0x330] sm:$0xff] }
 0x218   :  { %2910 = vmatpush1.bf16.msra.mxu1 %v10221_v4  ;;  %2825 = vmatprep.subr.bf16.mxu0 %v10228_v5  ;;  %v10283_v4 = vcombine.low %v1157_v57, %v1161_v58  ;;  %v10285_v5 = vcombine.low %v1158_v59, %v1162_v60  ;;  %v10292_v6 = vcombine.high %v1165_v1, %v1169_v34  ;;  %v1221_v60 = vld [vmem:[#allocation7 + $0x4d0] sm:$0xff] }
 0x219   :  { %2911 = vmatprep.subr.bf16.mxu1 %v10230_v8  ;;  %v1173_v8 = vld [vmem:[#allocation7 + $0x350] sm:$0xff]  ;;  %v10340_v58 = vcombine.high %v1213_v51, %v1217_v52 }
 0x21b   :  { %2826 = vmatpush1.bf16.msra.mxu0 %v10227_v9  ;;  %v1177_v9 = vld [vmem:[#allocation7 + $0x370] sm:$0xff] }
 0x21c   :  { %2912 = vmatpush1.bf16.msra.mxu1 %v10229_v12  ;;  %2827 = vmatprep.subr.bf16.mxu0 %v10236_v13  ;;  %v10291_v12 = vcombine.low %v1165_v1, %v1169_v34  ;;  %v10293_v13 = vcombine.low %v1166_v2, %v1170_v3  ;;  %v10300_v14 = vcombine.high %v1173_v8, %v1177_v9  ;;  %v1229_v2 = vld [vmem:[#allocation7 + $0x510] sm:$0xff] }
 0x21d   :  { %2913 = vmatprep.subr.bf16.mxu1 %v10238_v16  ;;  %v1181_v16 = vld [vmem:[#allocation7 + $0x390] sm:$0xff] }
 0x21e   :  { %v1233_v3 = vld [vmem:[#allocation7 + $0x530] sm:$0xff] }
 0x21f   :  { %2828 = vmatpush1.bf16.msra.mxu0 %v10235_v17  ;;  %v1185_v17 = vld [vmem:[#allocation7 + $0x3b0] sm:$0xff] }
 0x220   :  { %2914 = vmatpush1.bf16.msra.mxu1 %v10237_v18  ;;  %2829 = vmatprep.subr.bf16.mxu0 %v10244_v19  ;;  %v1182_v18 = vld [vmem:[#allocation7 + $0x398] sm:$0xff]  ;;  %v10308_v22 = vcombine.high %v1181_v16, %v1185_v17 }
 0x221   :  { %2915 = vmatprep.subr.bf16.mxu1 %v10246_v20  ;;  %v1186_v19 = vld [vmem:[#allocation7 + $0x3b8] sm:$0xff]  ;;  %v10299_v20 = vcombine.low %v1173_v8, %v1177_v9  ;;  %v1237_v9 = vld [vmem:[#allocation7 + $0x550] sm:$0xff] }
 0x222   :  { %v10310_v23 = vcombine.high %v1182_v18, %v1186_v19  ;;  %v10309_v29 = vcombine.low %v1182_v18, %v1186_v19  ;;  %v1249_v18 = vld [vmem:[#allocation7 + $0x5b0] sm:$0xff]  ;;  %v1246_v19 = vld [vmem:[#allocation7 + $0x598] sm:$0xff] }
 0x223   :  { %2830 = vmatpush1.bf16.msra.mxu0 %v10243_v25  ;;  %v1193_v25 = vld [vmem:[#allocation7 + $0x3f0] sm:$0xff] }
 0x224   :  { %2916 = vmatpush1.bf16.msra.mxu1 %v10245_v26  ;;  %2831 = vmatprep.subr.bf16.mxu0 %v10252_v27  ;;  %v1190_v26 = vld [vmem:[#allocation7 + $0x3d8] sm:$0xff]  ;;  %v10316_v32 = vcombine.high %v1189_v24, %v1193_v25 }
 0x225   :  { %2917 = vmatprep.subr.bf16.mxu1 %v10254_v28  ;;  %v1194_v27 = vld [vmem:[#allocation7 + $0x3f8] sm:$0xff]  ;;  %v10307_v28 = vcombine.low %v1181_v16, %v1185_v17  ;;  %v1245_v17 = vld [vmem:[#allocation7 + $0x590] sm:$0xff] }
 0x226   :  { %v10318_v33 = vcombine.high %v1190_v26, %v1194_v27  ;;  %v10317_v41 = vcombine.low %v1190_v26, %v1194_v27  ;;  %v1257_v26 = vld [vmem:[#allocation7 + $0x5f0] sm:$0xff]  ;;  %v1254_v27 = vld [vmem:[#allocation7 + $0x5d8] sm:$0xff] }
 0x227   :  { %2832 = vmatpush1.bf16.msra.mxu0 %v10251_v37  ;;  %v1201_v37 = vld [vmem:[#allocation7 + $0x430] sm:$0xff] }
 0x228   :  { %2918 = vmatpush1.bf16.msra.mxu1 %v10253_v38  ;;  %2833 = vmatprep.subr.bf16.mxu0 %v10260_v39  ;;  %v1198_v38 = vld [vmem:[#allocation7 + $0x418] sm:$0xff]  ;;  %v10324_v42 = vcombine.high %v1197_v36, %v1201_v37 }
 0x229   :  { %2919 = vmatprep.subr.bf16.mxu1 %v10262_v40  ;;  %v1202_v39 = vld [vmem:[#allocation7 + $0x438] sm:$0xff]  ;;  %v10315_v40 = vcombine.low %v1189_v24, %v1193_v25  ;;  %v1253_v25 = vld [vmem:[#allocation7 + $0x5d0] sm:$0xff] }
 0x22a   :  { %v10326_v43 = vcombine.high %v1198_v38, %v1202_v39  ;;  %v10325_v49 = vcombine.low %v1198_v38, %v1202_v39  ;;  %v1265_v38 = vld [vmem:[#allocation7 + $0x630] sm:$0xff]  ;;  %v1262_v39 = vld [vmem:[#allocation7 + $0x618] sm:$0xff] }
 0x22b   :  { %2834 = vmatpush1.bf16.msra.mxu0 %v10259_v45  ;;  %v1209_v45 = vld [vmem:[#allocation7 + $0x470] sm:$0xff] }
 0x22c   :  { %2920 = vmatpush1.bf16.msra.mxu1 %v10261_v46  ;;  %2835 = vmatprep.subr.bf16.mxu0 %v10268_v47  ;;  %v10323_v46 = vcombine.low %v1197_v36, %v1201_v37  ;;  %v1206_v47 = vld [vmem:[#allocation7 + $0x458] sm:$0xff]  ;;  %v10332_v50 = vcombine.high %v1205_v44, %v1209_v45  ;;  %v1261_v37 = vld [vmem:[#allocation7 + $0x610] sm:$0xff] }
 0x22d   :  { %2921 = vmatprep.subr.bf16.mxu1 %v10270_v48  ;;  %v1210_v48 = vld [vmem:[#allocation7 + $0x478] sm:$0xff] }
 0x22e   :  { %v10333_v57 = vcombine.low %v1206_v47, %v1210_v48 }
 0x22f   :  { %2836 = vmatpush1.bf16.msra.mxu0 %v10267_v53  ;;  %v10334_v53 = vcombine.high %v1206_v47, %v1210_v48  ;;  %v1270_v47 = vld [vmem:[#allocation7 + $0x658] sm:$0xff] }
 0x230   :  { %2922 = vmatpush1.bf16.msra.mxu1 %v10269_v54  ;;  %2837 = vmatprep.subr.bf16.mxu0 %v10276_v55  ;;  %v1214_v54 = vld [vmem:[#allocation7 + $0x498] sm:$0xff] }
 0x231   :  { %2923 = vmatprep.subr.bf16.mxu1 %v10278_v56  ;;  %v1218_v55 = vld [vmem:[#allocation7 + $0x4b8] sm:$0xff]  ;;  %v10331_v56 = vcombine.low %v1205_v44, %v1209_v45  ;;  %v1269_v45 = vld [vmem:[#allocation7 + $0x650] sm:$0xff] }
 0x232   :  { %v10342_v59 = vcombine.high %v1214_v54, %v1218_v55  ;;  %v1274_v48 = vld [vmem:[#allocation7 + $0x678] sm:$0xff] }
 0x233   :  { %2838 = vmatpush1.bf16.msra.mxu0 %v10275_v61  ;;  %v1225_v61 = vld [vmem:[#allocation7 + $0x4f0] sm:$0xff] }
 0x234   :  { %2924 = vmatpush1.bf16.msra.mxu1 %v10277_v62  ;;  %2839 = vmatprep.subr.bf16.mxu0 %v10284_v63  ;;  %v1222_v62 = vld [vmem:[#allocation7 + $0x4d8] sm:$0xff]  ;;  %v10348_v1 = vcombine.high %v1221_v60, %v1225_v61 }
 0x235   :  { %2925 = vmatprep.subr.bf16.mxu1 %v10286_v0  ;;  %v1226_v63 = vld [vmem:[#allocation7 + $0x4f8] sm:$0xff]  ;;  %v10339_v0 = vcombine.low %v1213_v51, %v1217_v52  ;;  %v10398_v52 = vcombine.high %v1270_v47, %v1274_v48 }
 0x236   :  { %v10350_v34 = vcombine.high %v1222_v62, %v1226_v63 }
 0x237   :  { %2840 = vmatpush1.bf16.msra.mxu0 %v10283_v4  ;;  %v1230_v4 = vld [vmem:[#allocation7 + $0x518] sm:$0xff] }
 0x238   :  { %2926 = vmatpush1.bf16.msra.mxu1 %v10285_v5  ;;  %2841 = vmatprep.subr.bf16.mxu0 %v10292_v6  ;;  %v1234_v5 = vld [vmem:[#allocation7 + $0x538] sm:$0xff]  ;;  %v10349_v6 = vcombine.low %v1222_v62, %v1226_v63  ;;  %v1289_v62 = vld [vmem:[#allocation7 + $0x6f0] sm:$0xff] }
 0x239   :  { %2927 = vmatprep.subr.bf16.mxu1 %v10294_v7  ;;  %v10356_v7 = vcombine.high %v1229_v2, %v1233_v3  ;;  %v10358_v8 = vcombine.high %v1230_v4, %v1234_v5  ;;  %v1286_v63 = vld [vmem:[#allocation7 + $0x6d8] sm:$0xff] }
 0x23b   :  { %2842 = vmatpush1.bf16.msra.mxu0 %v10291_v12  ;;  %v1242_v12 = vld [vmem:[#allocation7 + $0x578] sm:$0xff] }
 0x23c   :  { %2928 = vmatpush1.bf16.msra.mxu1 %v10293_v13  ;;  %2843 = vmatprep.subr.bf16.mxu0 %v10300_v14  ;;  %v10355_v13 = vcombine.low %v1229_v2, %v1233_v3  ;;  %v10357_v14 = vcombine.low %v1230_v4, %v1234_v5  ;;  %v10366_v16 = vcombine.high %v1238_v11, %v1242_v12  ;;  %v1293_v3 = vld [vmem:[#allocation7 + $0x710] sm:$0xff]  ;;  %v1294_v5 = vld [vmem:[#allocation7 + $0x718] sm:$0xff] }
 0x23d   :  { %2929 = vmatprep.subr.bf16.mxu1 %v10302_v15  ;;  %v10364_v15 = vcombine.high %v1237_v9, %v1241_v10  ;;  %v1297_v4 = vld [vmem:[#allocation7 + $0x730] sm:$0xff] }
 0x23f   :  { %2844 = vmatpush1.bf16.msra.mxu0 %v10299_v20  ;;  %v1250_v20 = vld [vmem:[#allocation7 + $0x5b8] sm:$0xff] }
 0x240   :  { %2930 = vmatpush1.bf16.msra.mxu1 %v10301_v21  ;;  %2845 = vmatprep.subr.bf16.mxu0 %v10308_v22  ;;  %v10363_v21 = vcombine.low %v1237_v9, %v1241_v10  ;;  %v10365_v22 = vcombine.low %v1238_v11, %v1242_v12  ;;  %v10374_v24 = vcombine.high %v1246_v19, %v1250_v20  ;;  %v1301_v10 = vld [vmem:[#allocation7 + $0x750] sm:$0xff]  ;;  %v1302_v12 = vld [vmem:[#allocation7 + $0x758] sm:$0xff] }
 0x241   :  { %2931 = vmatprep.subr.bf16.mxu1 %v10310_v23  ;;  %v10372_v23 = vcombine.high %v1245_v17, %v1249_v18  ;;  %v1305_v11 = vld [vmem:[#allocation7 + $0x770] sm:$0xff] }
 0x243   :  { %2846 = vmatpush1.bf16.msra.mxu0 %v10307_v28  ;;  %v1258_v28 = vld [vmem:[#allocation7 + $0x5f8] sm:$0xff] }
 0x244   :  { %2932 = vmatpush1.bf16.msra.mxu1 %v10309_v29  ;;  %2847 = vmatprep.subr.bf16.mxu0 %v10316_v32  ;;  %v10371_v29 = vcombine.low %v1245_v17, %v1249_v18  ;;  %v10373_v32 = vcombine.low %v1246_v19, %v1250_v20  ;;  %v10382_v36 = vcombine.high %v1254_v27, %v1258_v28  ;;  %v1309_v18 = vld [vmem:[#allocation7 + $0x790] sm:$0xff]  ;;  %v1310_v20 = vld [vmem:[#allocation7 + $0x798] sm:$0xff] }
 0x245   :  { %2933 = vmatprep.subr.bf16.mxu1 %v10318_v33  ;;  %v10380_v33 = vcombine.high %v1253_v25, %v1257_v26  ;;  %v1313_v19 = vld [vmem:[#allocation7 + $0x7b0] sm:$0xff] }
 0x247   :  { %2848 = vmatpush1.bf16.msra.mxu0 %v10315_v40  ;;  %v1266_v40 = vld [vmem:[#allocation7 + $0x638] sm:$0xff] }
 0x248   :  { %2934 = vmatpush1.bf16.msra.mxu1 %v10317_v41  ;;  %2860 = vmatprep.subr.bf16.mxu0 %v10324_v42  ;;  %v10379_v41 = vcombine.low %v1253_v25, %v1257_v26  ;;  %v10381_v42 = vcombine.low %v1254_v27, %v1258_v28  ;;  %v10390_v44 = vcombine.high %v1262_v39, %v1266_v40  ;;  %v1317_v26 = vld [vmem:[#allocation7 + $0x7d0] sm:$0xff]  ;;  %v1318_v28 = vld [vmem:[#allocation7 + $0x7d8] sm:$0xff] }
 0x249   :  { %2946 = vmatprep.subr.bf16.mxu1 %v10326_v43  ;;  %v10388_v43 = vcombine.high %v1261_v37, %v1265_v38  ;;  %v1321_v27 = vld [vmem:[#allocation7 + $0x7f0] sm:$0xff] }
 0x24a   :  { %2850 = vmatmul.mubr.bf16.vlgmr.msra.gmra.mrb[8].mxu0 %v13620_v30 }
 0x24b   :  { %2936 = vmatmul.mubr.bf16.vlgmr.msra.gmra.mrb[8].mxu1 %v13620_v30  ;;  %2861 = vmatpush1.bf16.msra.mxu0 %v10323_v46  ;;  %v10341_v30 = vcombine.low %v1214_v54, %v1218_v55  ;;  %v1273_v46 = vld [vmem:[#allocation7 + $0x670] sm:$0xff]  ;;  %v1278_v55 = vld [vmem:[#allocation7 + $0x698] sm:$0xff] }
 0x24c   :  { %2892 = vmatprep.mubr.bf16.mxu0 %v13626_v35  ;;  %2947 = vmatpush1.bf16.msra.mxu1 %v10325_v49  ;;  %v10387_v49 = vcombine.low %v1261_v37, %v1265_v38  ;;  %v10396_v51 = vcombine.high %v1269_v45, %v1273_v46  ;;  %v1281_v54 = vld [vmem:[#allocation7 + $0x6b0] sm:$0xff]  ;;  %v10443_v38 = vcombine.low %v1317_v26, %v1321_v27 }
 0x24d   :  { %2978 = vmatprep.mubr.bf16.mxu1 %v13626_v35  ;;  %2862 = vmatprep.subr.bf16.mxu0 %v10332_v50  ;;  %v10347_v35 = vcombine.low %v1221_v60, %v1225_v61  ;;  %v10389_v50 = vcombine.low %v1262_v39, %v1266_v40  ;;  %v1285_v61 = vld [vmem:[#allocation7 + $0x6d0] sm:$0xff] }
 0x24e   :  { %2948 = vmatprep.subr.bf16.mxu1 %v10334_v53  ;;  %v1277_v53 = vld [vmem:[#allocation7 + $0x690] sm:$0xff] }
 0x24f   :  { %2863 = vmatpush1.bf16.msra.mxu0 %v10331_v56  ;;  %v1282_v56 = vld [vmem:[#allocation7 + $0x6b8] sm:$0xff] }
 0x250   :  { %2949 = vmatpush1.bf16.msra.mxu1 %v10333_v57  ;;  %2864 = vmatprep.subr.bf16.mxu0 %v10340_v58  ;;  %v10395_v57 = vcombine.low %v1269_v45, %v1273_v46  ;;  %v10397_v58 = vcombine.low %v1270_v47, %v1274_v48  ;;  %v10406_v60 = vcombine.high %v1278_v55, %v1282_v56 }
 0x251   :  { %2950 = vmatprep.subr.bf16.mxu1 %v10342_v59  ;;  %v10404_v59 = vcombine.high %v1277_v53, %v1281_v54 }
 0x253   :  { %2865 = vmatpush1.bf16.msra.mxu0 %v10339_v0  ;;  %v1290_v0 = vld [vmem:[#allocation7 + $0x6f8] sm:$0xff] }
 0x254   :  { %2951 = vmatpush1.bf16.msra.mxu1 %v10341_v30  ;;  %2866 = vmatprep.subr.bf16.mxu0 %v10348_v1  ;;  %v10403_v30 = vcombine.low %v1277_v53, %v1281_v54  ;;  %v10405_v1 = vcombine.low %v1278_v55, %v1282_v56  ;;  %v10414_v2 = vcombine.high %v1286_v63, %v1290_v0  ;;  %v13672_v55 = vld [vmem:[#allocation8] sm:$0xff]  ;;  %v12095_v56 = vld [vmem:[%s14272_s4 + $0x8] sm:$0xff]  }
 0x255   :  { %2952 = vmatprep.subr.bf16.mxu1 %v10350_v34  ;;  %v10412_v34 = vcombine.high %v1285_v61, %v1289_v62 }
 0x257   :  { %2867 = vmatpush1.bf16.msra.mxu0 %v10347_v35  ;;  %v1298_v35 = vld [vmem:[#allocation7 + $0x738] sm:$0xff] }
 0x258   :  { %2953 = vmatpush1.bf16.msra.mxu1 %v10349_v6  ;;  %2868 = vmatprep.subr.bf16.mxu0 %v10356_v7  ;;  %v10411_v6 = vcombine.low %v1285_v61, %v1289_v62  ;;  %v10413_v7 = vcombine.low %v1286_v63, %v1290_v0  ;;  %v10422_v9 = vcombine.high %v1294_v5, %v1298_v35  ;;  %v3407_v61 = vsel %vm3210_vm0, %v12095_v56, 0 }
 0x259   :  { %2954 = vmatprep.subr.bf16.mxu1 %v10358_v8  ;;  %v10420_v8 = vcombine.high %v1293_v3, %v1297_v4 }
 0x25b   :  { %2869 = vmatpush1.bf16.msra.mxu0 %v10355_v13  ;;  %v1306_v13 = vld [vmem:[#allocation7 + $0x778] sm:$0xff] }
 0x25c   :  { %2955 = vmatpush1.bf16.msra.mxu1 %v10357_v14  ;;  %2870 = vmatprep.subr.bf16.mxu0 %v10364_v15  ;;  %v10419_v14 = vcombine.low %v1293_v3, %v1297_v4  ;;  %v10421_v15 = vcombine.low %v1294_v5, %v1298_v35  ;;  %v10430_v17 = vcombine.high %v1302_v12, %v1306_v13 }
 0x25d   :  { %2956 = vmatprep.subr.bf16.mxu1 %v10366_v16  ;;  %v10428_v16 = vcombine.high %v1301_v10, %v1305_v11 }
 0x25f   :  { %2871 = vmatpush1.bf16.msra.mxu0 %v10363_v21  ;;  %v1314_v21 = vld [vmem:[#allocation7 + $0x7b8] sm:$0xff] }
 0x260   :  { %2957 = vmatpush1.bf16.msra.mxu1 %v10365_v22  ;;  %2872 = vmatprep.subr.bf16.mxu0 %v10372_v23  ;;  %v10427_v22 = vcombine.low %v1301_v10, %v1305_v11  ;;  %v10429_v23 = vcombine.low %v1302_v12, %v1306_v13  ;;  %v10438_v25 = vcombine.high %v1310_v20, %v1314_v21 }
 0x261   :  { %2958 = vmatprep.subr.bf16.mxu1 %v10374_v24  ;;  %v10436_v24 = vcombine.high %v1309_v18, %v1313_v19 }
 0x263   :  { %2873 = vmatpush1.bf16.msra.mxu0 %v10371_v29  ;;  %v1322_v29 = vld [vmem:[#allocation7 + $0x7f8] sm:$0xff] }
 0x264   :  { %2959 = vmatpush1.bf16.msra.mxu1 %v10373_v32  ;;  %2874 = vmatprep.subr.bf16.mxu0 %v10380_v33  ;;  %v10435_v32 = vcombine.low %v1309_v18, %v1313_v19  ;;  %v10437_v33 = vcombine.low %v1310_v20, %v1314_v21  ;;  %v10446_v37 = vcombine.high %v1318_v28, %v1322_v29 }
 0x265   :  { %2960 = vmatprep.subr.bf16.mxu1 %v10382_v36  ;;  %v10444_v36 = vcombine.high %v1317_v26, %v1321_v27  ;;  %v10445_v39 = vcombine.low %v1318_v28, %v1322_v29 }
 0x267   :  { %2875 = vmatpush1.bf16.msra.mxu0 %v10379_v41 }
 0x268   :  { %2961 = vmatpush1.bf16.msra.mxu1 %v10381_v42  ;;  %2876 = vmatprep.subr.bf16.mxu0 %v10388_v43 }
 0x269   :  { %2962 = vmatprep.subr.bf16.mxu1 %v10390_v44 }
 0x26b   :  { %2877 = vmatpush1.bf16.msra.mxu0 %v10387_v49  ;;  %v1325_v49 = vlaneseq }
 0x26c   :  { %2963 = vmatpush1.bf16.msra.mxu1 %v10389_v50  ;;  %2878 = vmatprep.subr.bf16.mxu0 %v10396_v51 }
 0x26d   :  { %2964 = vmatprep.subr.bf16.mxu1 %v10398_v52  ;;  %v13666_v50 = vshrl.u32 %v1325_v49, 7 }
 0x26f   :  { %2879 = vmatpush1.bf16.msra.mxu0 %v10395_v57  ;;  %v1343_v51 = vsub.s32 4, %v13666_v50  ;;  %v1351_v52 = vsub.s32 6, %v13666_v50  ;;  %v1347_v53 = vsub.s32 5, %v13666_v50  ;;  %v1355_v54 = vsub.s32 7, %v13666_v50  ;;  %v12096_v57 = vld [vmem:[%s14272_s4 + $0x10] sm:$0xff]  }
 0x270   :  { %2965 = vmatpush1.bf16.msra.mxu1 %v10397_v58  ;;  %2880 = vmatprep.subr.bf16.mxu0 %v10404_v59  ;;  %v13691_v29 = vsub.s32 0, %v13666_v50  ;;  %v13700_v49 = vsub.s32 3, %v13666_v50 }
 0x271   :  { %2966 = vmatprep.subr.bf16.mxu1 %v10406_v60  ;;  %v1344_v58 = vrot.slane %v13672_v55, %v1343_v51  ;;  %v1352_v59 = vrot.slane %v13672_v55, %v1351_v52  ;;  %v1348_v60 = vrot.slane %v13672_v55, %v1347_v53  ;;  %v1356_v62 = vrot.slane %v13672_v55, %v1355_v54 }
 0x272   :  { %v1328_v52 = vrot.slane %v13672_v55, %v13691_v29 }
 0x273   :  { %2881 = vmatpush1.bf16.msra.mxu0 %v10403_v30 }
 0x274   :  { %2967 = vmatpush1.bf16.msra.mxu1 %v10405_v1  ;;  %2882 = vmatprep.subr.bf16.mxu0 %v10412_v34 }
 0x275   :  { %2968 = vmatprep.subr.bf16.mxu1 %v10414_v2 }
 0x277   :  { %2883 = vmatpush1.bf16.msra.mxu0 %v10411_v6 }
 0x278   :  { %2969 = vmatpush1.bf16.msra.mxu1 %v10413_v7  ;;  %2884 = vmatprep.subr.bf16.mxu0 %v10420_v8 }
 0x279   :  { %2970 = vmatprep.subr.bf16.mxu1 %v10422_v9  ;;  %v3410_v9 = vsel %vm3210_vm0, %v12096_v57, 0 }
 0x27b   :  { %2885 = vmatpush1.bf16.msra.mxu0 %v10419_v14 }
 0x27c   :  { %2971 = vmatpush1.bf16.msra.mxu1 %v10421_v15  ;;  %2886 = vmatprep.subr.bf16.mxu0 %v10428_v16 }
 0x27d   :  { %2972 = vmatprep.subr.bf16.mxu1 %v10430_v17 }
 0x27f   :  { %2887 = vmatpush1.bf16.msra.mxu0 %v10427_v22 }
 0x280   :  { %2973 = vmatpush1.bf16.msra.mxu1 %v10429_v23  ;;  %2888 = vmatprep.subr.bf16.mxu0 %v10436_v24 }
 0x281   :  { %2974 = vmatprep.subr.bf16.mxu1 %v10438_v25 }
 0x283   :  { %2889 = vmatpush1.bf16.msra.mxu0 %v10435_v32 }
 0x284   :  { %2975 = vmatpush1.bf16.msra.mxu1 %v10437_v33  ;;  %2890 = vmatprep.subr.bf16.mxu0 %v10444_v36  ;;  %v13694_v36 = vsub.s32 2, %v13666_v50 }
 0x285   :  { %2976 = vmatprep.subr.bf16.mxu1 %v10446_v37 }
 0x286   :  { %v1336_v54 = vrot.slane %v13672_v55, %v13694_v36 }
 0x287   :  { %2891 = vmatpush1.bf16.msra.mxu0 %v10443_v38 }
 0x288   :  { %2977 = vmatpush1.bf16.msra.mxu1 %v10445_v39  ;;  %v13697_v39 = vsub.s32 1, %v13666_v50 }
 0x28a   :  { %2893 = vmatmul.mubr.bf16.vlgmr.msra.gmra.mrb[8].mxu0 %v13622_v31 }
 0x28b   :  { %2979 = vmatmul.mubr.bf16.vlgmr.msra.gmra.mrb[8].mxu1 %v13622_v31  ;;  %v12094_v31 = vld [vmem:[%s14272_s4] sm:$0xff]   ;;  %s13489_s4 = smov [#allocation13]  }
 0x28c   :  { %11633 = vmatprep.subr.msk.bf16.mxu0 %vm3210_vm0, %v12094_v31  ;;  %v3404_v48 = vsel %vm3210_vm0, %v12094_v31, 0  ;;  %11634 = vmatprep.subr.msk.bf16.mxu1 %vm3210_vm0, %v12094_v31  ;;  %s10032_s19 = sshll.u32 %s13489_s4, 4  ;;  %s10033_s19 = int_to_ptr.vmem [resolvable:$true] %s10032_s19 }
 0x28d   :  { %s13421_s21 = scalar_lea.vmem %s10033_s19, 1024  ;;  %p13426_p7 = scmp.lt.s32.totalorder %s10033_s19, %s10033_s19 }
 0x28e   :  { %p13422_p6 = scmp.ne.s32.totalorder %s10033_s19, %s13421_s21  ;;  %p13427_p8 = scmp.lt.s32.totalorder %s13421_s21, %s13421_s21 }
 0x290   :  { %11358 = vmatpush3.bf16.xpose.msra.mxu0 %v3404_v48  ;;  %p13428_p9 = por %p13427_p8, %p13426_p7 }
 0x291   :  { %11494 = vmatpush3.bf16.xpose.msra.mxu1 %v3404_v48  ;;  %11635 = vmatprep.subr.msk.bf16.mxu0 %vm3210_vm0, %v12095_v56 }
 0x292   :  { %11636 = vmatprep.subr.msk.bf16.mxu1 %vm3210_vm0, %v12095_v56  ;;  %v1332_v56 = vrot.slane %v13672_v55, %v13697_v39  ;;  %p13429_p10 = pnand %p13428_p9, %p13422_p6 }
 0x298   :  { %11360 = vmatpush3.bf16.xpose.msra.mxu0 %v3407_v61 }
 0x299   :  { %11495 = vmatpush3.bf16.xpose.msra.mxu1 %v3407_v61  ;;  %11637 = vmatprep.subr.msk.bf16.mxu0 %vm3210_vm0, %v12096_v57 }
 0x29a   :  { %11638 = vmatprep.subr.msk.bf16.mxu1 %vm3210_vm0, %v12096_v57  ;;  %v1340_v57 = vrot.slane %v13672_v55, %v13700_v49 }
 0x2a0   :  { %11362 = vmatpush3.bf16.xpose.msra.mxu0 %v3410_v9 }
 0x2a1   :  { %11496 = vmatpush3.bf16.xpose.msra.mxu1 %v3410_v9 }
 0x2dd   :  { %v13644_v40 = vpop.f32.mrb[4].mxu0  ;;  %v13646_v41 = vpop.f32.mrb[4].mxu1 }
 0x2de   :  { %v13648_v42 = vpop.f32.mrb[5].mxu0  ;;  %v13650_v43 = vpop.f32.mrb[5].mxu1  ;;  %v11497_v50 = vadd.f32 %v13644_v40, %v1328_v52 }
 0x2df   :  { %v13652_v44 = vpop.f32.mrb[6].mxu0  ;;  %v13654_v45 = vpop.f32.mrb[6].mxu1  ;;  %v11498_v61 = vadd.f32 %v13648_v42, %v1332_v56 }
 0x2e0   :  { %v13656_v46 = vpop.f32.mrb[7].mxu0  ;;  %v13658_v47 = vpop.f32.mrb[7].mxu1  ;;  %v11503_v40 = vadd.f32 %v13654_v45, %v1336_v54 }
 0x35d   :  { %v2894_v63 = vpop.f32.mrb[8].mxu0 }
 0x35e   :  { %v11505_v0 = vadd.f32 %v2894_v63, %v1344_v58  ;;  %v2980_v30 = vpop.f32.mrb[8].mxu1  ;;  %v2896_v1 = vpop.f32.mrb[9].mxu0 }
 0x35f   :  { %v11509_v34 = vadd.f32 %v2980_v30, %v1352_v59  ;;  %v11506_v2 = vadd.f32 %v2896_v1, %v1348_v60  ;;  %v2982_v3 = vpop.f32.mrb[9].mxu1  ;;  %v2898_v4 = vpop.f32.mrb[10].mxu0 }
 0x360   :  { %v10447_v5 = vmul.f32 -1.442695, %v11505_v0  ;;  %v11510_v35 = vadd.f32 %v2982_v3, %v1356_v62  ;;  %v11507_v6 = vadd.f32 %v2898_v4, %v1344_v58  ;;  %v2984_v7 = vpop.f32.mrb[10].mxu1  ;;  %v2900_v8 = vpop.f32.mrb[11].mxu0  ;;  %v11502_v0 = vadd.f32 %v13650_v43, %v1340_v57 }
 0x361   :  { %v10449_v10 = vmul.f32 -1.442695, %v11509_v34  ;;  %v10448_v11 = vmul.f32 -1.442695, %v11506_v2  ;;  %v11511_v12 = vadd.f32 %v2984_v7, %v1352_v59  ;;  %v11508_v13 = vadd.f32 %v2900_v8, %v1348_v60  ;;  %v2986_v14 = vpop.f32.mrb[11].mxu1  ;;  %v13281_v2 = vld [vmem:[#allocation2] sm:$0xff] }
 0x362   :  { %13249 = vpow2.f32 %v10447_v5  ;;  %v10450_v15 = vmul.f32 -1.442695, %v11510_v35  ;;  %v10451_v16 = vmul.f32 -1.442695, %v11507_v6  ;;  %v11512_v17 = vadd.f32 %v2986_v14, %v1356_v62  ;;  %v13282_v6 = vld [vmem:[#allocation2 + $0x8] sm:$0xff] }
 0x363   :  { %13251 = vpow2.f32 %v10449_v10  ;;  %v10453_v18 = vmul.f32 -1.442695, %v11511_v12  ;;  %v10452_v19 = vmul.f32 -1.442695, %v11508_v13  ;;  %v11501_v59 = vadd.f32 %v13646_v41, %v1336_v54  ;;  %v13284_v14 = vld [vmem:[#allocation2 + $0x28] sm:$0xff] }
 0x364   :  { %13253 = vpow2.f32 %v10448_v11  ;;  %v10454_v20 = vmul.f32 -1.442695, %v11512_v17  ;;  %v11499_v34 = vadd.f32 %v13652_v44, %v1328_v52  ;;  %v11500_v35 = vadd.f32 %v13656_v46, %v1332_v56  ;;  %v13283_v46 = vld [vmem:[#allocation2 + $0x20] sm:$0xff]  ;;  %v13285_v17 = vld [vmem:[#allocation2 + $0x10] sm:$0xff] }
 0x365   :  { %13255 = vpow2.f32 %v10450_v15  ;;  %v11504_v44 = vadd.f32 %v13658_v47, %v1340_v57 }
 0x366   :  { %13257 = vpow2.f32 %v10451_v16 }
 0x367   :  { %13259 = vpow2.f32 %v10453_v18 }
 0x368   :  { %13261 = vpow2.f32 %v10452_v19  ;;  %v13286_v19 = vld [vmem:[#allocation2 + $0x30] sm:$0xff] }
 0x369   :  { %13263 = vpow2.f32 %v10454_v20 }
 0x36c   :  { %v13250_v21 = vpop.eup %13249 }
 0x36d   :  { %v13252_v22 = vpop.eup %13251  ;;  %v3013_v23 = vadd.f32 1.0, %v13250_v21 }
 0x36e   :  { %v13254_v24 = vpop.eup %13253  ;;  %v3015_v25 = vadd.f32 1.0, %v13252_v22 }
 0x36f   :  { %v13256_v26 = vpop.eup %13255  ;;  %13265 = vrcp.f32 %v3013_v23  ;;  %v3014_v27 = vadd.f32 1.0, %v13254_v24  ;;  %v13287_v23 = vld [vmem:[#allocation2 + $0x18] sm:$0xff] }
 0x370   :  { %v13258_v28 = vpop.eup %13257  ;;  %13267 = vrcp.f32 %v3015_v25  ;;  %v3016_v32 = vadd.f32 1.0, %v13256_v26  ;;  %v13288_v25 = vld [vmem:[#allocation2 + $0x38] sm:$0xff] }
 0x371   :  { %v13260_v33 = vpop.eup %13259  ;;  %13269 = vrcp.f32 %v3014_v27  ;;  %v3017_v37 = vadd.f32 1.0, %v13258_v28 }
 0x372   :  { %v13262_v38 = vpop.eup %13261  ;;  %13271 = vrcp.f32 %v3016_v32  ;;  %v3019_v31 = vadd.f32 1.0, %v13260_v33 }
 0x373   :  { %v13264_v48 = vpop.eup %13263  ;;  %13273 = vrcp.f32 %v3017_v37  ;;  %v3018_v51 = vadd.f32 1.0, %v13262_v38 }
 0x374   :  { %13275 = vrcp.f32 %v3019_v31  ;;  %v3020_v53 = vadd.f32 1.0, %v13264_v48 }
 0x375   :  { %13277 = vrcp.f32 %v3018_v51 }
 0x376   :  { %13279 = vrcp.f32 %v3020_v53 }
 0x379   :  { %v13266_v58 = vpop.eup %13265 }
 0x37a   :  { %v13268_v60 = vpop.eup %13267  ;;  %v3037_v62 = vmul.f32 %v13266_v58, %v11497_v50 }
 0x37b   :  { %v13270_v63 = vpop.eup %13269  ;;  %v3039_v30 = vmul.f32 %v13268_v60, %v11501_v59 }
 0x37c   :  { %v13272_v1 = vpop.eup %13271  ;;  %v13715_v3 = vadd.f32 %v13281_v2, %v3037_v62  ;;  %v3038_v55 = vmul.f32 %v13270_v63, %v11498_v61 }
 0x37d   :  { %v13274_v4 = vpop.eup %13273  ;;  %v3040_v5 = vmul.f32 %v13272_v1, %v11502_v0  ;;  %v13734_v18 = vadd.f32 %v13285_v17, %v3039_v30 }
 0x37e   :  { %v13276_v41 = vpop.eup %13275  ;;  %v3059_v42 = vpack.c.bf16 %v13715_v3, %v13715_v3  ;;  %v13721_v43 = vadd.f32 %v13282_v6, %v3038_v55  ;;  %v3041_v7 = vmul.f32 %v13274_v4, %v11499_v34 }
 0x37f   :  { %v13278_v8 = vpop.eup %13277  ;;  %v3043_v9 = vmul.f32 %v13276_v41, %v11503_v40  ;;  %v3061_v21 = vpack.c.bf16 %v13734_v18, %v13734_v18  ;;  %v13742_v24 = vadd.f32 %v13287_v23, %v3040_v5 }
 0x380   :  { %v13280_v10 = vpop.eup %13279  ;;  %3067 = vxpose.xlu0.c.b16.start.end [1/1] (short) %v3059_v42, 128  ;;  %v3060_v45 = vpack.c.bf16 %v13721_v43, %v13721_v43  ;;  %v3042_v11 = vmul.f32 %v13278_v8, %v11500_v35  ;;  %v13726_v13 = vadd.f32 %v13283_v46, %v3041_v7 }
 0x381   :  { %v3044_v12 = vmul.f32 %v13280_v10, %v11504_v44  ;;  %v13736_v20 = vadd.f32 %v13286_v19, %v3043_v9  ;;  %v3062_v27 = vpack.c.bf16 %v13742_v24, %v13742_v24 }
 0x382   :  { %3083 = vxpose.xlu1.c.b16.start.end [1/1] (short) %v3060_v45, 128  ;;  %v13728_v15 = vadd.f32 %v13284_v14, %v3042_v11  ;;  %v3063_v16 = vpack.c.bf16 %v13726_v13, %v13726_v13 }
 0x383   :  { %v3065_v22 = vpack.c.bf16 %v13736_v20, %v13736_v20  ;;  %v13744_v26 = vadd.f32 %v13288_v25, %v3044_v12 }
 0x384   :  { %v3064_v47 = vpack.c.bf16 %v13728_v15, %v13728_v15 }
 0x385   :  { %v3066_v28 = vpack.c.bf16 %v13744_v26, %v13744_v26 }
 0x39d   :  { %3131 = vxpose.xlu0.c.b16.start.end [1/1] (short) %v3063_v16, 128 }
 0x39f   :  { %3147 = vxpose.xlu1.c.b16.start.end [1/1] (short) %v3064_v47, 128 }
 0x3ba   :  { %3099 = vxpose.xlu0.c.b16.start.end [1/1] (short) %v3061_v21, 128 }
 0x3bc   :  { %3163 = vxpose.xlu1.c.b16.start.end [1/1] (short) %v3065_v22, 128 }
 0x3d7   :  { %3115 = vxpose.xlu0.c.b16.start.end [1/1] (short) %v3062_v27, 128 }
 0x3d9   :  { %3179 = vxpose.xlu1.c.b16.start.end [1/1] (short) %v3066_v28, 128 }
 0x3e6   :  { %v3075_v32 = vpop.trf.xlu0 }
 0x3e7   :  { %11363 = vmatprep.mubr.msk.bf16.mxu0 %vm3210_vm0, %v3075_v32 }
 0x3e8   :  { %v3091_v33 = vpop.trf.xlu1 }
 0x3ea   :  { %v3076_v37 = vpop.trf.xlu0 }
 0x3eb   :  { %11364 = vmatmul.mubr.msk.bf16.vlgmr.msra.gmra.mrb[12].mxu0 %vm3210_vm0, %v3076_v37 }
 0x3ec   :  { %v3092_v38 = vpop.trf.xlu1 }
 0x3ee   :  { %v3077_v31 = vpop.trf.xlu0 }
 0x3ef   :  { %11367 = vmatprep.mubr.msk.bf16.mxu0 %vm3210_vm0, %v3077_v31 }
 0x3f0   :  { %v3093_v48 = vpop.trf.xlu1 }
 0x3f2   :  { %v3078_v51 = vpop.trf.xlu0 }
 0x3f3   :  { %11368 = vmatmul.mubr.msk.bf16.gmra.mrb[16].mxu0 %vm3210_vm0, %v3078_v51 }
 0x3f4   :  { %v3094_v52 = vpop.trf.xlu1 }
 0x3f6   :  { %v3079_v53 = vpop.trf.xlu0 }
 0x3f7   :  { %11371 = vmatprep.mubr.msk.bf16.mxu0 %vm3210_vm0, %v3079_v53 }
 0x3f8   :  { %v3095_v54 = vpop.trf.xlu1 }
 0x3fa   :  { %v3080_v56 = vpop.trf.xlu0 }
 0x3fb   :  { %11372 = vmatmul.mubr.msk.bf16.gmra.mrb[20].mxu0 %vm3210_vm0, %v3080_v56 }
 0x3fc   :  { %v3096_v57 = vpop.trf.xlu1 }
 0x3fe   :  { %v3081_v50 = vpop.trf.xlu0 }
 0x3ff   :  { %11375 = vmatprep.mubr.msk.bf16.mxu0 %vm3210_vm0, %v3081_v50  ;;  %v12097_v50 = vld [vmem:[#allocation10] ss:$16 sps:$4 sm:$0xff]  }
 0x400   :  { %v3097_v58 = vpop.trf.xlu1 }
 0x402   :  { %v3082_v59 = vpop.trf.xlu0 }
 0x403   :  { %11376 = vmatmul.mubr.msk.bf16.gmra.mrb[24].mxu0 %vm3210_vm0, %v3082_v59  ;;  %v12100_v59 = vld [vmem:[#allocation10 + $0xc00] ss:$16 sps:$4 sm:$0xff]  }
 0x404   :  { %11379 = vmatprep.mubr.msk.bf16.mxu0 %vm3210_vm0, %v3091_v33  ;;  %v3098_v60 = vpop.trf.xlu1 }
 0x406   :  { %v3139_v61 = vpop.trf.xlu0 }
 0x407   :  { %11427 = vmatprep.mubr.msk.bf16.mxu1 %vm3210_vm0, %v3139_v61  ;;  %v12103_v61 = vld [vmem:[#allocation10 + $0x20] ss:$16 sps:$4 sm:$0xff]  }
 0x408   :  { %v3155_v62 = vpop.trf.xlu1 }
 0x40a   :  { %v3140_v63 = vpop.trf.xlu0 }
 0x40b   :  { %11380 = vmatmul.mubr.msk.bf16.gmra.mrb[28].mxu0 %vm3210_vm0, %v3092_v38  ;;  %11428 = vmatmul.mubr.msk.bf16.vlgmr.msra.gmra.mrb[12].mxu1 %vm3210_vm0, %v3140_v63  ;;  %v12106_v63 = vld [vmem:[#allocation10 + $0xc20] ss:$16 sps:$4 sm:$0xff]  }
 0x40c   :  { %11383 = vmatprep.mubr.msk.bf16.mxu0 %vm3210_vm0, %v3093_v48  ;;  %v3156_v0 = vpop.trf.xlu1 }
 0x40e   :  { %v3141_v30 = vpop.trf.xlu0 }
 0x40f   :  { %11431 = vmatprep.mubr.msk.bf16.mxu1 %vm3210_vm0, %v3141_v30  ;;  %v12109_v30 = vld [vmem:[#allocation10 + $0x40] ss:$16 sps:$4 sm:$0xff]  }
 0x410   :  { %v3157_v1 = vpop.trf.xlu1 }
 0x412   :  { %v3142_v34 = vpop.trf.xlu0 }
 0x413   :  { %11384 = vmatmul.mubr.msk.bf16.gmra.mrb[32].mxu0 %vm3210_vm0, %v3094_v52  ;;  %11432 = vmatmul.mubr.msk.bf16.gmra.mrb[16].mxu1 %vm3210_vm0, %v3142_v34  ;;  %v12112_v34 = vld [vmem:[#allocation10 + $0xc40] ss:$16 sps:$4 sm:$0xff]  }
 0x414   :  { %11387 = vmatprep.mubr.msk.bf16.mxu0 %vm3210_vm0, %v3095_v54  ;;  %v3158_v2 = vpop.trf.xlu1 }
 0x416   :  { %v3143_v55 = vpop.trf.xlu0 }
 0x417   :  { %11435 = vmatprep.mubr.msk.bf16.mxu1 %vm3210_vm0, %v3143_v55  ;;  %v12115_v55 = vld [vmem:[#allocation10 + $0x60] ss:$16 sps:$4 sm:$0xff]  }
 0x418   :  { %v3159_v4 = vpop.trf.xlu1 }
 0x41a   :  { %v3144_v40 = vpop.trf.xlu0 }
 0x41b   :  { %11388 = vmatmul.mubr.msk.bf16.gmra.mrb[36].mxu0 %vm3210_vm0, %v3096_v57  ;;  %11436 = vmatmul.mubr.msk.bf16.gmra.mrb[20].mxu1 %vm3210_vm0, %v3144_v40  ;;  %v12118_v40 = vld [vmem:[#allocation10 + $0xc60] ss:$16 sps:$4 sm:$0xff]  }
 0x41c   :  { %11391 = vmatprep.mubr.msk.bf16.mxu0 %vm3210_vm0, %v3097_v58  ;;  %v3160_v5 = vpop.trf.xlu1  ;;  %v12099_v58 = vld [vmem:[#allocation10 + $0x4] ss:$16 sps:$4 sm:$0xff]  }
 0x41d   :  { %4986 = vmatprep.subr.bf16.mxu1 %v12099_v58  ;;  %v12153_v58 = vld [vmem:[#allocation10 + $0x124] ss:$16 sps:$4 sm:$0xff]  }
 0x41e   :  { %v3145_v41 = vpop.trf.xlu0  ;;  %4987 = vmatpush1.bf16.msra.mxu1 %v12097_v50  ;;  %v12151_v50 = vld [vmem:[#allocation10 + $0x120] ss:$16 sps:$4 sm:$0xff]  }
 0x41f   :  { %11439 = vmatprep.mubr.msk.bf16.mxu1 %vm3210_vm0, %v3145_v41  ;;  %v12121_v41 = vld [vmem:[#allocation10 + $0x80] ss:$16 sps:$4 sm:$0xff]  }
 0x420   :  { %v3161_v35 = vpop.trf.xlu1 }
 0x422   :  { %v3146_v42 = vpop.trf.xlu0 }
 0x423   :  { %11392 = vmatmul.mubr.msk.bf16.gmra.mrb[40].mxu0 %vm3210_vm0, %v3098_v60  ;;  %11440 = vmatmul.mubr.msk.bf16.gmra.mrb[24].mxu1 %vm3210_vm0, %v3146_v42  ;;  %v12102_v60 = vld [vmem:[#allocation10 + $0xc04] ss:$16 sps:$4 sm:$0xff]   ;;  %v12124_v42 = vld [vmem:[#allocation10 + $0xc80] ss:$16 sps:$4 sm:$0xff]  }
 0x424   :  { %11443 = vmatprep.mubr.msk.bf16.mxu1 %vm3210_vm0, %v3155_v62  ;;  %v3162_v6 = vpop.trf.xlu1  ;;  %7898 = vmatprep.subr.bf16.mxu0 %v12102_v60  ;;  %v12105_v62 = vld [vmem:[#allocation10 + $0x24] ss:$16 sps:$4 sm:$0xff]  }
 0x425   :  { %7899 = vmatpush1.bf16.msra.mxu0 %v12100_v59  ;;  %4988 = vmatprep.subr.bf16.mxu1 %v12105_v62  ;;  %v12154_v59 = vld [vmem:[#allocation10 + $0xd20] ss:$16 sps:$4 sm:$0xff]   ;;  %v12156_v60 = vld [vmem:[#allocation10 + $0xd24] ss:$16 sps:$4 sm:$0xff]  }
 0x426   :  { %v3107_v7 = vpop.trf.xlu0  ;;  %4989 = vmatpush1.bf16.msra.mxu1 %v12103_v61 }
 0x427   :  { %11395 = vmatprep.mubr.msk.bf16.mxu0 %vm3210_vm0, %v3107_v7  ;;  %v12127_v7 = vld [vmem:[#allocation10 + $0xa0] ss:$16 sps:$4 sm:$0xff]  }
 0x428   :  { %v3171_v44 = vpop.trf.xlu1 }
 0x42a   :  { %v3108_v8 = vpop.trf.xlu0 }
 0x42b   :  { %11444 = vmatmul.mubr.msk.bf16.gmra.mrb[28].mxu1 %vm3210_vm0, %v3156_v0  ;;  %11396 = vmatmul.mubr.msk.bf16.gmra.mrb[44].mxu0 %vm3210_vm0, %v3108_v8  ;;  %v12108_v0 = vld [vmem:[#allocation10 + $0xc24] ss:$16 sps:$4 sm:$0xff]  }
 0x42c   :  { %11447 = vmatprep.mubr.msk.bf16.mxu1 %vm3210_vm0, %v3157_v1  ;;  %v3172_v10 = vpop.trf.xlu1  ;;  %7900 = vmatprep.subr.bf16.mxu0 %v12108_v0  ;;  %v12111_v1 = vld [vmem:[#allocation10 + $0x44] ss:$16 sps:$4 sm:$0xff]  }
 0x42d   :  { %7901 = vmatpush1.bf16.msra.mxu0 %v12106_v63  ;;  %4990 = vmatprep.subr.bf16.mxu1 %v12111_v1  ;;  %v12129_v8 = vld [vmem:[#allocation10 + $0xa4] ss:$16 sps:$4 sm:$0xff]  }
 0x42e   :  { %v3109_v9 = vpop.trf.xlu0  ;;  %4991 = vmatpush1.bf16.msra.mxu1 %v12109_v30 }
 0x42f   :  { %11399 = vmatprep.mubr.msk.bf16.mxu0 %vm3210_vm0, %v3109_v9  ;;  %v12132_v9 = vld [vmem:[#allocation10 + $0xca4] ss:$16 sps:$4 sm:$0xff]  }
 0x430   :  { %v3173_v12 = vpop.trf.xlu1 }
 0x432   :  { %v3110_v45 = vpop.trf.xlu0 }
 0x433   :  { %11448 = vmatmul.mubr.msk.bf16.gmra.mrb[32].mxu1 %vm3210_vm0, %v3158_v2  ;;  %11400 = vmatmul.mubr.msk.bf16.gmra.mrb[48].mxu0 %vm3210_vm0, %v3110_v45  ;;  %v12114_v2 = vld [vmem:[#allocation10 + $0xc44] ss:$16 sps:$4 sm:$0xff]  }
 0x434   :  { %11451 = vmatprep.mubr.msk.bf16.mxu1 %vm3210_vm0, %v3159_v4  ;;  %v3174_v14 = vpop.trf.xlu1  ;;  %7902 = vmatprep.subr.bf16.mxu0 %v12114_v2  ;;  %v12117_v4 = vld [vmem:[#allocation10 + $0x64] ss:$16 sps:$4 sm:$0xff]  }
 0x435   :  { %7903 = vmatpush1.bf16.msra.mxu0 %v12112_v34  ;;  %4992 = vmatprep.subr.bf16.mxu1 %v12117_v4 }
 0x436   :  { %v3111_v11 = vpop.trf.xlu0  ;;  %4993 = vmatpush1.bf16.msra.mxu1 %v12115_v55 }
 0x437   :  { %11403 = vmatprep.mubr.msk.bf16.mxu0 %vm3210_vm0, %v3111_v11 }
 0x438   :  { %v3175_v17 = vpop.trf.xlu1 }
 0x43a   :  { %v3112_v46 = vpop.trf.xlu0 }
 0x43b   :  { %11452 = vmatmul.mubr.msk.bf16.gmra.mrb[36].mxu1 %vm3210_vm0, %v3160_v5  ;;  %11404 = vmatmul.mubr.msk.bf16.gmra.mrb[52].mxu0 %vm3210_vm0, %v3112_v46  ;;  %v12120_v5 = vld [vmem:[#allocation10 + $0xc64] ss:$16 sps:$4 sm:$0xff]   ;;  %v12133_v46 = vld [vmem:[#allocation10 + $0xc0] ss:$16 sps:$4 sm:$0xff]  }
 0x43c   :  { %11455 = vmatprep.mubr.msk.bf16.mxu1 %vm3210_vm0, %v3161_v35  ;;  %v3176_v21 = vpop.trf.xlu1  ;;  %7904 = vmatprep.subr.bf16.mxu0 %v12120_v5  ;;  %v12123_v35 = vld [vmem:[#allocation10 + $0x84] ss:$16 sps:$4 sm:$0xff]  }
 0x43d   :  { %7905 = vmatpush1.bf16.msra.mxu0 %v12118_v40  ;;  %4994 = vmatprep.subr.bf16.mxu1 %v12123_v35  ;;  %v12159_v35 = vld [vmem:[#allocation10 + $0x144] ss:$16 sps:$4 sm:$0xff]  }
 0x43e   :  { %v3113_v16 = vpop.trf.xlu0  ;;  %4995 = vmatpush1.bf16.msra.mxu1 %v12121_v41  ;;  %v12157_v41 = vld [vmem:[#allocation10 + $0x140] ss:$16 sps:$4 sm:$0xff]  }
 0x43f   :  { %11407 = vmatprep.mubr.msk.bf16.mxu0 %vm3210_vm0, %v3113_v16  ;;  %4996 = vmatprep.subr.bf16.mxu1 %v12129_v8  ;;  %v12136_v16 = vld [vmem:[#allocation10 + $0xcc0] ss:$16 sps:$4 sm:$0xff]  }
 0x440   :  { %v3177_v25 = vpop.trf.xlu1 }
 0x442   :  { %v3114_v47 = vpop.trf.xlu0  ;;  %4997 = vmatpush1.bf16.msra.mxu1 %v12127_v7 }
 0x443   :  { %11456 = vmatmul.mubr.msk.bf16.gmra.mrb[40].mxu1 %vm3210_vm0, %v3162_v6  ;;  %11408 = vmatmul.mubr.msk.bf16.gmra.mrb[56].mxu0 %vm3210_vm0, %v3114_v47  ;;  %v12126_v6 = vld [vmem:[#allocation10 + $0xc84] ss:$16 sps:$4 sm:$0xff]  }
 0x444   :  { %11459 = vmatprep.mubr.msk.bf16.mxu1 %vm3210_vm0, %v3171_v44  ;;  %v3178_v28 = vpop.trf.xlu1  ;;  %7906 = vmatprep.subr.bf16.mxu0 %v12126_v6  ;;  %v12130_v44 = vld [vmem:[#allocation10 + $0xca0] ss:$16 sps:$4 sm:$0xff]   ;;  %v12138_v47 = vld [vmem:[#allocation10 + $0xcc4] ss:$16 sps:$4 sm:$0xff]  }
 0x445   :  { %7907 = vmatpush1.bf16.msra.mxu0 %v12124_v42  ;;  %v12160_v42 = vld [vmem:[#allocation10 + $0xd40] ss:$16 sps:$4 sm:$0xff]   ;;  %v12162_v6 = vld [vmem:[#allocation10 + $0xd44] ss:$16 sps:$4 sm:$0xff]  }
 0x446   :  { %v3123_v19 = vpop.trf.xlu0  ;;  %7908 = vmatprep.subr.bf16.mxu0 %v12132_v9 }
 0x447   :  { %11411 = vmatprep.mubr.msk.bf16.mxu0 %vm3210_vm0, %v3123_v19 }
 0x448   :  { %v3187_v37 = vpop.trf.xlu1 }
 0x449   :  { %7909 = vmatpush1.bf16.msra.mxu0 %v12130_v44 }
 0x44a   :  { %v3124_v22 = vpop.trf.xlu0  ;;  %7910 = vmatprep.subr.bf16.mxu0 %v12138_v47 }
 0x44b   :  { %11460 = vmatmul.mubr.msk.bf16.gmra.mrb[44].mxu1 %vm3210_vm0, %v3172_v10  ;;  %11412 = vmatmul.mubr.msk.bf16.gmra.mrb[60].mxu0 %vm3210_vm0, %v3124_v22 }
 0x44c   :  { %11463 = vmatprep.mubr.msk.bf16.mxu1 %vm3210_vm0, %v3173_v12  ;;  %v3188_v31 = vpop.trf.xlu1 }
 0x44d   :  { %7911 = vmatpush1.bf16.msra.mxu0 %v12136_v16 }
 0x44e   :  { %v3125_v23 = vpop.trf.xlu0 }
 0x44f   :  { %11415 = vmatprep.mubr.msk.bf16.mxu0 %vm3210_vm0, %v3125_v23  ;;  %v12139_v23 = vld [vmem:[#allocation10 + $0xe0] ss:$16 sps:$4 sm:$0xff]  }
 0x450   :  { %v3189_v51 = vpop.trf.xlu1 }
 0x452   :  { %v3126_v27 = vpop.trf.xlu0 }
 0x453   :  { %11464 = vmatmul.mubr.msk.bf16.gmra.mrb[48].mxu1 %vm3210_vm0, %v3174_v14  ;;  %11416 = vmatmul.mubr.msk.bf16.gmra.mrb[64].mxu0 %vm3210_vm0, %v3126_v27  ;;  %v12135_v14 = vld [vmem:[#allocation10 + $0xc4] ss:$16 sps:$4 sm:$0xff]   ;;  %v12142_v27 = vld [vmem:[#allocation10 + $0xce0] ss:$16 sps:$4 sm:$0xff]  }
 0x454   :  { %11467 = vmatprep.mubr.msk.bf16.mxu1 %vm3210_vm0, %v3175_v17  ;;  %v3190_v52 = vpop.trf.xlu1  ;;  %4998 = vmatprep.subr.bf16.mxu1 %v12135_v14 }
 0x455   :  { %4999 = vmatpush1.bf16.msra.mxu1 %v12133_v46 }
 0x456   :  { %v3127_v32 = vpop.trf.xlu0 }
 0x457   :  { %11419 = vmatprep.mubr.msk.bf16.mxu0 %vm3210_vm0, %v3127_v32 }
 0x458   :  { %v3191_v53 = vpop.trf.xlu1 }
 0x45a   :  { %v3128_v33 = vpop.trf.xlu0 }
 0x45b   :  { %11468 = vmatmul.mubr.msk.bf16.gmra.mrb[52].mxu1 %vm3210_vm0, %v3176_v21  ;;  %11420 = vmatmul.mubr.msk.bf16.gmra.mrb[68].mxu0 %vm3210_vm0, %v3128_v33 }
 0x45c   :  { %11471 = vmatprep.mubr.msk.bf16.mxu1 %vm3210_vm0, %v3177_v25  ;;  %v3192_v54 = vpop.trf.xlu1  ;;  %v12141_v25 = vld [vmem:[#allocation10 + $0xe4] ss:$16 sps:$4 sm:$0xff]  }
 0x45d   :  { %5000 = vmatprep.subr.bf16.mxu1 %v12141_v25  ;;  %v12165_v25 = vld [vmem:[#allocation10 + $0x164] ss:$16 sps:$4 sm:$0xff]  }
 0x45e   :  { %v3129_v38 = vpop.trf.xlu0  ;;  %5001 = vmatpush1.bf16.msra.mxu1 %v12139_v23  ;;  %v12163_v23 = vld [vmem:[#allocation10 + $0x160] ss:$16 sps:$4 sm:$0xff]  }
 0x45f   :  { %11423 = vmatprep.mubr.msk.bf16.mxu0 %vm3210_vm0, %v3129_v38 }
 0x460   :  { %v3193_v56 = vpop.trf.xlu1 }
 0x462   :  { %v3130_v48 = vpop.trf.xlu0 }
 0x463   :  { %11472 = vmatmul.mubr.msk.bf16.gmra.mrb[56].mxu1 %vm3210_vm0, %v3178_v28  ;;  %11424 = vmatmul.mubr.msk.bf16.gmra.mrb[72].mxu0 %vm3210_vm0, %v3130_v48  ;;  %v12144_v28 = vld [vmem:[#allocation10 + $0xce4] ss:$16 sps:$4 sm:$0xff]  }
 0x464   :  { %11475 = vmatprep.mubr.msk.bf16.mxu1 %vm3210_vm0, %v3187_v37  ;;  %v3194_v57 = vpop.trf.xlu1  ;;  %7912 = vmatprep.subr.bf16.mxu0 %v12144_v28  ;;  %v12147_v48 = vld [vmem:[#allocation10 + $0x104] ss:$16 sps:$4 sm:$0xff]  }
 0x465   :  { %7913 = vmatpush1.bf16.msra.mxu0 %v12142_v27  ;;  %5002 = vmatprep.subr.bf16.mxu1 %v12147_v48  ;;  %v12166_v27 = vld [vmem:[#allocation10 + $0xd60] ss:$16 sps:$4 sm:$0xff]  }
 0x46b   :  { %11476 = vmatmul.mubr.msk.bf16.gmra.mrb[60].mxu1 %vm3210_vm0, %v3188_v31  ;;  %v12145_v31 = vld [vmem:[#allocation10 + $0x100] ss:$16 sps:$4 sm:$0xff]  }
 0x46c   :  { %11479 = vmatprep.mubr.msk.bf16.mxu1 %vm3210_vm0, %v3189_v51  ;;  %v12148_v51 = vld [vmem:[#allocation10 + $0xd00] ss:$16 sps:$4 sm:$0xff]   ;;  %5003 = vmatpush1.bf16.msra.mxu1 %v12145_v31 }
 0x46d   :  { %5004 = vmatprep.subr.bf16.mxu1 %v12153_v58 }
 0x470   :  { %5005 = vmatpush1.bf16.msra.mxu1 %v12151_v50 }
 0x471   :  { %5006 = vmatprep.subr.bf16.mxu1 %v12159_v35 }
 0x473   :  { %11480 = vmatmul.mubr.msk.bf16.gmra.mrb[64].mxu1 %vm3210_vm0, %v3190_v52  ;;  %v12150_v52 = vld [vmem:[#allocation10 + $0xd04] ss:$16 sps:$4 sm:$0xff]  }
 0x474   :  { %11483 = vmatprep.mubr.msk.bf16.mxu1 %vm3210_vm0, %v3191_v53  ;;  %7914 = vmatprep.subr.bf16.mxu0 %v12150_v52 }
 0x475   :  { %7915 = vmatpush1.bf16.msra.mxu0 %v12148_v51  ;;  %5007 = vmatpush1.bf16.msra.mxu1 %v12157_v41 }
 0x476   :  { %7916 = vmatprep.subr.bf16.mxu0 %v12156_v60  ;;  %5008 = vmatprep.subr.bf16.mxu1 %v12165_v25 }
 0x479   :  { %7917 = vmatpush1.bf16.msra.mxu0 %v12154_v59  ;;  %5009 = vmatpush1.bf16.msra.mxu1 %v12163_v23 }
 0x47a   :  { %7918 = vmatprep.subr.bf16.mxu0 %v12162_v6 }
 0x47b   :  { %11484 = vmatmul.mubr.msk.bf16.gmra.mrb[68].mxu1 %vm3210_vm0, %v3192_v54 }
 0x47c   :  { %11487 = vmatprep.mubr.msk.bf16.mxu1 %vm3210_vm0, %v3193_v56 }
 0x47d   :  { %7919 = vmatpush1.bf16.msra.mxu0 %v12160_v42 }
 0x483   :  { %11488 = vmatmul.mubr.msk.bf16.gmra.mrb[72].mxu1 %vm3210_vm0, %v3194_v57 }
 0x4be   :  { %v13814_v10 = vpop.f32.mrb[12].mxu0 }
 0x4bf   :  { %v3446_v45 = vpop.f32.mrb[13].mxu0 }
 0x4c0   :  { %v13816_v11 = vpop.f32.mrb[14].mxu0 }
 0x4c1   :  { %v13818_v12 = vpop.f32.mrb[15].mxu0 }
 0x4c6   :  { %v13820_v17 = vpop.f32.mrb[16].mxu0 }
 0x4c7   :  { %v13822_v19 = vpop.f32.mrb[17].mxu0 }
 0x4c8   :  { %v13824_v21 = vpop.f32.mrb[18].mxu0 }
 0x4c9   :  { %v13826_v22 = vpop.f32.mrb[19].mxu0 }
 0x4ce   :  { %v13828_v32 = vpop.f32.mrb[20].mxu0 }
 0x4cf   :  { %v13830_v33 = vpop.f32.mrb[21].mxu0 }
 0x4d0   :  { %v13832_v37 = vpop.f32.mrb[22].mxu0 }
 0x4d1   :  { %v13834_v38 = vpop.f32.mrb[23].mxu0 }
 0x4d6   :  { %v13836_v53 = vpop.f32.mrb[24].mxu0 }
 0x4d7   :  { %v13838_v54 = vpop.f32.mrb[25].mxu0 }
 0x4d8   :  { %v13840_v56 = vpop.f32.mrb[26].mxu0 }
 0x4d9   :  { %v13842_v57 = vpop.f32.mrb[27].mxu0 }
 0x4de   :  { %v13844_v61 = vpop.f32.mrb[28].mxu0  ;;  %v11429_v62 = vpop.f32.mrb[12].mxu1 }
 0x4df   :  { %v11658_v63 = vpack.i.bf16 %v11429_v62, %v13814_v10  ;;  %v13847_v0 = vpop.f32.mrb[29].mxu0  ;;  %v3702_v30 = vpop.f32.mrb[13].mxu1  ;;  %v12169_v62 = vld [vmem:[#allocation10 + $0x180] ss:$16 sps:$4 sm:$0xff]  }
 0x4e0   :  { %v11654_v1 = vpack.i.bf16 %v3702_v30, %v3446_v45  ;;  %v13849_v34 = vpop.f32.mrb[30].mxu0  ;;  %v11430_v2 = vpop.f32.mrb[14].mxu1  ;;  %v12172_v30 = vld [vmem:[#allocation10 + $0xd80] ss:$16 sps:$4 sm:$0xff]  }
 0x4e1   :  { %v11660_v55 = vpack.i.bf16 %v11430_v2, %v13816_v11  ;;  %v13852_v4 = vpop.f32.mrb[31].mxu0  ;;  %v3705_v40 = vpop.f32.mrb[15].mxu1 }
 0x4e2   :  { %v11656_v5 = vpack.i.bf16 %v3705_v40, %v13818_v12  ;;  %11655 = vxpose.xlu1.b32.start [1/16] (narrow) %v11654_v1, 48  ;;  %v12174_v1 = vld [vmem:[#allocation10 + $0xd84] ss:$16 sps:$4 sm:$0xff]  }
 0x4e6   :  { %v13855_v7 = vpop.f32.mrb[32].mxu0  ;;  %11657 = vxpose.xlu1.b32.cont [2/16] (narrow) %v11656_v5, 48  ;;  %v11433_v8 = vpop.f32.mrb[16].mxu1 }
 0x4e7   :  { %v11666_v44 = vpack.i.bf16 %v11433_v8, %v13820_v17  ;;  %v13858_v9 = vpop.f32.mrb[33].mxu0  ;;  %v3718_v10 = vpop.f32.mrb[17].mxu1  ;;  %v12168_v17 = vld [vmem:[#allocation10 + $0xd64] ss:$16 sps:$4 sm:$0xff]  }
 0x4e8   :  { %v11662_v45 = vpack.i.bf16 %v3718_v10, %v13822_v19  ;;  %v13861_v11 = vpop.f32.mrb[34].mxu0  ;;  %v11434_v12 = vpop.f32.mrb[18].mxu1  ;;  %7920 = vmatprep.subr.bf16.mxu0 %v12168_v17 }
 0x4e9   :  { %v11668_v46 = vpack.i.bf16 %v11434_v12, %v13824_v21  ;;  %v13864_v14 = vpop.f32.mrb[35].mxu0  ;;  %v3721_v16 = vpop.f32.mrb[19].mxu1  ;;  %7921 = vmatpush1.bf16.msra.mxu0 %v12166_v27  ;;  %v12177_v12 = vld [vmem:[#allocation10 + $0x1a4] ss:$16 sps:$4 sm:$0xff]  }
 0x4ea   :  { %v11664_v47 = vpack.i.bf16 %v3721_v16, %v13826_v22  ;;  %11659 = vxpose.xlu1.b32.cont [3/16] (narrow) %v11658_v63, 48  ;;  %v12171_v63 = vld [vmem:[#allocation10 + $0x184] ss:$16 sps:$4 sm:$0xff]   ;;  %7922 = vmatprep.subr.bf16.mxu0 %v12174_v1  ;;  %v12178_v16 = vld [vmem:[#allocation10 + $0xda0] ss:$16 sps:$4 sm:$0xff]  }
 0x4eb   :  { %5010 = vmatprep.subr.bf16.mxu1 %v12171_v63 }
 0x4ec   :  { %5011 = vmatpush1.bf16.msra.mxu1 %v12169_v62  ;;  %v12183_v62 = vld [vmem:[#allocation10 + $0x1c4] ss:$16 sps:$4 sm:$0xff]  }
 0x4ed   :  { %7923 = vmatpush1.bf16.msra.mxu0 %v12172_v30  ;;  %5012 = vmatprep.subr.bf16.mxu1 %v12177_v12 }
 0x4ee   :  { %v13867_v28 = vpop.f32.mrb[36].mxu0  ;;  %11661 = vxpose.xlu1.b32.cont [4/16] (narrow) %v11660_v55, 48  ;;  %v13869_v19 = vpop.f32.mrb[20].mxu1 }
 0x4ef   :  { %v11674_v21 = vpack.i.bf16 %v13869_v19, %v13828_v32  ;;  %v13873_v31 = vpop.f32.mrb[37].mxu0  ;;  %v3734_v22 = vpop.f32.mrb[21].mxu1 }
 0x4f0   :  { %v11670_v48 = vpack.i.bf16 %v3734_v22, %v13830_v33  ;;  %v13876_v51 = vpop.f32.mrb[38].mxu0  ;;  %v13878_v52 = vpop.f32.mrb[22].mxu1 }
 0x4f1   :  { %v11676_v50 = vpack.i.bf16 %v13878_v52, %v13832_v37  ;;  %v13882_v58 = vpop.f32.mrb[39].mxu0  ;;  %v3737_v59 = vpop.f32.mrb[23].mxu1 }
 0x4f2   :  { %v11672_v60 = vpack.i.bf16 %v3737_v59, %v13834_v38  ;;  %11663 = vxpose.xlu1.b32.cont [5/16] (narrow) %v11662_v45, 48  ;;  %v12175_v45 = vld [vmem:[#allocation10 + $0x1a0] ss:$16 sps:$4 sm:$0xff]  }
 0x4f3   :  { %5013 = vmatpush1.bf16.msra.mxu1 %v12175_v45  ;;  %v12181_v59 = vld [vmem:[#allocation10 + $0x1c0] ss:$16 sps:$4 sm:$0xff]  }
 0x4f4   :  { %5014 = vmatprep.subr.bf16.mxu1 %v12183_v62 }
 0x4f6   :  { %v13885_v33 = vpop.f32.mrb[40].mxu0  ;;  %11665 = vxpose.xlu1.b32.cont [6/16] (narrow) %v11664_v47, 48  ;;  %v13887_v2 = vpop.f32.mrb[24].mxu1  ;;  %v12180_v47 = vld [vmem:[#allocation10 + $0xda4] ss:$16 sps:$4 sm:$0xff]  }
 0x4f7   :  { %v11682_v55 = vpack.i.bf16 %v13887_v2, %v13836_v53  ;;  %v13891_v40 = vpop.f32.mrb[41].mxu0  ;;  %v13893_v38 = vpop.f32.mrb[25].mxu1  ;;  %7924 = vmatprep.subr.bf16.mxu0 %v12180_v47  ;;  %5015 = vmatpush1.bf16.msra.mxu1 %v12181_v59  ;;  %v12187_v47 = vld [vmem:[#allocation10 + $0xdc0] ss:$16 sps:$4 sm:$0xff]  }
 0x4f8   :  { %v11678_v5 = vpack.i.bf16 %v13893_v38, %v13838_v54  ;;  %v13897_v41 = vpop.f32.mrb[42].mxu0  ;;  %v13899_v35 = vpop.f32.mrb[26].mxu1  ;;  %7925 = vmatpush1.bf16.msra.mxu0 %v12178_v16  ;;  %v12186_v16 = vld [vmem:[#allocation10 + $0x1e4] ss:$16 sps:$4 sm:$0xff]  }
 0x4f9   :  { %v13903_v6 = vpop.f32.mrb[43].mxu0  ;;  %v13905_v8 = vpop.f32.mrb[27].mxu1  ;;  %5016 = vmatprep.subr.bf16.mxu1 %v12186_v16 }
 0x4fa   :  { %v11680_v10 = vpack.i.bf16 %v13905_v8, %v13842_v57  ;;  %11667 = vxpose.xlu1.b32.cont [7/16] (narrow) %v11666_v44, 48 }
 0x4fe   :  { %11669 = vxpose.xlu1.b32.cont [8/16] (narrow) %v11668_v46, 48  ;;  %v11445_v23 = vpop.f32.mrb[28].mxu1  ;;  %v13909_v25 = vpop.f32.mrb[44].mxu0 }
 0x4ff   :  { %v11720_v27 = vpack.i.bf16 %v11445_v23, %v13844_v61  ;;  %v3766_v17 = vpop.f32.mrb[29].mxu1  ;;  %v13912_v22 = vpop.f32.mrb[45].mxu0  ;;  %v12184_v61 = vld [vmem:[#allocation10 + $0x1e0] ss:$16 sps:$4 sm:$0xff]   ;;  %v12189_v23 = vld [vmem:[#allocation10 + $0xdc4] ss:$16 sps:$4 sm:$0xff]  }
 0x500   :  { %v11716_v44 = vpack.i.bf16 %v3766_v17, %v13847_v0  ;;  %v11446_v63 = vpop.f32.mrb[30].mxu1  ;;  %v13915_v30 = vpop.f32.mrb[46].mxu0  ;;  %7926 = vmatprep.subr.bf16.mxu0 %v12189_v23  ;;  %5017 = vmatpush1.bf16.msra.mxu1 %v12184_v61  ;;  %v12195_v61 = vld [vmem:[#allocation10 + $0xde4] ss:$16 sps:$4 sm:$0xff]  }
 0x501   :  { %v11722_v1 = vpack.i.bf16 %v11446_v63, %v13849_v34  ;;  %v3769_v45 = vpop.f32.mrb[31].mxu1  ;;  %v13918_v46 = vpop.f32.mrb[47].mxu0  ;;  %7927 = vmatpush1.bf16.msra.mxu0 %v12187_v47 }
 0x502   :  { %v11718_v12 = vpack.i.bf16 %v3769_v45, %v13852_v4  ;;  %11671 = vxpose.xlu1.b32.cont [9/16] (narrow) %v11670_v48, 48  ;;  %11717 = vxpose.xlu0.b32.start [1/16] (narrow) %v11716_v44, 48  ;;  %v12192_v4 = vld [vmem:[#allocation10 + $0x204] ss:$16 sps:$4 sm:$0xff]  }
 0x503   :  { %5029 = vmatprep.subr.bf16.mxu1 %v12192_v4  ;;  %7928 = vmatprep.subr.bf16.mxu0 %v12195_v61 }
 0x506   :  { %11673 = vxpose.xlu1.b32.cont [10/16] (narrow) %v11672_v60, 48  ;;  %11719 = vxpose.xlu0.b32.cont [2/16] (narrow) %v11718_v12, 48  ;;  %v11449_v0 = vpop.f32.mrb[32].mxu1  ;;  %v13921_v17 = vpop.f32.mrb[48].mxu0  ;;  %v12193_v12 = vld [vmem:[#allocation10 + $0xde0] ss:$16 sps:$4 sm:$0xff]  }
 0x507   :  { %v11728_v34 = vpack.i.bf16 %v11449_v0, %v13855_v7  ;;  %v3782_v63 = vpop.f32.mrb[33].mxu1  ;;  %v13924_v42 = vpop.f32.mrb[49].mxu0  ;;  %7929 = vmatpush1.bf16.msra.mxu0 %v12193_v12 }
 0x508   :  { %v11724_v48 = vpack.i.bf16 %v3782_v63, %v13858_v9  ;;  %v11450_v59 = vpop.f32.mrb[34].mxu1  ;;  %v13927_v62 = vpop.f32.mrb[50].mxu0 }
 0x509   :  { %v11730_v60 = vpack.i.bf16 %v11450_v59, %v13861_v11  ;;  %v3785_v44 = vpop.f32.mrb[35].mxu1  ;;  %v13930_v45 = vpop.f32.mrb[51].mxu0 }
 0x50a   :  { %v11726_v7 = vpack.i.bf16 %v3785_v44, %v13864_v14  ;;  %11675 = vxpose.xlu1.b32.cont [11/16] (narrow) %v11674_v21, 48  ;;  %11721 = vxpose.xlu0.b32.cont [3/16] (narrow) %v11720_v27, 48 }
 0x50e   :  { %11677 = vxpose.xlu1.b32.cont [12/16] (narrow) %v11676_v50, 48  ;;  %11723 = vxpose.xlu0.b32.cont [4/16] (narrow) %v11722_v1, 48  ;;  %v13939_v9 = vpop.f32.mrb[36].mxu1  ;;  %v13941_v11 = vpop.f32.mrb[52].mxu0 }
 0x50f   :  { %v11736_v14 = vpack.i.bf16 %v13939_v9, %v13867_v28  ;;  %v3798_v16 = vpop.f32.mrb[37].mxu1  ;;  %v13945_v47 = vpop.f32.mrb[53].mxu0  ;;  %v12207_v28 = vld [vmem:[#allocation10 + $0xe04] ss:$16 sps:$4 sm:$0xff]  }
 0x510   :  { %v11732_v32 = vpack.i.bf16 %v3798_v16, %v13873_v31  ;;  %v11454_v19 = vpop.f32.mrb[38].mxu1  ;;  %v13948_v21 = vpop.f32.mrb[54].mxu0  ;;  %7941 = vmatprep.subr.bf16.mxu0 %v12207_v28 }
 0x511   :  { %v11738_v37 = vpack.i.bf16 %v11454_v19, %v13876_v51  ;;  %v3801_v52 = vpop.f32.mrb[39].mxu1  ;;  %v13951_v50 = vpop.f32.mrb[55].mxu0 }
 0x512   :  { %v11734_v27 = vpack.i.bf16 %v3801_v52, %v13882_v58  ;;  %11679 = vxpose.xlu1.b32.cont [13/16] (narrow) %v11678_v5, 48  ;;  %11725 = vxpose.xlu0.b32.cont [5/16] (narrow) %v11724_v48, 48 }
 0x516   :  { %11681 = vxpose.xlu1.b32.cont [14/16] (narrow) %v11680_v10, 48  ;;  %11727 = vxpose.xlu0.b32.cont [6/16] (narrow) %v11726_v7, 48  ;;  %v13960_v31 = vpop.f32.mrb[40].mxu1  ;;  %v13962_v51 = vpop.f32.mrb[56].mxu0 }
 0x517   :  { %v11744_v1 = vpack.i.bf16 %v13960_v31, %v13885_v33  ;;  %v3814_v58 = vpop.f32.mrb[41].mxu1  ;;  %v13966_v23 = vpop.f32.mrb[57].mxu0 }
 0x518   :  { %v11740_v54 = vpack.i.bf16 %v3814_v58, %v13891_v40  ;;  %v13969_v38 = vpop.f32.mrb[42].mxu1  ;;  %v13971_v5 = vpop.f32.mrb[58].mxu0  ;;  %v14277_v40 = vpack.i.bf16 %v13899_v35, %v13840_v56 }
 0x519   :  { %v11746_v57 = vpack.i.bf16 %v13969_v38, %v13897_v41  ;;  %v3817_v8 = vpop.f32.mrb[43].mxu1  ;;  %v13975_v10 = vpop.f32.mrb[59].mxu0 }
 0x51a   :  { %v11742_v0 = vpack.i.bf16 %v3817_v8, %v13903_v6  ;;  %11683 = vxpose.xlu1.b32.cont [15/16] (narrow) %v11682_v55, 48  ;;  %11729 = vxpose.xlu0.b32.cont [7/16] (narrow) %v11728_v34, 48 }
 0x51e   :  { %11685 = vxpose.xlu1.b32.end [16/16] (narrow) %v14277_v40, 48  ;;  %11731 = vxpose.xlu0.b32.cont [8/16] (narrow) %v11730_v60, 48  ;;  %v11461_v63 = vpop.f32.mrb[44].mxu1  ;;  %v13984_v4 = vpop.f32.mrb[60].mxu0 }
 0x51f   :  { %v11844_v48 = vpack.i.bf16 %v11461_v63, %v13909_v25  ;;  %v3830_v59 = vpop.f32.mrb[45].mxu1  ;;  %v13987_v44 = vpop.f32.mrb[61].mxu0 }
 0x520   :  { %v11840_v6 = vpack.i.bf16 %v3830_v59, %v13912_v22  ;;  %v11462_v7 = vpop.f32.mrb[46].mxu1  ;;  %v13990_v12 = vpop.f32.mrb[62].mxu0 }
 0x521   :  { %v11846_v53 = vpack.i.bf16 %v11462_v7, %v13915_v30  ;;  %v3833_v2 = vpop.f32.mrb[47].mxu1  ;;  %v13993_v55 = vpop.f32.mrb[63].mxu0 }
 0x522   :  { %v11842_v56 = vpack.i.bf16 %v3833_v2, %v13918_v46  ;;  %11733 = vxpose.xlu0.b32.cont [9/16] (narrow) %v11732_v32, 48  ;;  %11841 = vxpose.xlu1.b32.start [1/16] (narrow) %v11840_v6, 48 }
 0x526   :  { %11735 = vxpose.xlu0.b32.cont [10/16] (narrow) %v11734_v27, 48  ;;  %v11465_v35 = vpop.f32.mrb[48].mxu1  ;;  %11843 = vxpose.xlu1.b32.cont [2/16] (narrow) %v11842_v56, 48  ;;  %v13996_v25 = vpop.f32.mrb[64].mxu0 }
 0x527   :  { %v11852_v34 = vpack.i.bf16 %v11465_v35, %v13921_v17  ;;  %v3846_v22 = vpop.f32.mrb[49].mxu1  ;;  %v13999_v60 = vpop.f32.mrb[65].mxu0 }
 0x528   :  { %v11848_v61 = vpack.i.bf16 %v3846_v22, %v13924_v42  ;;  %v11466_v30 = vpop.f32.mrb[50].mxu1  ;;  %v14002_v9 = vpop.f32.mrb[66].mxu0 }
 0x529   :  { %v11854_v16 = vpack.i.bf16 %v11466_v30, %v13927_v62  ;;  %v3849_v46 = vpop.f32.mrb[51].mxu1  ;;  %v14005_v32 = vpop.f32.mrb[67].mxu0 }
 0x52a   :  { %v11850_v19 = vpack.i.bf16 %v3849_v46, %v13930_v45  ;;  %11737 = vxpose.xlu0.b32.cont [11/16] (narrow) %v11736_v14, 48  ;;  %11845 = vxpose.xlu1.b32.cont [3/16] (narrow) %v11844_v48, 48 }
 0x52e   :  { %11739 = vxpose.xlu0.b32.cont [12/16] (narrow) %v11738_v37, 48  ;;  %v11469_v52 = vpop.f32.mrb[52].mxu1  ;;  %11847 = vxpose.xlu1.b32.cont [4/16] (narrow) %v11846_v53, 48  ;;  %v14008_v17 = vpop.f32.mrb[68].mxu0 }
 0x52f   :  { %v11860_v27 = vpack.i.bf16 %v11469_v52, %v13941_v11  ;;  %v3862_v42 = vpop.f32.mrb[53].mxu1  ;;  %v14011_v28 = vpop.f32.mrb[69].mxu0 }
 0x530   :  { %v11856_v58 = vpack.i.bf16 %v3862_v42, %v13945_v47  ;;  %v11470_v62 = vpop.f32.mrb[54].mxu1  ;;  %v14014_v8 = vpop.f32.mrb[70].mxu0 }
 0x531   :  { %v11862_v40 = vpack.i.bf16 %v11470_v62, %v13948_v21  ;;  %v3865_v45 = vpop.f32.mrb[55].mxu1  ;;  %v14017_v14 = vpop.f32.mrb[71].mxu0 }
 0x532   :  { %v11858_v37 = vpack.i.bf16 %v3865_v45, %v13951_v50  ;;  %11741 = vxpose.xlu0.b32.cont [13/16] (narrow) %v11740_v54, 48  ;;  %11849 = vxpose.xlu1.b32.cont [5/16] (narrow) %v11848_v61, 48 }
 0x536   :  { %11743 = vxpose.xlu0.b32.cont [14/16] (narrow) %v11742_v0, 48  ;;  %v11473_v63 = vpop.f32.mrb[56].mxu1  ;;  %11851 = vxpose.xlu1.b32.cont [6/16] (narrow) %v11850_v19, 48  ;;  %v14020_v11 = vpop.f32.mrb[72].mxu0 }
 0x537   :  { %v11868_v48 = vpack.i.bf16 %v11473_v63, %v13962_v51  ;;  %v3878_v47 = vpop.f32.mrb[57].mxu1  ;;  %v14023_v59 = vpop.f32.mrb[73].mxu0 }
 0x538   :  { %v11864_v6 = vpack.i.bf16 %v3878_v47, %v13966_v23  ;;  %v11474_v21 = vpop.f32.mrb[58].mxu1  ;;  %v14026_v7 = vpop.f32.mrb[74].mxu0 }
 0x539   :  { %v11870_v53 = vpack.i.bf16 %v11474_v21, %v13971_v5  ;;  %v3881_v50 = vpop.f32.mrb[59].mxu1  ;;  %v14029_v54 = vpop.f32.mrb[75].mxu0 }
 0x53a   :  { %v11866_v0 = vpack.i.bf16 %v3881_v50, %v13975_v10  ;;  %11745 = vxpose.xlu0.b32.cont [15/16] (narrow) %v11744_v1, 48  ;;  %11853 = vxpose.xlu1.b32.cont [7/16] (narrow) %v11852_v34, 48 }
 0x53e   :  { %11747 = vxpose.xlu0.b32.end [16/16] (narrow) %v11746_v57, 48  ;;  %v11477_v51 = vpop.f32.mrb[60].mxu1  ;;  %11855 = vxpose.xlu1.b32.cont [8/16] (narrow) %v11854_v16, 48 }
 0x53f   :  { %v11782_v23 = vpack.i.bf16 %v11477_v51, %v13984_v4  ;;  %v3894_v2 = vpop.f32.mrb[61].mxu1 }
 0x540   :  { %v11778_v5 = vpack.i.bf16 %v3894_v2, %v13987_v44  ;;  %v11478_v56 = vpop.f32.mrb[62].mxu1 }
 0x541   :  { %v11784_v35 = vpack.i.bf16 %v11478_v56, %v13990_v12  ;;  %v3897_v10 = vpop.f32.mrb[63].mxu1 }
 0x542   :  { %v11780_v22 = vpack.i.bf16 %v3897_v10, %v13993_v55  ;;  %11857 = vxpose.xlu1.b32.cont [9/16] (narrow) %v11856_v58, 48  ;;  %11779 = vxpose.xlu0.b32.start [1/16] (narrow) %v11778_v5, 48  ;;  %v12204_v5 = vld [vmem:[#allocation10 + $0x264] ss:$16 sps:$4 sm:$0xff]  }
 0x546   :  { %11859 = vxpose.xlu1.b32.cont [10/16] (narrow) %v11858_v37, 48  ;;  %11781 = vxpose.xlu0.b32.cont [2/16] (narrow) %v11780_v22, 48  ;;  %v11481_v33 = vpop.f32.mrb[64].mxu1  ;;  %v12202_v22 = vld [vmem:[#allocation10 + $0x260] ss:$16 sps:$4 sm:$0xff]  }
 0x547   :  { %v11790_v41 = vpack.i.bf16 %v11481_v33, %v13996_v25  ;;  %v3910_v31 = vpop.f32.mrb[65].mxu1 }
 0x548   :  { %v11786_v1 = vpack.i.bf16 %v3910_v31, %v13999_v60  ;;  %v11482_v38 = vpop.f32.mrb[66].mxu1  ;;  %v12210_v31 = vld [vmem:[#allocation10 + $0x284] ss:$16 sps:$4 sm:$0xff]  }
 0x549   :  { %v11792_v57 = vpack.i.bf16 %v11482_v38, %v14002_v9  ;;  %v3913_v4 = vpop.f32.mrb[67].mxu1 }
 0x54a   :  { %11861 = vxpose.xlu1.b32.cont [11/16] (narrow) %v11860_v27, 48  ;;  %11783 = vxpose.xlu0.b32.cont [3/16] (narrow) %v11782_v23, 48  ;;  %v11788_v44 = vpack.i.bf16 %v3913_v4, %v14005_v32  ;;  %v12199_v23 = vld [vmem:[#allocation10 + $0x240] ss:$16 sps:$4 sm:$0xff]  }
 0x54b   :  { %v12211_v4 = vld [vmem:[#allocation10 + $0xe20] ss:$16 sps:$4 sm:$0xff]  }
 0x54e   :  { %11863 = vxpose.xlu1.b32.cont [12/16] (narrow) %v11862_v40, 48  ;;  %11785 = vxpose.xlu0.b32.cont [4/16] (narrow) %v11784_v35, 48  ;;  %v11485_v12 = vpop.f32.mrb[68].mxu1 }
 0x54f   :  { %v11798_v55 = vpack.i.bf16 %v11485_v12, %v14008_v17  ;;  %v3926_v34 = vpop.f32.mrb[69].mxu1  ;;  %v12219_v12 = vld [vmem:[#allocation10 + $0xe44] ss:$16 sps:$4 sm:$0xff]  }
 0x550   :  { %v11794_v61 = vpack.i.bf16 %v3926_v34, %v14011_v28  ;;  %v11486_v25 = vpop.f32.mrb[70].mxu1  ;;  %v12214_v34 = vld [vmem:[#allocation10 + $0x2a0] ss:$16 sps:$4 sm:$0xff]  }
 0x551   :  { %v11800_v30 = vpack.i.bf16 %v11486_v25, %v14014_v8  ;;  %v3929_v60 = vpop.f32.mrb[71].mxu1  ;;  %v12222_v25 = vld [vmem:[#allocation10 + $0x2c4] ss:$16 sps:$4 sm:$0xff]  }
 0x552   :  { %11865 = vxpose.xlu1.b32.cont [13/16] (narrow) %v11864_v6, 48  ;;  %11787 = vxpose.xlu0.b32.cont [5/16] (narrow) %v11786_v1, 48  ;;  %v11796_v9 = vpack.i.bf16 %v3929_v60, %v14017_v14  ;;  %v12213_v1 = vld [vmem:[#allocation10 + $0xe24] ss:$16 sps:$4 sm:$0xff]   ;;  %v12220_v60 = vld [vmem:[#allocation10 + $0x2c0] ss:$16 sps:$4 sm:$0xff]  }
 0x556   :  { %11867 = vxpose.xlu1.b32.cont [14/16] (narrow) %v11866_v0, 48  ;;  %11789 = vxpose.xlu0.b32.cont [6/16] (narrow) %v11788_v44, 48  ;;  %v11489_v16 = vpop.f32.mrb[72].mxu1  ;;  %v12216_v44 = vld [vmem:[#allocation10 + $0x2a4] ss:$16 sps:$4 sm:$0xff]  }
 0x557   :  { %v11806_v46 = vpack.i.bf16 %v11489_v16, %v14020_v11  ;;  %v3942_v32 = vpop.f32.mrb[73].mxu1  ;;  %v12228_v16 = vld [vmem:[#allocation10 + $0x2e4] ss:$16 sps:$4 sm:$0xff]  }
 0x558   :  { %v11802_v19 = vpack.i.bf16 %v3942_v32, %v14023_v59  ;;  %v11490_v52 = vpop.f32.mrb[74].mxu1  ;;  %v12190_v59 = vld [vmem:[#allocation10 + $0x200] ss:$16 sps:$4 sm:$0xff]  }
 0x559   :  { %v11808_v17 = vpack.i.bf16 %v11490_v52, %v14026_v7  ;;  %v3945_v27 = vpop.f32.mrb[75].mxu1  ;;  %v12198_v7 = vld [vmem:[#allocation10 + $0x224] ss:$16 sps:$4 sm:$0xff]   ;;  %v12226_v32 = vld [vmem:[#allocation10 + $0x2e0] ss:$16 sps:$4 sm:$0xff]  }
 0x55a   :  { %11869 = vxpose.xlu1.b32.cont [15/16] (narrow) %v11868_v48, 48  ;;  %11791 = vxpose.xlu0.b32.cont [7/16] (narrow) %v11790_v41, 48  ;;  %v11804_v42 = vpack.i.bf16 %v3945_v27, %v14029_v54  ;;  %v12201_v54 = vld [vmem:[#allocation10 + $0x244] ss:$16 sps:$4 sm:$0xff]   ;;  %v12205_v41 = vld [vmem:[#allocation10 + $0xe00] ss:$16 sps:$4 sm:$0xff]  }
 0x55b   :  { %v12234_v52 = vld [vmem:[#allocation10 + $0x304] ss:$16 sps:$4 sm:$0xff]  }
 0x55e   :  { %11871 = vxpose.xlu1.b32.end [16/16] (narrow) %v11870_v53, 48  ;;  %11793 = vxpose.xlu0.b32.cont [8/16] (narrow) %v11792_v57, 48  ;;  %v12196_v53 = vld [vmem:[#allocation10 + $0x220] ss:$16 sps:$4 sm:$0xff]  }
 0x55f   :  { %v12208_v57 = vld [vmem:[#allocation10 + $0x280] ss:$16 sps:$4 sm:$0xff]  }
 0x562   :  { %11795 = vxpose.xlu0.b32.cont [9/16] (narrow) %v11794_v61, 48  ;;  %v11686_v28 = vpop.trf.xlu1  ;;  %v12217_v61 = vld [vmem:[#allocation10 + $0xe40] ss:$16 sps:$4 sm:$0xff]  }
 0x563   :  { %v11690_v14 = vunpack.i.h.bf16 %v11686_v28  ;;  %v11687_v37 = vunpack.i.l.bf16 %v11686_v28  ;;  %v12235_v28 = vld [vmem:[#allocation10 + $0xea0] ss:$16 sps:$4 sm:$0xff]  }
 0x565   :  { %v14062_v47 = vpack.c.bf16 %v11690_v14, %v11687_v37  ;;  %v12243_v14 = vld [vmem:[#allocation10 + $0xec4] ss:$16 sps:$4 sm:$0xff]  }
 0x566   :  { %11797 = vxpose.xlu0.b32.cont [10/16] (narrow) %v11796_v9, 48  ;;  %v14054_v58 = vpop.trf.xlu1  ;;  %v12223_v9 = vld [vmem:[#allocation10 + $0xe60] ss:$16 sps:$4 sm:$0xff]  }
 0x56a   :  { %11799 = vxpose.xlu0.b32.cont [11/16] (narrow) %v11798_v55, 48  ;;  %v14056_v62 = vpop.trf.xlu1 }
 0x56e   :  { %11801 = vxpose.xlu0.b32.cont [12/16] (narrow) %v11800_v30, 48  ;;  %v11701_v8 = vpop.trf.xlu1  ;;  %v12225_v30 = vld [vmem:[#allocation10 + $0xe64] ss:$16 sps:$4 sm:$0xff]  }
 0x56f   :  { %v11705_v0 = vunpack.i.h.bf16 %v11701_v8  ;;  %v11702_v51 = vunpack.i.l.bf16 %v11701_v8  ;;  %v12240_v8 = vld [vmem:[#allocation10 + $0x324] ss:$16 sps:$4 sm:$0xff]  }
 0x571   :  { %v14072_v10 = vpack.c.bf16 %v11705_v0, %v11702_v51  ;;  %v12252_v0 = vld [vmem:[#allocation10 + $0x364] ss:$16 sps:$4 sm:$0xff]  }
 0x572   :  { %11803 = vxpose.xlu0.b32.cont [13/16] (narrow) %v11802_v19, 48  ;;  %v14058_v40 = vpop.trf.xlu1  ;;  %v12229_v19 = vld [vmem:[#allocation10 + $0xe80] ss:$16 sps:$4 sm:$0xff]   ;;  %v12255_v51 = vld [vmem:[#allocation10 + $0xf04] ss:$16 sps:$4 sm:$0xff]  }
 0x576   :  { %11805 = vxpose.xlu0.b32.cont [14/16] (narrow) %v11804_v42, 48  ;;  %v14060_v45 = vpop.trf.xlu1  ;;  %v12232_v42 = vld [vmem:[#allocation10 + $0x300] ss:$16 sps:$4 sm:$0xff]  }
 0x57a   :  { %11807 = vxpose.xlu0.b32.cont [15/16] (narrow) %v11806_v46, 48  ;;  %v12231_v46 = vld [vmem:[#allocation10 + $0xe84] ss:$16 sps:$4 sm:$0xff]  }
 0x57e   :  { %11809 = vxpose.xlu0.b32.end [16/16] (narrow) %v11808_v17, 48  ;;  %v12237_v17 = vld [vmem:[#allocation10 + $0xea4] ss:$16 sps:$4 sm:$0xff]  }
 0x582   :  { %v11748_v63 = vpop.trf.xlu0 }
 0x583   :  { %v11752_v11 = vunpack.i.h.bf16 %v11748_v63  ;;  %v11749_v48 = vunpack.i.l.bf16 %v11748_v63  ;;  %v12238_v63 = vld [vmem:[#allocation10 + $0x320] ss:$16 sps:$4 sm:$0xff]  }
 0x585   :  { %v14064_v6 = vpack.c.bf16 %v11752_v11, %v11749_v48  ;;  %v12241_v11 = vld [vmem:[#allocation10 + $0xec0] ss:$16 sps:$4 sm:$0xff]   ;;  %v12246_v48 = vld [vmem:[#allocation10 + $0x344] ss:$16 sps:$4 sm:$0xff]  }
 0x586   :  { %v14066_v21 = vpop.trf.xlu0 }
 0x587   :  { %5018 = vmatprep.mubr.bf16.mxu1 %v14064_v6 }
 0x588   :  { %5019 = vmatmul.mubr.bf16.vlgmr.msra.gmra.mrb[76].mxu1 %v14062_v47 }
 0x589   :  { %5030 = vmatpush1.bf16.msra.mxu1 %v12190_v59  ;;  %v12249_v59 = vld [vmem:[#allocation10 + $0xee4] ss:$16 sps:$4 sm:$0xff]  }
 0x58a   :  { %v14070_v50 = vpop.trf.xlu0  ;;  %5031 = vmatprep.subr.bf16.mxu1 %v12198_v7 }
 0x58d   :  { %5032 = vmatpush1.bf16.msra.mxu1 %v12196_v53  ;;  %v12244_v53 = vld [vmem:[#allocation10 + $0x340] ss:$16 sps:$4 sm:$0xff]  }
 0x58e   :  { %v11763_v2 = vpop.trf.xlu0  ;;  %5033 = vmatprep.subr.bf16.mxu1 %v12201_v54  ;;  %v12247_v54 = vld [vmem:[#allocation10 + $0xee0] ss:$16 sps:$4 sm:$0xff]  }
 0x58f   :  { %v11767_v56 = vunpack.i.h.bf16 %v11763_v2  ;;  %v11764_v35 = vunpack.i.l.bf16 %v11763_v2  ;;  %v12250_v2 = vld [vmem:[#allocation10 + $0x360] ss:$16 sps:$4 sm:$0xff]  }
 0x591   :  { %5034 = vmatpush1.bf16.msra.mxu1 %v12199_v23  ;;  %v14074_v33 = vpack.c.bf16 %v11767_v56, %v11764_v35  ;;  %v12258_v56 = vld [vmem:[#allocation10 + $0x384] ss:$16 sps:$4 sm:$0xff]  }
 0x592   :  { %5035 = vmatprep.subr.bf16.mxu1 %v12204_v5  ;;  %v14076_v38 = vpop.trf.xlu0  ;;  %v12253_v5 = vld [vmem:[#allocation10 + $0xf00] ss:$16 sps:$4 sm:$0xff]   ;;  %v12261_v35 = vld [vmem:[#allocation10 + $0xf24] ss:$16 sps:$4 sm:$0xff]  }
 0x593   :  { %7930 = vmatprep.mubr.bf16.mxu0 %v14074_v33 }
 0x594   :  { %7931 = vmatmul.mubr.bf16.vlgmr.msra.gmra.mrb[76].mxu0 %v14072_v10 }
 0x595   :  { %5036 = vmatpush1.bf16.msra.mxu1 %v12202_v22  ;;  %7942 = vmatpush1.bf16.msra.mxu0 %v12205_v41  ;;  %v12256_v22 = vld [vmem:[#allocation10 + $0x380] ss:$16 sps:$4 sm:$0xff]  }
 0x596   :  { %5037 = vmatprep.subr.bf16.mxu1 %v12210_v31  ;;  %7943 = vmatprep.subr.bf16.mxu0 %v12213_v1  ;;  %v14080_v55 = vpop.trf.xlu0  ;;  %v12259_v41 = vld [vmem:[#allocation10 + $0xf20] ss:$16 sps:$4 sm:$0xff]   ;;  %v12264_v31 = vld [vmem:[#allocation10 + $0x3a4] ss:$16 sps:$4 sm:$0xff]  }
 0x597   :  { %v12267_v1 = vld [vmem:[#allocation10 + $0xf44] ss:$16 sps:$4 sm:$0xff]  }
 0x599   :  { %5038 = vmatpush1.bf16.msra.mxu1 %v12208_v57  ;;  %7944 = vmatpush1.bf16.msra.mxu0 %v12211_v4  ;;  %v12262_v57 = vld [vmem:[#allocation10 + $0x3a0] ss:$16 sps:$4 sm:$0xff]  }
 0x59a   :  { %5039 = vmatprep.subr.bf16.mxu1 %v12216_v44  ;;  %7945 = vmatprep.subr.bf16.mxu0 %v12219_v12  ;;  %v12265_v4 = vld [vmem:[#allocation10 + $0xf40] ss:$16 sps:$4 sm:$0xff]   ;;  %v12270_v44 = vld [vmem:[#allocation10 + $0x3c4] ss:$16 sps:$4 sm:$0xff]  }
 0x59b   :  { %v12273_v12 = vld [vmem:[#allocation10 + $0xf64] ss:$16 sps:$4 sm:$0xff]  }
 0x59d   :  { %5040 = vmatpush1.bf16.msra.mxu1 %v12214_v34  ;;  %7946 = vmatpush1.bf16.msra.mxu0 %v12217_v61  ;;  %v12268_v34 = vld [vmem:[#allocation10 + $0x3c0] ss:$16 sps:$4 sm:$0xff]  }
 0x59e   :  { %5041 = vmatprep.subr.bf16.mxu1 %v12222_v25  ;;  %7947 = vmatprep.subr.bf16.mxu0 %v12225_v30  ;;  %v12271_v61 = vld [vmem:[#allocation10 + $0xf60] ss:$16 sps:$4 sm:$0xff]   ;;  %v12276_v25 = vld [vmem:[#allocation10 + $0x3e4] ss:$16 sps:$4 sm:$0xff]  }
 0x59f   :  { %v12279_v30 = vld [vmem:[#allocation10 + $0xf84] ss:$16 sps:$4 sm:$0xff]  }
 0x5a1   :  { %5042 = vmatpush1.bf16.msra.mxu1 %v12220_v60  ;;  %7948 = vmatpush1.bf16.msra.mxu0 %v12223_v9 }
 0x5a2   :  { %5043 = vmatprep.subr.bf16.mxu1 %v12228_v16  ;;  %7949 = vmatprep.subr.bf16.mxu0 %v12231_v46  ;;  %v14082_v27 = vpop.trf.xlu1  ;;  %v12274_v16 = vld [vmem:[#allocation10 + $0x3e0] ss:$16 sps:$4 sm:$0xff]  }
 0x5a3   :  { %v11876_v60 = vunpack.i.h.bf16 %v14082_v27  ;;  %v11873_v9 = vunpack.i.l.bf16 %v14082_v27  ;;  %v12277_v46 = vld [vmem:[#allocation10 + $0xf80] ss:$16 sps:$4 sm:$0xff]  }
 0x5a5   :  { %5044 = vmatpush1.bf16.msra.mxu1 %v12226_v32  ;;  %7950 = vmatpush1.bf16.msra.mxu0 %v12229_v19  ;;  %v12282_v19 = vld [vmem:[#allocation10 + $0xc] ss:$16 sps:$4 sm:$0xff]  }
 0x5a6   :  { %5045 = vmatprep.subr.bf16.mxu1 %v12234_v52  ;;  %7951 = vmatprep.subr.bf16.mxu0 %v12237_v17  ;;  %v14084_v37 = vpop.trf.xlu1  ;;  %v12285_v52 = vld [vmem:[#allocation10 + $0xfa4] ss:$16 sps:$4 sm:$0xff]  }
 0x5a9   :  { %5046 = vmatpush1.bf16.msra.mxu1 %v12232_v42  ;;  %7952 = vmatpush1.bf16.msra.mxu0 %v12235_v28  ;;  %v14092_v28 = vpack.c.bf16 %v11876_v60, %v11873_v9  ;;  %v12315_v60 = vld [vmem:[#allocation10 + $0xc4c] ss:$16 sps:$4 sm:$0xff]   ;;  %v12310_v9 = vld [vmem:[#allocation10 + $0xa8] ss:$16 sps:$4 sm:$0xff]  }
 0x5aa   :  { %5047 = vmatprep.subr.bf16.mxu1 %v12240_v8  ;;  %7953 = vmatprep.subr.bf16.mxu0 %v12243_v14  ;;  %v14086_v7 = vpop.trf.xlu1  ;;  %v12280_v14 = vld [vmem:[#allocation10 + $0x8] ss:$16 sps:$4 sm:$0xff]  }
 0x5ad   :  { %5048 = vmatpush1.bf16.msra.mxu1 %v12238_v63  ;;  %7954 = vmatpush1.bf16.msra.mxu0 %v12241_v11  ;;  %v12283_v63 = vld [vmem:[#allocation10 + $0xfa0] ss:$16 sps:$4 sm:$0xff]   ;;  %v12288_v11 = vld [vmem:[#allocation10 + $0x2c] ss:$16 sps:$4 sm:$0xff]  }
 0x5ae   :  { %5049 = vmatprep.subr.bf16.mxu1 %v12246_v48  ;;  %7955 = vmatprep.subr.bf16.mxu0 %v12249_v59  ;;  %v14088_v23 = vpop.trf.xlu1  ;;  %v12291_v48 = vld [vmem:[#allocation10 + $0xfc4] ss:$16 sps:$4 sm:$0xff]   ;;  %v12286_v59 = vld [vmem:[#allocation10 + $0x28] ss:$16 sps:$4 sm:$0xff]  }
 0x5b1   :  { %5050 = vmatpush1.bf16.msra.mxu1 %v12244_v53  ;;  %7956 = vmatpush1.bf16.msra.mxu0 %v12247_v54  ;;  %v12289_v53 = vld [vmem:[#allocation10 + $0xfc0] ss:$16 sps:$4 sm:$0xff]  }
 0x5b2   :  { %5051 = vmatprep.subr.bf16.mxu1 %v12252_v0  ;;  %7957 = vmatprep.subr.bf16.mxu0 %v12255_v51  ;;  %v12294_v0 = vld [vmem:[#allocation10 + $0x4c] ss:$16 sps:$4 sm:$0xff]   ;;  %v12297_v51 = vld [vmem:[#allocation10 + $0xfe4] ss:$16 sps:$4 sm:$0xff]  }
 0x5b5   :  { %5052 = vmatpush1.bf16.msra.mxu1 %v12250_v2  ;;  %7958 = vmatpush1.bf16.msra.mxu0 %v12253_v5  ;;  %v11891_v2 = vunpack.i.h.bf16 %v14088_v23  ;;  %v11888_v5 = vunpack.i.l.bf16 %v14088_v23  ;;  %v12306_v23 = vld [vmem:[#allocation10 + $0x8c] ss:$16 sps:$4 sm:$0xff]  }
 0x5b6   :  { %5053 = vmatprep.subr.bf16.mxu1 %v12258_v56  ;;  %7959 = vmatprep.subr.bf16.mxu0 %v12261_v35  ;;  %v12292_v56 = vld [vmem:[#allocation10 + $0x48] ss:$16 sps:$4 sm:$0xff]   ;;  %v12295_v35 = vld [vmem:[#allocation10 + $0xfe0] ss:$16 sps:$4 sm:$0xff]  }
 0x5b9   :  { %5054 = vmatpush1.bf16.msra.mxu1 %v12256_v22  ;;  %7960 = vmatpush1.bf16.msra.mxu0 %v12259_v41  ;;  %v12300_v41 = vld [vmem:[#allocation10 + $0x6c] ss:$16 sps:$4 sm:$0xff]  }
 0x5ba   :  { %5055 = vmatprep.subr.bf16.mxu1 %v12264_v31  ;;  %7961 = vmatprep.subr.bf16.mxu0 %v12267_v1  ;;  %v12303_v31 = vld [vmem:[#allocation10 + $0xc0c] ss:$16 sps:$4 sm:$0xff]  }
 0x5bd   :  { %5056 = vmatpush1.bf16.msra.mxu1 %v12262_v57  ;;  %7962 = vmatpush1.bf16.msra.mxu0 %v12265_v4  ;;  %v14105_v57 = vpack.c.bf16 %v11891_v2, %v11888_v5  ;;  %v12298_v4 = vld [vmem:[#allocation10 + $0x68] ss:$16 sps:$4 sm:$0xff]   ;;  %v12342_v5 = vld [vmem:[#allocation10 + $0x14c] ss:$16 sps:$4 sm:$0xff]  }
 0x5be   :  { %5057 = vmatprep.subr.bf16.mxu1 %v12270_v44  ;;  %7963 = vmatprep.subr.bf16.mxu0 %v12273_v12  ;;  %v12301_v12 = vld [vmem:[#allocation10 + $0xc08] ss:$16 sps:$4 sm:$0xff]  }
 0x5bf   :  { %v12337_v2 = vld [vmem:[#allocation10 + $0xcc8] ss:$16 sps:$4 sm:$0xff]  }
 0x5c1   :  { %5058 = vmatpush1.bf16.msra.mxu1 %v12268_v34  ;;  %7964 = vmatpush1.bf16.msra.mxu0 %v12271_v61  ;;  %v12309_v34 = vld [vmem:[#allocation10 + $0xc2c] ss:$16 sps:$4 sm:$0xff]   ;;  %v12304_v61 = vld [vmem:[#allocation10 + $0x88] ss:$16 sps:$4 sm:$0xff]  }
 0x5c2   :  { %v11810_v32 = vpop.trf.xlu0  ;;  %5059 = vmatprep.subr.bf16.mxu1 %v12276_v25  ;;  %7965 = vmatprep.subr.bf16.mxu0 %v12279_v30  ;;  %v12307_v25 = vld [vmem:[#allocation10 + $0xc28] ss:$16 sps:$4 sm:$0xff]   ;;  %v12312_v30 = vld [vmem:[#allocation10 + $0xac] ss:$16 sps:$4 sm:$0xff]  }
 0x5c3   :  { %v11814_v17 = vunpack.i.h.bf16 %v11810_v32  ;;  %v11811_v42 = vunpack.i.l.bf16 %v11810_v32  ;;  %v12321_v32 = vld [vmem:[#allocation10 + $0xc6c] ss:$16 sps:$4 sm:$0xff]  }
 0x5c5   :  { %5060 = vmatpush1.bf16.msra.mxu1 %v12274_v16  ;;  %7966 = vmatpush1.bf16.msra.mxu0 %v12277_v46  ;;  %v14094_v8 = vpack.c.bf16 %v11814_v17, %v11811_v42  ;;  %v12313_v16 = vld [vmem:[#allocation10 + $0xc48] ss:$16 sps:$4 sm:$0xff]   ;;  %v12318_v46 = vld [vmem:[#allocation10 + $0xcc] ss:$16 sps:$4 sm:$0xff]  }
 0x5c6   :  { %v14096_v27 = vpop.trf.xlu0  ;;  %5072 = vmatprep.subr.bf16.mxu1 %v12282_v19  ;;  %7967 = vmatprep.subr.bf16.mxu0 %v12285_v52  ;;  %v12316_v19 = vld [vmem:[#allocation10 + $0xc8] ss:$16 sps:$4 sm:$0xff]   ;;  %v12324_v17 = vld [vmem:[#allocation10 + $0xec] ss:$16 sps:$4 sm:$0xff]  }
 0x5c7   :  { %5061 = vmatprep.mubr.bf16.mxu1 %v14094_v8  ;;  %v12319_v52 = vld [vmem:[#allocation10 + $0xc68] ss:$16 sps:$4 sm:$0xff]  }
 0x5c8   :  { %5062 = vmatmul.mubr.bf16.vlgmr.msra.gmra.mrb[76].mxu1 %v14092_v28  ;;  %v12322_v42 = vld [vmem:[#allocation10 + $0xe8] ss:$16 sps:$4 sm:$0xff]  }
 0x5c9   :  { %5073 = vmatpush1.bf16.msra.mxu1 %v12280_v14  ;;  %7968 = vmatpush1.bf16.msra.mxu0 %v12283_v63  ;;  %v12325_v14 = vld [vmem:[#allocation10 + $0xc88] ss:$16 sps:$4 sm:$0xff]   ;;  %v12330_v63 = vld [vmem:[#allocation10 + $0x10c] ss:$16 sps:$4 sm:$0xff]  }
 0x5ca   :  { %5104 = vmatprep.mubr.bf16.mxu1 %v14064_v6  ;;  %v14101_v54 = vpop.trf.xlu0  ;;  %5074 = vmatprep.subr.bf16.mxu1 %v12288_v11  ;;  %v12333_v11 = vld [vmem:[#allocation10 + $0xcac] ss:$16 sps:$4 sm:$0xff]  }
 0x5cb   :  { %7969 = vmatprep.subr.bf16.mxu0 %v12291_v48  ;;  %v12328_v48 = vld [vmem:[#allocation10 + $0x108] ss:$16 sps:$4 sm:$0xff]  }
 0x5cd   :  { %5075 = vmatpush1.bf16.msra.mxu1 %v12286_v59  ;;  %7970 = vmatpush1.bf16.msra.mxu0 %v12289_v53  ;;  %v12331_v59 = vld [vmem:[#allocation10 + $0xca8] ss:$16 sps:$4 sm:$0xff]   ;;  %v12336_v53 = vld [vmem:[#allocation10 + $0x12c] ss:$16 sps:$4 sm:$0xff]  }
 0x5ce   :  { %v11825_v22 = vpop.trf.xlu0  ;;  %5076 = vmatprep.subr.bf16.mxu1 %v12294_v0  ;;  %7971 = vmatprep.subr.bf16.mxu0 %v12297_v51  ;;  %v12339_v0 = vld [vmem:[#allocation10 + $0xccc] ss:$16 sps:$4 sm:$0xff]   ;;  %v12334_v51 = vld [vmem:[#allocation10 + $0x128] ss:$16 sps:$4 sm:$0xff]  }
 0x5cf   :  { %v11829_v6 = vunpack.i.h.bf16 %v11825_v22  ;;  %v11826_v1 = vunpack.i.l.bf16 %v11825_v22  ;;  %v12343_v22 = vld [vmem:[#allocation10 + $0xce8] ss:$16 sps:$4 sm:$0xff]  }
 0x5d1   :  { %5077 = vmatpush1.bf16.msra.mxu1 %v12292_v56  ;;  %7972 = vmatpush1.bf16.msra.mxu0 %v12295_v35  ;;  %v14107_v44 = vpack.c.bf16 %v11829_v6, %v11826_v1  ;;  %v12345_v56 = vld [vmem:[#allocation10 + $0xcec] ss:$16 sps:$4 sm:$0xff]   ;;  %v12340_v35 = vld [vmem:[#allocation10 + $0x148] ss:$16 sps:$4 sm:$0xff]  }
 0x5d2   :  { %5078 = vmatprep.subr.bf16.mxu1 %v12300_v41  ;;  %7984 = vmatprep.subr.bf16.mxu0 %v12303_v31  ;;  %v12348_v41 = vld [vmem:[#allocation10 + $0x16c] ss:$16 sps:$4 sm:$0xff]   ;;  %v12346_v6 = vld [vmem:[#allocation10 + $0x168] ss:$16 sps:$4 sm:$0xff]  }
 0x5d3   :  { %7973 = vmatprep.mubr.bf16.mxu0 %v14107_v44  ;;  %v12351_v31 = vld [vmem:[#allocation10 + $0xd0c] ss:$16 sps:$4 sm:$0xff]   ;;  %v12349_v1 = vld [vmem:[#allocation10 + $0xd08] ss:$16 sps:$4 sm:$0xff]  }
 0x5d4   :  { %7974 = vmatmul.mubr.bf16.vlgmr.msra.gmra.mrb[76].mxu0 %v14105_v57 }
 0x5d5   :  { %5079 = vmatpush1.bf16.msra.mxu1 %v12298_v4  ;;  %7985 = vmatpush1.bf16.msra.mxu0 %v12301_v12  ;;  %v12354_v4 = vld [vmem:[#allocation10 + $0x18c] ss:$16 sps:$4 sm:$0xff]  }
 0x5d6   :  { %8016 = vmatprep.mubr.bf16.mxu0 %v14074_v33  ;;  %5080 = vmatprep.subr.bf16.mxu1 %v12306_v23  ;;  %v12327_v33 = vld [vmem:[#allocation10 + $0xc8c] ss:$16 sps:$4 sm:$0xff]   ;;  %v12352_v23 = vld [vmem:[#allocation10 + $0x188] ss:$16 sps:$4 sm:$0xff]  }
 0x5d7   :  { %7986 = vmatprep.subr.bf16.mxu0 %v12309_v34  ;;  %v12357_v12 = vld [vmem:[#allocation10 + $0xd2c] ss:$16 sps:$4 sm:$0xff]   ;;  %v12355_v34 = vld [vmem:[#allocation10 + $0xd28] ss:$16 sps:$4 sm:$0xff]  }
 0x5d9   :  { %5081 = vmatpush1.bf16.msra.mxu1 %v12304_v61  ;;  %7987 = vmatpush1.bf16.msra.mxu0 %v12307_v25  ;;  %v12360_v61 = vld [vmem:[#allocation10 + $0x1ac] ss:$16 sps:$4 sm:$0xff]  }
 0x5da   :  { %5082 = vmatprep.subr.bf16.mxu1 %v12312_v30  ;;  %7988 = vmatprep.subr.bf16.mxu0 %v12315_v60  ;;  %v12363_v25 = vld [vmem:[#allocation10 + $0xd4c] ss:$16 sps:$4 sm:$0xff]   ;;  %v12358_v30 = vld [vmem:[#allocation10 + $0x1a8] ss:$16 sps:$4 sm:$0xff]  }
 0x5db   :  { %v12361_v60 = vld [vmem:[#allocation10 + $0xd48] ss:$16 sps:$4 sm:$0xff]  }
 0x5dd   :  { %5083 = vmatpush1.bf16.msra.mxu1 %v12310_v9  ;;  %7989 = vmatpush1.bf16.msra.mxu0 %v12313_v16  ;;  %v12366_v9 = vld [vmem:[#allocation10 + $0x1cc] ss:$16 sps:$4 sm:$0xff]  }
 0x5de   :  { %5084 = vmatprep.subr.bf16.mxu1 %v12318_v46  ;;  %7990 = vmatprep.subr.bf16.mxu0 %v12321_v32  ;;  %v12369_v16 = vld [vmem:[#allocation10 + $0xd6c] ss:$16 sps:$4 sm:$0xff]   ;;  %v12364_v46 = vld [vmem:[#allocation10 + $0x1c8] ss:$16 sps:$4 sm:$0xff]  }
 0x5df   :  { %v12367_v32 = vld [vmem:[#allocation10 + $0xd68] ss:$16 sps:$4 sm:$0xff]  }
 0x5e1   :  { %5085 = vmatpush1.bf16.msra.mxu1 %v12316_v19  ;;  %7991 = vmatpush1.bf16.msra.mxu0 %v12319_v52  ;;  %v12372_v19 = vld [vmem:[#allocation10 + $0x1ec] ss:$16 sps:$4 sm:$0xff]  }
 0x5e2   :  { %5086 = vmatprep.subr.bf16.mxu1 %v12324_v17  ;;  %7992 = vmatprep.subr.bf16.mxu0 %v12327_v33  ;;  %v12375_v52 = vld [vmem:[#allocation10 + $0xd8c] ss:$16 sps:$4 sm:$0xff]   ;;  %v12370_v17 = vld [vmem:[#allocation10 + $0x1e8] ss:$16 sps:$4 sm:$0xff]  }
 0x5e3   :  { %v12373_v33 = vld [vmem:[#allocation10 + $0xd88] ss:$16 sps:$4 sm:$0xff]  }
 0x5e5   :  { %5087 = vmatpush1.bf16.msra.mxu1 %v12322_v42  ;;  %7993 = vmatpush1.bf16.msra.mxu0 %v12325_v14  ;;  %v12378_v42 = vld [vmem:[#allocation10 + $0x20c] ss:$16 sps:$4 sm:$0xff]  }
 0x5e6   :  { %5088 = vmatprep.subr.bf16.mxu1 %v12330_v63  ;;  %7994 = vmatprep.subr.bf16.mxu0 %v12333_v11  ;;  %v12381_v14 = vld [vmem:[#allocation10 + $0xdac] ss:$16 sps:$4 sm:$0xff]   ;;  %v12376_v63 = vld [vmem:[#allocation10 + $0x208] ss:$16 sps:$4 sm:$0xff]  }
 0x5e7   :  { %v12379_v11 = vld [vmem:[#allocation10 + $0xda8] ss:$16 sps:$4 sm:$0xff]  }
 0x5e9   :  { %5089 = vmatpush1.bf16.msra.mxu1 %v12328_v48  ;;  %7995 = vmatpush1.bf16.msra.mxu0 %v12331_v59  ;;  %v12384_v48 = vld [vmem:[#allocation10 + $0x22c] ss:$16 sps:$4 sm:$0xff]  }
 0x5ea   :  { %5090 = vmatprep.subr.bf16.mxu1 %v12336_v53  ;;  %7996 = vmatprep.subr.bf16.mxu0 %v12339_v0  ;;  %v12387_v59 = vld [vmem:[#allocation10 + $0xdcc] ss:$16 sps:$4 sm:$0xff]   ;;  %v12382_v53 = vld [vmem:[#allocation10 + $0x228] ss:$16 sps:$4 sm:$0xff]  }
 0x5eb   :  { %v12385_v0 = vld [vmem:[#allocation10 + $0xdc8] ss:$16 sps:$4 sm:$0xff]  }
 0x5ed   :  { %5091 = vmatpush1.bf16.msra.mxu1 %v12334_v51  ;;  %7997 = vmatpush1.bf16.msra.mxu0 %v12337_v2  ;;  %v12390_v51 = vld [vmem:[#allocation10 + $0x24c] ss:$16 sps:$4 sm:$0xff]  }
 0x5ee   :  { %5092 = vmatprep.subr.bf16.mxu1 %v12342_v5  ;;  %7998 = vmatprep.subr.bf16.mxu0 %v12345_v56  ;;  %v12393_v2 = vld [vmem:[#allocation10 + $0xdec] ss:$16 sps:$4 sm:$0xff]   ;;  %v12388_v5 = vld [vmem:[#allocation10 + $0x248] ss:$16 sps:$4 sm:$0xff]  }
 0x5ef   :  { %v12391_v56 = vld [vmem:[#allocation10 + $0xde8] ss:$16 sps:$4 sm:$0xff]  }
 0x5f1   :  { %5093 = vmatpush1.bf16.msra.mxu1 %v12340_v35  ;;  %7999 = vmatpush1.bf16.msra.mxu0 %v12343_v22  ;;  %v12396_v35 = vld [vmem:[#allocation10 + $0x26c] ss:$16 sps:$4 sm:$0xff]  }
 0x5f2   :  { %5094 = vmatprep.subr.bf16.mxu1 %v12348_v41  ;;  %8000 = vmatprep.subr.bf16.mxu0 %v12351_v31  ;;  %v12399_v22 = vld [vmem:[#allocation10 + $0xe0c] ss:$16 sps:$4 sm:$0xff]  }
 0x5f3   :  { %v12402_v41 = vld [vmem:[#allocation10 + $0x28c] ss:$16 sps:$4 sm:$0xff]  }
 0x5f4   :  { %v12405_v31 = vld [vmem:[#allocation10 + $0xe2c] ss:$16 sps:$4 sm:$0xff]  }
 0x5f5   :  { %5095 = vmatpush1.bf16.msra.mxu1 %v12346_v6  ;;  %8001 = vmatpush1.bf16.msra.mxu0 %v12349_v1  ;;  %v12400_v6 = vld [vmem:[#allocation10 + $0x288] ss:$16 sps:$4 sm:$0xff]  }
 0x5f6   :  { %5096 = vmatprep.subr.bf16.mxu1 %v12354_v4  ;;  %8002 = vmatprep.subr.bf16.mxu0 %v12357_v12  ;;  %v12403_v1 = vld [vmem:[#allocation10 + $0xe28] ss:$16 sps:$4 sm:$0xff]   ;;  %v12408_v4 = vld [vmem:[#allocation10 + $0x2ac] ss:$16 sps:$4 sm:$0xff]  }
 0x5f7   :  { %v12411_v12 = vld [vmem:[#allocation10 + $0xe4c] ss:$16 sps:$4 sm:$0xff]  }
 0x5f9   :  { %5097 = vmatpush1.bf16.msra.mxu1 %v12352_v23  ;;  %8003 = vmatpush1.bf16.msra.mxu0 %v12355_v34  ;;  %v12406_v23 = vld [vmem:[#allocation10 + $0x2a8] ss:$16 sps:$4 sm:$0xff]  }
 0x5fa   :  { %5098 = vmatprep.subr.bf16.mxu1 %v12360_v61  ;;  %8004 = vmatprep.subr.bf16.mxu0 %v12363_v25  ;;  %v12409_v34 = vld [vmem:[#allocation10 + $0xe48] ss:$16 sps:$4 sm:$0xff]   ;;  %v12414_v61 = vld [vmem:[#allocation10 + $0x2cc] ss:$16 sps:$4 sm:$0xff]  }
 0x5fb   :  { %v12417_v25 = vld [vmem:[#allocation10 + $0xe6c] ss:$16 sps:$4 sm:$0xff]  }
 0x5fd   :  { %5099 = vmatpush1.bf16.msra.mxu1 %v12358_v30  ;;  %8005 = vmatpush1.bf16.msra.mxu0 %v12361_v60  ;;  %v12415_v30 = vld [vmem:[#allocation10 + $0xe68] ss:$16 sps:$4 sm:$0xff]   ;;  %v12420_v60 = vld [vmem:[#allocation10 + $0x2ec] ss:$16 sps:$4 sm:$0xff]  }
 0x5fe   :  { %5100 = vmatprep.subr.bf16.mxu1 %v12366_v9  ;;  %8006 = vmatprep.subr.bf16.mxu0 %v12369_v16  ;;  %v12418_v9 = vld [vmem:[#allocation10 + $0x2e8] ss:$16 sps:$4 sm:$0xff]  }
 0x5ff   :  { %v12421_v16 = vld [vmem:[#allocation10 + $0xe88] ss:$16 sps:$4 sm:$0xff]  }
 0x601   :  { %5101 = vmatpush1.bf16.msra.mxu1 %v12364_v46  ;;  %8007 = vmatpush1.bf16.msra.mxu0 %v12367_v32  ;;  %v12426_v46 = vld [vmem:[#allocation10 + $0x30c] ss:$16 sps:$4 sm:$0xff]  }
 0x602   :  { %5102 = vmatprep.subr.bf16.mxu1 %v12372_v19  ;;  %8008 = vmatprep.subr.bf16.mxu0 %v12375_v52  ;;  %v12429_v32 = vld [vmem:[#allocation10 + $0xeac] ss:$16 sps:$4 sm:$0xff]   ;;  %v12424_v19 = vld [vmem:[#allocation10 + $0x308] ss:$16 sps:$4 sm:$0xff]  }
 0x603   :  { %v12427_v52 = vld [vmem:[#allocation10 + $0xea8] ss:$16 sps:$4 sm:$0xff]  }
 0x605   :  { %5103 = vmatpush1.bf16.msra.mxu1 %v12370_v17  ;;  %8009 = vmatpush1.bf16.msra.mxu0 %v12373_v33  ;;  %v12432_v17 = vld [vmem:[#allocation10 + $0x32c] ss:$16 sps:$4 sm:$0xff]  }
 0x606   :  { %5115 = vmatprep.subr.bf16.mxu1 %v12378_v42  ;;  %8010 = vmatprep.subr.bf16.mxu0 %v12381_v14  ;;  %v12435_v33 = vld [vmem:[#allocation10 + $0xecc] ss:$16 sps:$4 sm:$0xff]   ;;  %v12430_v42 = vld [vmem:[#allocation10 + $0x328] ss:$16 sps:$4 sm:$0xff]  }
 0x607   :  { %v12433_v14 = vld [vmem:[#allocation10 + $0xec8] ss:$16 sps:$4 sm:$0xff]  }
 0x608   :  { %5105 = vmatmul.mubr.bf16.vlgmr.msra.gmra.mrb[80].mxu1 %v14062_v47  ;;  %v12394_v47 = vld [vmem:[#allocation10 + $0x268] ss:$16 sps:$4 sm:$0xff]  }
 0x609   :  { %5116 = vmatpush1.bf16.msra.mxu1 %v12376_v63  ;;  %5147 = vmatprep.mubr.bf16.mxu1 %v14094_v8  ;;  %v12397_v8 = vld [vmem:[#allocation10 + $0xe08] ss:$16 sps:$4 sm:$0xff]   ;;  %v12438_v63 = vld [vmem:[#allocation10 + $0x34c] ss:$16 sps:$4 sm:$0xff]  }
 0x60a   :  { %8011 = vmatpush1.bf16.msra.mxu0 %v12379_v11  ;;  %5117 = vmatprep.subr.bf16.mxu1 %v12384_v48  ;;  %v12441_v11 = vld [vmem:[#allocation10 + $0xeec] ss:$16 sps:$4 sm:$0xff]   ;;  %v12436_v48 = vld [vmem:[#allocation10 + $0x348] ss:$16 sps:$4 sm:$0xff]  }
 0x60b   :  { %8012 = vmatprep.subr.bf16.mxu0 %v12387_v59  ;;  %v12439_v59 = vld [vmem:[#allocation10 + $0xee8] ss:$16 sps:$4 sm:$0xff]  }
 0x60d   :  { %5118 = vmatpush1.bf16.msra.mxu1 %v12382_v53  ;;  %v12444_v53 = vld [vmem:[#allocation10 + $0x36c] ss:$16 sps:$4 sm:$0xff]  }
 0x60e   :  { %8013 = vmatpush1.bf16.msra.mxu0 %v12385_v0  ;;  %5119 = vmatprep.subr.bf16.mxu1 %v12390_v51  ;;  %v12447_v0 = vld [vmem:[#allocation10 + $0xf0c] ss:$16 sps:$4 sm:$0xff]   ;;  %v12442_v51 = vld [vmem:[#allocation10 + $0x368] ss:$16 sps:$4 sm:$0xff]  }
 0x60f   :  { %8014 = vmatprep.subr.bf16.mxu0 %v12393_v2  ;;  %v12445_v2 = vld [vmem:[#allocation10 + $0xf08] ss:$16 sps:$4 sm:$0xff]  }
 0x611   :  { %5120 = vmatpush1.bf16.msra.mxu1 %v12388_v5  ;;  %v12450_v5 = vld [vmem:[#allocation10 + $0x38c] ss:$16 sps:$4 sm:$0xff]  }
 0x612   :  { %8015 = vmatpush1.bf16.msra.mxu0 %v12391_v56  ;;  %5121 = vmatprep.subr.bf16.mxu1 %v12396_v35  ;;  %v12453_v56 = vld [vmem:[#allocation10 + $0xf2c] ss:$16 sps:$4 sm:$0xff]   ;;  %v12448_v35 = vld [vmem:[#allocation10 + $0x388] ss:$16 sps:$4 sm:$0xff]  }
 0x613   :  { %8027 = vmatprep.subr.bf16.mxu0 %v12399_v22  ;;  %v12451_v22 = vld [vmem:[#allocation10 + $0xf28] ss:$16 sps:$4 sm:$0xff]  }
 0x615   :  { %8017 = vmatmul.mubr.bf16.vlgmr.msra.gmra.mrb[80].mxu0 %v14072_v10  ;;  %5122 = vmatpush1.bf16.msra.mxu1 %v12394_v47  ;;  %v12412_v10 = vld [vmem:[#allocation10 + $0x2c8] ss:$16 sps:$4 sm:$0xff]   ;;  %v12456_v47 = vld [vmem:[#allocation10 + $0x3ac] ss:$16 sps:$4 sm:$0xff]  }
 0x616   :  { %8028 = vmatpush1.bf16.msra.mxu0 %v12397_v8  ;;  %8059 = vmatprep.mubr.bf16.mxu0 %v14107_v44  ;;  %v12423_v44 = vld [vmem:[#allocation10 + $0xe8c] ss:$16 sps:$4 sm:$0xff]  }
 0x617   :  { %5123 = vmatprep.subr.bf16.mxu1 %v12402_v41  ;;  %8029 = vmatprep.subr.bf16.mxu0 %v12405_v31  ;;  %v12459_v8 = vld [vmem:[#allocation10 + $0xf4c] ss:$16 sps:$4 sm:$0xff]   ;;  %v12454_v41 = vld [vmem:[#allocation10 + $0x3a8] ss:$16 sps:$4 sm:$0xff]  }
 0x618   :  { %v12457_v31 = vld [vmem:[#allocation10 + $0xf48] ss:$16 sps:$4 sm:$0xff]  }
 0x619   :  { %5124 = vmatpush1.bf16.msra.mxu1 %v12400_v6  ;;  %v12462_v6 = vld [vmem:[#allocation10 + $0x3cc] ss:$16 sps:$4 sm:$0xff]  }
 0x61a   :  { %8030 = vmatpush1.bf16.msra.mxu0 %v12403_v1  ;;  %5125 = vmatprep.subr.bf16.mxu1 %v12408_v4  ;;  %v12465_v1 = vld [vmem:[#allocation10 + $0xf6c] ss:$16 sps:$4 sm:$0xff]   ;;  %v12460_v4 = vld [vmem:[#allocation10 + $0x3c8] ss:$16 sps:$4 sm:$0xff]  }
 0x61b   :  { %8031 = vmatprep.subr.bf16.mxu0 %v12411_v12  ;;  %v12463_v12 = vld [vmem:[#allocation10 + $0xf68] ss:$16 sps:$4 sm:$0xff]  }
 0x61d   :  { %5126 = vmatpush1.bf16.msra.mxu1 %v12406_v23  ;;  %v12468_v23 = vld [vmem:[#allocation10 + $0x3ec] ss:$16 sps:$4 sm:$0xff]  }
 0x61e   :  { %8032 = vmatpush1.bf16.msra.mxu0 %v12409_v34  ;;  %5127 = vmatprep.subr.bf16.mxu1 %v12414_v61  ;;  %v12471_v34 = vld [vmem:[#allocation10 + $0xf8c] ss:$16 sps:$4 sm:$0xff]   ;;  %v12466_v61 = vld [vmem:[#allocation10 + $0x3e8] ss:$16 sps:$4 sm:$0xff]  }
 0x61f   :  { %8033 = vmatprep.subr.bf16.mxu0 %v12417_v25  ;;  %v12469_v25 = vld [vmem:[#allocation10 + $0xf88] ss:$16 sps:$4 sm:$0xff]  }
 0x621   :  { %5128 = vmatpush1.bf16.msra.mxu1 %v12412_v10  ;;  %v12474_v10 = vld [vmem:[#allocation10 + $0x404] ss:$16 sps:$4 sm:$0xff]  }
 0x622   :  { %8034 = vmatpush1.bf16.msra.mxu0 %v12415_v30  ;;  %5129 = vmatprep.subr.bf16.mxu1 %v12420_v60  ;;  %v11757_v30 = vunpack.i.h.bf16 %v14066_v21  ;;  %v11754_v60 = vunpack.i.l.bf16 %v14066_v21  ;;  %v12481_v21 = vld [vmem:[#allocation10 + $0xfc8] ss:$16 sps:$4 sm:$0xff]  }
 0x623   :  { %8035 = vmatprep.subr.bf16.mxu0 %v12423_v44  ;;  %v12477_v44 = vld [vmem:[#allocation10 + $0xfac] ss:$16 sps:$4 sm:$0xff]  }
 0x625   :  { %5130 = vmatpush1.bf16.msra.mxu1 %v12418_v9  ;;  %v12472_v9 = vld [vmem:[#allocation10 + $0x400] ss:$16 sps:$4 sm:$0xff]  }
 0x626   :  { %8036 = vmatpush1.bf16.msra.mxu0 %v12421_v16  ;;  %5131 = vmatprep.subr.bf16.mxu1 %v12426_v46  ;;  %v12475_v16 = vld [vmem:[#allocation10 + $0xfa8] ss:$16 sps:$4 sm:$0xff]   ;;  %v12480_v46 = vld [vmem:[#allocation10 + $0x424] ss:$16 sps:$4 sm:$0xff]  }
 0x627   :  { %8037 = vmatprep.subr.bf16.mxu0 %v12429_v32  ;;  %v14118_v32 = vpack.c.bf16 %v11757_v30, %v11754_v60  ;;  %v12523_v30 = vld [vmem:[#allocation10 + $0x10a0] ss:$16 sps:$4 sm:$0xff]   ;;  %v12528_v60 = vld [vmem:[#allocation10 + $0x524] ss:$16 sps:$4 sm:$0xff]  }
 0x629   :  { %5132 = vmatpush1.bf16.msra.mxu1 %v12424_v19  ;;  %v12483_v19 = vld [vmem:[#allocation10 + $0xfcc] ss:$16 sps:$4 sm:$0xff]  }
 0x62a   :  { %8038 = vmatpush1.bf16.msra.mxu0 %v12427_v52  ;;  %5133 = vmatprep.subr.bf16.mxu1 %v12432_v17  ;;  %v12478_v52 = vld [vmem:[#allocation10 + $0x420] ss:$16 sps:$4 sm:$0xff]   ;;  %v12486_v17 = vld [vmem:[#allocation10 + $0x444] ss:$16 sps:$4 sm:$0xff]  }
 0x62b   :  { %8039 = vmatprep.subr.bf16.mxu0 %v12435_v33  ;;  %v12489_v33 = vld [vmem:[#allocation10 + $0xfec] ss:$16 sps:$4 sm:$0xff]  }
 0x62d   :  { %5134 = vmatpush1.bf16.msra.mxu1 %v12430_v42  ;;  %v12484_v42 = vld [vmem:[#allocation10 + $0x440] ss:$16 sps:$4 sm:$0xff]  }
 0x62e   :  { %8040 = vmatpush1.bf16.msra.mxu0 %v12433_v14  ;;  %5135 = vmatprep.subr.bf16.mxu1 %v12438_v63  ;;  %v12487_v14 = vld [vmem:[#allocation10 + $0xfe8] ss:$16 sps:$4 sm:$0xff]   ;;  %v12492_v63 = vld [vmem:[#allocation10 + $0x464] ss:$16 sps:$4 sm:$0xff]  }
 0x62f   :  { %8041 = vmatprep.subr.bf16.mxu0 %v12441_v11  ;;  %v14122_v11 = vpop.trf.xlu0 }
 0x631   :  { %5136 = vmatpush1.bf16.msra.mxu1 %v12436_v48  ;;  %v14124_v48 = vpop.trf.xlu1 }
 0x632   :  { %8042 = vmatpush1.bf16.msra.mxu0 %v12439_v59  ;;  %5137 = vmatprep.subr.bf16.mxu1 %v12444_v53  ;;  %v11772_v59 = vunpack.i.h.bf16 %v14076_v38  ;;  %v11769_v53 = vunpack.i.l.bf16 %v14076_v38  ;;  %v12507_v38 = vld [vmem:[#allocation10 + $0x1044] ss:$16 sps:$4 sm:$0xff]  }
 0x633   :  { %8043 = vmatprep.subr.bf16.mxu0 %v12447_v0  ;;  %v12490_v0 = vld [vmem:[#allocation10 + $0x460] ss:$16 sps:$4 sm:$0xff]  }
 0x635   :  { %5138 = vmatpush1.bf16.msra.mxu1 %v12442_v51  ;;  %v12493_v51 = vld [vmem:[#allocation10 + $0x1000] ss:$16 sps:$4 sm:$0xff]  }
 0x636   :  { %8044 = vmatpush1.bf16.msra.mxu0 %v12445_v2  ;;  %5139 = vmatprep.subr.bf16.mxu1 %v12450_v5  ;;  %v12498_v2 = vld [vmem:[#allocation10 + $0x484] ss:$16 sps:$4 sm:$0xff]  }
 0x637   :  { %8045 = vmatprep.subr.bf16.mxu0 %v12453_v56  ;;  %v12501_v5 = vld [vmem:[#allocation10 + $0x1024] ss:$16 sps:$4 sm:$0xff]   ;;  %v14128_v56 = vpack.c.bf16 %v11772_v59, %v11769_v53  ;;  %v12544_v59 = vld [vmem:[#allocation10 + $0x580] ss:$16 sps:$4 sm:$0xff]  }
 0x638   :  { %v12547_v53 = vld [vmem:[#allocation10 + $0x1120] ss:$16 sps:$4 sm:$0xff]  }
 0x639   :  { %5140 = vmatpush1.bf16.msra.mxu1 %v12448_v35  ;;  %v12496_v35 = vld [vmem:[#allocation10 + $0x480] ss:$16 sps:$4 sm:$0xff]  }
 0x63a   :  { %8046 = vmatpush1.bf16.msra.mxu0 %v12451_v22  ;;  %5141 = vmatprep.subr.bf16.mxu1 %v12456_v47  ;;  %v12499_v22 = vld [vmem:[#allocation10 + $0x1020] ss:$16 sps:$4 sm:$0xff]   ;;  %v12504_v47 = vld [vmem:[#allocation10 + $0x4a4] ss:$16 sps:$4 sm:$0xff]  }
 0x63b   :  { %8047 = vmatprep.subr.bf16.mxu0 %v12459_v8  ;;  %v12502_v8 = vld [vmem:[#allocation10 + $0x4a0] ss:$16 sps:$4 sm:$0xff]  }
 0x63d   :  { %5142 = vmatpush1.bf16.msra.mxu1 %v12454_v41  ;;  %v12505_v41 = vld [vmem:[#allocation10 + $0x1040] ss:$16 sps:$4 sm:$0xff]  }
 0x63e   :  { %8048 = vmatpush1.bf16.msra.mxu0 %v12457_v31  ;;  %5143 = vmatprep.subr.bf16.mxu1 %v12462_v6  ;;  %v12510_v31 = vld [vmem:[#allocation10 + $0x4c4] ss:$16 sps:$4 sm:$0xff]  }
 0x63f   :  { %8049 = vmatprep.subr.bf16.mxu0 %v12465_v1  ;;  %v12513_v6 = vld [vmem:[#allocation10 + $0x1064] ss:$16 sps:$4 sm:$0xff]   ;;  %v12511_v1 = vld [vmem:[#allocation10 + $0x1060] ss:$16 sps:$4 sm:$0xff]  }
 0x641   :  { %5144 = vmatpush1.bf16.msra.mxu1 %v12460_v4  ;;  %v12516_v4 = vld [vmem:[#allocation10 + $0x4e4] ss:$16 sps:$4 sm:$0xff]  }
 0x642   :  { %8050 = vmatpush1.bf16.msra.mxu0 %v12463_v12  ;;  %5145 = vmatprep.subr.bf16.mxu1 %v12468_v23  ;;  %v12519_v12 = vld [vmem:[#allocation10 + $0x1084] ss:$16 sps:$4 sm:$0xff]   ;;  %v12514_v23 = vld [vmem:[#allocation10 + $0x4e0] ss:$16 sps:$4 sm:$0xff]  }
 0x643   :  { %8051 = vmatprep.subr.bf16.mxu0 %v12471_v34  ;;  %v12517_v34 = vld [vmem:[#allocation10 + $0x1080] ss:$16 sps:$4 sm:$0xff]  }
 0x645   :  { %5146 = vmatpush1.bf16.msra.mxu1 %v12466_v61  ;;  %v12522_v61 = vld [vmem:[#allocation10 + $0x504] ss:$16 sps:$4 sm:$0xff]  }
 0x646   :  { %8052 = vmatpush1.bf16.msra.mxu0 %v12469_v25  ;;  %5959 = vmatprep.subr.bf16.mxu1 %v12474_v10  ;;  %v12525_v25 = vld [vmem:[#allocation10 + $0x10a4] ss:$16 sps:$4 sm:$0xff]   ;;  %v12520_v10 = vld [vmem:[#allocation10 + $0x500] ss:$16 sps:$4 sm:$0xff]  }
 0x647   :  { %8053 = vmatprep.subr.bf16.mxu0 %v12477_v44  ;;  %v12531_v44 = vld [vmem:[#allocation10 + $0x10c4] ss:$16 sps:$4 sm:$0xff]  }
 0x648   :  { %5148 = vmatmul.mubr.bf16.vlgmr.msra.gmra.mrb[80].mxu1 %v14092_v28  ;;  %v12495_v28 = vld [vmem:[#allocation10 + $0x1004] ss:$16 sps:$4 sm:$0xff]  }
 0x649   :  { %5960 = vmatpush1.bf16.msra.mxu1 %v12472_v9  ;;  %5991 = vmatprep.mubr.bf16.mxu1 %v14118_v32  ;;  %v12526_v9 = vld [vmem:[#allocation10 + $0x520] ss:$16 sps:$4 sm:$0xff]  }
 0x64a   :  { %8054 = vmatpush1.bf16.msra.mxu0 %v12475_v16  ;;  %5961 = vmatprep.subr.bf16.mxu1 %v12480_v46  ;;  %v12529_v16 = vld [vmem:[#allocation10 + $0x10c0] ss:$16 sps:$4 sm:$0xff]   ;;  %v12534_v46 = vld [vmem:[#allocation10 + $0x544] ss:$16 sps:$4 sm:$0xff]  }
 0x64b   :  { %8055 = vmatprep.subr.bf16.mxu0 %v12483_v19  ;;  %v12537_v19 = vld [vmem:[#allocation10 + $0x10e4] ss:$16 sps:$4 sm:$0xff]  }
 0x64d   :  { %5962 = vmatpush1.bf16.msra.mxu1 %v12478_v52  ;;  %v12532_v52 = vld [vmem:[#allocation10 + $0x540] ss:$16 sps:$4 sm:$0xff]  }
 0x64e   :  { %8056 = vmatpush1.bf16.msra.mxu0 %v12481_v21  ;;  %5963 = vmatprep.subr.bf16.mxu1 %v12486_v17  ;;  %v12535_v21 = vld [vmem:[#allocation10 + $0x10e0] ss:$16 sps:$4 sm:$0xff]   ;;  %v12540_v17 = vld [vmem:[#allocation10 + $0x564] ss:$16 sps:$4 sm:$0xff]  }
 0x64f   :  { %8057 = vmatprep.subr.bf16.mxu0 %v12489_v33  ;;  %v12543_v33 = vld [vmem:[#allocation10 + $0x1104] ss:$16 sps:$4 sm:$0xff]  }
 0x651   :  { %5964 = vmatpush1.bf16.msra.mxu1 %v12484_v42  ;;  %v12538_v42 = vld [vmem:[#allocation10 + $0x560] ss:$16 sps:$4 sm:$0xff]  }
 0x652   :  { %8058 = vmatpush1.bf16.msra.mxu0 %v12487_v14  ;;  %5965 = vmatprep.subr.bf16.mxu1 %v12492_v63  ;;  %v12541_v14 = vld [vmem:[#allocation10 + $0x1100] ss:$16 sps:$4 sm:$0xff]   ;;  %v12546_v63 = vld [vmem:[#allocation10 + $0x584] ss:$16 sps:$4 sm:$0xff]  }
 0x653   :  { %8871 = vmatprep.subr.bf16.mxu0 %v12495_v28  ;;  %v12549_v28 = vld [vmem:[#allocation10 + $0x1124] ss:$16 sps:$4 sm:$0xff]  }
 0x655   :  { %8060 = vmatmul.mubr.bf16.vlgmr.msra.gmra.mrb[80].mxu0 %v14105_v57  ;;  %5966 = vmatpush1.bf16.msra.mxu1 %v12490_v0  ;;  %v12508_v57 = vld [vmem:[#allocation10 + $0x4c0] ss:$16 sps:$4 sm:$0xff]   ;;  %v12552_v0 = vld [vmem:[#allocation10 + $0x5a4] ss:$16 sps:$4 sm:$0xff]  }
 0x656   :  { %8872 = vmatpush1.bf16.msra.mxu0 %v12493_v51  ;;  %8903 = vmatprep.mubr.bf16.mxu0 %v14128_v56  ;;  %v12555_v51 = vld [vmem:[#allocation10 + $0x1144] ss:$16 sps:$4 sm:$0xff]  }
 0x657   :  { %5967 = vmatprep.subr.bf16.mxu1 %v12498_v2  ;;  %8873 = vmatprep.subr.bf16.mxu0 %v12501_v5  ;;  %v12550_v2 = vld [vmem:[#allocation10 + $0x5a0] ss:$16 sps:$4 sm:$0xff]  }
 0x658   :  { %v12553_v5 = vld [vmem:[#allocation10 + $0x1140] ss:$16 sps:$4 sm:$0xff]  }
 0x659   :  { %5968 = vmatpush1.bf16.msra.mxu1 %v12496_v35  ;;  %v12558_v35 = vld [vmem:[#allocation10 + $0x5c4] ss:$16 sps:$4 sm:$0xff]  }
 0x65a   :  { %8874 = vmatpush1.bf16.msra.mxu0 %v12499_v22  ;;  %5969 = vmatprep.subr.bf16.mxu1 %v12504_v47  ;;  %v12561_v22 = vld [vmem:[#allocation10 + $0x1164] ss:$16 sps:$4 sm:$0xff]   ;;  %v12556_v47 = vld [vmem:[#allocation10 + $0x5c0] ss:$16 sps:$4 sm:$0xff]  }
 0x65b   :  { %8875 = vmatprep.subr.bf16.mxu0 %v12507_v38  ;;  %v12559_v38 = vld [vmem:[#allocation10 + $0x1160] ss:$16 sps:$4 sm:$0xff]  }
 0x65d   :  { %5970 = vmatpush1.bf16.msra.mxu1 %v12502_v8  ;;  %v12564_v8 = vld [vmem:[#allocation10 + $0x5e4] ss:$16 sps:$4 sm:$0xff]  }
 0x65e   :  { %8876 = vmatpush1.bf16.msra.mxu0 %v12505_v41  ;;  %5971 = vmatprep.subr.bf16.mxu1 %v12510_v31  ;;  %v12567_v41 = vld [vmem:[#allocation10 + $0x1184] ss:$16 sps:$4 sm:$0xff]   ;;  %v12562_v31 = vld [vmem:[#allocation10 + $0x5e0] ss:$16 sps:$4 sm:$0xff]  }
 0x65f   :  { %8877 = vmatprep.subr.bf16.mxu0 %v12513_v6  ;;  %v11695_v6 = vunpack.i.h.bf16 %v14054_v58 }
 0x661   :  { %5972 = vmatpush1.bf16.msra.mxu1 %v12508_v57  ;;  %v11692_v57 = vunpack.i.l.bf16 %v14054_v58 }
 0x662   :  { %8878 = vmatpush1.bf16.msra.mxu0 %v12511_v1  ;;  %5973 = vmatprep.subr.bf16.mxu1 %v12516_v4  ;;  %v12565_v1 = vld [vmem:[#allocation10 + $0x1180] ss:$16 sps:$4 sm:$0xff]   ;;  %v12570_v4 = vld [vmem:[#allocation10 + $0x604] ss:$16 sps:$4 sm:$0xff]  }
 0x663   :  { %8879 = vmatprep.subr.bf16.mxu0 %v12519_v12  ;;  %v11819_v12 = vunpack.i.h.bf16 %v14096_v27 }
 0x665   :  { %5974 = vmatpush1.bf16.msra.mxu1 %v12514_v23  ;;  %v11816_v23 = vunpack.i.l.bf16 %v14096_v27  ;;  %v12574_v27 = vld [vmem:[#allocation10 + $0x620] ss:$16 sps:$4 sm:$0xff]  }
 0x666   :  { %8880 = vmatpush1.bf16.msra.mxu0 %v12517_v34  ;;  %5975 = vmatprep.subr.bf16.mxu1 %v12522_v61  ;;  %v12573_v34 = vld [vmem:[#allocation10 + $0x11a4] ss:$16 sps:$4 sm:$0xff]   ;;  %v12568_v61 = vld [vmem:[#allocation10 + $0x600] ss:$16 sps:$4 sm:$0xff]  }
 0x667   :  { %8881 = vmatprep.subr.bf16.mxu0 %v12525_v25  ;;  %v14136_v25 = vpack.c.bf16 %v11695_v6, %v11692_v57  ;;  %v14138_v58 = vpack.c.bf16 %v11819_v12, %v11816_v23  ;;  %v12615_v6 = vld [vmem:[#allocation10 + $0x1284] ss:$16 sps:$4 sm:$0xff]   ;;  %v12610_v57 = vld [vmem:[#allocation10 + $0x6e0] ss:$16 sps:$4 sm:$0xff]  }
 0x668   :  { %v12621_v12 = vld [vmem:[#allocation10 + $0x12a4] ss:$16 sps:$4 sm:$0xff]   ;;  %v12616_v23 = vld [vmem:[#allocation10 + $0x700] ss:$16 sps:$4 sm:$0xff]  }
 0x669   :  { %5976 = vmatpush1.bf16.msra.mxu1 %v12520_v10  ;;  %v12571_v10 = vld [vmem:[#allocation10 + $0x11a0] ss:$16 sps:$4 sm:$0xff]  }
 0x66a   :  { %8882 = vmatpush1.bf16.msra.mxu0 %v12523_v30  ;;  %5977 = vmatprep.subr.bf16.mxu1 %v12528_v60  ;;  %v12576_v30 = vld [vmem:[#allocation10 + $0x624] ss:$16 sps:$4 sm:$0xff]  }
 0x66b   :  { %8883 = vmatprep.subr.bf16.mxu0 %v12531_v44  ;;  %v12579_v60 = vld [vmem:[#allocation10 + $0x11c4] ss:$16 sps:$4 sm:$0xff]   ;;  %v12577_v44 = vld [vmem:[#allocation10 + $0x11c0] ss:$16 sps:$4 sm:$0xff]  }
 0x66d   :  { %5978 = vmatpush1.bf16.msra.mxu1 %v12526_v9  ;;  %v12582_v9 = vld [vmem:[#allocation10 + $0x644] ss:$16 sps:$4 sm:$0xff]  }
 0x66e   :  { %8884 = vmatpush1.bf16.msra.mxu0 %v12529_v16  ;;  %5979 = vmatprep.subr.bf16.mxu1 %v12534_v46  ;;  %v12585_v16 = vld [vmem:[#allocation10 + $0x11e4] ss:$16 sps:$4 sm:$0xff]   ;;  %v12580_v46 = vld [vmem:[#allocation10 + $0x640] ss:$16 sps:$4 sm:$0xff]  }
 0x66f   :  { %8885 = vmatprep.subr.bf16.mxu0 %v12537_v19  ;;  %v12583_v19 = vld [vmem:[#allocation10 + $0x11e0] ss:$16 sps:$4 sm:$0xff]  }
 0x671   :  { %5980 = vmatpush1.bf16.msra.mxu1 %v12532_v52  ;;  %v12588_v52 = vld [vmem:[#allocation10 + $0x664] ss:$16 sps:$4 sm:$0xff]  }
 0x672   :  { %8886 = vmatpush1.bf16.msra.mxu0 %v12535_v21  ;;  %5981 = vmatprep.subr.bf16.mxu1 %v12540_v17  ;;  %v11710_v21 = vunpack.i.h.bf16 %v14058_v40  ;;  %v11707_v17 = vunpack.i.l.bf16 %v14058_v40  ;;  %v12592_v40 = vld [vmem:[#allocation10 + $0x680] ss:$16 sps:$4 sm:$0xff]  }
 0x673   :  { %8887 = vmatprep.subr.bf16.mxu0 %v12543_v33  ;;  %v12591_v33 = vld [vmem:[#allocation10 + $0x1204] ss:$16 sps:$4 sm:$0xff]  }
 0x675   :  { %5982 = vmatpush1.bf16.msra.mxu1 %v12538_v42  ;;  %v11834_v42 = vunpack.i.h.bf16 %v14122_v11 }
 0x676   :  { %8888 = vmatpush1.bf16.msra.mxu0 %v12541_v14  ;;  %5983 = vmatprep.subr.bf16.mxu1 %v12546_v63  ;;  %v11831_v14 = vunpack.i.l.bf16 %v14122_v11  ;;  %v12586_v63 = vld [vmem:[#allocation10 + $0x660] ss:$16 sps:$4 sm:$0xff]   ;;  %v12600_v11 = vld [vmem:[#allocation10 + $0x6a4] ss:$16 sps:$4 sm:$0xff]  }
 0x677   :  { %8889 = vmatprep.subr.bf16.mxu0 %v12549_v28  ;;  %v12589_v28 = vld [vmem:[#allocation10 + $0x1200] ss:$16 sps:$4 sm:$0xff]  }
 0x679   :  { %5984 = vmatpush1.bf16.msra.mxu1 %v12544_v59  ;;  %v12594_v59 = vld [vmem:[#allocation10 + $0x684] ss:$16 sps:$4 sm:$0xff]  }
 0x67a   :  { %8890 = vmatpush1.bf16.msra.mxu0 %v12547_v53  ;;  %5985 = vmatprep.subr.bf16.mxu1 %v12552_v0  ;;  %v14146_v53 = vpack.c.bf16 %v11710_v21, %v11707_v17  ;;  %v12597_v0 = vld [vmem:[#allocation10 + $0x1224] ss:$16 sps:$4 sm:$0xff]   ;;  %v12637_v21 = vld [vmem:[#allocation10 + $0x1300] ss:$16 sps:$4 sm:$0xff]  }
 0x67b   :  { %8891 = vmatprep.subr.bf16.mxu0 %v12555_v51  ;;  %v14148_v51 = vpack.c.bf16 %v11834_v42, %v11831_v14  ;;  %v12642_v17 = vld [vmem:[#allocation10 + $0x784] ss:$16 sps:$4 sm:$0xff]   ;;  %v12640_v42 = vld [vmem:[#allocation10 + $0x780] ss:$16 sps:$4 sm:$0xff]  }
 0x67c   :  { %v12643_v14 = vld [vmem:[#allocation10 + $0x1320] ss:$16 sps:$4 sm:$0xff]  }
 0x67d   :  { %5986 = vmatpush1.bf16.msra.mxu1 %v12550_v2  ;;  %v12595_v2 = vld [vmem:[#allocation10 + $0x1220] ss:$16 sps:$4 sm:$0xff]  }
 0x67e   :  { %8892 = vmatpush1.bf16.msra.mxu0 %v12553_v5  ;;  %5987 = vmatprep.subr.bf16.mxu1 %v12558_v35  ;;  %v12603_v5 = vld [vmem:[#allocation10 + $0x1244] ss:$16 sps:$4 sm:$0xff]   ;;  %v12598_v35 = vld [vmem:[#allocation10 + $0x6a0] ss:$16 sps:$4 sm:$0xff]  }
 0x67f   :  { %8893 = vmatprep.subr.bf16.mxu0 %v12561_v22  ;;  %v12601_v22 = vld [vmem:[#allocation10 + $0x1240] ss:$16 sps:$4 sm:$0xff]  }
 0x681   :  { %5988 = vmatpush1.bf16.msra.mxu1 %v12556_v47  ;;  %v12606_v47 = vld [vmem:[#allocation10 + $0x6c4] ss:$16 sps:$4 sm:$0xff]  }
 0x682   :  { %8894 = vmatpush1.bf16.msra.mxu0 %v12559_v38  ;;  %5989 = vmatprep.subr.bf16.mxu1 %v12564_v8  ;;  %v12609_v38 = vld [vmem:[#allocation10 + $0x1264] ss:$16 sps:$4 sm:$0xff]   ;;  %v12604_v8 = vld [vmem:[#allocation10 + $0x6c0] ss:$16 sps:$4 sm:$0xff]  }
 0x683   :  { %8895 = vmatprep.subr.bf16.mxu0 %v12567_v41  ;;  %v12607_v41 = vld [vmem:[#allocation10 + $0x1260] ss:$16 sps:$4 sm:$0xff]  }
 0x685   :  { %5990 = vmatpush1.bf16.msra.mxu1 %v12562_v31  ;;  %v12612_v31 = vld [vmem:[#allocation10 + $0x6e4] ss:$16 sps:$4 sm:$0xff]  }
 0x686   :  { %8896 = vmatpush1.bf16.msra.mxu0 %v12565_v1  ;;  %6002 = vmatprep.subr.bf16.mxu1 %v12570_v4  ;;  %v12613_v1 = vld [vmem:[#allocation10 + $0x1280] ss:$16 sps:$4 sm:$0xff]   ;;  %v12618_v4 = vld [vmem:[#allocation10 + $0x704] ss:$16 sps:$4 sm:$0xff]  }
 0x687   :  { %8897 = vmatprep.subr.bf16.mxu0 %v12573_v34  ;;  %v12619_v34 = vld [vmem:[#allocation10 + $0x12a0] ss:$16 sps:$4 sm:$0xff]  }
 0x688   :  { %5992 = vmatmul.mubr.bf16.vlgmr.msra.gmra.mrb[76].mxu1 %v14136_v25 }
 0x689   :  { %6003 = vmatpush1.bf16.msra.mxu1 %v12568_v61  ;;  %6034 = vmatprep.mubr.bf16.mxu1 %v14138_v58  ;;  %v12624_v61 = vld [vmem:[#allocation10 + $0x724] ss:$16 sps:$4 sm:$0xff]  }
 0x68a   :  { %8898 = vmatpush1.bf16.msra.mxu0 %v12571_v10  ;;  %6004 = vmatprep.subr.bf16.mxu1 %v12576_v30  ;;  %v12627_v10 = vld [vmem:[#allocation10 + $0x12c4] ss:$16 sps:$4 sm:$0xff]   ;;  %v12622_v30 = vld [vmem:[#allocation10 + $0x720] ss:$16 sps:$4 sm:$0xff]  }
 0x68b   :  { %8899 = vmatprep.subr.bf16.mxu0 %v12579_v60  ;;  %v12625_v60 = vld [vmem:[#allocation10 + $0x12c0] ss:$16 sps:$4 sm:$0xff]  }
 0x68d   :  { %6005 = vmatpush1.bf16.msra.mxu1 %v12574_v27  ;;  %v12630_v27 = vld [vmem:[#allocation10 + $0x744] ss:$16 sps:$4 sm:$0xff]  }
 0x68e   :  { %8900 = vmatpush1.bf16.msra.mxu0 %v12577_v44  ;;  %6006 = vmatprep.subr.bf16.mxu1 %v12582_v9  ;;  %v12633_v44 = vld [vmem:[#allocation10 + $0x12e4] ss:$16 sps:$4 sm:$0xff]   ;;  %v12628_v9 = vld [vmem:[#allocation10 + $0x740] ss:$16 sps:$4 sm:$0xff]  }
 0x68f   :  { %8901 = vmatprep.subr.bf16.mxu0 %v12585_v16  ;;  %v12631_v16 = vld [vmem:[#allocation10 + $0x12e0] ss:$16 sps:$4 sm:$0xff]  }
 0x691   :  { %6007 = vmatpush1.bf16.msra.mxu1 %v12580_v46  ;;  %v12636_v46 = vld [vmem:[#allocation10 + $0x764] ss:$16 sps:$4 sm:$0xff]  }
 0x692   :  { %8902 = vmatpush1.bf16.msra.mxu0 %v12583_v19  ;;  %6008 = vmatprep.subr.bf16.mxu1 %v12588_v52  ;;  %v12639_v19 = vld [vmem:[#allocation10 + $0x1304] ss:$16 sps:$4 sm:$0xff]   ;;  %v12634_v52 = vld [vmem:[#allocation10 + $0x760] ss:$16 sps:$4 sm:$0xff]  }
 0x693   :  { %8914 = vmatprep.subr.bf16.mxu0 %v12591_v33  ;;  %v12645_v33 = vld [vmem:[#allocation10 + $0x1324] ss:$16 sps:$4 sm:$0xff]  }
 0x695   :  { %8904 = vmatmul.mubr.bf16.vlgmr.msra.gmra.mrb[76].mxu0 %v14146_v53  ;;  %6009 = vmatpush1.bf16.msra.mxu1 %v12586_v63  ;;  %v12648_v63 = vld [vmem:[#allocation10 + $0x7a4] ss:$16 sps:$4 sm:$0xff]  }
 0x696   :  { %8915 = vmatpush1.bf16.msra.mxu0 %v12589_v28  ;;  %6010 = vmatprep.subr.bf16.mxu1 %v12594_v59  ;;  %v12651_v28 = vld [vmem:[#allocation10 + $0x1344] ss:$16 sps:$4 sm:$0xff]   ;;  %v12646_v59 = vld [vmem:[#allocation10 + $0x7a0] ss:$16 sps:$4 sm:$0xff]  }
 0x697   :  { %8916 = vmatprep.subr.bf16.mxu0 %v12597_v0  ;;  %8946 = vmatprep.mubr.bf16.mxu0 %v14148_v51  ;;  %v12649_v0 = vld [vmem:[#allocation10 + $0x1340] ss:$16 sps:$4 sm:$0xff]  }
 0x699   :  { %6011 = vmatpush1.bf16.msra.mxu1 %v12592_v40  ;;  %v12654_v40 = vld [vmem:[#allocation10 + $0x7c4] ss:$16 sps:$4 sm:$0xff]  }
 0x69a   :  { %8917 = vmatpush1.bf16.msra.mxu0 %v12595_v2  ;;  %6012 = vmatprep.subr.bf16.mxu1 %v12600_v11  ;;  %v12657_v2 = vld [vmem:[#allocation10 + $0x1364] ss:$16 sps:$4 sm:$0xff]   ;;  %v12652_v11 = vld [vmem:[#allocation10 + $0x7c0] ss:$16 sps:$4 sm:$0xff]  }
 0x69b   :  { %8918 = vmatprep.subr.bf16.mxu0 %v12603_v5  ;;  %v12655_v5 = vld [vmem:[#allocation10 + $0x1360] ss:$16 sps:$4 sm:$0xff]  }
 0x69d   :  { %6013 = vmatpush1.bf16.msra.mxu1 %v12598_v35  ;;  %v12660_v35 = vld [vmem:[#allocation10 + $0x7e4] ss:$16 sps:$4 sm:$0xff]  }
 0x69e   :  { %8919 = vmatpush1.bf16.msra.mxu0 %v12601_v22  ;;  %6014 = vmatprep.subr.bf16.mxu1 %v12606_v47  ;;  %v12663_v22 = vld [vmem:[#allocation10 + $0x1384] ss:$16 sps:$4 sm:$0xff]   ;;  %v12658_v47 = vld [vmem:[#allocation10 + $0x7e0] ss:$16 sps:$4 sm:$0xff]  }
 0x69f   :  { %8920 = vmatprep.subr.bf16.mxu0 %v12609_v38  ;;  %v11881_v38 = vunpack.i.h.bf16 %v14084_v37 }
 0x6a1   :  { %6015 = vmatpush1.bf16.msra.mxu1 %v12604_v8  ;;  %v11878_v8 = vunpack.i.l.bf16 %v14084_v37  ;;  %v12670_v37 = vld [vmem:[#allocation10 + $0x428] ss:$16 sps:$4 sm:$0xff]  }
 0x6a2   :  { %8921 = vmatpush1.bf16.msra.mxu0 %v12607_v41  ;;  %6016 = vmatprep.subr.bf16.mxu1 %v12612_v31  ;;  %v12661_v41 = vld [vmem:[#allocation10 + $0x1380] ss:$16 sps:$4 sm:$0xff]   ;;  %v12666_v31 = vld [vmem:[#allocation10 + $0x40c] ss:$16 sps:$4 sm:$0xff]  }
 0x6a3   :  { %8922 = vmatprep.subr.bf16.mxu0 %v12615_v6  ;;  %v12669_v6 = vld [vmem:[#allocation10 + $0x13a4] ss:$16 sps:$4 sm:$0xff]  }
 0x6a5   :  { %6017 = vmatpush1.bf16.msra.mxu1 %v12610_v57  ;;  %v12664_v57 = vld [vmem:[#allocation10 + $0x408] ss:$16 sps:$4 sm:$0xff]  }
 0x6a6   :  { %8923 = vmatpush1.bf16.msra.mxu0 %v12613_v1  ;;  %6018 = vmatprep.subr.bf16.mxu1 %v12618_v4  ;;  %v14154_v1 = vpack.c.bf16 %v11881_v38, %v11878_v8  ;;  %v12667_v4 = vld [vmem:[#allocation10 + $0x13a0] ss:$16 sps:$4 sm:$0xff]   ;;  %v12715_v38 = vld [vmem:[#allocation10 + $0x10a8] ss:$16 sps:$4 sm:$0xff]   ;;  %v12720_v8 = vld [vmem:[#allocation10 + $0x52c] ss:$16 sps:$4 sm:$0xff]  }
 0x6a7   :  { %8924 = vmatprep.subr.bf16.mxu0 %v12621_v12  ;;  %v12672_v12 = vld [vmem:[#allocation10 + $0x42c] ss:$16 sps:$4 sm:$0xff]  }
 0x6a9   :  { %6019 = vmatpush1.bf16.msra.mxu1 %v12616_v23  ;;  %v12675_v23 = vld [vmem:[#allocation10 + $0x13c4] ss:$16 sps:$4 sm:$0xff]  }
 0x6aa   :  { %8925 = vmatpush1.bf16.msra.mxu0 %v12619_v34  ;;  %6020 = vmatprep.subr.bf16.mxu1 %v12624_v61  ;;  %v12673_v34 = vld [vmem:[#allocation10 + $0x13c0] ss:$16 sps:$4 sm:$0xff]   ;;  %v12678_v61 = vld [vmem:[#allocation10 + $0x44c] ss:$16 sps:$4 sm:$0xff]  }
 0x6ab   :  { %8926 = vmatprep.subr.bf16.mxu0 %v12627_v10  ;;  %v12681_v10 = vld [vmem:[#allocation10 + $0x13e4] ss:$16 sps:$4 sm:$0xff]  }
 0x6ad   :  { %6021 = vmatpush1.bf16.msra.mxu1 %v12622_v30  ;;  %v11896_v30 = vunpack.i.h.bf16 %v14124_v48 }
 0x6ae   :  { %8927 = vmatpush1.bf16.msra.mxu0 %v12625_v60  ;;  %6022 = vmatprep.subr.bf16.mxu1 %v12630_v27  ;;  %v11893_v60 = vunpack.i.l.bf16 %v14124_v48  ;;  %v12676_v27 = vld [vmem:[#allocation10 + $0x448] ss:$16 sps:$4 sm:$0xff]  }
 0x6af   :  { %8928 = vmatprep.subr.bf16.mxu0 %v12633_v44  ;;  %v12679_v44 = vld [vmem:[#allocation10 + $0x13e0] ss:$16 sps:$4 sm:$0xff]   ;;  %v12688_v48 = vld [vmem:[#allocation10 + $0x488] ss:$16 sps:$4 sm:$0xff]  }
 0x6b1   :  { %6023 = vmatpush1.bf16.msra.mxu1 %v12628_v9  ;;  %v12684_v9 = vld [vmem:[#allocation10 + $0x46c] ss:$16 sps:$4 sm:$0xff]  }
 0x6b2   :  { %8929 = vmatpush1.bf16.msra.mxu0 %v12631_v16  ;;  %6024 = vmatprep.subr.bf16.mxu1 %v12636_v46  ;;  %v12687_v16 = vld [vmem:[#allocation10 + $0x100c] ss:$16 sps:$4 sm:$0xff]   ;;  %v14160_v46 = vpack.c.bf16 %v11896_v30, %v11893_v60 }
 0x6b3   :  { %8930 = vmatprep.subr.bf16.mxu0 %v12639_v19  ;;  %v12685_v19 = vld [vmem:[#allocation10 + $0x1008] ss:$16 sps:$4 sm:$0xff]   ;;  %v12738_v30 = vld [vmem:[#allocation10 + $0x58c] ss:$16 sps:$4 sm:$0xff]  }
 0x6b4   :  { %v12741_v60 = vld [vmem:[#allocation10 + $0x112c] ss:$16 sps:$4 sm:$0xff]  }
 0x6b5   :  { %6025 = vmatpush1.bf16.msra.mxu1 %v12634_v52  ;;  %v12690_v52 = vld [vmem:[#allocation10 + $0x48c] ss:$16 sps:$4 sm:$0xff]  }
 0x6b6   :  { %8931 = vmatpush1.bf16.msra.mxu0 %v12637_v21  ;;  %6026 = vmatprep.subr.bf16.mxu1 %v12642_v17  ;;  %v12693_v21 = vld [vmem:[#allocation10 + $0x102c] ss:$16 sps:$4 sm:$0xff]   ;;  %v12691_v17 = vld [vmem:[#allocation10 + $0x1028] ss:$16 sps:$4 sm:$0xff]  }
 0x6b7   :  { %8932 = vmatprep.subr.bf16.mxu0 %v12645_v33  ;;  %v12696_v33 = vld [vmem:[#allocation10 + $0x4ac] ss:$16 sps:$4 sm:$0xff]  }
 0x6b9   :  { %6027 = vmatpush1.bf16.msra.mxu1 %v12640_v42  ;;  %v12699_v42 = vld [vmem:[#allocation10 + $0x104c] ss:$16 sps:$4 sm:$0xff]  }
 0x6ba   :  { %8933 = vmatpush1.bf16.msra.mxu0 %v12643_v14  ;;  %6028 = vmatprep.subr.bf16.mxu1 %v12648_v63  ;;  %v12694_v14 = vld [vmem:[#allocation10 + $0x4a8] ss:$16 sps:$4 sm:$0xff]  }
 0x6bb   :  { %8934 = vmatprep.subr.bf16.mxu0 %v12651_v28  ;;  %v12697_v63 = vld [vmem:[#allocation10 + $0x1048] ss:$16 sps:$4 sm:$0xff]   ;;  %v12702_v28 = vld [vmem:[#allocation10 + $0x4cc] ss:$16 sps:$4 sm:$0xff]  }
 0x6bd   :  { %6029 = vmatpush1.bf16.msra.mxu1 %v12646_v59  ;;  %v12705_v59 = vld [vmem:[#allocation10 + $0x106c] ss:$16 sps:$4 sm:$0xff]  }
 0x6be   :  { %8935 = vmatpush1.bf16.msra.mxu0 %v12649_v0  ;;  %6030 = vmatprep.subr.bf16.mxu1 %v12654_v40  ;;  %v12700_v0 = vld [vmem:[#allocation10 + $0x4c8] ss:$16 sps:$4 sm:$0xff]  }
 0x6bf   :  { %8936 = vmatprep.subr.bf16.mxu0 %v12657_v2  ;;  %v12703_v40 = vld [vmem:[#allocation10 + $0x1068] ss:$16 sps:$4 sm:$0xff]   ;;  %v12708_v2 = vld [vmem:[#allocation10 + $0x4ec] ss:$16 sps:$4 sm:$0xff]  }
 0x6c1   :  { %6031 = vmatpush1.bf16.msra.mxu1 %v12652_v11  ;;  %v12706_v11 = vld [vmem:[#allocation10 + $0x4e8] ss:$16 sps:$4 sm:$0xff]  }
 0x6c2   :  { %8937 = vmatpush1.bf16.msra.mxu0 %v12655_v5  ;;  %6032 = vmatprep.subr.bf16.mxu1 %v12660_v35  ;;  %v12709_v5 = vld [vmem:[#allocation10 + $0x1088] ss:$16 sps:$4 sm:$0xff]   ;;  %v12714_v35 = vld [vmem:[#allocation10 + $0x50c] ss:$16 sps:$4 sm:$0xff]  }
 0x6c3   :  { %8938 = vmatprep.subr.bf16.mxu0 %v12663_v22  ;;  %v12717_v22 = vld [vmem:[#allocation10 + $0x10ac] ss:$16 sps:$4 sm:$0xff]  }
 0x6c5   :  { %6033 = vmatpush1.bf16.msra.mxu1 %v12658_v47  ;;  %v12712_v47 = vld [vmem:[#allocation10 + $0x508] ss:$16 sps:$4 sm:$0xff]  }
 0x6c6   :  { %8939 = vmatpush1.bf16.msra.mxu0 %v12661_v41  ;;  %6045 = vmatprep.subr.bf16.mxu1 %v12666_v31  ;;  %v12723_v41 = vld [vmem:[#allocation10 + $0x10cc] ss:$16 sps:$4 sm:$0xff]   ;;  %v12718_v31 = vld [vmem:[#allocation10 + $0x528] ss:$16 sps:$4 sm:$0xff]  }
 0x6c7   :  { %8940 = vmatprep.subr.bf16.mxu0 %v12669_v6  ;;  %v12721_v6 = vld [vmem:[#allocation10 + $0x10c8] ss:$16 sps:$4 sm:$0xff]  }
 0x6c8   :  { %6035 = vmatmul.mubr.bf16.vlgmr.msra.gmra.mrb[76].mxu1 %v14154_v1 }
 0x6c9   :  { %6046 = vmatpush1.bf16.msra.mxu1 %v12664_v57  ;;  %6077 = vmatprep.mubr.bf16.mxu1 %v14118_v32  ;;  %v12682_v32 = vld [vmem:[#allocation10 + $0x468] ss:$16 sps:$4 sm:$0xff]   ;;  %v12726_v57 = vld [vmem:[#allocation10 + $0x54c] ss:$16 sps:$4 sm:$0xff]  }
 0x6ca   :  { %8941 = vmatpush1.bf16.msra.mxu0 %v12667_v4  ;;  %6047 = vmatprep.subr.bf16.mxu1 %v12672_v12  ;;  %v12729_v4 = vld [vmem:[#allocation10 + $0x10ec] ss:$16 sps:$4 sm:$0xff]   ;;  %v12724_v12 = vld [vmem:[#allocation10 + $0x548] ss:$16 sps:$4 sm:$0xff]  }
 0x6cb   :  { %8942 = vmatprep.subr.bf16.mxu0 %v12675_v23  ;;  %v12727_v23 = vld [vmem:[#allocation10 + $0x10e8] ss:$16 sps:$4 sm:$0xff]  }
 0x6cd   :  { %6048 = vmatpush1.bf16.msra.mxu1 %v12670_v37  ;;  %v12732_v37 = vld [vmem:[#allocation10 + $0x56c] ss:$16 sps:$4 sm:$0xff]  }
 0x6ce   :  { %8943 = vmatpush1.bf16.msra.mxu0 %v12673_v34  ;;  %6049 = vmatprep.subr.bf16.mxu1 %v12678_v61  ;;  %v12735_v34 = vld [vmem:[#allocation10 + $0x110c] ss:$16 sps:$4 sm:$0xff]   ;;  %v12730_v61 = vld [vmem:[#allocation10 + $0x568] ss:$16 sps:$4 sm:$0xff]  }
 0x6cf   :  { %8944 = vmatprep.subr.bf16.mxu0 %v12681_v10  ;;  %v12733_v10 = vld [vmem:[#allocation10 + $0x1108] ss:$16 sps:$4 sm:$0xff]  }
 0x6d1   :  { %6050 = vmatpush1.bf16.msra.mxu1 %v12676_v27  ;;  %v12736_v27 = vld [vmem:[#allocation10 + $0x588] ss:$16 sps:$4 sm:$0xff]  }
 0x6d2   :  { %8945 = vmatpush1.bf16.msra.mxu0 %v12679_v44  ;;  %6051 = vmatprep.subr.bf16.mxu1 %v12684_v9  ;;  %v12739_v44 = vld [vmem:[#allocation10 + $0x1128] ss:$16 sps:$4 sm:$0xff]   ;;  %v12744_v9 = vld [vmem:[#allocation10 + $0x5ac] ss:$16 sps:$4 sm:$0xff]  }
 0x6d3   :  { %8957 = vmatprep.subr.bf16.mxu0 %v12687_v16  ;;  %v12747_v16 = vld [vmem:[#allocation10 + $0x114c] ss:$16 sps:$4 sm:$0xff]  }
 0x6d5   :  { %8947 = vmatmul.mubr.bf16.vlgmr.msra.gmra.mrb[76].mxu0 %v14160_v46  ;;  %6052 = vmatpush1.bf16.msra.mxu1 %v12682_v32  ;;  %v12742_v32 = vld [vmem:[#allocation10 + $0x5a8] ss:$16 sps:$4 sm:$0xff]  }
 0x6d6   :  { %8958 = vmatpush1.bf16.msra.mxu0 %v12685_v19  ;;  %8989 = vmatprep.mubr.bf16.mxu0 %v14128_v56  ;;  %v12711_v56 = vld [vmem:[#allocation10 + $0x108c] ss:$16 sps:$4 sm:$0xff]   ;;  %v12745_v19 = vld [vmem:[#allocation10 + $0x1148] ss:$16 sps:$4 sm:$0xff]  }
 0x6d7   :  { %6053 = vmatprep.subr.bf16.mxu1 %v12690_v52  ;;  %8959 = vmatprep.subr.bf16.mxu0 %v12693_v21  ;;  %v12750_v52 = vld [vmem:[#allocation10 + $0x5cc] ss:$16 sps:$4 sm:$0xff]  }
 0x6d8   :  { %v12753_v21 = vld [vmem:[#allocation10 + $0x116c] ss:$16 sps:$4 sm:$0xff]  }
 0x6d9   :  { %6054 = vmatpush1.bf16.msra.mxu1 %v12688_v48  ;;  %v12748_v48 = vld [vmem:[#allocation10 + $0x5c8] ss:$16 sps:$4 sm:$0xff]  }
 0x6da   :  { %8960 = vmatpush1.bf16.msra.mxu0 %v12691_v17  ;;  %6055 = vmatprep.subr.bf16.mxu1 %v12696_v33  ;;  %v12751_v17 = vld [vmem:[#allocation10 + $0x1168] ss:$16 sps:$4 sm:$0xff]   ;;  %v12756_v33 = vld [vmem:[#allocation10 + $0x5ec] ss:$16 sps:$4 sm:$0xff]  }
 0x6db   :  { %8961 = vmatprep.subr.bf16.mxu0 %v12699_v42  ;;  %v12759_v42 = vld [vmem:[#allocation10 + $0x118c] ss:$16 sps:$4 sm:$0xff]  }
 0x6dd   :  { %6056 = vmatpush1.bf16.msra.mxu1 %v12694_v14  ;;  %v12754_v14 = vld [vmem:[#allocation10 + $0x5e8] ss:$16 sps:$4 sm:$0xff]  }
 0x6de   :  { %8962 = vmatpush1.bf16.msra.mxu0 %v12697_v63  ;;  %6057 = vmatprep.subr.bf16.mxu1 %v12702_v28  ;;  %v12757_v63 = vld [vmem:[#allocation10 + $0x1188] ss:$16 sps:$4 sm:$0xff]   ;;  %v12762_v28 = vld [vmem:[#allocation10 + $0x60c] ss:$16 sps:$4 sm:$0xff]  }
 0x6df   :  { %8963 = vmatprep.subr.bf16.mxu0 %v12705_v59  ;;  %v12765_v59 = vld [vmem:[#allocation10 + $0x11ac] ss:$16 sps:$4 sm:$0xff]  }
 0x6e1   :  { %6058 = vmatpush1.bf16.msra.mxu1 %v12700_v0  ;;  %v12760_v0 = vld [vmem:[#allocation10 + $0x608] ss:$16 sps:$4 sm:$0xff]  }
 0x6e2   :  { %8964 = vmatpush1.bf16.msra.mxu0 %v12703_v40  ;;  %6059 = vmatprep.subr.bf16.mxu1 %v12708_v2  ;;  %v12763_v40 = vld [vmem:[#allocation10 + $0x11a8] ss:$16 sps:$4 sm:$0xff]   ;;  %v12768_v2 = vld [vmem:[#allocation10 + $0x62c] ss:$16 sps:$4 sm:$0xff]  }
 0x6e3   :  { %8965 = vmatprep.subr.bf16.mxu0 %v12711_v56  ;;  %v12771_v56 = vld [vmem:[#allocation10 + $0x11cc] ss:$16 sps:$4 sm:$0xff]  }
 0x6e5   :  { %6060 = vmatpush1.bf16.msra.mxu1 %v12706_v11  ;;  %v12766_v11 = vld [vmem:[#allocation10 + $0x628] ss:$16 sps:$4 sm:$0xff]  }
 0x6e6   :  { %8966 = vmatpush1.bf16.msra.mxu0 %v12709_v5  ;;  %6061 = vmatprep.subr.bf16.mxu1 %v12714_v35  ;;  %v12769_v5 = vld [vmem:[#allocation10 + $0x11c8] ss:$16 sps:$4 sm:$0xff]   ;;  %v12774_v35 = vld [vmem:[#allocation10 + $0x64c] ss:$16 sps:$4 sm:$0xff]  }
 0x6e7   :  { %8967 = vmatprep.subr.bf16.mxu0 %v12717_v22  ;;  %v12777_v22 = vld [vmem:[#allocation10 + $0x11ec] ss:$16 sps:$4 sm:$0xff]  }
 0x6e9   :  { %6062 = vmatpush1.bf16.msra.mxu1 %v12712_v47  ;;  %v12772_v47 = vld [vmem:[#allocation10 + $0x648] ss:$16 sps:$4 sm:$0xff]  }
 0x6ea   :  { %8968 = vmatpush1.bf16.msra.mxu0 %v12715_v38  ;;  %6063 = vmatprep.subr.bf16.mxu1 %v12720_v8  ;;  %v12775_v38 = vld [vmem:[#allocation10 + $0x11e8] ss:$16 sps:$4 sm:$0xff]   ;;  %v12780_v8 = vld [vmem:[#allocation10 + $0x66c] ss:$16 sps:$4 sm:$0xff]  }
 0x6eb   :  { %8969 = vmatprep.subr.bf16.mxu0 %v12723_v41  ;;  %v12783_v41 = vld [vmem:[#allocation10 + $0x120c] ss:$16 sps:$4 sm:$0xff]  }
 0x6ed   :  { %6064 = vmatpush1.bf16.msra.mxu1 %v12718_v31  ;;  %v12786_v31 = vld [vmem:[#allocation10 + $0x68c] ss:$16 sps:$4 sm:$0xff]  }
 0x6ee   :  { %8970 = vmatpush1.bf16.msra.mxu0 %v12721_v6  ;;  %6065 = vmatprep.subr.bf16.mxu1 %v12726_v57  ;;  %v12789_v6 = vld [vmem:[#allocation10 + $0x122c] ss:$16 sps:$4 sm:$0xff]   ;;  %v12784_v57 = vld [vmem:[#allocation10 + $0x688] ss:$16 sps:$4 sm:$0xff]  }
 0x6ef   :  { %8971 = vmatprep.subr.bf16.mxu0 %v12729_v4  ;;  %v12787_v4 = vld [vmem:[#allocation10 + $0x1228] ss:$16 sps:$4 sm:$0xff]  }
 0x6f1   :  { %6066 = vmatpush1.bf16.msra.mxu1 %v12724_v12  ;;  %v12792_v12 = vld [vmem:[#allocation10 + $0x6ac] ss:$16 sps:$4 sm:$0xff]  }
 0x6f2   :  { %8972 = vmatpush1.bf16.msra.mxu0 %v12727_v23  ;;  %6067 = vmatprep.subr.bf16.mxu1 %v12732_v37  ;;  %v12795_v23 = vld [vmem:[#allocation10 + $0x124c] ss:$16 sps:$4 sm:$0xff]   ;;  %v12790_v37 = vld [vmem:[#allocation10 + $0x6a8] ss:$16 sps:$4 sm:$0xff]  }
 0x6f3   :  { %8973 = vmatprep.subr.bf16.mxu0 %v12735_v34  ;;  %v12793_v34 = vld [vmem:[#allocation10 + $0x1248] ss:$16 sps:$4 sm:$0xff]  }
 0x6f5   :  { %6068 = vmatpush1.bf16.msra.mxu1 %v12730_v61  ;;  %v12798_v61 = vld [vmem:[#allocation10 + $0x6cc] ss:$16 sps:$4 sm:$0xff]  }
 0x6f6   :  { %8974 = vmatpush1.bf16.msra.mxu0 %v12733_v10  ;;  %6069 = vmatprep.subr.bf16.mxu1 %v12738_v30  ;;  %v12801_v10 = vld [vmem:[#allocation10 + $0x126c] ss:$16 sps:$4 sm:$0xff]   ;;  %v12799_v30 = vld [vmem:[#allocation10 + $0x1268] ss:$16 sps:$4 sm:$0xff]  }
 0x6f7   :  { %8975 = vmatprep.subr.bf16.mxu0 %v12741_v60  ;;  %v12804_v60 = vld [vmem:[#allocation10 + $0x6ec] ss:$16 sps:$4 sm:$0xff]  }
 0x6f9   :  { %6070 = vmatpush1.bf16.msra.mxu1 %v12736_v27  ;;  %v12802_v27 = vld [vmem:[#allocation10 + $0x6e8] ss:$16 sps:$4 sm:$0xff]  }
 0x6fa   :  { %8976 = vmatpush1.bf16.msra.mxu0 %v12739_v44  ;;  %6071 = vmatprep.subr.bf16.mxu1 %v12744_v9  ;;  %v12805_v44 = vld [vmem:[#allocation10 + $0x1288] ss:$16 sps:$4 sm:$0xff]   ;;  %v12810_v9 = vld [vmem:[#allocation10 + $0x70c] ss:$16 sps:$4 sm:$0xff]  }
 0x6fb   :  { %8977 = vmatprep.subr.bf16.mxu0 %v12747_v16  ;;  %v12813_v16 = vld [vmem:[#allocation10 + $0x12ac] ss:$16 sps:$4 sm:$0xff]  }
 0x6fd   :  { %6072 = vmatpush1.bf16.msra.mxu1 %v12742_v32  ;;  %v12808_v32 = vld [vmem:[#allocation10 + $0x708] ss:$16 sps:$4 sm:$0xff]  }
 0x6fe   :  { %8978 = vmatpush1.bf16.msra.mxu0 %v12745_v19  ;;  %6073 = vmatprep.subr.bf16.mxu1 %v12750_v52  ;;  %v12811_v19 = vld [vmem:[#allocation10 + $0x12a8] ss:$16 sps:$4 sm:$0xff]   ;;  %v12816_v52 = vld [vmem:[#allocation10 + $0x72c] ss:$16 sps:$4 sm:$0xff]  }
 0x6ff   :  { %8979 = vmatprep.subr.bf16.mxu0 %v12753_v21  ;;  %v12819_v21 = vld [vmem:[#allocation10 + $0x12cc] ss:$16 sps:$4 sm:$0xff]  }
 0x701   :  { %6074 = vmatpush1.bf16.msra.mxu1 %v12748_v48  ;;  %v12814_v48 = vld [vmem:[#allocation10 + $0x728] ss:$16 sps:$4 sm:$0xff]  }
 0x702   :  { %8980 = vmatpush1.bf16.msra.mxu0 %v12751_v17  ;;  %6075 = vmatprep.subr.bf16.mxu1 %v12756_v33  ;;  %v12817_v17 = vld [vmem:[#allocation10 + $0x12c8] ss:$16 sps:$4 sm:$0xff]   ;;  %v12822_v33 = vld [vmem:[#allocation10 + $0x74c] ss:$16 sps:$4 sm:$0xff]  }
 0x703   :  { %8981 = vmatprep.subr.bf16.mxu0 %v12759_v42  ;;  %v12825_v42 = vld [vmem:[#allocation10 + $0x12ec] ss:$16 sps:$4 sm:$0xff]  }
 0x705   :  { %6076 = vmatpush1.bf16.msra.mxu1 %v12754_v14  ;;  %v12820_v14 = vld [vmem:[#allocation10 + $0x748] ss:$16 sps:$4 sm:$0xff]  }
 0x706   :  { %8982 = vmatpush1.bf16.msra.mxu0 %v12757_v63  ;;  %6088 = vmatprep.subr.bf16.mxu1 %v12762_v28  ;;  %v12823_v63 = vld [vmem:[#allocation10 + $0x12e8] ss:$16 sps:$4 sm:$0xff]   ;;  %v12828_v28 = vld [vmem:[#allocation10 + $0x76c] ss:$16 sps:$4 sm:$0xff]  }
 0x707   :  { %8983 = vmatprep.subr.bf16.mxu0 %v12765_v59  ;;  %v12831_v59 = vld [vmem:[#allocation10 + $0x130c] ss:$16 sps:$4 sm:$0xff]  }
 0x708   :  { %6078 = vmatmul.mubr.bf16.vlgmr.msra.gmra.mrb[80].mxu1 %v14136_v25  ;;  %v12778_v25 = vld [vmem:[#allocation10 + $0x668] ss:$16 sps:$4 sm:$0xff]  }
 0x709   :  { %6089 = vmatpush1.bf16.msra.mxu1 %v12760_v0  ;;  %6120 = vmatprep.mubr.bf16.mxu1 %v14138_v58  ;;  %v12781_v58 = vld [vmem:[#allocation10 + $0x1208] ss:$16 sps:$4 sm:$0xff]  }
 0x70a   :  { %8984 = vmatpush1.bf16.msra.mxu0 %v12763_v40  ;;  %6090 = vmatprep.subr.bf16.mxu1 %v12768_v2  ;;  %v12826_v0 = vld [vmem:[#allocation10 + $0x768] ss:$16 sps:$4 sm:$0xff]   ;;  %v12834_v2 = vld [vmem:[#allocation10 + $0x78c] ss:$16 sps:$4 sm:$0xff]  }
 0x70b   :  { %8985 = vmatprep.subr.bf16.mxu0 %v12771_v56  ;;  %v12829_v40 = vld [vmem:[#allocation10 + $0x1308] ss:$16 sps:$4 sm:$0xff]   ;;  %v12837_v56 = vld [vmem:[#allocation10 + $0x132c] ss:$16 sps:$4 sm:$0xff]  }
 0x70d   :  { %6091 = vmatpush1.bf16.msra.mxu1 %v12766_v11  ;;  %v12832_v11 = vld [vmem:[#allocation10 + $0x788] ss:$16 sps:$4 sm:$0xff]  }
 0x70e   :  { %8986 = vmatpush1.bf16.msra.mxu0 %v12769_v5  ;;  %6092 = vmatprep.subr.bf16.mxu1 %v12774_v35  ;;  %v12835_v5 = vld [vmem:[#allocation10 + $0x1328] ss:$16 sps:$4 sm:$0xff]   ;;  %v12840_v35 = vld [vmem:[#allocation10 + $0x7ac] ss:$16 sps:$4 sm:$0xff]  }
 0x70f   :  { %8987 = vmatprep.subr.bf16.mxu0 %v12777_v22  ;;  %v12843_v22 = vld [vmem:[#allocation10 + $0x134c] ss:$16 sps:$4 sm:$0xff]  }
 0x711   :  { %6093 = vmatpush1.bf16.msra.mxu1 %v12772_v47  ;;  %v12838_v47 = vld [vmem:[#allocation10 + $0x7a8] ss:$16 sps:$4 sm:$0xff]  }
 0x712   :  { %8988 = vmatpush1.bf16.msra.mxu0 %v12775_v38  ;;  %6094 = vmatprep.subr.bf16.mxu1 %v12780_v8  ;;  %v12841_v38 = vld [vmem:[#allocation10 + $0x1348] ss:$16 sps:$4 sm:$0xff]   ;;  %v12846_v8 = vld [vmem:[#allocation10 + $0x7cc] ss:$16 sps:$4 sm:$0xff]  }
 0x713   :  { %9000 = vmatprep.subr.bf16.mxu0 %v12783_v41  ;;  %v12849_v41 = vld [vmem:[#allocation10 + $0x136c] ss:$16 sps:$4 sm:$0xff]  }
 0x715   :  { %8990 = vmatmul.mubr.bf16.vlgmr.msra.gmra.mrb[80].mxu0 %v14146_v53  ;;  %6095 = vmatpush1.bf16.msra.mxu1 %v12778_v25  ;;  %v12796_v53 = vld [vmem:[#allocation10 + $0x6c8] ss:$16 sps:$4 sm:$0xff]  }
 0x716   :  { %9001 = vmatpush1.bf16.msra.mxu0 %v12781_v58  ;;  %9032 = vmatprep.mubr.bf16.mxu0 %v14148_v51  ;;  %v12807_v51 = vld [vmem:[#allocation10 + $0x128c] ss:$16 sps:$4 sm:$0xff]   ;;  %v12844_v25 = vld [vmem:[#allocation10 + $0x7c8] ss:$16 sps:$4 sm:$0xff]  }
 0x717   :  { %6096 = vmatprep.subr.bf16.mxu1 %v12786_v31  ;;  %9002 = vmatprep.subr.bf16.mxu0 %v12789_v6  ;;  %v12847_v58 = vld [vmem:[#allocation10 + $0x1368] ss:$16 sps:$4 sm:$0xff]   ;;  %v12852_v31 = vld [vmem:[#allocation10 + $0x7ec] ss:$16 sps:$4 sm:$0xff]  }
 0x718   :  { %v12855_v6 = vld [vmem:[#allocation10 + $0x138c] ss:$16 sps:$4 sm:$0xff]  }
 0x719   :  { %6097 = vmatpush1.bf16.msra.mxu1 %v12784_v57  ;;  %v12850_v57 = vld [vmem:[#allocation10 + $0x7e8] ss:$16 sps:$4 sm:$0xff]  }
 0x71a   :  { %9003 = vmatpush1.bf16.msra.mxu0 %v12787_v4  ;;  %6098 = vmatprep.subr.bf16.mxu1 %v12792_v12  ;;  %v12853_v4 = vld [vmem:[#allocation10 + $0x1388] ss:$16 sps:$4 sm:$0xff]   ;;  %v12858_v12 = vld [vmem:[#allocation10 + $0x804] ss:$16 sps:$4 sm:$0xff]  }
 0x71b   :  { %9004 = vmatprep.subr.bf16.mxu0 %v12795_v23  ;;  %v11762_v23 = vunpack.i.h.bf16 %v14070_v50 }
 0x71d   :  { %6099 = vmatpush1.bf16.msra.mxu1 %v12790_v37  ;;  %v11759_v37 = vunpack.i.l.bf16 %v14070_v50  ;;  %v12865_v50 = vld [vmem:[#allocation10 + $0x13c8] ss:$16 sps:$4 sm:$0xff]  }
 0x71e   :  { %9005 = vmatpush1.bf16.msra.mxu0 %v12793_v34  ;;  %6100 = vmatprep.subr.bf16.mxu1 %v12798_v61  ;;  %v12861_v34 = vld [vmem:[#allocation10 + $0x13ac] ss:$16 sps:$4 sm:$0xff]   ;;  %v12856_v61 = vld [vmem:[#allocation10 + $0x800] ss:$16 sps:$4 sm:$0xff]  }
 0x71f   :  { %9006 = vmatprep.subr.bf16.mxu0 %v12801_v10  ;;  %v12859_v10 = vld [vmem:[#allocation10 + $0x13a8] ss:$16 sps:$4 sm:$0xff]  }
 0x721   :  { %6101 = vmatpush1.bf16.msra.mxu1 %v12796_v53  ;;  %v12864_v53 = vld [vmem:[#allocation10 + $0x824] ss:$16 sps:$4 sm:$0xff]  }
 0x722   :  { %9007 = vmatpush1.bf16.msra.mxu0 %v12799_v30  ;;  %6102 = vmatprep.subr.bf16.mxu1 %v12804_v60  ;;  %v14170_v30 = vpack.c.bf16 %v11762_v23, %v11759_v37  ;;  %v12867_v60 = vld [vmem:[#allocation10 + $0x13cc] ss:$16 sps:$4 sm:$0xff]   ;;  %v12921_v23 = vld [vmem:[#allocation10 + $0x14e4] ss:$16 sps:$4 sm:$0xff]   ;;  %v12916_v37 = vld [vmem:[#allocation10 + $0x940] ss:$16 sps:$4 sm:$0xff]  }
 0x723   :  { %9008 = vmatprep.subr.bf16.mxu0 %v12807_v51  ;;  %v12862_v51 = vld [vmem:[#allocation10 + $0x820] ss:$16 sps:$4 sm:$0xff]  }
 0x725   :  { %6103 = vmatpush1.bf16.msra.mxu1 %v12802_v27  ;;  %v12870_v27 = vld [vmem:[#allocation10 + $0x844] ss:$16 sps:$4 sm:$0xff]  }
 0x726   :  { %9009 = vmatpush1.bf16.msra.mxu0 %v12805_v44  ;;  %6104 = vmatprep.subr.bf16.mxu1 %v12810_v9  ;;  %v12873_v44 = vld [vmem:[#allocation10 + $0x13ec] ss:$16 sps:$4 sm:$0xff]   ;;  %v12868_v9 = vld [vmem:[#allocation10 + $0x840] ss:$16 sps:$4 sm:$0xff]  }
 0x727   :  { %9010 = vmatprep.subr.bf16.mxu0 %v12813_v16  ;;  %v12871_v16 = vld [vmem:[#allocation10 + $0x13e8] ss:$16 sps:$4 sm:$0xff]  }
 0x729   :  { %6105 = vmatpush1.bf16.msra.mxu1 %v12808_v32  ;;  %v12876_v32 = vld [vmem:[#allocation10 + $0x864] ss:$16 sps:$4 sm:$0xff]  }
 0x72a   :  { %9011 = vmatpush1.bf16.msra.mxu0 %v12811_v19  ;;  %6106 = vmatprep.subr.bf16.mxu1 %v12816_v52  ;;  %v14174_v19 = vpop.trf.xlu0  ;;  %v14176_v52 = vpop.trf.xlu1 }
 0x72b   :  { %9012 = vmatprep.subr.bf16.mxu0 %v12819_v21  ;;  %v11777_v21 = vunpack.i.h.bf16 %v14080_v55 }
 0x72d   :  { %6107 = vmatpush1.bf16.msra.mxu1 %v12814_v48  ;;  %v11774_v48 = vunpack.i.l.bf16 %v14080_v55  ;;  %v12891_v55 = vld [vmem:[#allocation10 + $0x1444] ss:$16 sps:$4 sm:$0xff]  }
 0x72e   :  { %9013 = vmatpush1.bf16.msra.mxu0 %v12817_v17  ;;  %6108 = vmatprep.subr.bf16.mxu1 %v12822_v33  ;;  %v12874_v17 = vld [vmem:[#allocation10 + $0x860] ss:$16 sps:$4 sm:$0xff]  }
 0x72f   :  { %9014 = vmatprep.subr.bf16.mxu0 %v12825_v42  ;;  %v12877_v33 = vld [vmem:[#allocation10 + $0x1400] ss:$16 sps:$4 sm:$0xff]   ;;  %v12882_v42 = vld [vmem:[#allocation10 + $0x884] ss:$16 sps:$4 sm:$0xff]  }
 0x731   :  { %6109 = vmatpush1.bf16.msra.mxu1 %v12820_v14  ;;  %v12885_v14 = vld [vmem:[#allocation10 + $0x1424] ss:$16 sps:$4 sm:$0xff]  }
 0x732   :  { %9015 = vmatpush1.bf16.msra.mxu0 %v12823_v63  ;;  %6110 = vmatprep.subr.bf16.mxu1 %v12828_v28  ;;  %v14180_v63 = vpack.c.bf16 %v11777_v21, %v11774_v48  ;;  %v12880_v28 = vld [vmem:[#allocation10 + $0x880] ss:$16 sps:$4 sm:$0xff]   ;;  %v12942_v21 = vld [vmem:[#allocation10 + $0x9c4] ss:$16 sps:$4 sm:$0xff]  }
 0x733   :  { %9016 = vmatprep.subr.bf16.mxu0 %v12831_v59  ;;  %v12883_v59 = vld [vmem:[#allocation10 + $0x1420] ss:$16 sps:$4 sm:$0xff]   ;;  %v12945_v48 = vld [vmem:[#allocation10 + $0x1564] ss:$16 sps:$4 sm:$0xff]  }
 0x735   :  { %6111 = vmatpush1.bf16.msra.mxu1 %v12826_v0  ;;  %v12888_v0 = vld [vmem:[#allocation10 + $0x8a4] ss:$16 sps:$4 sm:$0xff]  }
 0x736   :  { %9017 = vmatpush1.bf16.msra.mxu0 %v12829_v40  ;;  %6112 = vmatprep.subr.bf16.mxu1 %v12834_v2  ;;  %v12886_v40 = vld [vmem:[#allocation10 + $0x8a0] ss:$16 sps:$4 sm:$0xff]  }
 0x737   :  { %9018 = vmatprep.subr.bf16.mxu0 %v12837_v56  ;;  %v12889_v2 = vld [vmem:[#allocation10 + $0x1440] ss:$16 sps:$4 sm:$0xff]   ;;  %v12894_v56 = vld [vmem:[#allocation10 + $0x8c4] ss:$16 sps:$4 sm:$0xff]  }
 0x739   :  { %6113 = vmatpush1.bf16.msra.mxu1 %v12832_v11  ;;  %v12897_v11 = vld [vmem:[#allocation10 + $0x1464] ss:$16 sps:$4 sm:$0xff]  }
 0x73a   :  { %9019 = vmatpush1.bf16.msra.mxu0 %v12835_v5  ;;  %6114 = vmatprep.subr.bf16.mxu1 %v12840_v35  ;;  %v12895_v5 = vld [vmem:[#allocation10 + $0x1460] ss:$16 sps:$4 sm:$0xff]   ;;  %v12900_v35 = vld [vmem:[#allocation10 + $0x8e4] ss:$16 sps:$4 sm:$0xff]  }
 0x73b   :  { %9020 = vmatprep.subr.bf16.mxu0 %v12843_v22  ;;  %v12903_v22 = vld [vmem:[#allocation10 + $0x1484] ss:$16 sps:$4 sm:$0xff]  }
 0x73d   :  { %6115 = vmatpush1.bf16.msra.mxu1 %v12838_v47  ;;  %v12898_v47 = vld [vmem:[#allocation10 + $0x8e0] ss:$16 sps:$4 sm:$0xff]  }
 0x73e   :  { %9021 = vmatpush1.bf16.msra.mxu0 %v12841_v38  ;;  %6116 = vmatprep.subr.bf16.mxu1 %v12846_v8  ;;  %v12901_v38 = vld [vmem:[#allocation10 + $0x1480] ss:$16 sps:$4 sm:$0xff]   ;;  %v12906_v8 = vld [vmem:[#allocation10 + $0x904] ss:$16 sps:$4 sm:$0xff]  }
 0x73f   :  { %9022 = vmatprep.subr.bf16.mxu0 %v12849_v41  ;;  %v12909_v41 = vld [vmem:[#allocation10 + $0x14a4] ss:$16 sps:$4 sm:$0xff]  }
 0x741   :  { %6117 = vmatpush1.bf16.msra.mxu1 %v12844_v25  ;;  %v12904_v25 = vld [vmem:[#allocation10 + $0x900] ss:$16 sps:$4 sm:$0xff]  }
 0x742   :  { %9023 = vmatpush1.bf16.msra.mxu0 %v12847_v58  ;;  %6118 = vmatprep.subr.bf16.mxu1 %v12852_v31  ;;  %v12907_v58 = vld [vmem:[#allocation10 + $0x14a0] ss:$16 sps:$4 sm:$0xff]   ;;  %v12912_v31 = vld [vmem:[#allocation10 + $0x924] ss:$16 sps:$4 sm:$0xff]  }
 0x743   :  { %9024 = vmatprep.subr.bf16.mxu0 %v12855_v6  ;;  %v12915_v6 = vld [vmem:[#allocation10 + $0x14c4] ss:$16 sps:$4 sm:$0xff]  }
 0x745   :  { %6119 = vmatpush1.bf16.msra.mxu1 %v12850_v57  ;;  %v12910_v57 = vld [vmem:[#allocation10 + $0x920] ss:$16 sps:$4 sm:$0xff]  }
 0x746   :  { %9025 = vmatpush1.bf16.msra.mxu0 %v12853_v4  ;;  %6911 = vmatprep.subr.bf16.mxu1 %v12858_v12  ;;  %v12913_v4 = vld [vmem:[#allocation10 + $0x14c0] ss:$16 sps:$4 sm:$0xff]   ;;  %v12918_v12 = vld [vmem:[#allocation10 + $0x944] ss:$16 sps:$4 sm:$0xff]  }
 0x747   :  { %9026 = vmatprep.subr.bf16.mxu0 %v12861_v34  ;;  %v12919_v34 = vld [vmem:[#allocation10 + $0x14e0] ss:$16 sps:$4 sm:$0xff]  }
 0x748   :  { %6121 = vmatmul.mubr.bf16.vlgmr.msra.gmra.mrb[80].mxu1 %v14154_v1  ;;  %v12879_v1 = vld [vmem:[#allocation10 + $0x1404] ss:$16 sps:$4 sm:$0xff]  }
 0x749   :  { %6912 = vmatpush1.bf16.msra.mxu1 %v12856_v61  ;;  %6943 = vmatprep.mubr.bf16.mxu1 %v14170_v30  ;;  %v12924_v61 = vld [vmem:[#allocation10 + $0x964] ss:$16 sps:$4 sm:$0xff]  }
 0x74a   :  { %9027 = vmatpush1.bf16.msra.mxu0 %v12859_v10  ;;  %6913 = vmatprep.subr.bf16.mxu1 %v12864_v53  ;;  %v12927_v10 = vld [vmem:[#allocation10 + $0x1504] ss:$16 sps:$4 sm:$0xff]   ;;  %v12922_v53 = vld [vmem:[#allocation10 + $0x960] ss:$16 sps:$4 sm:$0xff]  }
 0x74b   :  { %9028 = vmatprep.subr.bf16.mxu0 %v12867_v60  ;;  %v12925_v60 = vld [vmem:[#allocation10 + $0x1500] ss:$16 sps:$4 sm:$0xff]  }
 0x74d   :  { %6914 = vmatpush1.bf16.msra.mxu1 %v12862_v51  ;;  %v12930_v51 = vld [vmem:[#allocation10 + $0x984] ss:$16 sps:$4 sm:$0xff]  }
 0x74e   :  { %9029 = vmatpush1.bf16.msra.mxu0 %v12865_v50  ;;  %6915 = vmatprep.subr.bf16.mxu1 %v12870_v27  ;;  %v12933_v50 = vld [vmem:[#allocation10 + $0x1524] ss:$16 sps:$4 sm:$0xff]   ;;  %v12928_v27 = vld [vmem:[#allocation10 + $0x980] ss:$16 sps:$4 sm:$0xff]  }
 0x74f   :  { %9030 = vmatprep.subr.bf16.mxu0 %v12873_v44  ;;  %v12931_v44 = vld [vmem:[#allocation10 + $0x1520] ss:$16 sps:$4 sm:$0xff]  }
 0x751   :  { %6916 = vmatpush1.bf16.msra.mxu1 %v12868_v9  ;;  %v12936_v9 = vld [vmem:[#allocation10 + $0x9a4] ss:$16 sps:$4 sm:$0xff]  }
 0x752   :  { %9031 = vmatpush1.bf16.msra.mxu0 %v12871_v16  ;;  %6917 = vmatprep.subr.bf16.mxu1 %v12876_v32  ;;  %v12939_v16 = vld [vmem:[#allocation10 + $0x1544] ss:$16 sps:$4 sm:$0xff]   ;;  %v12934_v32 = vld [vmem:[#allocation10 + $0x9a0] ss:$16 sps:$4 sm:$0xff]  }
 0x753   :  { %9823 = vmatprep.subr.bf16.mxu0 %v12879_v1  ;;  %v12937_v1 = vld [vmem:[#allocation10 + $0x1540] ss:$16 sps:$4 sm:$0xff]  }
 0x755   :  { %9033 = vmatmul.mubr.bf16.vlgmr.msra.gmra.mrb[80].mxu0 %v14160_v46  ;;  %6918 = vmatpush1.bf16.msra.mxu1 %v12874_v17  ;;  %v12892_v46 = vld [vmem:[#allocation10 + $0x8c0] ss:$16 sps:$4 sm:$0xff]  }
 0x756   :  { %9824 = vmatpush1.bf16.msra.mxu0 %v12877_v33  ;;  %9855 = vmatprep.mubr.bf16.mxu0 %v14180_v63  ;;  %v12940_v17 = vld [vmem:[#allocation10 + $0x9c0] ss:$16 sps:$4 sm:$0xff]  }
 0x757   :  { %6919 = vmatprep.subr.bf16.mxu1 %v12882_v42  ;;  %9825 = vmatprep.subr.bf16.mxu0 %v12885_v14  ;;  %v12943_v33 = vld [vmem:[#allocation10 + $0x1560] ss:$16 sps:$4 sm:$0xff]   ;;  %v12948_v42 = vld [vmem:[#allocation10 + $0x9e4] ss:$16 sps:$4 sm:$0xff]  }
 0x758   :  { %v12951_v14 = vld [vmem:[#allocation10 + $0x1584] ss:$16 sps:$4 sm:$0xff]  }
 0x759   :  { %6920 = vmatpush1.bf16.msra.mxu1 %v12880_v28  ;;  %v12946_v28 = vld [vmem:[#allocation10 + $0x9e0] ss:$16 sps:$4 sm:$0xff]  }
 0x75a   :  { %9826 = vmatpush1.bf16.msra.mxu0 %v12883_v59  ;;  %6921 = vmatprep.subr.bf16.mxu1 %v12888_v0  ;;  %v11700_v59 = vunpack.i.h.bf16 %v14056_v62  ;;  %v11697_v0 = vunpack.i.l.bf16 %v14056_v62 }
 0x75b   :  { %9827 = vmatprep.subr.bf16.mxu0 %v12891_v55  ;;  %v12949_v55 = vld [vmem:[#allocation10 + $0x1580] ss:$16 sps:$4 sm:$0xff]  }
 0x75d   :  { %6922 = vmatpush1.bf16.msra.mxu1 %v12886_v40  ;;  %v12954_v40 = vld [vmem:[#allocation10 + $0xa04] ss:$16 sps:$4 sm:$0xff]  }
 0x75e   :  { %9828 = vmatpush1.bf16.msra.mxu0 %v12889_v2  ;;  %6923 = vmatprep.subr.bf16.mxu1 %v12894_v56  ;;  %v11824_v2 = vunpack.i.h.bf16 %v14101_v54  ;;  %v11821_v56 = vunpack.i.l.bf16 %v14101_v54  ;;  %v12958_v54 = vld [vmem:[#allocation10 + $0xa20] ss:$16 sps:$4 sm:$0xff]  }
 0x75f   :  { %9829 = vmatprep.subr.bf16.mxu0 %v12897_v11  ;;  %v12957_v11 = vld [vmem:[#allocation10 + $0x15a4] ss:$16 sps:$4 sm:$0xff]  }
 0x760   :  { %v14190_v62 = vpack.c.bf16 %v11824_v2, %v11821_v56  ;;  %v13009_v2 = vld [vmem:[#allocation10 + $0x16c0] ss:$16 sps:$4 sm:$0xff]   ;;  %v13014_v56 = vld [vmem:[#allocation10 + $0xb44] ss:$16 sps:$4 sm:$0xff]  }
 0x761   :  { %6924 = vmatpush1.bf16.msra.mxu1 %v12892_v46  ;;  %v12952_v46 = vld [vmem:[#allocation10 + $0xa00] ss:$16 sps:$4 sm:$0xff]  }
 0x762   :  { %9830 = vmatpush1.bf16.msra.mxu0 %v12895_v5  ;;  %6925 = vmatprep.subr.bf16.mxu1 %v12900_v35  ;;  %v14188_v5 = vpack.c.bf16 %v11700_v59, %v11697_v0  ;;  %v12955_v35 = vld [vmem:[#allocation10 + $0x15a0] ss:$16 sps:$4 sm:$0xff]   ;;  %v13008_v0 = vld [vmem:[#allocation10 + $0xb24] ss:$16 sps:$4 sm:$0xff]  }
 0x763   :  { %9831 = vmatprep.subr.bf16.mxu0 %v12903_v22  ;;  %v12960_v22 = vld [vmem:[#allocation10 + $0xa24] ss:$16 sps:$4 sm:$0xff]   ;;  %v13003_v59 = vld [vmem:[#allocation10 + $0x16a0] ss:$16 sps:$4 sm:$0xff]  }
 0x765   :  { %6926 = vmatpush1.bf16.msra.mxu1 %v12898_v47  ;;  %v12963_v47 = vld [vmem:[#allocation10 + $0x15c4] ss:$16 sps:$4 sm:$0xff]  }
 0x766   :  { %9832 = vmatpush1.bf16.msra.mxu0 %v12901_v38  ;;  %6927 = vmatprep.subr.bf16.mxu1 %v12906_v8  ;;  %v12961_v38 = vld [vmem:[#allocation10 + $0x15c0] ss:$16 sps:$4 sm:$0xff]   ;;  %v12966_v8 = vld [vmem:[#allocation10 + $0xa44] ss:$16 sps:$4 sm:$0xff]  }
 0x767   :  { %9833 = vmatprep.subr.bf16.mxu0 %v12909_v41  ;;  %v12969_v41 = vld [vmem:[#allocation10 + $0x15e4] ss:$16 sps:$4 sm:$0xff]  }
 0x769   :  { %6928 = vmatpush1.bf16.msra.mxu1 %v12904_v25  ;;  %v12964_v25 = vld [vmem:[#allocation10 + $0xa40] ss:$16 sps:$4 sm:$0xff]  }
 0x76a   :  { %9834 = vmatpush1.bf16.msra.mxu0 %v12907_v58  ;;  %6929 = vmatprep.subr.bf16.mxu1 %v12912_v31  ;;  %v12967_v58 = vld [vmem:[#allocation10 + $0x15e0] ss:$16 sps:$4 sm:$0xff]   ;;  %v12972_v31 = vld [vmem:[#allocation10 + $0xa64] ss:$16 sps:$4 sm:$0xff]  }
 0x76b   :  { %9835 = vmatprep.subr.bf16.mxu0 %v12915_v6  ;;  %v11715_v6 = vunpack.i.h.bf16 %v14060_v45 }
 0x76d   :  { %6930 = vmatpush1.bf16.msra.mxu1 %v12910_v57  ;;  %v11712_v57 = vunpack.i.l.bf16 %v14060_v45  ;;  %v12976_v45 = vld [vmem:[#allocation10 + $0xa80] ss:$16 sps:$4 sm:$0xff]  }
 0x76e   :  { %9836 = vmatpush1.bf16.msra.mxu0 %v12913_v4  ;;  %6931 = vmatprep.subr.bf16.mxu1 %v12918_v12  ;;  %v12975_v4 = vld [vmem:[#allocation10 + $0x1604] ss:$16 sps:$4 sm:$0xff]   ;;  %v11839_v12 = vunpack.i.h.bf16 %v14174_v19 }
 0x76f   :  { %9837 = vmatprep.subr.bf16.mxu0 %v12921_v23  ;;  %v11836_v23 = vunpack.i.l.bf16 %v14174_v19  ;;  %v12984_v19 = vld [vmem:[#allocation10 + $0xaa4] ss:$16 sps:$4 sm:$0xff]  }
 0x771   :  { %6932 = vmatpush1.bf16.msra.mxu1 %v12916_v37  ;;  %v12970_v37 = vld [vmem:[#allocation10 + $0xa60] ss:$16 sps:$4 sm:$0xff]  }
 0x772   :  { %9838 = vmatpush1.bf16.msra.mxu0 %v12919_v34  ;;  %6933 = vmatprep.subr.bf16.mxu1 %v12924_v61  ;;  %v12973_v34 = vld [vmem:[#allocation10 + $0x1600] ss:$16 sps:$4 sm:$0xff]   ;;  %v12978_v61 = vld [vmem:[#allocation10 + $0xa84] ss:$16 sps:$4 sm:$0xff]  }
 0x773   :  { %9839 = vmatprep.subr.bf16.mxu0 %v12927_v10  ;;  %v14198_v10 = vpack.c.bf16 %v11715_v6, %v11712_v57  ;;  %v13035_v6 = vld [vmem:[#allocation10 + $0x1744] ss:$16 sps:$4 sm:$0xff]   ;;  %v13030_v57 = vld [vmem:[#allocation10 + $0xba0] ss:$16 sps:$4 sm:$0xff]  }
 0x775   :  { %6934 = vmatpush1.bf16.msra.mxu1 %v12922_v53  ;;  %v12981_v53 = vld [vmem:[#allocation10 + $0x1624] ss:$16 sps:$4 sm:$0xff]  }
 0x776   :  { %9840 = vmatpush1.bf16.msra.mxu0 %v12925_v60  ;;  %6935 = vmatprep.subr.bf16.mxu1 %v12930_v51  ;;  %v14200_v60 = vpack.c.bf16 %v11839_v12, %v11836_v23  ;;  %v12979_v51 = vld [vmem:[#allocation10 + $0x1620] ss:$16 sps:$4 sm:$0xff]   ;;  %v13038_v12 = vld [vmem:[#allocation10 + $0xbc4] ss:$16 sps:$4 sm:$0xff]  }
 0x777   :  { %9841 = vmatprep.subr.bf16.mxu0 %v12933_v50  ;;  %v12987_v50 = vld [vmem:[#allocation10 + $0x1644] ss:$16 sps:$4 sm:$0xff]  }
 0x778   :  { %v13041_v23 = vld [vmem:[#allocation10 + $0x1764] ss:$16 sps:$4 sm:$0xff]  }
 0x779   :  { %6936 = vmatpush1.bf16.msra.mxu1 %v12928_v27  ;;  %v12982_v27 = vld [vmem:[#allocation10 + $0xaa0] ss:$16 sps:$4 sm:$0xff]  }
 0x77a   :  { %9842 = vmatpush1.bf16.msra.mxu0 %v12931_v44  ;;  %6937 = vmatprep.subr.bf16.mxu1 %v12936_v9  ;;  %v12985_v44 = vld [vmem:[#allocation10 + $0x1640] ss:$16 sps:$4 sm:$0xff]   ;;  %v12990_v9 = vld [vmem:[#allocation10 + $0xac4] ss:$16 sps:$4 sm:$0xff]  }
 0x77b   :  { %9843 = vmatprep.subr.bf16.mxu0 %v12939_v16  ;;  %v12993_v16 = vld [vmem:[#allocation10 + $0x1664] ss:$16 sps:$4 sm:$0xff]  }
 0x77d   :  { %6938 = vmatpush1.bf16.msra.mxu1 %v12934_v32  ;;  %v12988_v32 = vld [vmem:[#allocation10 + $0xac0] ss:$16 sps:$4 sm:$0xff]  }
 0x77e   :  { %9844 = vmatpush1.bf16.msra.mxu0 %v12937_v1  ;;  %6939 = vmatprep.subr.bf16.mxu1 %v12942_v21  ;;  %v12991_v1 = vld [vmem:[#allocation10 + $0x1660] ss:$16 sps:$4 sm:$0xff]   ;;  %v12996_v21 = vld [vmem:[#allocation10 + $0xae4] ss:$16 sps:$4 sm:$0xff]  }
 0x77f   :  { %9845 = vmatprep.subr.bf16.mxu0 %v12945_v48  ;;  %v12999_v48 = vld [vmem:[#allocation10 + $0x1684] ss:$16 sps:$4 sm:$0xff]  }
 0x781   :  { %6940 = vmatpush1.bf16.msra.mxu1 %v12940_v17  ;;  %v12994_v17 = vld [vmem:[#allocation10 + $0xae0] ss:$16 sps:$4 sm:$0xff]  }
 0x782   :  { %9846 = vmatpush1.bf16.msra.mxu0 %v12943_v33  ;;  %6941 = vmatprep.subr.bf16.mxu1 %v12948_v42  ;;  %v12997_v33 = vld [vmem:[#allocation10 + $0x1680] ss:$16 sps:$4 sm:$0xff]   ;;  %v13002_v42 = vld [vmem:[#allocation10 + $0xb04] ss:$16 sps:$4 sm:$0xff]  }
 0x783   :  { %9847 = vmatprep.subr.bf16.mxu0 %v12951_v14  ;;  %v13005_v14 = vld [vmem:[#allocation10 + $0x16a4] ss:$16 sps:$4 sm:$0xff]  }
 0x785   :  { %6942 = vmatpush1.bf16.msra.mxu1 %v12946_v28  ;;  %v13000_v28 = vld [vmem:[#allocation10 + $0xb00] ss:$16 sps:$4 sm:$0xff]  }
 0x786   :  { %9848 = vmatpush1.bf16.msra.mxu0 %v12949_v55  ;;  %6954 = vmatprep.subr.bf16.mxu1 %v12954_v40  ;;  %v13011_v55 = vld [vmem:[#allocation10 + $0x16c4] ss:$16 sps:$4 sm:$0xff]   ;;  %v13006_v40 = vld [vmem:[#allocation10 + $0xb20] ss:$16 sps:$4 sm:$0xff]  }
 0x787   :  { %9849 = vmatprep.subr.bf16.mxu0 %v12957_v11  ;;  %v13017_v11 = vld [vmem:[#allocation10 + $0x16e4] ss:$16 sps:$4 sm:$0xff]  }
 0x788   :  { %6944 = vmatmul.mubr.bf16.vlgmr.msra.gmra.mrb[76].mxu1 %v14188_v5 }
 0x789   :  { %6955 = vmatpush1.bf16.msra.mxu1 %v12952_v46  ;;  %6986 = vmatprep.mubr.bf16.mxu1 %v14190_v62  ;;  %v13012_v46 = vld [vmem:[#allocation10 + $0xb40] ss:$16 sps:$4 sm:$0xff]  }
 0x78a   :  { %9850 = vmatpush1.bf16.msra.mxu0 %v12955_v35  ;;  %6956 = vmatprep.subr.bf16.mxu1 %v12960_v22  ;;  %v13015_v35 = vld [vmem:[#allocation10 + $0x16e0] ss:$16 sps:$4 sm:$0xff]   ;;  %v13020_v22 = vld [vmem:[#allocation10 + $0xb64] ss:$16 sps:$4 sm:$0xff]  }
 0x78b   :  { %9851 = vmatprep.subr.bf16.mxu0 %v12963_v47  ;;  %v13023_v47 = vld [vmem:[#allocation10 + $0x1704] ss:$16 sps:$4 sm:$0xff]  }
 0x78d   :  { %6957 = vmatpush1.bf16.msra.mxu1 %v12958_v54  ;;  %v13018_v54 = vld [vmem:[#allocation10 + $0xb60] ss:$16 sps:$4 sm:$0xff]  }
 0x78e   :  { %9852 = vmatpush1.bf16.msra.mxu0 %v12961_v38  ;;  %6958 = vmatprep.subr.bf16.mxu1 %v12966_v8  ;;  %v13021_v38 = vld [vmem:[#allocation10 + $0x1700] ss:$16 sps:$4 sm:$0xff]   ;;  %v13026_v8 = vld [vmem:[#allocation10 + $0xb84] ss:$16 sps:$4 sm:$0xff]  }
 0x78f   :  { %9853 = vmatprep.subr.bf16.mxu0 %v12969_v41  ;;  %v13029_v41 = vld [vmem:[#allocation10 + $0x1724] ss:$16 sps:$4 sm:$0xff]  }
 0x791   :  { %6959 = vmatpush1.bf16.msra.mxu1 %v12964_v25  ;;  %v13024_v25 = vld [vmem:[#allocation10 + $0xb80] ss:$16 sps:$4 sm:$0xff]  }
 0x792   :  { %9854 = vmatpush1.bf16.msra.mxu0 %v12967_v58  ;;  %6960 = vmatprep.subr.bf16.mxu1 %v12972_v31  ;;  %v13027_v58 = vld [vmem:[#allocation10 + $0x1720] ss:$16 sps:$4 sm:$0xff]   ;;  %v13032_v31 = vld [vmem:[#allocation10 + $0xba4] ss:$16 sps:$4 sm:$0xff]  }
 0x793   :  { %9866 = vmatprep.subr.bf16.mxu0 %v12975_v4  ;;  %v13033_v4 = vld [vmem:[#allocation10 + $0x1740] ss:$16 sps:$4 sm:$0xff]  }
 0x795   :  { %9856 = vmatmul.mubr.bf16.vlgmr.msra.gmra.mrb[76].mxu0 %v14198_v10  ;;  %6961 = vmatpush1.bf16.msra.mxu1 %v12970_v37  ;;  %v13036_v37 = vld [vmem:[#allocation10 + $0xbc0] ss:$16 sps:$4 sm:$0xff]  }
 0x796   :  { %9867 = vmatpush1.bf16.msra.mxu0 %v12973_v34  ;;  %6962 = vmatprep.subr.bf16.mxu1 %v12978_v61  ;;  %v13039_v34 = vld [vmem:[#allocation10 + $0x1760] ss:$16 sps:$4 sm:$0xff]   ;;  %v13044_v61 = vld [vmem:[#allocation10 + $0xbe4] ss:$16 sps:$4 sm:$0xff]  }
 0x797   :  { %9868 = vmatprep.subr.bf16.mxu0 %v12981_v53  ;;  %9898 = vmatprep.mubr.bf16.mxu0 %v14200_v60  ;;  %v13047_v53 = vld [vmem:[#allocation10 + $0x1784] ss:$16 sps:$4 sm:$0xff]  }
 0x799   :  { %6963 = vmatpush1.bf16.msra.mxu1 %v12976_v45  ;;  %v13042_v45 = vld [vmem:[#allocation10 + $0xbe0] ss:$16 sps:$4 sm:$0xff]  }
 0x79a   :  { %9869 = vmatpush1.bf16.msra.mxu0 %v12979_v51  ;;  %6964 = vmatprep.subr.bf16.mxu1 %v12984_v19  ;;  %v11886_v51 = vunpack.i.h.bf16 %v14086_v7  ;;  %v11883_v19 = vunpack.i.l.bf16 %v14086_v7  ;;  %v13054_v7 = vld [vmem:[#allocation10 + $0x828] ss:$16 sps:$4 sm:$0xff]  }
 0x79b   :  { %9870 = vmatprep.subr.bf16.mxu0 %v12987_v50  ;;  %v13045_v50 = vld [vmem:[#allocation10 + $0x1780] ss:$16 sps:$4 sm:$0xff]  }
 0x79d   :  { %6965 = vmatpush1.bf16.msra.mxu1 %v12982_v27  ;;  %v13050_v27 = vld [vmem:[#allocation10 + $0x80c] ss:$16 sps:$4 sm:$0xff]  }
 0x79e   :  { %9871 = vmatpush1.bf16.msra.mxu0 %v12985_v44  ;;  %6966 = vmatprep.subr.bf16.mxu1 %v12990_v9  ;;  %v13053_v44 = vld [vmem:[#allocation10 + $0x17a4] ss:$16 sps:$4 sm:$0xff]   ;;  %v13048_v9 = vld [vmem:[#allocation10 + $0x808] ss:$16 sps:$4 sm:$0xff]  }
 0x79f   :  { %9872 = vmatprep.subr.bf16.mxu0 %v12993_v16  ;;  %v14206_v16 = vpack.c.bf16 %v11886_v51, %v11883_v19  ;;  %v13113_v51 = vld [vmem:[#allocation10 + $0x14ec] ss:$16 sps:$4 sm:$0xff]   ;;  %v13108_v19 = vld [vmem:[#allocation10 + $0x948] ss:$16 sps:$4 sm:$0xff]  }
 0x7a1   :  { %6967 = vmatpush1.bf16.msra.mxu1 %v12988_v32  ;;  %v13051_v32 = vld [vmem:[#allocation10 + $0x17a0] ss:$16 sps:$4 sm:$0xff]  }
 0x7a2   :  { %9873 = vmatpush1.bf16.msra.mxu0 %v12991_v1  ;;  %6968 = vmatprep.subr.bf16.mxu1 %v12996_v21  ;;  %v13056_v1 = vld [vmem:[#allocation10 + $0x82c] ss:$16 sps:$4 sm:$0xff]   ;;  %v13059_v21 = vld [vmem:[#allocation10 + $0x17c4] ss:$16 sps:$4 sm:$0xff]  }
 0x7a3   :  { %9874 = vmatprep.subr.bf16.mxu0 %v12999_v48  ;;  %v13057_v48 = vld [vmem:[#allocation10 + $0x17c0] ss:$16 sps:$4 sm:$0xff]  }
 0x7a5   :  { %6969 = vmatpush1.bf16.msra.mxu1 %v12994_v17  ;;  %v13062_v17 = vld [vmem:[#allocation10 + $0x84c] ss:$16 sps:$4 sm:$0xff]  }
 0x7a6   :  { %9875 = vmatpush1.bf16.msra.mxu0 %v12997_v33  ;;  %6970 = vmatprep.subr.bf16.mxu1 %v13002_v42  ;;  %v13065_v33 = vld [vmem:[#allocation10 + $0x17e4] ss:$16 sps:$4 sm:$0xff]   ;;  %v11901_v42 = vunpack.i.h.bf16 %v14176_v52 }
 0x7a7   :  { %9876 = vmatprep.subr.bf16.mxu0 %v13005_v14  ;;  %v11898_v14 = vunpack.i.l.bf16 %v14176_v52  ;;  %v13072_v52 = vld [vmem:[#allocation10 + $0x888] ss:$16 sps:$4 sm:$0xff]  }
 0x7a9   :  { %6971 = vmatpush1.bf16.msra.mxu1 %v13000_v28  ;;  %v13060_v28 = vld [vmem:[#allocation10 + $0x848] ss:$16 sps:$4 sm:$0xff]  }
 0x7aa   :  { %9877 = vmatpush1.bf16.msra.mxu0 %v13003_v59  ;;  %6972 = vmatprep.subr.bf16.mxu1 %v13008_v0  ;;  %v13063_v59 = vld [vmem:[#allocation10 + $0x17e0] ss:$16 sps:$4 sm:$0xff]   ;;  %v13068_v0 = vld [vmem:[#allocation10 + $0x86c] ss:$16 sps:$4 sm:$0xff]  }
 0x7ab   :  { %9878 = vmatprep.subr.bf16.mxu0 %v13011_v55  ;;  %v13071_v55 = vld [vmem:[#allocation10 + $0x140c] ss:$16 sps:$4 sm:$0xff]  }
 0x7ad   :  { %6973 = vmatpush1.bf16.msra.mxu1 %v13006_v40  ;;  %v13066_v40 = vld [vmem:[#allocation10 + $0x868] ss:$16 sps:$4 sm:$0xff]  }
 0x7ae   :  { %9879 = vmatpush1.bf16.msra.mxu0 %v13009_v2  ;;  %6974 = vmatprep.subr.bf16.mxu1 %v13014_v56  ;;  %v13069_v2 = vld [vmem:[#allocation10 + $0x1408] ss:$16 sps:$4 sm:$0xff]   ;;  %v13074_v56 = vld [vmem:[#allocation10 + $0x88c] ss:$16 sps:$4 sm:$0xff]  }
 0x7af   :  { %9880 = vmatprep.subr.bf16.mxu0 %v13017_v11  ;;  %v13077_v11 = vld [vmem:[#allocation10 + $0x142c] ss:$16 sps:$4 sm:$0xff]  }
 0x7b1   :  { %6975 = vmatpush1.bf16.msra.mxu1 %v13012_v46  ;;  %v13075_v46 = vld [vmem:[#allocation10 + $0x1428] ss:$16 sps:$4 sm:$0xff]  }
 0x7b2   :  { %9881 = vmatpush1.bf16.msra.mxu0 %v13015_v35  ;;  %6976 = vmatprep.subr.bf16.mxu1 %v13020_v22  ;;  %v13080_v35 = vld [vmem:[#allocation10 + $0x8ac] ss:$16 sps:$4 sm:$0xff]  }
 0x7b3   :  { %9882 = vmatprep.subr.bf16.mxu0 %v13023_v47  ;;  %v13083_v22 = vld [vmem:[#allocation10 + $0x144c] ss:$16 sps:$4 sm:$0xff]   ;;  %v13078_v47 = vld [vmem:[#allocation10 + $0x8a8] ss:$16 sps:$4 sm:$0xff]  }
 0x7b5   :  { %6977 = vmatpush1.bf16.msra.mxu1 %v13018_v54  ;;  %v13081_v54 = vld [vmem:[#allocation10 + $0x1448] ss:$16 sps:$4 sm:$0xff]  }
 0x7b6   :  { %9883 = vmatpush1.bf16.msra.mxu0 %v13021_v38  ;;  %6978 = vmatprep.subr.bf16.mxu1 %v13026_v8  ;;  %v13086_v38 = vld [vmem:[#allocation10 + $0x8cc] ss:$16 sps:$4 sm:$0xff]  }
 0x7b7   :  { %9884 = vmatprep.subr.bf16.mxu0 %v13029_v41  ;;  %v13089_v8 = vld [vmem:[#allocation10 + $0x146c] ss:$16 sps:$4 sm:$0xff]   ;;  %v13084_v41 = vld [vmem:[#allocation10 + $0x8c8] ss:$16 sps:$4 sm:$0xff]  }
 0x7b9   :  { %6979 = vmatpush1.bf16.msra.mxu1 %v13024_v25  ;;  %v13087_v25 = vld [vmem:[#allocation10 + $0x1468] ss:$16 sps:$4 sm:$0xff]  }
 0x7ba   :  { %9885 = vmatpush1.bf16.msra.mxu0 %v13027_v58  ;;  %6980 = vmatprep.subr.bf16.mxu1 %v13032_v31  ;;  %v13092_v58 = vld [vmem:[#allocation10 + $0x8ec] ss:$16 sps:$4 sm:$0xff]   ;;  %v13090_v31 = vld [vmem:[#allocation10 + $0x8e8] ss:$16 sps:$4 sm:$0xff]  }
 0x7bb   :  { %9886 = vmatprep.subr.bf16.mxu0 %v13035_v6  ;;  %v13093_v6 = vld [vmem:[#allocation10 + $0x1488] ss:$16 sps:$4 sm:$0xff]  }
 0x7bd   :  { %6981 = vmatpush1.bf16.msra.mxu1 %v13030_v57  ;;  %v13098_v57 = vld [vmem:[#allocation10 + $0x90c] ss:$16 sps:$4 sm:$0xff]  }
 0x7be   :  { %9887 = vmatpush1.bf16.msra.mxu0 %v13033_v4  ;;  %6982 = vmatprep.subr.bf16.mxu1 %v13038_v12  ;;  %v13101_v4 = vld [vmem:[#allocation10 + $0x14ac] ss:$16 sps:$4 sm:$0xff]   ;;  %v13096_v12 = vld [vmem:[#allocation10 + $0x908] ss:$16 sps:$4 sm:$0xff]  }
 0x7bf   :  { %9888 = vmatprep.subr.bf16.mxu0 %v13041_v23  ;;  %v13099_v23 = vld [vmem:[#allocation10 + $0x14a8] ss:$16 sps:$4 sm:$0xff]  }
 0x7c1   :  { %6983 = vmatpush1.bf16.msra.mxu1 %v13036_v37  ;;  %v13104_v37 = vld [vmem:[#allocation10 + $0x92c] ss:$16 sps:$4 sm:$0xff]  }
 0x7c2   :  { %9889 = vmatpush1.bf16.msra.mxu0 %v13039_v34  ;;  %6984 = vmatprep.subr.bf16.mxu1 %v13044_v61  ;;  %v13107_v34 = vld [vmem:[#allocation10 + $0x14cc] ss:$16 sps:$4 sm:$0xff]   ;;  %v13102_v61 = vld [vmem:[#allocation10 + $0x928] ss:$16 sps:$4 sm:$0xff]  }
 0x7c3   :  { %9890 = vmatprep.subr.bf16.mxu0 %v13047_v53  ;;  %v13105_v53 = vld [vmem:[#allocation10 + $0x14c8] ss:$16 sps:$4 sm:$0xff]  }
 0x7c5   :  { %6985 = vmatpush1.bf16.msra.mxu1 %v13042_v45  ;;  %v13110_v45 = vld [vmem:[#allocation10 + $0x94c] ss:$16 sps:$4 sm:$0xff]  }
 0x7c6   :  { %9891 = vmatpush1.bf16.msra.mxu0 %v13045_v50  ;;  %6997 = vmatprep.subr.bf16.mxu1 %v13050_v27  ;;  %v13111_v50 = vld [vmem:[#allocation10 + $0x14e8] ss:$16 sps:$4 sm:$0xff]   ;;  %v13116_v27 = vld [vmem:[#allocation10 + $0x96c] ss:$16 sps:$4 sm:$0xff]  }
 0x7c7   :  { %9892 = vmatprep.subr.bf16.mxu0 %v13053_v44  ;;  %v13119_v44 = vld [vmem:[#allocation10 + $0x150c] ss:$16 sps:$4 sm:$0xff]  }
 0x7c8   :  { %6987 = vmatmul.mubr.bf16.vlgmr.msra.gmra.mrb[76].mxu1 %v14206_v16 }
 0x7c9   :  { %6998 = vmatpush1.bf16.msra.mxu1 %v13048_v9  ;;  %7029 = vmatprep.mubr.bf16.mxu1 %v14170_v30  ;;  %v14212_v30 = vpack.c.bf16 %v11901_v42, %v11898_v14  ;;  %v13114_v9 = vld [vmem:[#allocation10 + $0x968] ss:$16 sps:$4 sm:$0xff]  }
 0x7ca   :  { %9893 = vmatpush1.bf16.msra.mxu0 %v13051_v32  ;;  %6999 = vmatprep.subr.bf16.mxu1 %v13056_v1  ;;  %v13117_v32 = vld [vmem:[#allocation10 + $0x1508] ss:$16 sps:$4 sm:$0xff]   ;;  %v13122_v1 = vld [vmem:[#allocation10 + $0x98c] ss:$16 sps:$4 sm:$0xff]  }
 0x7cb   :  { %9894 = vmatprep.subr.bf16.mxu0 %v13059_v21  ;;  %v13125_v21 = vld [vmem:[#allocation10 + $0x152c] ss:$16 sps:$4 sm:$0xff]   ;;  %v13126_v42 = vld [vmem:[#allocation10 + $0x9a8] ss:$16 sps:$4 sm:$0xff]  }
 0x7cc   :  { %v13129_v14 = vld [vmem:[#allocation10 + $0x1548] ss:$16 sps:$4 sm:$0xff]  }
 0x7cd   :  { %7000 = vmatpush1.bf16.msra.mxu1 %v13054_v7  ;;  %v13120_v7 = vld [vmem:[#allocation10 + $0x988] ss:$16 sps:$4 sm:$0xff]  }
 0x7ce   :  { %9895 = vmatpush1.bf16.msra.mxu0 %v13057_v48  ;;  %7001 = vmatprep.subr.bf16.mxu1 %v13062_v17  ;;  %v13123_v48 = vld [vmem:[#allocation10 + $0x1528] ss:$16 sps:$4 sm:$0xff]   ;;  %v13128_v17 = vld [vmem:[#allocation10 + $0x9ac] ss:$16 sps:$4 sm:$0xff]  }
 0x7cf   :  { %9896 = vmatprep.subr.bf16.mxu0 %v13065_v33  ;;  %v13131_v33 = vld [vmem:[#allocation10 + $0x154c] ss:$16 sps:$4 sm:$0xff]  }
 0x7d1   :  { %7002 = vmatpush1.bf16.msra.mxu1 %v13060_v28  ;;  %v13134_v28 = vld [vmem:[#allocation10 + $0x9cc] ss:$16 sps:$4 sm:$0xff]  }
 0x7d2   :  { %9897 = vmatpush1.bf16.msra.mxu0 %v13063_v59  ;;  %7003 = vmatprep.subr.bf16.mxu1 %v13068_v0  ;;  %v13137_v59 = vld [vmem:[#allocation10 + $0x156c] ss:$16 sps:$4 sm:$0xff]   ;;  %v13132_v0 = vld [vmem:[#allocation10 + $0x9c8] ss:$16 sps:$4 sm:$0xff]  }
 0x7d3   :  { %9909 = vmatprep.subr.bf16.mxu0 %v13071_v55  ;;  %v13135_v55 = vld [vmem:[#allocation10 + $0x1568] ss:$16 sps:$4 sm:$0xff]  }
 0x7d5   :  { %9899 = vmatmul.mubr.bf16.vlgmr.msra.gmra.mrb[76].mxu0 %v14212_v30  ;;  %7004 = vmatpush1.bf16.msra.mxu1 %v13066_v40  ;;  %v13140_v40 = vld [vmem:[#allocation10 + $0x9ec] ss:$16 sps:$4 sm:$0xff]  }
 0x7d6   :  { %9910 = vmatpush1.bf16.msra.mxu0 %v13069_v2  ;;  %9941 = vmatprep.mubr.bf16.mxu0 %v14180_v63  ;;  %v13095_v63 = vld [vmem:[#allocation10 + $0x148c] ss:$16 sps:$4 sm:$0xff]  }
 0x7d7   :  { %7005 = vmatprep.subr.bf16.mxu1 %v13074_v56  ;;  %9911 = vmatprep.subr.bf16.mxu0 %v13077_v11  ;;  %v13143_v2 = vld [vmem:[#allocation10 + $0x158c] ss:$16 sps:$4 sm:$0xff]   ;;  %v13138_v56 = vld [vmem:[#allocation10 + $0x9e8] ss:$16 sps:$4 sm:$0xff]  }
 0x7d8   :  { %v13141_v11 = vld [vmem:[#allocation10 + $0x1588] ss:$16 sps:$4 sm:$0xff]  }
 0x7d9   :  { %7006 = vmatpush1.bf16.msra.mxu1 %v13072_v52  ;;  %v13146_v52 = vld [vmem:[#allocation10 + $0xa0c] ss:$16 sps:$4 sm:$0xff]  }
 0x7da   :  { %9912 = vmatpush1.bf16.msra.mxu0 %v13075_v46  ;;  %7007 = vmatprep.subr.bf16.mxu1 %v13080_v35  ;;  %v13149_v46 = vld [vmem:[#allocation10 + $0x15ac] ss:$16 sps:$4 sm:$0xff]   ;;  %v13144_v35 = vld [vmem:[#allocation10 + $0xa08] ss:$16 sps:$4 sm:$0xff]  }
 0x7db   :  { %9913 = vmatprep.subr.bf16.mxu0 %v13083_v22  ;;  %v13147_v22 = vld [vmem:[#allocation10 + $0x15a8] ss:$16 sps:$4 sm:$0xff]  }
 0x7dd   :  { %7008 = vmatpush1.bf16.msra.mxu1 %v13078_v47  ;;  %v13152_v47 = vld [vmem:[#allocation10 + $0xa2c] ss:$16 sps:$4 sm:$0xff]  }
 0x7de   :  { %9914 = vmatpush1.bf16.msra.mxu0 %v13081_v54  ;;  %7009 = vmatprep.subr.bf16.mxu1 %v13086_v38  ;;  %v13155_v54 = vld [vmem:[#allocation10 + $0x15cc] ss:$16 sps:$4 sm:$0xff]   ;;  %v13150_v38 = vld [vmem:[#allocation10 + $0xa28] ss:$16 sps:$4 sm:$0xff]  }
 0x7df   :  { %9915 = vmatprep.subr.bf16.mxu0 %v13089_v8  ;;  %v13153_v8 = vld [vmem:[#allocation10 + $0x15c8] ss:$16 sps:$4 sm:$0xff]  }
 0x7e1   :  { %7010 = vmatpush1.bf16.msra.mxu1 %v13084_v41  ;;  %v13158_v41 = vld [vmem:[#allocation10 + $0xa4c] ss:$16 sps:$4 sm:$0xff]  }
 0x7e2   :  { %9916 = vmatpush1.bf16.msra.mxu0 %v13087_v25  ;;  %7011 = vmatprep.subr.bf16.mxu1 %v13092_v58  ;;  %v13161_v25 = vld [vmem:[#allocation10 + $0x15ec] ss:$16 sps:$4 sm:$0xff]   ;;  %v13156_v58 = vld [vmem:[#allocation10 + $0xa48] ss:$16 sps:$4 sm:$0xff]  }
 0x7e3   :  { %9917 = vmatprep.subr.bf16.mxu0 %v13095_v63  ;;  %v13159_v63 = vld [vmem:[#allocation10 + $0x15e8] ss:$16 sps:$4 sm:$0xff]  }
 0x7e5   :  { %7012 = vmatpush1.bf16.msra.mxu1 %v13090_v31  ;;  %v13164_v31 = vld [vmem:[#allocation10 + $0xa6c] ss:$16 sps:$4 sm:$0xff]  }
 0x7e6   :  { %9918 = vmatpush1.bf16.msra.mxu0 %v13093_v6  ;;  %7013 = vmatprep.subr.bf16.mxu1 %v13098_v57  ;;  %v13167_v6 = vld [vmem:[#allocation10 + $0x160c] ss:$16 sps:$4 sm:$0xff]  }
 0x7e7   :  { %9919 = vmatprep.subr.bf16.mxu0 %v13101_v4  ;;  %v13170_v57 = vld [vmem:[#allocation10 + $0xa8c] ss:$16 sps:$4 sm:$0xff]  }
 0x7e8   :  { %v13173_v4 = vld [vmem:[#allocation10 + $0x162c] ss:$16 sps:$4 sm:$0xff]  }
 0x7e9   :  { %7014 = vmatpush1.bf16.msra.mxu1 %v13096_v12  ;;  %v13168_v12 = vld [vmem:[#allocation10 + $0xa88] ss:$16 sps:$4 sm:$0xff]  }
 0x7ea   :  { %9920 = vmatpush1.bf16.msra.mxu0 %v13099_v23  ;;  %7015 = vmatprep.subr.bf16.mxu1 %v13104_v37  ;;  %v13171_v23 = vld [vmem:[#allocation10 + $0x1628] ss:$16 sps:$4 sm:$0xff]   ;;  %v13176_v37 = vld [vmem:[#allocation10 + $0xaac] ss:$16 sps:$4 sm:$0xff]  }
 0x7eb   :  { %9921 = vmatprep.subr.bf16.mxu0 %v13107_v34  ;;  %v13179_v34 = vld [vmem:[#allocation10 + $0x164c] ss:$16 sps:$4 sm:$0xff]  }
 0x7ed   :  { %7016 = vmatpush1.bf16.msra.mxu1 %v13102_v61  ;;  %v13174_v61 = vld [vmem:[#allocation10 + $0xaa8] ss:$16 sps:$4 sm:$0xff]  }
 0x7ee   :  { %9922 = vmatpush1.bf16.msra.mxu0 %v13105_v53  ;;  %7017 = vmatprep.subr.bf16.mxu1 %v13110_v45  ;;  %v13177_v53 = vld [vmem:[#allocation10 + $0x1648] ss:$16 sps:$4 sm:$0xff]   ;;  %v13182_v45 = vld [vmem:[#allocation10 + $0xacc] ss:$16 sps:$4 sm:$0xff]  }
 0x7ef   :  { %9923 = vmatprep.subr.bf16.mxu0 %v13113_v51  ;;  %v13185_v51 = vld [vmem:[#allocation10 + $0x166c] ss:$16 sps:$4 sm:$0xff]  }
 0x7f1   :  { %7018 = vmatpush1.bf16.msra.mxu1 %v13108_v19  ;;  %v13183_v19 = vld [vmem:[#allocation10 + $0x1668] ss:$16 sps:$4 sm:$0xff]  }
 0x7f2   :  { %9924 = vmatpush1.bf16.msra.mxu0 %v13111_v50  ;;  %7019 = vmatprep.subr.bf16.mxu1 %v13116_v27  ;;  %v13188_v50 = vld [vmem:[#allocation10 + $0xaec] ss:$16 sps:$4 sm:$0xff]   ;;  %v13186_v27 = vld [vmem:[#allocation10 + $0xae8] ss:$16 sps:$4 sm:$0xff]  }
 0x7f3   :  { %9925 = vmatprep.subr.bf16.mxu0 %v13119_v44  ;;  %v13189_v44 = vld [vmem:[#allocation10 + $0x1688] ss:$16 sps:$4 sm:$0xff]  }
 0x7f5   :  { %7020 = vmatpush1.bf16.msra.mxu1 %v13114_v9  ;;  %v13194_v9 = vld [vmem:[#allocation10 + $0xb0c] ss:$16 sps:$4 sm:$0xff]  }
 0x7f6   :  { %9926 = vmatpush1.bf16.msra.mxu0 %v13117_v32  ;;  %7021 = vmatprep.subr.bf16.mxu1 %v13122_v1  ;;  %v13197_v32 = vld [vmem:[#allocation10 + $0x16ac] ss:$16 sps:$4 sm:$0xff]   ;;  %v13192_v1 = vld [vmem:[#allocation10 + $0xb08] ss:$16 sps:$4 sm:$0xff]  }
 0x7f7   :  { %9927 = vmatprep.subr.bf16.mxu0 %v13125_v21  ;;  %v13195_v21 = vld [vmem:[#allocation10 + $0x16a8] ss:$16 sps:$4 sm:$0xff]  }
 0x7f9   :  { %7022 = vmatpush1.bf16.msra.mxu1 %v13120_v7  ;;  %v13200_v7 = vld [vmem:[#allocation10 + $0xb2c] ss:$16 sps:$4 sm:$0xff]  }
 0x7fa   :  { %9928 = vmatpush1.bf16.msra.mxu0 %v13123_v48  ;;  %7023 = vmatprep.subr.bf16.mxu1 %v13128_v17  ;;  %v13203_v48 = vld [vmem:[#allocation10 + $0x16cc] ss:$16 sps:$4 sm:$0xff]   ;;  %v13198_v17 = vld [vmem:[#allocation10 + $0xb28] ss:$16 sps:$4 sm:$0xff]  }
 0x7fb   :  { %9929 = vmatprep.subr.bf16.mxu0 %v13131_v33  ;;  %v13201_v33 = vld [vmem:[#allocation10 + $0x16c8] ss:$16 sps:$4 sm:$0xff]  }
 0x7fd   :  { %7024 = vmatpush1.bf16.msra.mxu1 %v13126_v42  ;;  %v13206_v42 = vld [vmem:[#allocation10 + $0xb4c] ss:$16 sps:$4 sm:$0xff]  }
 0x7fe   :  { %9930 = vmatpush1.bf16.msra.mxu0 %v13129_v14  ;;  %7025 = vmatprep.subr.bf16.mxu1 %v13134_v28  ;;  %v13209_v14 = vld [vmem:[#allocation10 + $0x16ec] ss:$16 sps:$4 sm:$0xff]   ;;  %v13204_v28 = vld [vmem:[#allocation10 + $0xb48] ss:$16 sps:$4 sm:$0xff]  }
 0x7ff   :  { %9931 = vmatprep.subr.bf16.mxu0 %v13137_v59  ;;  %v13207_v59 = vld [vmem:[#allocation10 + $0x16e8] ss:$16 sps:$4 sm:$0xff]  }
 0x801   :  { %7026 = vmatpush1.bf16.msra.mxu1 %v13132_v0  ;;  %v13212_v0 = vld [vmem:[#allocation10 + $0xb6c] ss:$16 sps:$4 sm:$0xff]  }
 0x802   :  { %9932 = vmatpush1.bf16.msra.mxu0 %v13135_v55  ;;  %7027 = vmatprep.subr.bf16.mxu1 %v13140_v40  ;;  %v13215_v55 = vld [vmem:[#allocation10 + $0x170c] ss:$16 sps:$4 sm:$0xff]   ;;  %v13210_v40 = vld [vmem:[#allocation10 + $0xb68] ss:$16 sps:$4 sm:$0xff]  }
 0x803   :  { %9933 = vmatprep.subr.bf16.mxu0 %v13143_v2  ;;  %v13213_v2 = vld [vmem:[#allocation10 + $0x1708] ss:$16 sps:$4 sm:$0xff]  }
 0x805   :  { %7028 = vmatpush1.bf16.msra.mxu1 %v13138_v56  ;;  %v13218_v56 = vld [vmem:[#allocation10 + $0xb8c] ss:$16 sps:$4 sm:$0xff]  }
 0x806   :  { %9934 = vmatpush1.bf16.msra.mxu0 %v13141_v11  ;;  %7040 = vmatprep.subr.bf16.mxu1 %v13146_v52  ;;  %v13221_v11 = vld [vmem:[#allocation10 + $0x172c] ss:$16 sps:$4 sm:$0xff]   ;;  %v13216_v52 = vld [vmem:[#allocation10 + $0xb88] ss:$16 sps:$4 sm:$0xff]  }
 0x807   :  { %9935 = vmatprep.subr.bf16.mxu0 %v13149_v46  ;;  %v13219_v46 = vld [vmem:[#allocation10 + $0x1728] ss:$16 sps:$4 sm:$0xff]  }
 0x808   :  { %7030 = vmatmul.mubr.bf16.vlgmr.msra.gmra.mrb[80].mxu1 %v14188_v5  ;;  %v13162_v5 = vld [vmem:[#allocation10 + $0xa68] ss:$16 sps:$4 sm:$0xff]  }
 0x809   :  { %7041 = vmatpush1.bf16.msra.mxu1 %v13144_v35  ;;  %7072 = vmatprep.mubr.bf16.mxu1 %v14190_v62  ;;  %v13165_v62 = vld [vmem:[#allocation10 + $0x1608] ss:$16 sps:$4 sm:$0xff]   ;;  %v13224_v35 = vld [vmem:[#allocation10 + $0xbac] ss:$16 sps:$4 sm:$0xff]  }
 0x80a   :  { %9936 = vmatpush1.bf16.msra.mxu0 %v13147_v22  ;;  %7042 = vmatprep.subr.bf16.mxu1 %v13152_v47  ;;  %v13227_v22 = vld [vmem:[#allocation10 + $0x174c] ss:$16 sps:$4 sm:$0xff]   ;;  %v13222_v47 = vld [vmem:[#allocation10 + $0xba8] ss:$16 sps:$4 sm:$0xff]  }
 0x80b   :  { %9937 = vmatprep.subr.bf16.mxu0 %v13155_v54  ;;  %v13225_v54 = vld [vmem:[#allocation10 + $0x1748] ss:$16 sps:$4 sm:$0xff]  }
 0x80d   :  { %7043 = vmatpush1.bf16.msra.mxu1 %v13150_v38  ;;  %v13230_v38 = vld [vmem:[#allocation10 + $0xbcc] ss:$16 sps:$4 sm:$0xff]  }
 0x80e   :  { %9938 = vmatpush1.bf16.msra.mxu0 %v13153_v8  ;;  %7044 = vmatprep.subr.bf16.mxu1 %v13158_v41  ;;  %v13233_v8 = vld [vmem:[#allocation10 + $0x176c] ss:$16 sps:$4 sm:$0xff]   ;;  %v13228_v41 = vld [vmem:[#allocation10 + $0xbc8] ss:$16 sps:$4 sm:$0xff]  }
 0x80f   :  { %9939 = vmatprep.subr.bf16.mxu0 %v13161_v25  ;;  %v13231_v25 = vld [vmem:[#allocation10 + $0x1768] ss:$16 sps:$4 sm:$0xff]  }
 0x811   :  { %7045 = vmatpush1.bf16.msra.mxu1 %v13156_v58  ;;  %v13236_v58 = vld [vmem:[#allocation10 + $0xbec] ss:$16 sps:$4 sm:$0xff]  }
 0x812   :  { %9940 = vmatpush1.bf16.msra.mxu0 %v13159_v63  ;;  %7046 = vmatprep.subr.bf16.mxu1 %v13164_v31  ;;  %v13239_v63 = vld [vmem:[#allocation10 + $0x178c] ss:$16 sps:$4 sm:$0xff]   ;;  %v13234_v31 = vld [vmem:[#allocation10 + $0xbe8] ss:$16 sps:$4 sm:$0xff]  }
 0x813   :  { %9952 = vmatprep.subr.bf16.mxu0 %v13167_v6  ;;  %v13237_v6 = vld [vmem:[#allocation10 + $0x1788] ss:$16 sps:$4 sm:$0xff]  }
 0x815   :  { %9942 = vmatmul.mubr.bf16.vlgmr.msra.gmra.mrb[80].mxu0 %v14198_v10  ;;  %7047 = vmatpush1.bf16.msra.mxu1 %v13162_v5  ;;  %v13180_v10 = vld [vmem:[#allocation10 + $0xac8] ss:$16 sps:$4 sm:$0xff]   ;;  %v13242_v5 = vld [vmem:[#allocation10 + $0x17ac] ss:$16 sps:$4 sm:$0xff]  }
 0x816   :  { %9953 = vmatpush1.bf16.msra.mxu0 %v13165_v62  ;;  %9984 = vmatprep.mubr.bf16.mxu0 %v14200_v60  ;;  %v13191_v60 = vld [vmem:[#allocation10 + $0x168c] ss:$16 sps:$4 sm:$0xff]   ;;  %v13240_v62 = vld [vmem:[#allocation10 + $0x17a8] ss:$16 sps:$4 sm:$0xff]  }
 0x817   :  { %7048 = vmatprep.subr.bf16.mxu1 %v13170_v57  ;;  %9954 = vmatprep.subr.bf16.mxu0 %v13173_v4  ;;  %v13245_v57 = vld [vmem:[#allocation10 + $0x17cc] ss:$16 sps:$4 sm:$0xff]   ;;  %v13243_v4 = vld [vmem:[#allocation10 + $0x17c8] ss:$16 sps:$4 sm:$0xff]  }
 0x819   :  { %7049 = vmatpush1.bf16.msra.mxu1 %v13168_v12  ;;  %v13248_v12 = vld [vmem:[#allocation10 + $0x17ec] ss:$16 sps:$4 sm:$0xff]  }
 0x81a   :  { %9955 = vmatpush1.bf16.msra.mxu0 %v13171_v23  ;;  %7050 = vmatprep.subr.bf16.mxu1 %v13176_v37  ;;  %v13246_v23 = vld [vmem:[#allocation10 + $0x17e8] ss:$16 sps:$4 sm:$0xff]   ;;  %v4213_v37 = vld [vmem:[#allocation11] sm:$0xf] }
 0x81b   :  { %9956 = vmatprep.subr.bf16.mxu0 %v13179_v34  ;;  %v5162_v34 = vrot.slane %v4213_v37, %v13691_v29 }
 0x81d   :  { %7051 = vmatpush1.bf16.msra.mxu1 %v13174_v61  ;;  %v5166_v61 = vrot.slane %v4213_v37, %v13697_v39 }
 0x81e   :  { %9957 = vmatpush1.bf16.msra.mxu0 %v13177_v53  ;;  %7052 = vmatprep.subr.bf16.mxu1 %v13182_v45 }
 0x81f   :  { %9958 = vmatprep.subr.bf16.mxu0 %v13185_v51 }
 0x821   :  { %7053 = vmatpush1.bf16.msra.mxu1 %v13180_v10 }
 0x822   :  { %9959 = vmatpush1.bf16.msra.mxu0 %v13183_v19  ;;  %7054 = vmatprep.subr.bf16.mxu1 %v13188_v50  ;;  %v7099_v19 = vmul.f32 2.0, %v13715_v3 }
 0x823   :  { %9960 = vmatprep.subr.bf16.mxu0 %v13191_v60 }
 0x825   :  { %7055 = vmatpush1.bf16.msra.mxu1 %v13186_v27 }
 0x826   :  { %9961 = vmatpush1.bf16.msra.mxu0 %v13189_v44  ;;  %7056 = vmatprep.subr.bf16.mxu1 %v13194_v9  ;;  %v7100_v44 = vmul.f32 2.0, %v13721_v43 }
 0x827   :  { %9962 = vmatprep.subr.bf16.mxu0 %v13197_v32 }
 0x829   :  { %7057 = vmatpush1.bf16.msra.mxu1 %v13192_v1 }
 0x82a   :  { %9963 = vmatpush1.bf16.msra.mxu0 %v13195_v21  ;;  %7058 = vmatprep.subr.bf16.mxu1 %v13200_v7  ;;  %v7103_v21 = vmul.f32 2.0, %v13726_v13 }
 0x82b   :  { %9964 = vmatprep.subr.bf16.mxu0 %v13203_v48 }
 0x82d   :  { %7059 = vmatpush1.bf16.msra.mxu1 %v13198_v17  ;;  %v7104_v17 = vmul.f32 2.0, %v13728_v15 }
 0x82e   :  { %9965 = vmatpush1.bf16.msra.mxu0 %v13201_v33  ;;  %7060 = vmatprep.subr.bf16.mxu1 %v13206_v42  ;;  %v7124_v42 = vld [vmem:[#allocation11 + $0x4] sm:$0xf] }
 0x82f   :  { %9966 = vmatprep.subr.bf16.mxu0 %v13209_v14  ;;  %v8074_v14 = vrot.slane %v7124_v42, %v13691_v29  ;;  %v8078_v43 = vrot.slane %v7124_v42, %v13697_v39  ;;  %v5170_v39 = vrot.slane %v4213_v37, %v13694_v36 }
 0x831   :  { %7061 = vmatpush1.bf16.msra.mxu1 %v13204_v28 }
 0x832   :  { %9967 = vmatpush1.bf16.msra.mxu0 %v13207_v59  ;;  %7062 = vmatprep.subr.bf16.mxu1 %v13212_v0 }
 0x833   :  { %9968 = vmatprep.subr.bf16.mxu0 %v13215_v55 }
 0x835   :  { %7063 = vmatpush1.bf16.msra.mxu1 %v13210_v40 }
 0x836   :  { %9969 = vmatpush1.bf16.msra.mxu0 %v13213_v2  ;;  %7064 = vmatprep.subr.bf16.mxu1 %v13218_v56 }
 0x837   :  { %9970 = vmatprep.subr.bf16.mxu0 %v13221_v11 }
 0x839   :  { %7065 = vmatpush1.bf16.msra.mxu1 %v13216_v52 }
 0x83a   :  { %9971 = vmatpush1.bf16.msra.mxu0 %v13219_v46  ;;  %7066 = vmatprep.subr.bf16.mxu1 %v13224_v35 }
 0x83b   :  { %9972 = vmatprep.subr.bf16.mxu0 %v13227_v22 }
 0x83d   :  { %7067 = vmatpush1.bf16.msra.mxu1 %v13222_v47 }
 0x83e   :  { %9973 = vmatpush1.bf16.msra.mxu0 %v13225_v54  ;;  %7068 = vmatprep.subr.bf16.mxu1 %v13230_v38  ;;  %v5174_v54 = vrot.slane %v4213_v37, %v13700_v49 }
 0x83f   :  { %9974 = vmatprep.subr.bf16.mxu0 %v13233_v8 }
 0x841   :  { %7069 = vmatpush1.bf16.msra.mxu1 %v13228_v41 }
 0x842   :  { %9975 = vmatpush1.bf16.msra.mxu0 %v13231_v25  ;;  %7070 = vmatprep.subr.bf16.mxu1 %v13236_v58 }
 0x843   :  { %9976 = vmatprep.subr.bf16.mxu0 %v13239_v63 }
 0x845   :  { %7071 = vmatpush1.bf16.msra.mxu1 %v13234_v31  ;;  %v7101_v31 = vmul.f32 2.0, %v13734_v18 }
 0x846   :  { %9977 = vmatpush1.bf16.msra.mxu0 %v13237_v6 }
 0x847   :  { %9978 = vmatprep.subr.bf16.mxu0 %v13242_v5 }
 0x848   :  { %7073 = vmatmul.mubr.bf16.vlgmr.msra.gmra.mrb[80].mxu1 %v14206_v16 }
 0x84a   :  { %9979 = vmatpush1.bf16.msra.mxu0 %v13240_v62 }
 0x84b   :  { %9980 = vmatprep.subr.bf16.mxu0 %v13245_v57  ;;  %v7102_v57 = vmul.f32 2.0, %v13742_v24  ;;  %v8082_v24 = vrot.slane %v7124_v42, %v13694_v36 }
 0x84e   :  { %9981 = vmatpush1.bf16.msra.mxu0 %v13243_v4 }
 0x84f   :  { %9982 = vmatprep.subr.bf16.mxu0 %v13248_v12 }
 0x852   :  { %9983 = vmatpush1.bf16.msra.mxu0 %v13246_v23 }
 0x855   :  { %9985 = vmatmul.mubr.bf16.vlgmr.msra.gmra.mrb[80].mxu0 %v14212_v30 }
 0x89b   :  { %v6988_v53 = vpop.f32.mrb[76].mxu1 }
 0x89c   :  { %v11513_v45 = vadd.f32 %v6988_v53, %v5162_v34  ;;  %v6990_v51 = vpop.f32.mrb[77].mxu1  ;;  %v7106_v53 = vmul.f32 2.0, %v13744_v26 }
 0x89d   :  { %v11514_v10 = vadd.f32 %v6990_v51, %v5166_v61  ;;  %v6992_v16 = vpop.f32.mrb[78].mxu1  ;;  %v8086_v51 = vrot.slane %v7124_v42, %v13700_v49 }
 0x89e   :  { %v7091_v50 = vmax.f32 %v11513_v45, 0.0  ;;  %v11515_v60 = vadd.f32 %v6992_v16, %v5162_v34  ;;  %v6994_v27 = vpop.f32.mrb[79].mxu1  ;;  %v7105_v34 = vmul.f32 2.0, %v13736_v20 }
 0x89f   :  { %v7092_v9 = vmax.f32 %v11514_v10, 0.0  ;;  %v11516_v32 = vadd.f32 %v6994_v27, %v5166_v61 }
 0x8a0   :  { %v7107_v30 = vadd.f32 %v7099_v19, %v7091_v50  ;;  %v7095_v1 = vmax.f32 %v11515_v60, 0.0 }
 0x8a1   :  { %v7108_v7 = vadd.f32 %v7100_v44, %v7092_v9  ;;  %v7096_v48 = vmax.f32 %v11516_v32, 0.0 }
 0x8a2   :  { %7115 = vst [vmem:[#allocation13] sm:$0xff] %v7107_v30  ;;  %v7111_v33 = vadd.f32 %v7103_v21, %v7095_v1 }
 0x8a3   :  { %7116 = vst [vmem:[#allocation13 + $0x8] sm:$0xff] %v7108_v7  ;;  %v7112_v3 = vadd.f32 %v7104_v17, %v7096_v48 }
 0x8a4   :  { %7119 = vst [vmem:[#allocation13 + $0x20] sm:$0xff] %v7111_v33 }
 0x8a5   :  { %7120 = vst [vmem:[#allocation13 + $0x28] sm:$0xff] %v7112_v3 }
 0x8a8   :  { %v9900_v28 = vpop.f32.mrb[76].mxu0 }
 0x8a9   :  { %v11521_v59 = vadd.f32 %v9900_v28, %v8074_v14  ;;  %v9902_v0 = vpop.f32.mrb[77].mxu0 }
 0x8aa   :  { %v11522_v55 = vadd.f32 %v9902_v0, %v8078_v43  ;;  %v9904_v13 = vpop.f32.mrb[78].mxu0 }
 0x8ab   :  { %v10003_v40 = vmax.f32 %v11521_v59, 0.0  ;;  %v11523_v2 = vadd.f32 %v9904_v13, %v8074_v14  ;;  %v9906_v56 = vpop.f32.mrb[79].mxu0 }
 0x8ac   :  { %v10004_v15 = vmax.f32 %v11522_v55, 0.0  ;;  %v11524_v11 = vadd.f32 %v9906_v56, %v8078_v43 }
 0x8ad   :  { %v10011_v52 = vadd.f32 %v10003_v40, %v7099_v19  ;;  %v10007_v46 = vmax.f32 %v11523_v2, 0.0 }
 0x8ae   :  { %v10012_v35 = vadd.f32 %v10004_v15, %v7100_v44  ;;  %v10008_v22 = vmax.f32 %v11524_v11, 0.0 }
 0x8af   :  { %10019 = vst [vmem:[#allocation14] sm:$0xff] %v10011_v52  ;;  %v10015_v47 = vadd.f32 %v10007_v46, %v7103_v21 }
 0x8b0   :  { %10020 = vst [vmem:[#allocation14 + $0x8] sm:$0xff] %v10012_v35  ;;  %v10016_v29 = vadd.f32 %v10008_v22, %v7104_v17 }
 0x8b1   :  { %10023 = vst [vmem:[#allocation14 + $0x20] sm:$0xff] %v10015_v47 }
 0x8b2   :  { %10024 = vst [vmem:[#allocation14 + $0x28] sm:$0xff] %v10016_v29 }
 0x91b   :  { %v7074_v38 = vpop.f32.mrb[80].mxu1 }
 0x91c   :  { %v11517_v8 = vadd.f32 %v7074_v38, %v5170_v39  ;;  %v7076_v41 = vpop.f32.mrb[81].mxu1 }
 0x91d   :  { %v11518_v25 = vadd.f32 %v7076_v41, %v5174_v54  ;;  %v7078_v58 = vpop.f32.mrb[82].mxu1 }
 0x91e   :  { %v7093_v63 = vmax.f32 %v11517_v8, 0.0  ;;  %v11519_v6 = vadd.f32 %v7078_v58, %v5170_v39  ;;  %v7080_v5 = vpop.f32.mrb[83].mxu1 }
 0x91f   :  { %v7094_v62 = vmax.f32 %v11518_v25, 0.0  ;;  %v11520_v4 = vadd.f32 %v7080_v5, %v5174_v54 }
 0x920   :  { %v7109_v12 = vadd.f32 %v7101_v31, %v7093_v63  ;;  %v7097_v23 = vmax.f32 %v11519_v6, 0.0 }
 0x921   :  { %v7110_v37 = vadd.f32 %v7102_v57, %v7094_v62  ;;  %v7098_v61 = vmax.f32 %v11520_v4, 0.0 }
 0x922   :  { %7117 = vst [vmem:[#allocation13 + $0x10] sm:$0xff] %v7109_v12  ;;  %v7113_v45 = vadd.f32 %v7105_v34, %v7097_v23 }
 0x923   :  { %7118 = vst [vmem:[#allocation13 + $0x18] sm:$0xff] %v7110_v37  ;;  %v7114_v18 = vadd.f32 %v7106_v53, %v7098_v61 }
 0x924   :  { %7121 = vst [vmem:[#allocation13 + $0x30] sm:$0xff] %v7113_v45 }
 0x925   :  { %7122 = vst [vmem:[#allocation13 + $0x38] sm:$0xff] %v7114_v18 }
 0x926   :  { %13432 = shalt.err (!%p13429_p10)
}
 0x927   :  { %s13433_s2 = scalar_lea.hbm %s14275_s7, 1024 }
 0x928   :  { %p13434_p11 = scmp.ne.s32.totalorder %s14275_s7, %s13433_s2  ;;  %p13437_p12 = scmp.lt.u32.totalorder %s13433_s2, %s14275_s7 }
 0x92a   :  { %p13439_p13 = pnand %p13437_p12, %p13434_p11 }
 0x92c   :  { %13442 = shalt.err (!%p13439_p13)
}
 0x92d   :  { %10038 = dma.vmem_to_hbm [thread:$0]  %s10033_s19, 1024, %s14275_s7, [#allocation4], %s13482_s3, %s13482_s3, %s13483_s20   ;;  %v9986_v36 = vpop.f32.mrb[80].mxu0 }
 0x92e   :  { %v11525_v49 = vadd.f32 %v9986_v36, %v8082_v24  ;;  %v9988_v20 = vpop.f32.mrb[81].mxu0  ;;  %s13490_s9 = smov [#allocation14]  }
 0x92f   :  { %v11526_v26 = vadd.f32 %v9988_v20, %v8086_v51  ;;  %v9990_v10 = vpop.f32.mrb[82].mxu0  ;;  %s10044_s10 = sshll.u32 %s13490_s9, 4  ;;  %s10045_s10 = int_to_ptr.vmem [resolvable:$true] %s10044_s10 }
 0x930   :  { %v10005_v16 = vmax.f32 %v11525_v49, 0.0  ;;  %v11527_v19 = vadd.f32 %v9990_v10, %v8082_v24  ;;  %v9992_v50 = vpop.f32.mrb[83].mxu0  ;;  %s13443_s7 = scalar_lea.vmem %s10045_s10, 1024  ;;  %p13448_p1 = scmp.lt.s32.totalorder %s10045_s10, %s10045_s10 }
 0x931   :  { %v10006_v60 = vmax.f32 %v11526_v26, 0.0  ;;  %v11528_v27 = vadd.f32 %v9992_v50, %v8086_v51  ;;  %p13444_p0 = scmp.ne.s32.totalorder %s10045_s10, %s13443_s7  ;;  %p13449_p2 = scmp.lt.s32.totalorder %s13443_s7, %s13443_s7 }
 0x932   :  { %v10013_v44 = vadd.f32 %v10005_v16, %v7101_v31  ;;  %v10009_v9 = vmax.f32 %v11527_v19, 0.0 }
 0x933   :  { %v10014_v32 = vadd.f32 %v10006_v60, %v7102_v57  ;;  %v10010_v30 = vmax.f32 %v11528_v27, 0.0  ;;  %p13450_p3 = por %p13449_p2, %p13448_p1 }
 0x934   :  { %10021 = vst [vmem:[#allocation14 + $0x10] sm:$0xff] %v10013_v44  ;;  %v10017_v1 = vadd.f32 %v10009_v9, %v7105_v34 }
 0x935   :  { %10022 = vst [vmem:[#allocation14 + $0x18] sm:$0xff] %v10014_v32  ;;  %v10018_v21 = vadd.f32 %v10010_v30, %v7106_v53  ;;  %p13451_p4 = pnand %p13450_p3, %p13444_p0 }
 0x936   :  { %10025 = vst [vmem:[#allocation14 + $0x30] sm:$0xff] %v10017_v1 }
 0x937   :  { %10026 = vst [vmem:[#allocation14 + $0x38] sm:$0xff] %v10018_v21 }
 0x938   :  { %13454 = shalt.err (!%p13451_p4)
}
 0x939   :  { %s13455_s22 = scalar_lea.hbm %s14276_s8, 1024 }
 0x93a   :  { %p13456_p5 = scmp.ne.s32.totalorder %s14276_s8, %s13455_s22  ;;  %p13459_p6 = scmp.lt.u32.totalorder %s13455_s22, %s14276_s8 }
 0x93c   :  { %p13461_p7 = pnand %p13459_p6, %p13456_p5 }
 0x93e   :  { %13464 = shalt.err (!%p13461_p7)
}
 0x93f   :  { %10050 = dma.vmem_to_hbm [thread:$0]  %s10045_s10, 1024, %s14276_s8, [#allocation15], %s13482_s3, %s13482_s3, %s13483_s20  }
 0x940   :  { %13473 = dma.done.wait [#allocation4], 1024  }
 0x941   :  { %13474 = vsyncadd [#allocation4], 4294966272 }
 0x942   :  { %13475 = dma.done.wait [#allocation15], 1024  }
 0x943   :  { %13476 = vsyncadd [#allocation15], 4294966272 }
 0x944   :  { %10057 = vsyncpa [#allocation3], 1 }
 0x945   :  { %10058 = vsyncpa [#allocation6], 1 }
 0x946   :  { %10059 = vsyncpa [#allocation9], 1 }
 0x947   :  { %10060 = vsyncpa [#allocation12], 1 }
 0x948   :  { %10061 = vsyncpa [#allocation4], 1 }
 0x949   :  { %10062 = vsyncpa [#allocation15], 1 }

</bundles_post_ra>
